<compile_context>
chip_gen: v5e
topology: v5e:2x2
jax: 0.10.0
libtpu: 0.0.40
codegen_flags: <defaults>
</compile_context>

<pallas_src>
import jax
import jax.numpy as jnp
from jax.experimental import pallas as pl
from jax.experimental.pallas import tpu as pltpu

EPS = 1e-5
ALPHABET_SIZE = 41
C1, C2 = 16, 32          # conv1 / conv2 output channels
FF_OUT = 1024
TILE_K = 2048            # K tile of the big Linear (2048x1024 bf16 tile = 4 MB)


def _round_up(x, m):
    return ((x + m - 1) // m) * m


# ----------------------------- Pallas kernels ------------------------------ #

def _conv_stage_kernel(c1_ref, w1_ref, g1_ref, be1_ref,
                       w2_ref, g2_ref, be2_ref, o_ref, pp_ref):
    """conv1(3x3,1->16)+BN+ReLU -> maxpool2x2 -> conv2(3x3,16->32)+BN+ReLU, fused.

    c1_ref : (4*B*H2*W2, 9) f32 conv1 im2col; rows ordered (pool-window pos, b, h2, w2)
             so the 2x2 maxpool is a max over four contiguous row blocks.
    w1_ref : (9, 16), taps in (dy, dx) order.   w2_ref: (144, 32), rows (dy, dx, cin).
    g*/be*: (1, C) BatchNorm affine params.     o_ref : (B*H2*W2, 32) bf16, NHWC order.
    pp_ref : VMEM scratch (B, H2+2, W2+2, 16) = zero-halo pooled map (conv2 'same' pad).
    """
    B, H2p, W2p, _ = pp_ref.shape
    H2, W2 = H2p - 2, W2p - 2
    nq = B * H2 * W2                 # pooled pixels
    n1 = 4 * nq                      # conv1 output pixels (= B*H*W)

    # ---- conv1 as one MXU matmul over the 9 taps (Cin == 1). ----
    y1 = jnp.dot(c1_ref[...], w1_ref[...], preferred_element_type=jnp.float32)

    # ---- BatchNorm2d(16): training batch stats (biased variance), then ReLU. ----
    mean1 = jnp.sum(y1, axis=0, keepdims=True) * (1.0 / n1)
    var1 = jnp.sum((y1 - mean1) ** 2, axis=0, keepdims=True) * (1.0 / n1)
    scale1 = g1_ref[...] * jax.lax.rsqrt(var1 + EPS)
    shift1 = be1_ref[...] - mean1 * scale1
    a1 = jnp.maximum(y1 * scale1 + shift1, 0.0)

    # ---- 2x2/2 max pool = max over the four contiguous row blocks. ----
    pooled = jnp.maximum(jnp.maximum(a1[0 * nq:1 * nq], a1[1 * nq:2 * nq]),
                         jnp.maximum(a1[2 * nq:3 * nq], a1[3 * nq:4 * nq]))

    # Zero only the 1-pixel halo, then write the interior (conv2 'same' padding).
    pp_ref[:, 0:1, :, :] = jnp.zeros((B, 1, W2p, C1), jnp.float32)
    pp_ref[:, H2 + 1:H2 + 2, :, :] = jnp.zeros((B, 1, W2p, C1), jnp.float32)
    pp_ref[:, :, 0:1, :] = jnp.zeros((B, H2p, 1, C1), jnp.float32)
    pp_ref[:, :, W2 + 1:W2 + 2, :] = jnp.zeros((B, H2p, 1, C1), jnp.float32)
    pp_ref[:, 1:H2 + 1, 1:W2 + 1, :] = pooled.reshape(B, H2, W2, C1)

    # ---- conv2 (3x3, 16->32): nine K=16 MXU matmuls over shifted tap windows. ----
    acc2 = jnp.zeros((nq, C2), jnp.float32)
    for dy in range(3):
        for dx in range(3):
            t = 3 * dy + dx
            tap = pp_ref[:, dy:dy + H2, dx:dx + W2, :].reshape(nq, C1)
            acc2 = acc2 + jnp.dot(tap, w2_ref[t * C1:(t + 1) * C1, :],
                                  preferred_element_type=jnp.float32)

    # ---- BatchNorm2d(32) + ReLU, stored directly as bf16 NHWC-flatten features. ----
    mean2 = jnp.sum(acc2, axis=0, keepdims=True) * (1.0 / nq)
    var2 = jnp.sum((acc2 - mean2) ** 2, axis=0, keepdims=True) * (1.0 / nq)
    scale2 = g2_ref[...] * jax.lax.rsqrt(var2 + EPS)
    shift2 = be2_ref[...] - mean2 * scale2
    o_ref[...] = jnp.maximum(acc2 * scale2 + shift2, 0.0).astype(o_ref.dtype)


def _matmul_bias_kernel(x_ref, w_ref, b_ref, o_ref, acc_ref):
    @pl.when(pl.program_id(1) == 0)
    def _():
        acc_ref[...] = jnp.zeros_like(acc_ref)

    acc_ref[...] += jnp.dot(x_ref[...], w_ref[...],
                            preferred_element_type=jnp.float32)

    @pl.when(pl.program_id(1) == pl.num_programs(1) - 1)
    def _():
        o_ref[...] = acc_ref[...] + b_ref[...]


# ------------------------------ Pallas wrappers ----------------------------- #

def matmul_bias(x, w, b, *, tile_n, tile_k):
    """y = x @ w + b; grid = (N tiles [parallel], K tiles [reduction])."""
    M, K = x.shape
    Kw, N = w.shape
    assert K == Kw, (K, Kw)
    assert N % tile_n == 0 and K % tile_k == 0, (N, tile_n, K, tile_k)
    return pl.pallas_call(
        _matmul_bias_kernel,
        out_shape=jax.ShapeDtypeStruct((M, N), jnp.float32),
        grid=(N // tile_n, K // tile_k),
        in_specs=[
            pl.BlockSpec((M, tile_k), lambda n, k: (0, k)),
            pl.BlockSpec((tile_k, tile_n), lambda n, k: (k, n)),
            pl.BlockSpec((1, tile_n), lambda n, k: (0, n)),
        ],
        out_specs=pl.BlockSpec((M, tile_n), lambda n, k: (0, n)),
        scratch_shapes=[pltpu.VMEM((M, tile_n), jnp.float32)],
        compiler_params=pltpu.CompilerParams(
            dimension_semantics=("parallel", "arbitrary")),
    )(x, w, b)


def conv_stage(x_nchw, p):
    B, _, H, W = x_nchw.shape
    assert H % 2 == 0 and W % 2 == 0
    H2, W2 = H // 2, W // 2

    x = x_nchw[:, 0].astype(jnp.float32)                 # (B, H, W), Cin == 1
    xp = jnp.pad(x, ((0, 0), (1, 1), (1, 1)))            # (B, H+2, W+2)

    # conv1 im2col, grouped by 2x2-pool window position (outermost), built by XLA on
    # the tiny 1-channel input.  Row order inside each block is (b, h2, w2).
    blocks = []
    for hp in range(2):
        for wp in range(2):
            taps = [xp[:, hp + dy:hp + dy + H:2, wp + dx:wp + dx + W:2]
                    for dy in range(3) for dx in range(3)]
            blocks.append(jnp.stack(taps, axis=-1))      # (B, H2, W2, 9)
    c1 = jnp.stack(blocks, axis=0).reshape(4 * B * H2 * W2, 9)

    out = pl.pallas_call(
        _conv_stage_kernel,
        out_shape=jax.ShapeDtypeStruct((B * H2 * W2, C2), jnp.bfloat16),
        scratch_shapes=[pltpu.VMEM((B, H2 + 2, W2 + 2, C1), jnp.float32)],
    )(c1, p["w1"], p["g1"], p["be1"], p["w2"], p["g2"], p["be2"])

    # Free contiguous NHWC flatten (bf16), matching wff's stored row order.
    return out.reshape(B, H2 * W2 * C2)


# ------------------------------ Model (glue) -------------------------------- #

def init_params(key, H, W, alphabet_size=ALPHABET_SIZE):
    ks = jax.random.split(key, 4)
    H2, W2 = H // 2, W // 2
    feat = C2 * H2 * W2
    feat_pad = _round_up(feat, TILE_K)
    p = {}
    # conv1 (1->16): rows of w1 are the 3x3 taps in (dy, dx) order.  Conv biases are
    # omitted: a per-channel constant before train-mode BatchNorm is cancelled by the
    # batch-mean subtraction.
    p["w1"] = jax.random.normal(ks[0], (9, C1), jnp.float32) * 0.1
    p["g1"] = jnp.ones((1, C1), jnp.float32)
    p["be1"] = jnp.zeros((1, C1), jnp.float32)
    # conv2 (16->32): rows of w2 are in (dy, dx, cin) order.
    p["w2"] = jax.random.normal(ks[1], (9 * C1, C2), jnp.float32) * 0.05
    p["g2"] = jnp.ones((1, C2), jnp.float32)
    p["be2"] = jnp.zeros((1, C2), jnp.float32)
    # feed_forward Linear (xavier_normal_, bias 0.01).  Rows stored in NHWC-flatten
    # order (no activation transpose needed; loading torch weights would need a
    # one-time row permutation from NCHW-flatten order), zero-padded to a TILE_K
    # multiple, stored bf16 (weight-BW bound layer, f32 accumulation in-kernel).
    # TODO(synk): the torch reference hard-codes in_features=200160 (its expected
    # image size); here in_features = 32*(H//2)*(W//2) for the synthetic input.
    std_ff = (2.0 / (feat + FF_OUT)) ** 0.5
    wff = jax.random.normal(ks[2], (feat, FF_OUT), jnp.float32) * std_ff
    p["wff"] = jnp.pad(wff, ((0, feat_pad - feat), (0, 0))).astype(jnp.bfloat16)
    p["bff"] = jnp.full((1, FF_OUT), 0.01, jnp.float32)
    # 41 x Linear(1024, 2) heads stacked into one matmul, zero-padded to 128 output
    # lanes (lane-dense stores); real columns are sliced outside.
    std_h = (2.0 / (FF_OUT + 2)) ** 0.5
    wh = jax.random.normal(ks[3], (FF_OUT, 2 * alphabet_size), jnp.float32) * std_h
    p["wh"] = jnp.pad(wh, ((0, 0), (0, 128 - 2 * alphabet_size))).astype(jnp.bfloat16)
    p["bh"] = jnp.pad(jnp.full((1, 2 * alphabet_size), 0.01, jnp.float32),
                      ((0, 0), (0, 128 - 2 * alphabet_size)))
    return p


def jadhav_forward(x_nchw, p, alphabet_size=ALPHABET_SIZE):
    B = x_nchw.shape[0]

    feat = conv_stage(x_nchw, p)                         # (B, feat) bf16
    K = feat.shape[1]
    Kp = p["wff"].shape[0]
    if Kp != K:                                          # zero-pad K to tile multiple
        feat = jnp.pad(feat, ((0, 0), (0, Kp - K)))

    # Big Linear: tn = N (fully contiguous weight-tile DMA), tk = 2048.
    y = matmul_bias(feat, p["wff"], p["bff"], tile_n=FF_OUT, tile_k=TILE_K)

    # 41 fused heads as one single-step pallas_call (grid = (1, 1)).
    heads = matmul_bias(y.astype(jnp.bfloat16), p["wh"], p["bh"],
                        tile_n=128, tile_k=FF_OUT)
    heads = heads[:, :2 * alphabet_size]
    # == torch.cat([unsqueeze(l(x), 0) for l in out_pos_list], axis=0) -> (41, B, 2)
    return jnp.transpose(heads.reshape(B, alphabet_size, 2), (1, 0, 2))


# ---------------------------------- main ------------------------------------ #

if __name__ == "__main__":
    key = jax.random.PRNGKey(0)
    k_x, k_p = jax.random.split(key)

    B, H, W = 2, 16, 16
    x = jax.random.normal(k_x, (B, 1, H, W), jnp.float32)   # NCHW like the torch module
    params = init_params(k_p, H, W)

    out = jax.jit(jadhav_forward)(x, params)
    out = jax.block_until_ready(out)

    assert out.shape == (ALPHABET_SIZE, B, 2), out.shape
    assert out.dtype == jnp.float32
    assert bool(jnp.all(jnp.isfinite(out)))
    print("KERNEL_OK")
</pallas_src>

<mosaic_0001>
module attributes {stable_mosaic.version = 11 : i64} {
  func.func @_conv_stage_kernel(%arg0: memref<512x9xf32, #tpu.memory_space<vmem>>, %arg1: memref<9x16xf32, #tpu.memory_space<vmem>>, %arg2: memref<1x16xf32, #tpu.memory_space<vmem>>, %arg3: memref<1x16xf32, #tpu.memory_space<vmem>>, %arg4: memref<144x32xf32, #tpu.memory_space<vmem>>, %arg5: memref<1x32xf32, #tpu.memory_space<vmem>>, %arg6: memref<1x32xf32, #tpu.memory_space<vmem>>, %arg7: memref<128x32xbf16, #tpu.memory_space<vmem>>, %arg8: memref<2x10x10x16xf32, #tpu.memory_space<vmem>>) attributes {dimension_semantics = [], scalar_prefetch = 0 : i64, scratch_operands = 1 : i64, tpu.core_type = #tpu.core_type<tc>} {
    %c0 = arith.constant 0 : index
    %c0_0 = arith.constant 0 : index
    %0 = vector.load %arg0[%c0, %c0_0] : memref<512x9xf32, #tpu.memory_space<vmem>>, vector<512x9xf32>
    %c0_1 = arith.constant 0 : index
    %c0_2 = arith.constant 0 : index
    %1 = vector.load %arg1[%c0_1, %c0_2] : memref<9x16xf32, #tpu.memory_space<vmem>>, vector<9x16xf32>
    %cst = arith.constant dense<0.000000e+00> : vector<512x16xf32>
    %2 = tpu.matmul %0, %1, %cst {dimension_numbers = #tpu.dot_dimension_numbers<[1], [0], [0], [1], [0, 0, 1, 1], [], []>} : vector<512x9xf32>, vector<9x16xf32>, vector<512x16xf32> -> vector<512x16xf32>
    %cst_3 = arith.constant dense<0.000000e+00> : vector<16xf32>
    %3 = vector.multi_reduction <add>, %2, %cst_3 [0] : vector<512x16xf32> to vector<16xf32>
    %4 = vector.shape_cast %3 : vector<16xf32> to vector<1x16xf32>
    %cst_4 = arith.constant 0.001953125 : f32
    %5 = vector.broadcast %cst_4 : f32 to vector<1x16xf32>
    %6 = arith.mulf %4, %5 : vector<1x16xf32>
    %7 = vector.broadcast %6 : vector<1x16xf32> to vector<512x16xf32>
    %8 = arith.subf %2, %7 : vector<512x16xf32>
    %9 = arith.mulf %8, %8 : vector<512x16xf32>
    %cst_5 = arith.constant dense<0.000000e+00> : vector<16xf32>
    %10 = vector.multi_reduction <add>, %9, %cst_5 [0] : vector<512x16xf32> to vector<16xf32>
    %11 = vector.shape_cast %10 : vector<16xf32> to vector<1x16xf32>
    %cst_6 = arith.constant 0.001953125 : f32
    %12 = vector.broadcast %cst_6 : f32 to vector<1x16xf32>
    %13 = arith.mulf %11, %12 : vector<1x16xf32>
    %c0_7 = arith.constant 0 : index
    %c0_8 = arith.constant 0 : index
    %14 = vector.load %arg2[%c0_7, %c0_8] : memref<1x16xf32, #tpu.memory_space<vmem>>, vector<1x16xf32>
    %cst_9 = arith.constant 9.99999974E-6 : f32
    %15 = vector.broadcast %cst_9 : f32 to vector<1x16xf32>
    %16 = arith.addf %13, %15 : vector<1x16xf32>
    %17 = math.rsqrt %16 : vector<1x16xf32>
    %18 = arith.mulf %14, %17 : vector<1x16xf32>
    %c0_10 = arith.constant 0 : index
    %c0_11 = arith.constant 0 : index
    %19 = vector.load %arg3[%c0_10, %c0_11] : memref<1x16xf32, #tpu.memory_space<vmem>>, vector<1x16xf32>
    %20 = arith.mulf %6, %18 : vector<1x16xf32>
    %21 = arith.subf %19, %20 : vector<1x16xf32>
    %22 = vector.broadcast %18 : vector<1x16xf32> to vector<512x16xf32>
    %23 = arith.mulf %2, %22 : vector<512x16xf32>
    %24 = vector.broadcast %21 : vector<1x16xf32> to vector<512x16xf32>
    %25 = arith.addf %23, %24 : vector<512x16xf32>
    %cst_12 = arith.constant 0.000000e+00 : f32
    %26 = vector.broadcast %cst_12 : f32 to vector<512x16xf32>
    %27 = arith.maximumf %25, %26 : vector<512x16xf32>
    %28 = vector.extract_strided_slice %27 {offsets = [0, 0], sizes = [128, 16], strides = [1, 1]} : vector<512x16xf32> to vector<128x16xf32>
    %29 = vector.extract_strided_slice %27 {offsets = [128, 0], sizes = [128, 16], strides = [1, 1]} : vector<512x16xf32> to vector<128x16xf32>
    %30 = arith.maximumf %28, %29 : vector<128x16xf32>
    %31 = vector.extract_strided_slice %27 {offsets = [256, 0], sizes = [128, 16], strides = [1, 1]} : vector<512x16xf32> to vector<128x16xf32>
    %32 = vector.extract_strided_slice %27 {offsets = [384, 0], sizes = [128, 16], strides = [1, 1]} : vector<512x16xf32> to vector<128x16xf32>
    %33 = arith.maximumf %31, %32 : vector<128x16xf32>
    %34 = arith.maximumf %30, %33 : vector<128x16xf32>
    %cst_13 = arith.constant 0.000000e+00 : f32
    %35 = vector.broadcast %cst_13 : f32 to vector<2x1x10x16xf32>
    %c0_14 = arith.constant 0 : index
    %c0_15 = arith.constant 0 : index
    %c0_16 = arith.constant 0 : index
    %c0_17 = arith.constant 0 : index
    %36 = vector.load %arg8[%c0_14, %c0_15, %c0_16, %c0_17] : memref<2x10x10x16xf32, #tpu.memory_space<vmem>>, vector<2x1x10x16xf32>
    tpu.vector_store %arg8[%c0_14, %c0_15, %c0_16, %c0_17], %35 {strides = array<i32>} : memref<2x10x10x16xf32, #tpu.memory_space<vmem>>, vector<2x1x10x16xf32>,
    %cst_18 = arith.constant 0.000000e+00 : f32
    %37 = vector.broadcast %cst_18 : f32 to vector<2x1x10x16xf32>
    %c0_19 = arith.constant 0 : index
    %c9 = arith.constant 9 : index
    %c0_20 = arith.constant 0 : index
    %c0_21 = arith.constant 0 : index
    %38 = vector.load %arg8[%c0_19, %c9, %c0_20, %c0_21] : memref<2x10x10x16xf32, #tpu.memory_space<vmem>>, vector<2x1x10x16xf32>
    tpu.vector_store %arg8[%c0_19, %c9, %c0_20, %c0_21], %37 {strides = array<i32>} : memref<2x10x10x16xf32, #tpu.memory_space<vmem>>, vector<2x1x10x16xf32>,
    %cst_22 = arith.constant 0.000000e+00 : f32
    %39 = vector.broadcast %cst_22 : f32 to vector<2x10x1x16xf32>
    %c0_23 = arith.constant 0 : index
    %c0_24 = arith.constant 0 : index
    %c0_25 = arith.constant 0 : index
    %c0_26 = arith.constant 0 : index
    %40 = vector.load %arg8[%c0_23, %c0_24, %c0_25, %c0_26] : memref<2x10x10x16xf32, #tpu.memory_space<vmem>>, vector<2x10x1x16xf32>
    tpu.vector_store %arg8[%c0_23, %c0_24, %c0_25, %c0_26], %39 {strides = array<i32>} : memref<2x10x10x16xf32, #tpu.memory_space<vmem>>, vector<2x10x1x16xf32>,
    %cst_27 = arith.constant 0.000000e+00 : f32
    %41 = vector.broadcast %cst_27 : f32 to vector<2x10x1x16xf32>
    %c0_28 = arith.constant 0 : index
    %c0_29 = arith.constant 0 : index
    %c9_30 = arith.constant 9 : index
    %c0_31 = arith.constant 0 : index
    %42 = vector.load %arg8[%c0_28, %c0_29, %c9_30, %c0_31] : memref<2x10x10x16xf32, #tpu.memory_space<vmem>>, vector<2x10x1x16xf32>
    tpu.vector_store %arg8[%c0_28, %c0_29, %c9_30, %c0_31], %41 {strides = array<i32>} : memref<2x10x10x16xf32, #tpu.memory_space<vmem>>, vector<2x10x1x16xf32>,
    %43 = vector.shape_cast %34 : vector<128x16xf32> to vector<2x8x8x16xf32>
    %c0_32 = arith.constant 0 : index
    %c1 = arith.constant 1 : index
    %c1_33 = arith.constant 1 : index
    %c0_34 = arith.constant 0 : index
    %44 = vector.load %arg8[%c0_32, %c1, %c1_33, %c0_34] : memref<2x10x10x16xf32, #tpu.memory_space<vmem>>, vector<2x8x8x16xf32>
    tpu.vector_store %arg8[%c0_32, %c1, %c1_33, %c0_34], %43 {strides = array<i32>} : memref<2x10x10x16xf32, #tpu.memory_space<vmem>>, vector<2x8x8x16xf32>,
    %cst_35 = arith.constant 0.000000e+00 : f32
    %45 = vector.broadcast %cst_35 : f32 to vector<128x32xf32>
    %c0_36 = arith.constant 0 : index
    %c0_37 = arith.constant 0 : index
    %c0_38 = arith.constant 0 : index
    %c0_39 = arith.constant 0 : index
    %46 = vector.load %arg8[%c0_36, %c0_37, %c0_38, %c0_39] : memref<2x10x10x16xf32, #tpu.memory_space<vmem>>, vector<2x8x8x16xf32>
    %47 = vector.shape_cast %46 : vector<2x8x8x16xf32> to vector<128x16xf32>
    %c0_40 = arith.constant 0 : index
    %c0_41 = arith.constant 0 : index
    %48 = vector.load %arg4[%c0_40, %c0_41] : memref<144x32xf32, #tpu.memory_space<vmem>>, vector<16x32xf32>
    %cst_42 = arith.constant dense<0.000000e+00> : vector<128x32xf32>
    %49 = tpu.matmul %47, %48, %cst_42 {dimension_numbers = #tpu.dot_dimension_numbers<[1], [0], [0], [1], [0, 0, 1, 1], [], []>} : vector<128x16xf32>, vector<16x32xf32>, vector<128x32xf32> -> vector<128x32xf32>
    %50 = arith.addf %45, %49 : vector<128x32xf32>
    %c0_43 = arith.constant 0 : index
    %c0_44 = arith.constant 0 : index
    %c1_45 = arith.constant 1 : index
    %c0_46 = arith.constant 0 : index
    %51 = vector.load %arg8[%c0_43, %c0_44, %c1_45, %c0_46] : memref<2x10x10x16xf32, #tpu.memory_space<vmem>>, vector<2x8x8x16xf32>
    %52 = vector.shape_cast %51 : vector<2x8x8x16xf32> to vector<128x16xf32>
    %c16 = arith.constant 16 : index
    %c0_47 = arith.constant 0 : index
    %53 = vector.load %arg4[%c16, %c0_47] : memref<144x32xf32, #tpu.memory_space<vmem>>, vector<16x32xf32>
    %cst_48 = arith.constant dense<0.000000e+00> : vector<128x32xf32>
    %54 = tpu.matmul %52, %53, %cst_48 {dimension_numbers = #tpu.dot_dimension_numbers<[1], [0], [0], [1], [0, 0, 1, 1], [], []>} : vector<128x16xf32>, vector<16x32xf32>, vector<128x32xf32> -> vector<128x32xf32>
    %55 = arith.addf %50, %54 : vector<128x32xf32>
    %c0_49 = arith.constant 0 : index
    %c0_50 = arith.constant 0 : index
    %c2 = arith.constant 2 : index
    %c0_51 = arith.constant 0 : index
    %56 = vector.load %arg8[%c0_49, %c0_50, %c2, %c0_51] : memref<2x10x10x16xf32, #tpu.memory_space<vmem>>, vector<2x8x8x16xf32>
    %57 = vector.shape_cast %56 : vector<2x8x8x16xf32> to vector<128x16xf32>
    %c32 = arith.constant 32 : index
    %c0_52 = arith.constant 0 : index
    %58 = vector.load %arg4[%c32, %c0_52] : memref<144x32xf32, #tpu.memory_space<vmem>>, vector<16x32xf32>
    %cst_53 = arith.constant dense<0.000000e+00> : vector<128x32xf32>
    %59 = tpu.matmul %57, %58, %cst_53 {dimension_numbers = #tpu.dot_dimension_numbers<[1], [0], [0], [1], [0, 0, 1, 1], [], []>} : vector<128x16xf32>, vector<16x32xf32>, vector<128x32xf32> -> vector<128x32xf32>
    %60 = arith.addf %55, %59 : vector<128x32xf32>
    %c0_54 = arith.constant 0 : index
    %c1_55 = arith.constant 1 : index
    %c0_56 = arith.constant 0 : index
    %c0_57 = arith.constant 0 : index
    %61 = vector.load %arg8[%c0_54, %c1_55, %c0_56, %c0_57] : memref<2x10x10x16xf32, #tpu.memory_space<vmem>>, vector<2x8x8x16xf32>
    %62 = vector.shape_cast %61 : vector<2x8x8x16xf32> to vector<128x16xf32>
    %c48 = arith.constant 48 : index
    %c0_58 = arith.constant 0 : index
    %63 = vector.load %arg4[%c48, %c0_58] : memref<144x32xf32, #tpu.memory_space<vmem>>, vector<16x32xf32>
    %cst_59 = arith.constant dense<0.000000e+00> : vector<128x32xf32>
    %64 = tpu.matmul %62, %63, %cst_59 {dimension_numbers = #tpu.dot_dimension_numbers<[1], [0], [0], [1], [0, 0, 1, 1], [], []>} : vector<128x16xf32>, vector<16x32xf32>, vector<128x32xf32> -> vector<128x32xf32>
    %65 = arith.addf %60, %64 : vector<128x32xf32>
    %c0_60 = arith.constant 0 : index
    %c1_61 = arith.constant 1 : index
    %c1_62 = arith.constant 1 : index
    %c0_63 = arith.constant 0 : index
    %66 = vector.load %arg8[%c0_60, %c1_61, %c1_62, %c0_63] : memref<2x10x10x16xf32, #tpu.memory_space<vmem>>, vector<2x8x8x16xf32>
    %67 = vector.shape_cast %66 : vector<2x8x8x16xf32> to vector<128x16xf32>
    %c64 = arith.constant 64 : index
    %c0_64 = arith.constant 0 : index
    %68 = vector.load %arg4[%c64, %c0_64] : memref<144x32xf32, #tpu.memory_space<vmem>>, vector<16x32xf32>
    %cst_65 = arith.constant dense<0.000000e+00> : vector<128x32xf32>
    %69 = tpu.matmul %67, %68, %cst_65 {dimension_numbers = #tpu.dot_dimension_numbers<[1], [0], [0], [1], [0, 0, 1, 1], [], []>} : vector<128x16xf32>, vector<16x32xf32>, vector<128x32xf32> -> vector<128x32xf32>
    %70 = arith.addf %65, %69 : vector<128x32xf32>
    %c0_66 = arith.constant 0 : index
    %c1_67 = arith.constant 1 : index
    %c2_68 = arith.constant 2 : index
    %c0_69 = arith.constant 0 : index
    %71 = vector.load %arg8[%c0_66, %c1_67, %c2_68, %c0_69] : memref<2x10x10x16xf32, #tpu.memory_space<vmem>>, vector<2x8x8x16xf32>
    %72 = vector.shape_cast %71 : vector<2x8x8x16xf32> to vector<128x16xf32>
    %c80 = arith.constant 80 : index
    %c0_70 = arith.constant 0 : index
    %73 = vector.load %arg4[%c80, %c0_70] : memref<144x32xf32, #tpu.memory_space<vmem>>, vector<16x32xf32>
    %cst_71 = arith.constant dense<0.000000e+00> : vector<128x32xf32>
    %74 = tpu.matmul %72, %73, %cst_71 {dimension_numbers = #tpu.dot_dimension_numbers<[1], [0], [0], [1], [0, 0, 1, 1], [], []>} : vector<128x16xf32>, vector<16x32xf32>, vector<128x32xf32> -> vector<128x32xf32>
    %75 = arith.addf %70, %74 : vector<128x32xf32>
    %c0_72 = arith.constant 0 : index
    %c2_73 = arith.constant 2 : index
    %c0_74 = arith.constant 0 : index
    %c0_75 = arith.constant 0 : index
    %76 = vector.load %arg8[%c0_72, %c2_73, %c0_74, %c0_75] : memref<2x10x10x16xf32, #tpu.memory_space<vmem>>, vector<2x8x8x16xf32>
    %77 = vector.shape_cast %76 : vector<2x8x8x16xf32> to vector<128x16xf32>
    %c96 = arith.constant 96 : index
    %c0_76 = arith.constant 0 : index
    %78 = vector.load %arg4[%c96, %c0_76] : memref<144x32xf32, #tpu.memory_space<vmem>>, vector<16x32xf32>
    %cst_77 = arith.constant dense<0.000000e+00> : vector<128x32xf32>
    %79 = tpu.matmul %77, %78, %cst_77 {dimension_numbers = #tpu.dot_dimension_numbers<[1], [0], [0], [1], [0, 0, 1, 1], [], []>} : vector<128x16xf32>, vector<16x32xf32>, vector<128x32xf32> -> vector<128x32xf32>
    %80 = arith.addf %75, %79 : vector<128x32xf32>
    %c0_78 = arith.constant 0 : index
    %c2_79 = arith.constant 2 : index
    %c1_80 = arith.constant 1 : index
    %c0_81 = arith.constant 0 : index
    %81 = vector.load %arg8[%c0_78, %c2_79, %c1_80, %c0_81] : memref<2x10x10x16xf32, #tpu.memory_space<vmem>>, vector<2x8x8x16xf32>
    %82 = vector.shape_cast %81 : vector<2x8x8x16xf32> to vector<128x16xf32>
    %c112 = arith.constant 112 : index
    %c0_82 = arith.constant 0 : index
    %83 = vector.load %arg4[%c112, %c0_82] : memref<144x32xf32, #tpu.memory_space<vmem>>, vector<16x32xf32>
    %cst_83 = arith.constant dense<0.000000e+00> : vector<128x32xf32>
    %84 = tpu.matmul %82, %83, %cst_83 {dimension_numbers = #tpu.dot_dimension_numbers<[1], [0], [0], [1], [0, 0, 1, 1], [], []>} : vector<128x16xf32>, vector<16x32xf32>, vector<128x32xf32> -> vector<128x32xf32>
    %85 = arith.addf %80, %84 : vector<128x32xf32>
    %c0_84 = arith.constant 0 : index
    %c2_85 = arith.constant 2 : index
    %c2_86 = arith.constant 2 : index
    %c0_87 = arith.constant 0 : index
    %86 = vector.load %arg8[%c0_84, %c2_85, %c2_86, %c0_87] : memref<2x10x10x16xf32, #tpu.memory_space<vmem>>, vector<2x8x8x16xf32>
    %87 = vector.shape_cast %86 : vector<2x8x8x16xf32> to vector<128x16xf32>
    %c128 = arith.constant 128 : index
    %c0_88 = arith.constant 0 : index
    %88 = vector.load %arg4[%c128, %c0_88] : memref<144x32xf32, #tpu.memory_space<vmem>>, vector<16x32xf32>
    %cst_89 = arith.constant dense<0.000000e+00> : vector<128x32xf32>
    %89 = tpu.matmul %87, %88, %cst_89 {dimension_numbers = #tpu.dot_dimension_numbers<[1], [0], [0], [1], [0, 0, 1, 1], [], []>} : vector<128x16xf32>, vector<16x32xf32>, vector<128x32xf32> -> vector<128x32xf32>
    %90 = arith.addf %85, %89 : vector<128x32xf32>
    %cst_90 = arith.constant dense<0.000000e+00> : vector<32xf32>
    %91 = vector.multi_reduction <add>, %90, %cst_90 [0] : vector<128x32xf32> to vector<32xf32>
    %92 = vector.shape_cast %91 : vector<32xf32> to vector<1x32xf32>
    %cst_91 = arith.constant 7.812500e-03 : f32
    %93 = vector.broadcast %cst_91 : f32 to vector<1x32xf32>
    %94 = arith.mulf %92, %93 : vector<1x32xf32>
    %95 = vector.broadcast %94 : vector<1x32xf32> to vector<128x32xf32>
    %96 = arith.subf %90, %95 : vector<128x32xf32>
    %97 = arith.mulf %96, %96 : vector<128x32xf32>
    %cst_92 = arith.constant dense<0.000000e+00> : vector<32xf32>
    %98 = vector.multi_reduction <add>, %97, %cst_92 [0] : vector<128x32xf32> to vector<32xf32>
    %99 = vector.shape_cast %98 : vector<32xf32> to vector<1x32xf32>
    %cst_93 = arith.constant 7.812500e-03 : f32
    %100 = vector.broadcast %cst_93 : f32 to vector<1x32xf32>
    %101 = arith.mulf %99, %100 : vector<1x32xf32>
    %c0_94 = arith.constant 0 : index
    %c0_95 = arith.constant 0 : index
    %102 = vector.load %arg5[%c0_94, %c0_95] : memref<1x32xf32, #tpu.memory_space<vmem>>, vector<1x32xf32>
    %cst_96 = arith.constant 9.99999974E-6 : f32
    %103 = vector.broadcast %cst_96 : f32 to vector<1x32xf32>
    %104 = arith.addf %101, %103 : vector<1x32xf32>
    %105 = math.rsqrt %104 : vector<1x32xf32>
    %106 = arith.mulf %102, %105 : vector<1x32xf32>
    %c0_97 = arith.constant 0 : index
    %c0_98 = arith.constant 0 : index
    %107 = vector.load %arg6[%c0_97, %c0_98] : memref<1x32xf32, #tpu.memory_space<vmem>>, vector<1x32xf32>
    %108 = arith.mulf %94, %106 : vector<1x32xf32>
    %109 = arith.subf %107, %108 : vector<1x32xf32>
    %110 = vector.broadcast %106 : vector<1x32xf32> to vector<128x32xf32>
    %111 = arith.mulf %90, %110 : vector<128x32xf32>
    %112 = vector.broadcast %109 : vector<1x32xf32> to vector<128x32xf32>
    %113 = arith.addf %111, %112 : vector<128x32xf32>
    %cst_99 = arith.constant 0.000000e+00 : f32
    %114 = vector.broadcast %cst_99 : f32 to vector<128x32xf32>
    %115 = arith.maximumf %113, %114 : vector<128x32xf32>
    %116 = arith.truncf %115 : vector<128x32xf32> to vector<128x32xbf16>
    %c0_100 = arith.constant 0 : index
    %c0_101 = arith.constant 0 : index
    %117 = vector.load %arg7[%c0_100, %c0_101] : memref<128x32xbf16, #tpu.memory_space<vmem>>, vector<128x32xbf16>
    tpu.vector_store %arg7[%c0_100, %c0_101], %116 {strides = array<i32>} : memref<128x32xbf16, #tpu.memory_space<vmem>>, vector<128x32xbf16>,
    return
  }
}

module attributes {stable_mosaic.version = 11 : i64} {
  func.func @_matmul_bias_kernel(%arg0: i32, %arg1: i32, %arg2: memref<2x1024xbf16, #tpu.memory_space<vmem>>, %arg3: memref<1024x128xbf16, #tpu.memory_space<vmem>>, %arg4: memref<1x128xf32, #tpu.memory_space<vmem>>, %arg5: memref<2x128xf32, #tpu.memory_space<vmem>>, %arg6: memref<2x128xf32, #tpu.memory_space<vmem>>) attributes {dimension_semantics = [#tpu.dimension_semantics<parallel>, #tpu.dimension_semantics<arbitrary>], iteration_bounds = array<i64: 1, 1>, scalar_prefetch = 0 : i64, scratch_operands = 1 : i64, tpu.core_type = #tpu.core_type<tc>, window_params = [{transform_indices = @transform_0, window_bounds = array<i64: 2, 1024>}, {transform_indices = @transform_1, window_bounds = array<i64: 1024, 128>}, {transform_indices = @transform_2, window_bounds = array<i64: 1, 128>}, {transform_indices = @transform_3, window_bounds = array<i64: 2, 128>}]} {
    %c0_i32 = arith.constant 0 : i32
    %0 = arith.cmpi eq, %arg1, %c0_i32 : i32
    %1 = arith.extui %0 : i1 to i32
    %c0_i32_0 = arith.constant 0 : i32
    %2 = arith.cmpi ne, %1, %c0_i32_0 : i32
    scf.if %2 {
      %cst_10 = arith.constant 0.000000e+00 : f32
      %12 = vector.broadcast %cst_10 : f32 to vector<2x128xf32>
      %c0_11 = arith.constant 0 : index
      %c0_12 = arith.constant 0 : index
      %13 = vector.load %arg6[%c0_11, %c0_12] : memref<2x128xf32, #tpu.memory_space<vmem>>, vector<2x128xf32>
      tpu.vector_store %arg6[%c0_11, %c0_12], %12 {strides = array<i32>} : memref<2x128xf32, #tpu.memory_space<vmem>>, vector<2x128xf32>,
    } else {
    }
    %c0 = arith.constant 0 : index
    %c0_1 = arith.constant 0 : index
    %3 = vector.load %arg6[%c0, %c0_1] : memref<2x128xf32, #tpu.memory_space<vmem>>, vector<2x128xf32>
    %c0_2 = arith.constant 0 : index
    %c0_3 = arith.constant 0 : index
    %4 = vector.load %arg2[%c0_2, %c0_3] : memref<2x1024xbf16, #tpu.memory_space<vmem>>, vector<2x1024xbf16>
    %c0_4 = arith.constant 0 : index
    %c0_5 = arith.constant 0 : index
    %5 = vector.load %arg3[%c0_4, %c0_5] : memref<1024x128xbf16, #tpu.memory_space<vmem>>, vector<1024x128xbf16>
    %cst = arith.constant dense<0.000000e+00> : vector<2x128xf32>
    %6 = tpu.matmul %4, %5, %cst {dimension_numbers = #tpu.dot_dimension_numbers<[1], [0], [0], [1], [0, 0, 1, 1], [], []>} : vector<2x1024xbf16>, vector<1024x128xbf16>, vector<2x128xf32> -> vector<2x128xf32>
    %7 = arith.addf %3, %6 : vector<2x128xf32>
    %c0_6 = arith.constant 0 : index
    %c0_7 = arith.constant 0 : index
    %8 = vector.load %arg6[%c0_6, %c0_7] : memref<2x128xf32, #tpu.memory_space<vmem>>, vector<2x128xf32>
    tpu.vector_store %arg6[%c0_6, %c0_7], %7 {strides = array<i32>} : memref<2x128xf32, #tpu.memory_space<vmem>>, vector<2x128xf32>,
    %c0_i32_8 = arith.constant 0 : i32
    %9 = arith.cmpi eq, %arg1, %c0_i32_8 : i32
    %10 = arith.extui %9 : i1 to i32
    %c0_i32_9 = arith.constant 0 : i32
    %11 = arith.cmpi ne, %10, %c0_i32_9 : i32
    scf.if %11 {
      %c0_10 = arith.constant 0 : index
      %c0_11 = arith.constant 0 : index
      %12 = vector.load %arg6[%c0_10, %c0_11] : memref<2x128xf32, #tpu.memory_space<vmem>>, vector<2x128xf32>
      %c0_12 = arith.constant 0 : index
      %c0_13 = arith.constant 0 : index
      %13 = vector.load %arg4[%c0_12, %c0_13] : memref<1x128xf32, #tpu.memory_space<vmem>>, vector<1x128xf32>
      %14 = vector.broadcast %13 : vector<1x128xf32> to vector<2x128xf32>
      %15 = arith.addf %12, %14 : vector<2x128xf32>
      %c0_14 = arith.constant 0 : index
      %c0_15 = arith.constant 0 : index
      %16 = vector.load %arg5[%c0_14, %c0_15] : memref<2x128xf32, #tpu.memory_space<vmem>>, vector<2x128xf32>
      tpu.vector_store %arg5[%c0_14, %c0_15], %15 {strides = array<i32>} : memref<2x128xf32, #tpu.memory_space<vmem>>, vector<2x128xf32>,
    } else {
    }
    return
  }
  func.func @transform_0(%arg0: i32, %arg1: i32) -> (i32, i32) {
    %c0_i32 = arith.constant 0 : i32
    %c0_i32_0 = arith.constant 0 : i32
    return %c0_i32, %arg1 : i32, i32
  }
  func.func @transform_1(%arg0: i32, %arg1: i32) -> (i32, i32) {
    %c0_i32 = arith.constant 0 : i32
    return %arg1, %arg0 : i32, i32
  }
  func.func @transform_2(%arg0: i32, %arg1: i32) -> (i32, i32) {
    %c0_i32 = arith.constant 0 : i32
    %c0_i32_0 = arith.constant 0 : i32
    return %c0_i32, %arg0 : i32, i32
  }
  func.func @transform_3(%arg0: i32, %arg1: i32) -> (i32, i32) {
    %c0_i32 = arith.constant 0 : i32
    %c0_i32_0 = arith.constant 0 : i32
    return %c0_i32, %arg0 : i32, i32
  }
}

module attributes {stable_mosaic.version = 11 : i64} {
  func.func @_matmul_bias_kernel(%arg0: i32, %arg1: i32, %arg2: memref<2x2048xbf16, #tpu.memory_space<vmem>>, %arg3: memref<2048x1024xbf16, #tpu.memory_space<vmem>>, %arg4: memref<1x1024xf32, #tpu.memory_space<vmem>>, %arg5: memref<2x1024xf32, #tpu.memory_space<vmem>>, %arg6: memref<2x1024xf32, #tpu.memory_space<vmem>>) attributes {dimension_semantics = [#tpu.dimension_semantics<parallel>, #tpu.dimension_semantics<arbitrary>], iteration_bounds = array<i64: 1, 1>, scalar_prefetch = 0 : i64, scratch_operands = 1 : i64, tpu.core_type = #tpu.core_type<tc>, window_params = [{transform_indices = @transform_0, window_bounds = array<i64: 2, 2048>}, {transform_indices = @transform_1, window_bounds = array<i64: 2048, 1024>}, {transform_indices = @transform_2, window_bounds = array<i64: 1, 1024>}, {transform_indices = @transform_3, window_bounds = array<i64: 2, 1024>}]} {
    %c0_i32 = arith.constant 0 : i32
    %0 = arith.cmpi eq, %arg1, %c0_i32 : i32
    %1 = arith.extui %0 : i1 to i32
    %c0_i32_0 = arith.constant 0 : i32
    %2 = arith.cmpi ne, %1, %c0_i32_0 : i32
    scf.if %2 {
      %cst_10 = arith.constant 0.000000e+00 : f32
      %12 = vector.broadcast %cst_10 : f32 to vector<2x1024xf32>
      %c0_11 = arith.constant 0 : index
      %c0_12 = arith.constant 0 : index
      %13 = vector.load %arg6[%c0_11, %c0_12] : memref<2x1024xf32, #tpu.memory_space<vmem>>, vector<2x1024xf32>
      tpu.vector_store %arg6[%c0_11, %c0_12], %12 {strides = array<i32>} : memref<2x1024xf32, #tpu.memory_space<vmem>>, vector<2x1024xf32>,
    } else {
    }
    %c0 = arith.constant 0 : index
    %c0_1 = arith.constant 0 : index
    %3 = vector.load %arg6[%c0, %c0_1] : memref<2x1024xf32, #tpu.memory_space<vmem>>, vector<2x1024xf32>
    %c0_2 = arith.constant 0 : index
    %c0_3 = arith.constant 0 : index
    %4 = vector.load %arg2[%c0_2, %c0_3] : memref<2x2048xbf16, #tpu.memory_space<vmem>>, vector<2x2048xbf16>
    %c0_4 = arith.constant 0 : index
    %c0_5 = arith.constant 0 : index
    %5 = vector.load %arg3[%c0_4, %c0_5] : memref<2048x1024xbf16, #tpu.memory_space<vmem>>, vector<2048x1024xbf16>
    %cst = arith.constant dense<0.000000e+00> : vector<2x1024xf32>
    %6 = tpu.matmul %4, %5, %cst {dimension_numbers = #tpu.dot_dimension_numbers<[1], [0], [0], [1], [0, 0, 1, 1], [], []>} : vector<2x2048xbf16>, vector<2048x1024xbf16>, vector<2x1024xf32> -> vector<2x1024xf32>
    %7 = arith.addf %3, %6 : vector<2x1024xf32>
    %c0_6 = arith.constant 0 : index
    %c0_7 = arith.constant 0 : index
    %8 = vector.load %arg6[%c0_6, %c0_7] : memref<2x1024xf32, #tpu.memory_space<vmem>>, vector<2x1024xf32>
    tpu.vector_store %arg6[%c0_6, %c0_7], %7 {strides = array<i32>} : memref<2x1024xf32, #tpu.memory_space<vmem>>, vector<2x1024xf32>,
    %c0_i32_8 = arith.constant 0 : i32
    %9 = arith.cmpi eq, %arg1, %c0_i32_8 : i32
    %10 = arith.extui %9 : i1 to i32
    %c0_i32_9 = arith.constant 0 : i32
    %11 = arith.cmpi ne, %10, %c0_i32_9 : i32
    scf.if %11 {
      %c0_10 = arith.constant 0 : index
      %c0_11 = arith.constant 0 : index
      %12 = vector.load %arg6[%c0_10, %c0_11] : memref<2x1024xf32, #tpu.memory_space<vmem>>, vector<2x1024xf32>
      %c0_12 = arith.constant 0 : index
      %c0_13 = arith.constant 0 : index
      %13 = vector.load %arg4[%c0_12, %c0_13] : memref<1x1024xf32, #tpu.memory_space<vmem>>, vector<1x1024xf32>
      %14 = vector.broadcast %13 : vector<1x1024xf32> to vector<2x1024xf32>
      %15 = arith.addf %12, %14 : vector<2x1024xf32>
      %c0_14 = arith.constant 0 : index
      %c0_15 = arith.constant 0 : index
      %16 = vector.load %arg5[%c0_14, %c0_15] : memref<2x1024xf32, #tpu.memory_space<vmem>>, vector<2x1024xf32>
      tpu.vector_store %arg5[%c0_14, %c0_15], %15 {strides = array<i32>} : memref<2x1024xf32, #tpu.memory_space<vmem>>, vector<2x1024xf32>,
    } else {
    }
    return
  }
  func.func @transform_0(%arg0: i32, %arg1: i32) -> (i32, i32) {
    %c0_i32 = arith.constant 0 : i32
    %c0_i32_0 = arith.constant 0 : i32
    return %c0_i32, %arg1 : i32, i32
  }
  func.func @transform_1(%arg0: i32, %arg1: i32) -> (i32, i32) {
    %c0_i32 = arith.constant 0 : i32
    return %arg1, %arg0 : i32, i32
  }
  func.func @transform_2(%arg0: i32, %arg1: i32) -> (i32, i32) {
    %c0_i32 = arith.constant 0 : i32
    %c0_i32_0 = arith.constant 0 : i32
    return %c0_i32, %arg0 : i32, i32
  }
  func.func @transform_3(%arg0: i32, %arg1: i32) -> (i32, i32) {
    %c0_i32 = arith.constant 0 : i32
    %c0_i32_0 = arith.constant 0 : i32
    return %c0_i32, %arg0 : i32, i32
  }
}

</mosaic_0001>

<bundles_post_ra>
// kernel: jadhav_forward.5
= control target key start
LH: loop header
LB: loop body
LE: loop exit
PB: predicated region body
PF: predicated region fallthrough
CT: control target
= control target key end

     0   :  { %8 = vsyncpa [#allocation4], 0  ;;  %s1118_s0 = inlined_call_operand.vmem [shape: bf16[2,1024], index: 0, kind: input, shape index: {}]   ;;  %s1119_s1 = inlined_call_operand.hbm [shape: bf16[1024,128], index: 1, kind: input, shape index: {}]   ;;  %s1120_s2 = inlined_call_operand.hbm [shape: f32[1,128], index: 2, kind: input, shape index: {}]   ;;  %s1121_s3 = inlined_call_operand.vmem [shape: f32[2,128], index: 3, kind: output, shape index: {}]  }
   0x1   :  { %s16_s14 = sshll.u32 %s1119_s1, 4  ;;  %s17_s14 = int_to_ptr.hbm [resolvable:$true] %s16_s14 }
   0x2   :  { %9 = vsyncpa [#allocation6], 0  ;;  %s1081_s15 = smov [#allocation3]   ;;  %s30_s19 = sshll.u32 %s1120_s2, 4  ;;  %s31_s19 = int_to_ptr.hbm [resolvable:$true] %s30_s19 }
   0x3   :  { %s18_s16 = sshll.u32 %s1081_s15, 4  ;;  %s1082_s20 = smov 64   ;;  %s19_s16 = int_to_ptr.vmem [resolvable:$true] %s18_s16 }
   0x4   :  { %s1083_s21 = smov 4   ;;  %s1084_s22 = smov [#allocation5]  }
   0x5   :  { %24 = dma.hbm_to_vmem [thread:$0]  %s17_s14, 8192, %s19_s16, [#allocation4], %s1082_s20, %s1082_s20, %s1083_s21  }
   0x6   :  { %s32_s23 = sshll.u32 %s1084_s22, 4  ;;  %s33_s23 = int_to_ptr.vmem [resolvable:$true] %s32_s23 }
   0x7   :  { %35 = dma.hbm_to_vmem [thread:$0]  %s31_s19, 16, %s33_s23, [#allocation6]  }
   0x8   :  { %1077 = dma.done.wait [#allocation4], 8192  }
   0x9   :  { %1078 = vsyncadd [#allocation4], 4294959104 }
   0xa   :  { %1079 = dma.done.wait [#allocation6], 16  }
   0xb   :  { %1080 = vsyncadd [#allocation6], 4294967280  ;;  %v966_v0 = vld [vmem:[#allocation3 + $0x38] sm:$0xff]  ;;  %v965_v4 = vld [vmem:[#allocation3 + $0x30] sm:$0xff] }
   0xc   :  { %v974_v1 = vld [vmem:[#allocation3 + $0x78] sm:$0xff]  ;;  %581 = vmatpush.bf16.msra.mxu0 %v966_v0  ;;  %v973_v5 = vld [vmem:[#allocation3 + $0x70] sm:$0xff]  ;;  %v964_v8 = vld [vmem:[#allocation3 + $0x28] sm:$0xff] }
   0xd   :  { %v982_v2 = vld [vmem:[#allocation3 + $0xb8] sm:$0xff]  ;;  %594 = vmatpush.bf16.msra.mxu1 %v974_v1  ;;  %v981_v6 = vld [vmem:[#allocation3 + $0xb0] sm:$0xff]  ;;  %v972_v9 = vld [vmem:[#allocation3 + $0x68] sm:$0xff] }
   0xe   :  { %v990_v3 = vld [vmem:[#allocation3 + $0xf8] sm:$0xff]  ;;  %607 = vmatpush.bf16.msra.mxu2 %v982_v2  ;;  %v989_v7 = vld [vmem:[#allocation3 + $0xf0] sm:$0xff]  ;;  %v980_v10 = vld [vmem:[#allocation3 + $0xa8] sm:$0xff] }
   0xf   :  { %620 = vmatpush.bf16.msra.mxu3 %v990_v3  ;;  %v988_v11 = vld [vmem:[#allocation3 + $0xe8] sm:$0xff]  ;;  %v963_v12 = vld [vmem:[#allocation3 + $0x20] sm:$0xff]  ;;  %v50_v16 = vld [vmem:[%s1118_s0] sm:$0xff] }
  0x10   :  { %582 = vmatpush.bf16.msra.mxu0 %v965_v4  ;;  %v971_v13 = vld [vmem:[#allocation3 + $0x60] sm:$0xff]  ;;  %v962_v17 = vld [vmem:[#allocation3 + $0x18] sm:$0xff]  ;;  %180 = vst [vmem:[#allocation1] ss:$9 sm:$0xff] %v50_v16  ;;  %v961_v21 = vld [vmem:[#allocation3 + $0x10] sm:$0xff] }
  0x11   :  { %595 = vmatpush.bf16.msra.mxu1 %v973_v5  ;;  %v979_v14 = vld [vmem:[#allocation3 + $0xa0] sm:$0xff]  ;;  %v970_v18 = vld [vmem:[#allocation3 + $0x58] sm:$0xff]  ;;  %v969_v22 = vld [vmem:[#allocation3 + $0x50] sm:$0xff] }
  0x12   :  { %608 = vmatpush.bf16.msra.mxu2 %v981_v6  ;;  %v987_v15 = vld [vmem:[#allocation3 + $0xe0] sm:$0xff]  ;;  %v978_v19 = vld [vmem:[#allocation3 + $0x98] sm:$0xff]  ;;  %v977_v23 = vld [vmem:[#allocation3 + $0x90] sm:$0xff] }
  0x13   :  { %621 = vmatpush.bf16.msra.mxu3 %v989_v7  ;;  %v986_v20 = vld [vmem:[#allocation3 + $0xd8] sm:$0xff]  ;;  %v985_v24 = vld [vmem:[#allocation3 + $0xd0] sm:$0xff]  ;;  %v960_v25 = vld [vmem:[#allocation3 + $0x8] sm:$0xff] }
  0x14   :  { %583 = vmatpush.bf16.msra.mxu0 %v964_v8  ;;  %v968_v26 = vld [vmem:[#allocation3 + $0x48] sm:$0xff]  ;;  %v959_v29 = vld [vmem:[#allocation3] sm:$0xff]  ;;  %v998_v33 = vld [vmem:[#allocation3 + $0x138] sm:$0xff] }
  0x15   :  { %596 = vmatpush.bf16.msra.mxu1 %v972_v9  ;;  %v976_v27 = vld [vmem:[#allocation3 + $0x88] sm:$0xff]  ;;  %v967_v30 = vld [vmem:[#allocation3 + $0x40] sm:$0xff]  ;;  %v1006_v34 = vld [vmem:[#allocation3 + $0x178] sm:$0xff] }
  0x16   :  { %609 = vmatpush.bf16.msra.mxu2 %v980_v10  ;;  %v984_v28 = vld [vmem:[#allocation3 + $0xc8] sm:$0xff]  ;;  %v975_v31 = vld [vmem:[#allocation3 + $0x80] sm:$0xff]  ;;  %v1014_v35 = vld [vmem:[#allocation3 + $0x1b8] sm:$0xff] }
  0x17   :  { %622 = vmatpush.bf16.msra.mxu3 %v988_v11  ;;  %v983_v32 = vld [vmem:[#allocation3 + $0xc0] sm:$0xff]  ;;  %v1022_v36 = vld [vmem:[#allocation3 + $0x1f8] sm:$0xff]  ;;  %v997_v37 = vld [vmem:[#allocation3 + $0x130] sm:$0xff]  ;;  %v1085_v11 = vmov 0.0  }
  0x18   :  { %584 = vmatpush.bf16.msra.mxu0 %v963_v12  ;;  %v183_v38 = vld [vmem:[#allocation1 + $0x12] sm:$0xff]  ;;  %v181_v39 = vld [vmem:[#allocation1] sm:$0xff]  ;;  %v182_v42 = vld [vmem:[#allocation1 + $0x9] sm:$0xff]  ;;  %48 = vst [vmem:[#allocation2] sm:$0x3] %v1085_v11 }
  0x19   :  { %597 = vmatpush.bf16.msra.mxu1 %v971_v13  ;;  %v1005_v40 = vld [vmem:[#allocation3 + $0x170] sm:$0xff]  ;;  %v996_v45 = vld [vmem:[#allocation3 + $0x128] sm:$0xff]  ;;  %v995_v49 = vld [vmem:[#allocation3 + $0x120] sm:$0xff] }
  0x1a   :  { %610 = vmatpush.bf16.msra.mxu2 %v979_v14  ;;  %v184_v41 = vld [vmem:[#allocation1 + $0x1b] sm:$0xff]  ;;  %v1004_v46 = vld [vmem:[#allocation3 + $0x168] sm:$0xff]  ;;  %v1003_v50 = vld [vmem:[#allocation3 + $0x160] sm:$0xff] }
  0x1b   :  { %623 = vmatpush.bf16.msra.mxu3 %v987_v15  ;;  %v1013_v43 = vld [vmem:[#allocation3 + $0x1b0] sm:$0xff]  ;;  %v1012_v47 = vld [vmem:[#allocation3 + $0x1a8] sm:$0xff]  ;;  %v1011_v51 = vld [vmem:[#allocation3 + $0x1a0] sm:$0xff] }
  0x1c   :  { %585 = vmatpush.bf16.msra.mxu0 %v962_v17  ;;  %v1021_v44 = vld [vmem:[#allocation3 + $0x1f0] sm:$0xff]  ;;  %v1020_v48 = vld [vmem:[#allocation3 + $0x1e8] sm:$0xff]  ;;  %v1019_v52 = vld [vmem:[#allocation3 + $0x1e0] sm:$0xff] }
  0x1d   :  { %598 = vmatpush.bf16.msra.mxu1 %v970_v18  ;;  %v994_v53 = vld [vmem:[#allocation3 + $0x118] sm:$0xff]  ;;  %v993_v57 = vld [vmem:[#allocation3 + $0x110] sm:$0xff]  ;;  %v992_v61 = vld [vmem:[#allocation3 + $0x108] sm:$0xff] }
  0x1e   :  { %611 = vmatpush.bf16.msra.mxu2 %v978_v19  ;;  %v1002_v54 = vld [vmem:[#allocation3 + $0x158] sm:$0xff]  ;;  %v1001_v58 = vld [vmem:[#allocation3 + $0x150] sm:$0xff]  ;;  %v1000_v62 = vld [vmem:[#allocation3 + $0x148] sm:$0xff] }
  0x1f   :  { %624 = vmatpush.bf16.msra.mxu3 %v986_v20  ;;  %v1010_v55 = vld [vmem:[#allocation3 + $0x198] sm:$0xff]  ;;  %v1009_v59 = vld [vmem:[#allocation3 + $0x190] sm:$0xff]  ;;  %v1008_v63 = vld [vmem:[#allocation3 + $0x188] sm:$0xff] }
  0x20   :  { %586 = vmatpush.bf16.msra.mxu0 %v961_v21  ;;  %v1018_v56 = vld [vmem:[#allocation3 + $0x1d8] sm:$0xff]  ;;  %v1017_v60 = vld [vmem:[#allocation3 + $0x1d0] sm:$0xff]  ;;  %v1016_v0 = vld [vmem:[#allocation3 + $0x1c8] sm:$0xff] }
  0x21   :  { %599 = vmatpush.bf16.msra.mxu1 %v969_v22  ;;  %v991_v1 = vld [vmem:[#allocation3 + $0x100] sm:$0xff]  ;;  %v187_v7 = vld [vmem:[#allocation1 + $0x36] sm:$0xff]  ;;  %v188_v8 = vld [vmem:[#allocation1 + $0x3f] sm:$0xff] }
  0x22   :  { %612 = vmatpush.bf16.msra.mxu2 %v977_v23  ;;  %v999_v2 = vld [vmem:[#allocation3 + $0x140] sm:$0xff] }
  0x23   :  { %625 = vmatpush.bf16.msra.mxu3 %v985_v24  ;;  %v1007_v3 = vld [vmem:[#allocation3 + $0x180] sm:$0xff] }
  0x24   :  { %587 = vmatpush.bf16.msra.mxu0 %v960_v25  ;;  %v1015_v4 = vld [vmem:[#allocation3 + $0x1c0] sm:$0xff] }
  0x25   :  { %600 = vmatpush.bf16.msra.mxu1 %v968_v26  ;;  %v185_v5 = vld [vmem:[#allocation1 + $0x24] sm:$0xff]  ;;  %v186_v6 = vld [vmem:[#allocation1 + $0x2d] sm:$0xff] }
  0x26   :  { %613 = vmatpush.bf16.msra.mxu2 %v976_v27 }
  0x27   :  { %626 = vmatpush.bf16.msra.mxu3 %v984_v28 }
  0x28   :  { %588 = vmatpush.bf16.msra.mxu0 %v959_v29 }
  0x29   :  { %601 = vmatpush.bf16.msra.mxu1 %v967_v30  ;;  %v49_v30 = vld [vmem:[#allocation2] sm:$0x3] }
  0x2a   :  { %614 = vmatpush.bf16.msra.mxu2 %v975_v31 }
  0x2b   :  { %627 = vmatpush.bf16.msra.mxu3 %v983_v32  ;;  %589 = vmatmul.bf16.vlgmr.msra.gmra.mxu0 %v181_v39 }
  0x2c   :  { %633 = vmatpush.bf16.msrb.mxu0 %v998_v33  ;;  %602 = vmatmul.bf16.vlgmr.msra.gmra.mxu1 %v182_v42 }
  0x2d   :  { %646 = vmatpush.bf16.msrb.mxu1 %v1006_v34  ;;  %615 = vmatmul.bf16.vlgmr.msra.gmra.mxu2 %v183_v38 }
  0x2e   :  { %659 = vmatpush.bf16.msrb.mxu2 %v1014_v35  ;;  %628 = vmatmul.bf16.vlgmr.msra.gmra.mxu3 %v184_v41  ;;  %v1028_v35 = vld [vmem:[#allocation5] ss:$0 sm:$0xff] }
  0x2f   :  { %672 = vmatpush.bf16.msrb.mxu3 %v1022_v36 }
  0x30   :  { %634 = vmatpush.bf16.msrb.mxu0 %v997_v37 }
  0x31   :  { %647 = vmatpush.bf16.msrb.mxu1 %v1005_v40 }
  0x32   :  { %660 = vmatpush.bf16.msrb.mxu2 %v1013_v43 }
  0x33   :  { %673 = vmatpush.bf16.msrb.mxu3 %v1021_v44 }
  0x34   :  { %635 = vmatpush.bf16.msrb.mxu0 %v996_v45 }
  0x35   :  { %648 = vmatpush.bf16.msrb.mxu1 %v1004_v46 }
  0x36   :  { %661 = vmatpush.bf16.msrb.mxu2 %v1012_v47 }
  0x37   :  { %674 = vmatpush.bf16.msrb.mxu3 %v1020_v48 }
  0x38   :  { %636 = vmatpush.bf16.msrb.mxu0 %v995_v49 }
  0x39   :  { %649 = vmatpush.bf16.msrb.mxu1 %v1003_v50 }
  0x3a   :  { %662 = vmatpush.bf16.msrb.mxu2 %v1011_v51 }
  0x3b   :  { %675 = vmatpush.bf16.msrb.mxu3 %v1019_v52 }
  0x3c   :  { %637 = vmatpush.bf16.msrb.mxu0 %v994_v53 }
  0x3d   :  { %650 = vmatpush.bf16.msrb.mxu1 %v1002_v54 }
  0x3e   :  { %663 = vmatpush.bf16.msrb.mxu2 %v1010_v55 }
  0x3f   :  { %676 = vmatpush.bf16.msrb.mxu3 %v1018_v56 }
  0x40   :  { %638 = vmatpush.bf16.msrb.mxu0 %v993_v57 }
  0x41   :  { %651 = vmatpush.bf16.msrb.mxu1 %v1001_v58 }
  0x42   :  { %664 = vmatpush.bf16.msrb.mxu2 %v1009_v59 }
  0x43   :  { %677 = vmatpush.bf16.msrb.mxu3 %v1017_v60 }
  0x44   :  { %639 = vmatpush.bf16.msrb.mxu0 %v992_v61 }
  0x45   :  { %652 = vmatpush.bf16.msrb.mxu1 %v1000_v62 }
  0x46   :  { %665 = vmatpush.bf16.msrb.mxu2 %v1008_v63 }
  0x47   :  { %678 = vmatpush.bf16.msrb.mxu3 %v1016_v0 }
  0x48   :  { %640 = vmatpush.bf16.msrb.mxu0 %v991_v1 }
  0x49   :  { %653 = vmatpush.bf16.msrb.mxu1 %v999_v2 }
  0x4a   :  { %666 = vmatpush.bf16.msrb.mxu2 %v1007_v3 }
  0x4b   :  { %679 = vmatpush.bf16.msrb.mxu3 %v1015_v4  ;;  %641 = vmatmul.bf16.vlgmr.msrb.gmra.mxu0 %v185_v5 }
  0x4c   :  { %654 = vmatmul.bf16.vlgmr.msrb.gmra.mxu1 %v186_v6 }
  0x4d   :  { %667 = vmatmul.bf16.vlgmr.msrb.gmra.mxu2 %v187_v7 }
  0x4e   :  { %680 = vmatmul.bf16.vlgmr.msrb.gmra.mxu3 %v188_v8 }
  0xa8   :  { %v590_v9 = vpop.f32.mrf.mxu0 }
  0xa9   :  { %v603_v10 = vpop.f32.mrf.mxu1 }
  0xaa   :  { %v604_v18 = vadd.f32 %v603_v10, %v590_v9 }
  0xb0   :  { %v616_v12 = vpop.f32.mrf.mxu2  ;;  %v592_v14 = vpop.f32.mrf.mxu0 }
  0xb1   :  { %v629_v13 = vpop.f32.mrf.mxu3  ;;  %v605_v15 = vpop.f32.mrf.mxu1  ;;  %v617_v19 = vadd.f32 %v616_v12, %v604_v18 }
  0xb3   :  { %v630_v20 = vadd.f32 %v629_v13, %v617_v19 }
  0xb8   :  { %v618_v16 = vpop.f32.mrf.mxu2 }
  0xb9   :  { %v631_v17 = vpop.f32.mrf.mxu3 }
  0xc8   :  { %v642_v21 = vpop.f32.mrf.mxu0 }
  0xc9   :  { %v655_v22 = vpop.f32.mrf.mxu1  ;;  %v643_v23 = vadd.f32 %v642_v21, %v630_v20 }
  0xcb   :  { %v656_v24 = vadd.f32 %v655_v22, %v643_v23 }
  0xd0   :  { %v668_v25 = vpop.f32.mrf.mxu2  ;;  %v644_v28 = vpop.f32.mrf.mxu0 }
  0xd1   :  { %v681_v26 = vpop.f32.mrf.mxu3  ;;  %v669_v27 = vadd.f32 %v668_v25, %v656_v24  ;;  %v657_v29 = vpop.f32.mrf.mxu1 }
  0xd3   :  { %v682_v31 = vadd.f32 %v681_v26, %v669_v27 }
  0xd5   :  { %v685_v32 = vadd.f32 %v682_v31, %v49_v30 }
  0xd7   :  { %686 = vst [vmem:[#allocation2] sm:$0x3] %v685_v32 }
  0xd8   :  { %v670_v33 = vpop.f32.mrf.mxu2 }
  0xd9   :  { %v683_v34 = vpop.f32.mrf.mxu3 }
  0xde   :  { %v690_v36 = vld [vmem:[#allocation2] sm:$0x3] }
  0xdf   :  { %v695_v37 = vadd.f32 %v1028_v35, %v690_v36 }
  0xe1   :  { %696 = vst [vmem:[%s1121_s3] sm:$0x3] %v695_v37 }
  0xe2   :  { %701 = vsyncpa [#allocation4], 1 }
  0xe3   :  { %702 = vsyncpa [#allocation6], 1 }

// kernel: jadhav_forward.3
= control target key start
LH: loop header
LB: loop body
LE: loop exit
PB: predicated region body
PF: predicated region fallthrough
CT: control target
= control target key end

     0   :  { %12 = vsyncpa [#allocation4], 0  ;;  %s5170_s0 = inlined_call_operand.vmem [shape: f32[512,9], index: 0, kind: input, shape index: {}]   ;;  %s5171_s1 = inlined_call_operand.hbm [shape: f32[9,16], index: 1, kind: input, shape index: {}]   ;;  %s5172_s2 = inlined_call_operand.hbm [shape: f32[1,16], index: 2, kind: input, shape index: {}]   ;;  %s5173_s3 = inlined_call_operand.hbm [shape: f32[1,16], index: 3, kind: input, shape index: {}]   ;;  %s5174_s4 = inlined_call_operand.vmem [shape: f32[144,32], index: 4, kind: input, shape index: {}]   ;;  %s5175_s5 = inlined_call_operand.hbm [shape: f32[1,32], index: 5, kind: input, shape index: {}]   ;;  %s5176_s6 = inlined_call_operand.hbm [shape: f32[1,32], index: 6, kind: input, shape index: {}]   ;;  %s5177_s7 = inlined_call_operand.vmem [shape: bf16[128,32], index: 7, kind: output, shape index: {}]  }
   0x1   :  { %13 = vsyncpa [#allocation6], 0  ;;  %s35_s26 = sshll.u32 %s5172_s2, 4  ;;  %s36_s26 = int_to_ptr.hbm [resolvable:$true] %s35_s26 }
   0x2   :  { %14 = vsyncpa [#allocation9], 0  ;;  %s3159_s27 = smov [#allocation5]   ;;  %s59_s8 = sshll.u32 %s5175_s5, 4  ;;  %s60_s8 = int_to_ptr.hbm [resolvable:$true] %s59_s8 }
   0x3   :  { %s37_s28 = sshll.u32 %s3159_s27, 4  ;;  %s3160_s9 = smov [#allocation8]   ;;  %s38_s28 = int_to_ptr.vmem [resolvable:$true] %s37_s28 }
   0x4   :  { %40 = dma.hbm_to_vmem [thread:$0]  %s36_s26, 16, %s38_s28, [#allocation6]  }
   0x5   :  { %s61_s10 = sshll.u32 %s3160_s9, 4  ;;  %s21_s13 = sshll.u32 %s5171_s1, 4  ;;  %s62_s10 = int_to_ptr.vmem [resolvable:$true] %s61_s10  ;;  %s22_s13 = int_to_ptr.hbm [resolvable:$true] %s21_s13 }
   0x6   :  { %64 = dma.hbm_to_vmem [thread:$0]  %s60_s8, 16, %s62_s10, [#allocation9]  }
   0x7   :  { %s3161_s2 = smov [#allocation3]   ;;  %s46_s17 = sshll.u32 %s5173_s3, 4  ;;  %s47_s17 = int_to_ptr.hbm [resolvable:$true] %s46_s17 }
   0x8   :  { %s23_s14 = sshll.u32 %s3161_s2, 4  ;;  %s3162_s18 = smov 128   ;;  %s24_s14 = int_to_ptr.vmem [resolvable:$true] %s23_s14 }
   0x9   :  { %s3163_s5 = smov 8   ;;  %s3164_s19 = smov [#allocation7]  }
   0xa   :  { %29 = dma.hbm_to_vmem [thread:$0]  %s22_s13, 256, %s24_s14, [#allocation4], %s3162_s18, %s3162_s18, %s3163_s5  }
   0xb   :  { %s48_s20 = sshll.u32 %s3164_s19, 4  ;;  %s70_s1 = sshll.u32 %s5176_s6, 4  ;;  %s49_s20 = int_to_ptr.vmem [resolvable:$true] %s48_s20  ;;  %s71_s1 = int_to_ptr.hbm [resolvable:$true] %s70_s1 }
   0xc   :  { %51 = dma.hbm_to_vmem [thread:$0]  %s47_s17, 16, %s49_s20, [#allocation6]  }
   0xd   :  { %s3165_s23 = smov [#allocation10]  }
   0xe   :  { %s72_s24 = sshll.u32 %s3165_s23, 4  ;;  %s73_s24 = int_to_ptr.vmem [resolvable:$true] %s72_s24 }
   0xf   :  { %75 = dma.hbm_to_vmem [thread:$0]  %s71_s1, 16, %s73_s24, [#allocation9]  }
  0x10   :  { %3153 = dma.done.wait [#allocation4], 256  }
  0x11   :  { %3154 = vsyncadd [#allocation4], 4294967040 }
  0x12   :  { %3155 = dma.done.wait [#allocation6], 32  }
  0x13   :  { %3156 = vsyncadd [#allocation6], 4294967264 }
  0x14   :  { %3157 = dma.done.wait [#allocation9], 32  }
  0x15   :  { %3158 = vsyncadd [#allocation9], 4294967264  ;;  %vm355_vm0 = vcmask 1040384   ;;  %v161_v0 = vld [vmem:[#allocation3 + $0x8] sm:$0x1]  ;;  %v160_v1 = vld [vmem:[#allocation3] sm:$0xff] }
  0x16   :  { %2806 = vmatpush.msk.msra.mxu0 %vm355_vm0, %v161_v0  ;;  %v96_v2 = vld [vmem:[%s5170_s0] sm:$0xff]  ;;  %vm162_vm1 = vcmask 72704   ;;  %3015 = vmatpush.msk.msra.mxu1 %vm355_vm0, %v161_v0  ;;  %v97_v3 = vld [vmem:[%s5170_s0 + $0x8] sm:$0xff]  ;;  %v98_v4 = vld [vmem:[%s5170_s0 + $0x10] sm:$0xff]  ;;  %vm568_vm2 = vcmask 130048   ;;  %vm1237_vm6 = vcmask 122880  }
  0x17   :  { %3016 = vmatpush.msk.msra.mxu2 %vm355_vm0, %v161_v0  ;;  %3017 = vmatpush.msk.msra.mxu3 %vm355_vm0, %v161_v0  ;;  %v99_v5 = vld [vmem:[%s5170_s0 + $0x18] sm:$0xff]  ;;  %v100_v6 = vld [vmem:[%s5170_s0 + $0x20] sm:$0xff]  ;;  %v101_v7 = vld [vmem:[%s5170_s0 + $0x28] sm:$0xff]  ;;  %vm1228_vm7 = vcmask 123904   ;;  %vm2587_vm8 = vcmask 261120   ;;  %vm2782_vm12 = vcmask 257024  }
  0x18   :  { %374 = vmatpush.msra.mxu0 %v160_v1  ;;  %3018 = vmatpush.msra.mxu1 %v160_v1  ;;  %v102_v8 = vld [vmem:[%s5170_s0 + $0x30] sm:$0xff]  ;;  %v103_v9 = vld [vmem:[%s5170_s0 + $0x38] sm:$0xff]  ;;  %v104_v10 = vld [vmem:[%s5170_s0 + $0x40] sm:$0xff] }
  0x19   :  { %2807 = vmatmul.msk.f32.vlgmr.msra.gmra.mxu0 %vm162_vm1, %v96_v2  ;;  %3019 = vmatpush.msra.mxu2 %v160_v1  ;;  %v105_v11 = vld [vmem:[%s5170_s0 + $0x48] sm:$0xff]  ;;  %v106_v12 = vld [vmem:[%s5170_s0 + $0x50] sm:$0xff]  ;;  %v107_v13 = vld [vmem:[%s5170_s0 + $0x58] sm:$0xff] }
  0x1a   :  { %3020 = vmatpush.msra.mxu3 %v160_v1  ;;  %v108_v14 = vld [vmem:[%s5170_s0 + $0x60] sm:$0xff]  ;;  %v109_v15 = vld [vmem:[%s5170_s0 + $0x68] sm:$0xff]  ;;  %v110_v16 = vld [vmem:[%s5170_s0 + $0x70] sm:$0xff] }
  0x1b   :  { %v111_v17 = vld [vmem:[%s5170_s0 + $0x78] sm:$0xff]  ;;  %v112_v19 = vld [vmem:[%s5170_s0 + $0x80] sm:$0xff]  ;;  %v113_v21 = vld [vmem:[%s5170_s0 + $0x88] sm:$0xff] }
  0x1c   :  { %v114_v23 = vld [vmem:[%s5170_s0 + $0x90] sm:$0xff]  ;;  %v115_v25 = vld [vmem:[%s5170_s0 + $0x98] sm:$0xff]  ;;  %v116_v27 = vld [vmem:[%s5170_s0 + $0xa0] sm:$0xff] }
  0x1d   :  { %v117_v29 = vld [vmem:[%s5170_s0 + $0xa8] sm:$0xff]  ;;  %v118_v31 = vld [vmem:[%s5170_s0 + $0xb0] sm:$0xff]  ;;  %v119_v33 = vld [vmem:[%s5170_s0 + $0xb8] sm:$0xff] }
  0x1e   :  { %v120_v35 = vld [vmem:[%s5170_s0 + $0xc0] sm:$0xff]  ;;  %v121_v37 = vld [vmem:[%s5170_s0 + $0xc8] sm:$0xff]  ;;  %v122_v39 = vld [vmem:[%s5170_s0 + $0xd0] sm:$0xff] }
  0x1f   :  { %v123_v41 = vld [vmem:[%s5170_s0 + $0xd8] sm:$0xff]  ;;  %v124_v43 = vld [vmem:[%s5170_s0 + $0xe0] sm:$0xff]  ;;  %v125_v45 = vld [vmem:[%s5170_s0 + $0xe8] sm:$0xff] }
  0x20   :  { %v126_v47 = vld [vmem:[%s5170_s0 + $0xf0] sm:$0xff]  ;;  %v127_v49 = vld [vmem:[%s5170_s0 + $0xf8] sm:$0xff]  ;;  %v128_v51 = vld [vmem:[%s5170_s0 + $0x100] sm:$0xff] }
  0x21   :  { %2808 = vmatmul.msk.f32.gmra.mxu0 %vm162_vm1, %v97_v3  ;;  %v129_v53 = vld [vmem:[%s5170_s0 + $0x108] sm:$0xff]  ;;  %v130_v55 = vld [vmem:[%s5170_s0 + $0x110] sm:$0xff]  ;;  %v131_v57 = vld [vmem:[%s5170_s0 + $0x118] sm:$0xff] }
  0x22   :  { %v132_v59 = vld [vmem:[%s5170_s0 + $0x120] sm:$0xff]  ;;  %v133_v61 = vld [vmem:[%s5170_s0 + $0x128] sm:$0xff]  ;;  %v134_v63 = vld [vmem:[%s5170_s0 + $0x130] sm:$0xff] }
  0x23   :  { %v135_v1 = vld [vmem:[%s5170_s0 + $0x138] sm:$0xff]  ;;  %v136_v3 = vld [vmem:[%s5170_s0 + $0x140] sm:$0xff] }
  0x29   :  { %2809 = vmatmul.msk.f32.gmra.mxu0 %vm162_vm1, %v98_v4 }
  0x31   :  { %2810 = vmatmul.msk.f32.gmra.mxu0 %vm162_vm1, %v99_v5  ;;  %v137_v5 = vld [vmem:[%s5170_s0 + $0x148] sm:$0xff] }
  0x39   :  { %2811 = vmatmul.msk.f32.gmra.mxu0 %vm162_vm1, %v100_v6 }
  0x41   :  { %2812 = vmatmul.msk.f32.gmra.mxu0 %vm162_vm1, %v101_v7  ;;  %v138_v7 = vld [vmem:[%s5170_s0 + $0x150] sm:$0xff] }
  0x49   :  { %2813 = vmatmul.msk.f32.gmra.mxu0 %vm162_vm1, %v102_v8 }
  0x51   :  { %2814 = vmatmul.msk.f32.gmra.mxu0 %vm162_vm1, %v103_v9  ;;  %v139_v9 = vld [vmem:[%s5170_s0 + $0x158] sm:$0xff] }
  0x59   :  { %2815 = vmatmul.msk.f32.gmra.mxu0 %vm162_vm1, %v104_v10 }
  0x61   :  { %2816 = vmatmul.msk.f32.gmra.mxu0 %vm162_vm1, %v105_v11  ;;  %v140_v11 = vld [vmem:[%s5170_s0 + $0x160] sm:$0xff] }
  0x69   :  { %2817 = vmatmul.msk.f32.gmra.mxu0 %vm162_vm1, %v106_v12 }
  0x71   :  { %2818 = vmatmul.msk.f32.gmra.mxu0 %vm162_vm1, %v107_v13  ;;  %v141_v13 = vld [vmem:[%s5170_s0 + $0x168] sm:$0xff] }
  0x79   :  { %2819 = vmatmul.msk.f32.gmra.mxu0 %vm162_vm1, %v108_v14  ;;  %v148_v14 = vld [vmem:[%s5170_s0 + $0x1a0] sm:$0xff] }
  0x7a   :  { %2859 = vmatmul.msk.f32.vlgmr.msra.gmra.mxu1 %vm162_vm1, %v148_v14 }
  0x81   :  { %2820 = vmatmul.msk.f32.gmra.mxu0 %vm162_vm1, %v109_v15  ;;  %v152_v15 = vld [vmem:[%s5170_s0 + $0x1c0] sm:$0xff] }
  0x82   :  { %2863 = vmatmul.msk.f32.vlgmr.msra.gmra.mxu2 %vm162_vm1, %v152_v15 }
  0x89   :  { %2821 = vmatmul.msk.f32.gmra.mxu0 %vm162_vm1, %v110_v16 }
  0x91   :  { %2822 = vmatmul.msk.f32.gmra.mxu0 %vm162_vm1, %v111_v17  ;;  %v142_v17 = vld [vmem:[%s5170_s0 + $0x170] sm:$0xff] }
  0x96   :  { %v3286_v18 = vpop.f32.mrf.mxu0 }
  0x99   :  { %2823 = vmatmul.msk.f32.gmra.mxu0 %vm162_vm1, %v112_v19  ;;  %v149_v19 = vld [vmem:[%s5170_s0 + $0x1a8] sm:$0xff] }
  0x9a   :  { %2860 = vmatmul.msk.f32.gmra.mxu1 %vm162_vm1, %v149_v19 }
  0x9e   :  { %v3292_v20 = vpop.f32.mrf.mxu0 }
  0x9f   :  { %5233 = vst [vmem:[#allocation14_spill] sm:$0xff] %v3292_v20 }
  0xa1   :  { %2824 = vmatmul.msk.f32.gmra.mxu0 %vm162_vm1, %v113_v21  ;;  %v153_v21 = vld [vmem:[%s5170_s0 + $0x1c8] sm:$0xff] }
  0xa2   :  { %2864 = vmatmul.msk.f32.gmra.mxu2 %vm162_vm1, %v153_v21 }
  0xa6   :  { %v3298_v22 = vpop.f32.mrf.mxu0 }
  0xa7   :  { %5234 = vst [vmem:[#allocation15_spill] sm:$0xff] %v3298_v22 }
  0xa9   :  { %2825 = vmatmul.msk.f32.gmra.mxu0 %vm162_vm1, %v114_v23  ;;  %v156_v23 = vld [vmem:[%s5170_s0 + $0x1e0] sm:$0xff] }
  0xaa   :  { %2867 = vmatmul.msk.f32.vlgmr.msra.gmra.mxu3 %vm162_vm1, %v156_v23 }
  0xae   :  { %v3304_v24 = vpop.f32.mrf.mxu0 }
  0xaf   :  { %5235 = vst [vmem:[#allocation16_spill] sm:$0xff] %v3304_v24 }
  0xb1   :  { %2826 = vmatmul.msk.f32.gmra.mxu0 %vm162_vm1, %v115_v25 }
  0xb6   :  { %v3310_v26 = vpop.f32.mrf.mxu0 }
  0xb7   :  { %5236 = vst [vmem:[#allocation17_spill] sm:$0xff] %v3310_v26  ;;  %v576_v14 = vsel %vm568_vm2, %v3310_v26, 0.0 }
  0xb9   :  { %2827 = vmatmul.msk.f32.gmra.mxu0 %vm162_vm1, %v116_v27  ;;  %v143_v27 = vld [vmem:[%s5170_s0 + $0x178] sm:$0xff] }
  0xbe   :  { %v3316_v28 = vpop.f32.mrf.mxu0 }
  0xbf   :  { %5237 = vst [vmem:[#allocation18_spill] sm:$0xff] %v3316_v28 }
  0xc1   :  { %2828 = vmatmul.msk.f32.gmra.mxu0 %vm162_vm1, %v117_v29  ;;  %v150_v29 = vld [vmem:[%s5170_s0 + $0x1b0] sm:$0xff] }
  0xc2   :  { %2861 = vmatmul.msk.f32.gmra.mxu1 %vm162_vm1, %v150_v29 }
  0xc6   :  { %v3322_v30 = vpop.f32.mrf.mxu0 }
  0xc7   :  { %v580_v21 = vsel %vm568_vm2, %v3322_v30, 0.0 }
  0xc9   :  { %2829 = vmatmul.msk.f32.gmra.mxu0 %vm162_vm1, %v118_v31  ;;  %v154_v31 = vld [vmem:[%s5170_s0 + $0x1d0] sm:$0xff] }
  0xca   :  { %2865 = vmatmul.msk.f32.gmra.mxu2 %vm162_vm1, %v154_v31 }
  0xce   :  { %v3328_v32 = vpop.f32.mrf.mxu0 }
  0xd1   :  { %2830 = vmatmul.msk.f32.gmra.mxu0 %vm162_vm1, %v119_v33  ;;  %v157_v33 = vld [vmem:[%s5170_s0 + $0x1e8] sm:$0xff] }
  0xd2   :  { %2868 = vmatmul.msk.f32.gmra.mxu3 %vm162_vm1, %v157_v33 }
  0xd6   :  { %v3334_v34 = vpop.f32.mrf.mxu0 }
  0xd7   :  { %v584_v33 = vsel %vm568_vm2, %v3334_v34, 0.0 }
  0xd9   :  { %2831 = vmatmul.msk.f32.gmra.mxu0 %vm162_vm1, %v120_v35 }
  0xde   :  { %v3340_v36 = vpop.f32.mrf.mxu0 }
  0xe1   :  { %2832 = vmatmul.msk.f32.gmra.mxu0 %vm162_vm1, %v121_v37  ;;  %v144_v37 = vld [vmem:[%s5170_s0 + $0x180] sm:$0xff] }
  0xe6   :  { %v3346_v38 = vpop.f32.mrf.mxu0 }
  0xe9   :  { %2833 = vmatmul.msk.f32.gmra.mxu0 %vm162_vm1, %v122_v39  ;;  %v151_v39 = vld [vmem:[%s5170_s0 + $0x1b8] sm:$0xff] }
  0xea   :  { %2862 = vmatmul.msk.f32.gmra.mxu1 %vm162_vm1, %v151_v39  ;;  %v586_v39 = vsel %vm568_vm2, %v3340_v36, 0.0 }
  0xee   :  { %v3352_v40 = vpop.f32.mrf.mxu0 }
  0xf1   :  { %2834 = vmatmul.msk.f32.gmra.mxu0 %vm162_vm1, %v123_v41  ;;  %v155_v41 = vld [vmem:[%s5170_s0 + $0x1d8] sm:$0xff] }
  0xf2   :  { %2866 = vmatmul.msk.f32.gmra.mxu2 %vm162_vm1, %v155_v41 }
  0xf6   :  { %v3358_v42 = vpop.f32.mrf.mxu0 }
  0xf9   :  { %2835 = vmatmul.msk.f32.gmra.mxu0 %vm162_vm1, %v124_v43  ;;  %v158_v43 = vld [vmem:[%s5170_s0 + $0x1f0] sm:$0xff] }
  0xfa   :  { %2869 = vmatmul.msk.f32.gmra.mxu3 %vm162_vm1, %v158_v43  ;;  %v588_v43 = vsel %vm568_vm2, %v3346_v38, 0.0 }
  0xfe   :  { %v3364_v44 = vpop.f32.mrf.mxu0 }
 0x101   :  { %2836 = vmatmul.msk.f32.gmra.mxu0 %vm162_vm1, %v125_v45 }
 0x106   :  { %v3370_v46 = vpop.f32.mrf.mxu0 }
 0x109   :  { %2837 = vmatmul.msk.f32.gmra.mxu0 %vm162_vm1, %v126_v47  ;;  %v145_v47 = vld [vmem:[%s5170_s0 + $0x188] sm:$0xff] }
 0x10e   :  { %v3376_v48 = vpop.f32.mrf.mxu0 }
 0x111   :  { %2838 = vmatmul.msk.f32.gmra.mxu0 %vm162_vm1, %v127_v49  ;;  %v159_v49 = vld [vmem:[%s5170_s0 + $0x1f8] sm:$0xff] }
 0x112   :  { %2870 = vmatmul.msk.f32.gmra.mxu3 %vm162_vm1, %v159_v49  ;;  %v590_v49 = vsel %vm568_vm2, %v3352_v40, 0.0 }
 0x116   :  { %v3382_v50 = vpop.f32.mrf.mxu0 }
 0x119   :  { %2839 = vmatmul.msk.f32.gmra.mxu0 %vm162_vm1, %v128_v51 }
 0x11e   :  { %v3388_v52 = vpop.f32.mrf.mxu0 }
 0x121   :  { %2840 = vmatmul.msk.f32.gmra.mxu0 %vm162_vm1, %v129_v53  ;;  %v146_v53 = vld [vmem:[%s5170_s0 + $0x190] sm:$0xff] }
 0x126   :  { %v3394_v54 = vpop.f32.mrf.mxu0 }
 0x129   :  { %2841 = vmatmul.msk.f32.gmra.mxu0 %vm162_vm1, %v130_v55 }
 0x12e   :  { %v3400_v56 = vpop.f32.mrf.mxu0 }
 0x131   :  { %2842 = vmatmul.msk.f32.gmra.mxu0 %vm162_vm1, %v131_v57  ;;  %v147_v57 = vld [vmem:[%s5170_s0 + $0x198] sm:$0xff] }
 0x136   :  { %v3406_v58 = vpop.f32.mrf.mxu0 }
 0x139   :  { %2843 = vmatmul.msk.f32.gmra.mxu0 %vm162_vm1, %v132_v59 }
 0x13e   :  { %v3412_v60 = vpop.f32.mrf.mxu0 }
 0x141   :  { %2844 = vmatmul.msk.f32.gmra.mxu0 %vm162_vm1, %v133_v61 }
 0x146   :  { %v3418_v62 = vpop.f32.mrf.mxu0 }
 0x149   :  { %2845 = vmatmul.msk.f32.gmra.mxu0 %vm162_vm1, %v134_v63 }
 0x14e   :  { %v3424_v0 = vpop.f32.mrf.mxu0 }
 0x151   :  { %2846 = vmatmul.msk.f32.gmra.mxu0 %vm162_vm1, %v135_v1  ;;  %v570_v1 = vsel %vm568_vm2, %v3292_v20, 0.0 }
 0x156   :  { %v3430_v2 = vpop.f32.mrf.mxu0 }
 0x159   :  { %2847 = vmatmul.msk.f32.gmra.mxu0 %vm162_vm1, %v136_v3  ;;  %v569_v3 = vsel %vm568_vm2, %v3286_v18, 0.0 }
 0x15e   :  { %v3436_v4 = vpop.f32.mrf.mxu0 }
 0x161   :  { %2848 = vmatmul.msk.f32.gmra.mxu0 %vm162_vm1, %v137_v5  ;;  %v572_v5 = vsel %vm568_vm2, %v3298_v22, 0.0 }
 0x166   :  { %v3442_v6 = vpop.f32.mrf.mxu0 }
 0x169   :  { %2849 = vmatmul.msk.f32.gmra.mxu0 %vm162_vm1, %v138_v7  ;;  %v571_v7 = vadd.f32 %v570_v1, %v569_v3  ;;  %v592_v1 = vsel %vm568_vm2, %v3358_v42, 0.0 }
 0x16e   :  { %v3448_v8 = vpop.f32.mrf.mxu0 }
 0x171   :  { %2850 = vmatmul.msk.f32.gmra.mxu0 %vm162_vm1, %v139_v9  ;;  %v574_v9 = vsel %vm568_vm2, %v3304_v24, 0.0 }
 0x176   :  { %v3454_v10 = vpop.f32.mrf.mxu0 }
 0x179   :  { %2851 = vmatmul.msk.f32.gmra.mxu0 %vm162_vm1, %v140_v11  ;;  %v573_v11 = vadd.f32 %v572_v5, %v571_v7  ;;  %v594_v5 = vsel %vm568_vm2, %v3364_v44, 0.0 }
 0x17b   :  { %v575_v15 = vadd.f32 %v574_v9, %v573_v11  ;;  %v596_v9 = vsel %vm568_vm2, %v3370_v46, 0.0 }
 0x17d   :  { %v577_v19 = vadd.f32 %v576_v14, %v575_v15  ;;  %v598_v14 = vsel %vm568_vm2, %v3376_v48, 0.0 }
 0x17e   :  { %v3460_v12 = vpop.f32.mrf.mxu0 }
 0x181   :  { %2852 = vmatmul.msk.f32.gmra.mxu0 %vm162_vm1, %v141_v13 }
 0x186   :  { %v3474_v16 = vpop.f32.mrf.mxu0 }
 0x189   :  { %2853 = vmatmul.msk.f32.gmra.mxu0 %vm162_vm1, %v142_v17  ;;  %v578_v17 = vsel %vm568_vm2, %v3316_v28, 0.0 }
 0x18a   :  { %v579_v23 = vadd.f32 %v578_v17, %v577_v19  ;;  %v600_v19 = vsel %vm568_vm2, %v3382_v50, 0.0 }
 0x18c   :  { %v581_v29 = vadd.f32 %v580_v21, %v579_v23  ;;  %v602_v23 = vsel %vm568_vm2, %v3388_v52, 0.0 }
 0x18e   :  { %v3492_v25 = vpop.f32.mrf.mxu0 }
 0x191   :  { %2854 = vmatmul.msk.f32.gmra.mxu0 %vm162_vm1, %v143_v27  ;;  %v582_v27 = vsel %vm568_vm2, %v3328_v32, 0.0 }
 0x196   :  { %v3510_v35 = vpop.f32.mrf.mxu0 }
 0x199   :  { %2855 = vmatmul.msk.f32.gmra.mxu0 %vm162_vm1, %v144_v37  ;;  %v583_v37 = vadd.f32 %v582_v27, %v581_v29  ;;  %v604_v29 = vsel %vm568_vm2, %v3394_v54, 0.0 }
 0x19b   :  { %v585_v41 = vadd.f32 %v584_v33, %v583_v37  ;;  %v606_v37 = vsel %vm568_vm2, %v3400_v56, 0.0 }
 0x19e   :  { %v3528_v45 = vpop.f32.mrf.mxu0 }
 0x1a1   :  { %2856 = vmatmul.msk.f32.gmra.mxu0 %vm162_vm1, %v145_v47  ;;  %v587_v47 = vadd.f32 %v586_v39, %v585_v41 }
 0x1a6   :  { %v3538_v51 = vpop.f32.mrf.mxu0 }
 0x1a9   :  { %2857 = vmatmul.msk.f32.gmra.mxu0 %vm162_vm1, %v146_v53  ;;  %v589_v53 = vadd.f32 %v588_v43, %v587_v47  ;;  %v608_v43 = vsel %vm568_vm2, %v3406_v58, 0.0 }
 0x1ab   :  { %v591_v3 = vadd.f32 %v590_v49, %v589_v53  ;;  %v610_v49 = vsel %vm568_vm2, %v3412_v60, 0.0 }
 0x1ad   :  { %v593_v7 = vadd.f32 %v592_v1, %v591_v3  ;;  %v612_v1 = vsel %vm568_vm2, %v3418_v62, 0.0 }
 0x1ae   :  { %v3544_v55 = vpop.f32.mrf.mxu0 }
 0x1af   :  { %v595_v11 = vadd.f32 %v594_v5, %v593_v7  ;;  %v614_v5 = vsel %vm568_vm2, %v3424_v0, 0.0 }
 0x1b1   :  { %2858 = vmatmul.msk.f32.gmra.mxu0 %vm162_vm1, %v147_v57  ;;  %v597_v15 = vadd.f32 %v596_v9, %v595_v11  ;;  %v616_v11 = vsel %vm568_vm2, %v3430_v2, 0.0 }
 0x1b3   :  { %v599_v21 = vadd.f32 %v598_v14, %v597_v15  ;;  %v618_v15 = vsel %vm568_vm2, %v3436_v4, 0.0 }
 0x1b5   :  { %v601_v27 = vadd.f32 %v600_v19, %v599_v21  ;;  %v620_v21 = vsel %vm568_vm2, %v3442_v6, 0.0 }
 0x1b6   :  { %v3550_v59 = vpop.f32.mrf.mxu0 }
 0x1b7   :  { %v603_v33 = vadd.f32 %v602_v23, %v601_v27  ;;  %v622_v27 = vsel %vm568_vm2, %v3448_v8, 0.0 }
 0x1b9   :  { %v605_v39 = vadd.f32 %v604_v29, %v603_v33 }
 0x1bb   :  { %v607_v47 = vadd.f32 %v606_v37, %v605_v39  ;;  %v624_v37 = vsel %vm568_vm2, %v3454_v10, 0.0 }
 0x1bd   :  { %v609_v53 = vadd.f32 %v608_v43, %v607_v47  ;;  %v626_v43 = vsel %vm568_vm2, %v3460_v12, 0.0 }
 0x1be   :  { %v3552_v61 = vpop.f32.mrf.mxu0 }
 0x1bf   :  { %v611_v3 = vadd.f32 %v610_v49, %v609_v53  ;;  %v628_v49 = vsel %vm568_vm2, %v3474_v16, 0.0 }
 0x1c1   :  { %v613_v7 = vadd.f32 %v612_v1, %v611_v3  ;;  %v630_v1 = vsel %vm568_vm2, %v3492_v25, 0.0 }
 0x1c3   :  { %v615_v14 = vadd.f32 %v614_v5, %v613_v7  ;;  %v632_v7 = vsel %vm568_vm2, %v3510_v35, 0.0 }
 0x1c5   :  { %v617_v19 = vadd.f32 %v616_v11, %v615_v14  ;;  %v634_v14 = vsel %vm568_vm2, %v3528_v45, 0.0 }
 0x1c6   :  { %v3554_v63 = vpop.f32.mrf.mxu0 }
 0x1c7   :  { %v619_v23 = vadd.f32 %v618_v15, %v617_v19  ;;  %v636_v19 = vsel %vm568_vm2, %v3538_v51, 0.0 }
 0x1c9   :  { %v621_v29 = vadd.f32 %v620_v21, %v619_v23  ;;  %v638_v23 = vsel %vm568_vm2, %v3544_v55, 0.0 }
 0x1cb   :  { %v623_v39 = vadd.f32 %v622_v27, %v621_v29 }
 0x1cd   :  { %v625_v47 = vadd.f32 %v624_v37, %v623_v39  ;;  %v640_v37 = vsel %vm568_vm2, %v3550_v59, 0.0 }
 0x1ce   :  { %v3564_v13 = vpop.f32.mrf.mxu0 }
 0x1cf   :  { %v627_v53 = vadd.f32 %v626_v43, %v625_v47  ;;  %v642_v43 = vsel %vm568_vm2, %v3552_v61, 0.0 }
 0x1d1   :  { %v629_v3 = vadd.f32 %v628_v49, %v627_v53  ;;  %v644_v49 = vsel %vm568_vm2, %v3554_v63, 0.0 }
 0x1d3   :  { %v631_v11 = vadd.f32 %v630_v1, %v629_v3  ;;  %v3652_v1 = vpop.f32.mrf.mxu1  ;;  %v646_v3 = vsel %vm568_vm2, %v3564_v13, 0.0 }
 0x1d4   :  { %5245 = vst [vmem:[#allocation26_spill] sm:$0xff] %v3652_v1 }
 0x1d5   :  { %v633_v15 = vadd.f32 %v632_v7, %v631_v11 }
 0x1d6   :  { %v3574_v31 = vpop.f32.mrf.mxu0 }
 0x1d7   :  { %5238 = vst [vmem:[#allocation19_spill] sm:$0xff] %v3574_v31  ;;  %v635_v21 = vadd.f32 %v634_v14, %v633_v15  ;;  %v648_v14 = vsel %vm568_vm2, %v3574_v31, 0.0 }
 0x1d9   :  { %v637_v27 = vadd.f32 %v636_v19, %v635_v21 }
 0x1db   :  { %v639_v39 = vadd.f32 %v638_v23, %v637_v27 }
 0x1dd   :  { %v641_v47 = vadd.f32 %v640_v37, %v639_v39  ;;  %v3664_v37 = vpop.f32.mrf.mxu2 }
 0x1de   :  { %v3584_v57 = vpop.f32.mrf.mxu0  ;;  %5247 = vst [vmem:[#allocation28_spill] sm:$0xff] %v3664_v37 }
 0x1df   :  { %5239 = vst [vmem:[#allocation20_spill] sm:$0xff] %v3584_v57  ;;  %v643_v53 = vadd.f32 %v642_v43, %v641_v47  ;;  %v650_v19 = vsel %vm568_vm2, %v3584_v57, 0.0 }
 0x1e1   :  { %v645_v7 = vadd.f32 %v644_v49, %v643_v53  ;;  %v3670_v49 = vpop.f32.mrf.mxu1 }
 0x1e2   :  { %5249 = vst [vmem:[#allocation30_spill] sm:$0xff] %v3670_v49 }
 0x1e3   :  { %v647_v15 = vadd.f32 %v646_v3, %v645_v7 }
 0x1e5   :  { %v649_v21 = vadd.f32 %v648_v14, %v647_v15 }
 0x1e6   :  { %v3594_v17 = vpop.f32.mrf.mxu0 }
 0x1e7   :  { %v652_v23 = vsel %vm568_vm2, %v3594_v17, 0.0  ;;  %v651_v27 = vadd.f32 %v650_v19, %v649_v21 }
 0x1e9   :  { %v653_v43 = vadd.f32 %v652_v23, %v651_v27 }
 0x1ee   :  { %v3604_v41 = vpop.f32.mrf.mxu0 }
 0x1ef   :  { %5240 = vst [vmem:[#allocation21_spill] sm:$0xff] %v3604_v41  ;;  %v654_v39 = vsel %vm568_vm2, %v3604_v41, 0.0  ;;  %v3682_v41 = vpop.f32.mrf.mxu2 }
 0x1f0   :  { %v655_v3 = vadd.f32 %v654_v39, %v653_v43  ;;  %5251 = vst [vmem:[#allocation32_spill] sm:$0xff] %v3682_v41  ;;  %v3686_v43 = vpop.f32.mrf.mxu1 }
 0x1f1   :  { %5252 = vst [vmem:[#allocation33_spill] sm:$0xff] %v3686_v43 }
 0x1f6   :  { %v3614_v9 = vpop.f32.mrf.mxu0 }
 0x1f7   :  { %5241 = vst [vmem:[#allocation22_spill] sm:$0xff] %v3614_v9  ;;  %v656_v53 = vsel %vm568_vm2, %v3614_v9, 0.0 }
 0x1f8   :  { %v657_v14 = vadd.f32 %v656_v53, %v655_v3 }
 0x1fe   :  { %v3624_v33 = vpop.f32.mrf.mxu0 }
 0x1ff   :  { %5242 = vst [vmem:[#allocation23_spill] sm:$0xff] %v3624_v33  ;;  %v658_v7 = vsel %vm568_vm2, %v3624_v33, 0.0 }
 0x200   :  { %v659_v19 = vadd.f32 %v658_v7, %v657_v14 }
 0x206   :  { %v3634_v5 = vpop.f32.mrf.mxu0 }
 0x207   :  { %5243 = vst [vmem:[#allocation24_spill] sm:$0xff] %v3634_v5  ;;  %v660_v15 = vsel %vm568_vm2, %v3634_v5, 0.0 }
 0x208   :  { %v661_v23 = vadd.f32 %v660_v15, %v659_v19 }
 0x20e   :  { %v3644_v29 = vpop.f32.mrf.mxu0 }
 0x20f   :  { %5244 = vst [vmem:[#allocation25_spill] sm:$0xff] %v3644_v29  ;;  %v662_v21 = vsel %vm568_vm2, %v3644_v29, 0.0  ;;  %v3692_v29 = vpop.f32.mrf.mxu3 }
 0x210   :  { %v663_v39 = vadd.f32 %v662_v21, %v661_v23  ;;  %5253 = vst [vmem:[#allocation34_spill] sm:$0xff] %v3692_v29  ;;  %v3698_v21 = vpop.f32.mrf.mxu2  ;;  %v672_v23 = vsel %vm568_vm2, %v3652_v1, 0.0  ;;  %v680_v1 = vsel %vm568_vm2, %v3664_v37, 0.0 }
 0x211   :  { %5255 = vst [vmem:[#allocation36_spill] sm:$0xff] %v3698_v21 }
 0x216   :  { %v3656_v11 = vpop.f32.mrf.mxu0 }
 0x217   :  { %5246 = vst [vmem:[#allocation27_spill] sm:$0xff] %v3656_v11  ;;  %v664_v9 = vsel %vm568_vm2, %v3656_v11, 0.0 }
 0x218   :  { %v665_v3 = vadd.f32 %v664_v9, %v663_v39  ;;  %v3702_v9 = vpop.f32.mrf.mxu1  ;;  %v674_v39 = vsel %vm568_vm2, %v3670_v49, 0.0  ;;  %v682_v49 = vsel %vm568_vm2, %v3682_v41, 0.0 }
 0x219   :  { %5256 = vst [vmem:[#allocation37_spill] sm:$0xff] %v3702_v9 }
 0x21e   :  { %v3668_v47 = vpop.f32.mrf.mxu0 }
 0x21f   :  { %5248 = vst [vmem:[#allocation29_spill] sm:$0xff] %v3668_v47  ;;  %v666_v53 = vsel %vm568_vm2, %v3668_v47, 0.0 }
 0x220   :  { %v667_v14 = vadd.f32 %v666_v53, %v665_v3  ;;  %v676_v3 = vsel %vm568_vm2, %v3686_v43, 0.0 }
 0x226   :  { %v3680_v27 = vpop.f32.mrf.mxu0 }
 0x227   :  { %5250 = vst [vmem:[#allocation31_spill] sm:$0xff] %v3680_v27  ;;  %v668_v7 = vsel %vm568_vm2, %v3680_v27, 0.0 }
 0x228   :  { %v669_v15 = vadd.f32 %v668_v7, %v667_v14  ;;  %v678_v7 = vsel %vm568_vm2, %v3702_v9, 0.0 }
 0x22e   :  { %v3694_v19 = vpop.f32.mrf.mxu0 }
 0x22f   :  { %5254 = vst [vmem:[#allocation35_spill] sm:$0xff] %v3694_v19  ;;  %v670_v5 = vsel %vm568_vm2, %v3694_v19, 0.0 }
 0x230   :  { %v671_v11 = vadd.f32 %v670_v5, %v669_v15  ;;  %v3710_v5 = vpop.f32.mrf.mxu3 }
 0x231   :  { %5257 = vst [vmem:[#allocation38_spill] sm:$0xff] %v3710_v5 }
 0x232   :  { %v673_v47 = vadd.f32 %v672_v23, %v671_v11  ;;  %v3714_v23 = vpop.f32.mrf.mxu2 }
 0x233   :  { %5258 = vst [vmem:[#allocation39_spill] sm:$0xff] %v3714_v23  ;;  %v686_v9 = vsel %vm568_vm2, %v3714_v23, 0.0 }
 0x234   :  { %v675_v53 = vadd.f32 %v674_v39, %v673_v47  ;;  %v684_v39 = vsel %vm568_vm2, %v3698_v21, 0.0 }
 0x236   :  { %v677_v14 = vadd.f32 %v676_v3, %v675_v53 }
 0x238   :  { %v679_v15 = vadd.f32 %v678_v7, %v677_v14  ;;  %v3722_v43 = vpop.f32.mrf.mxu3  ;;  %v688_v7 = vsel %vm568_vm2, %v3692_v29, 0.0  ;;  %v690_v14 = vsel %vm568_vm2, %v3710_v5, 0.0 }
 0x239   :  { %5259 = vst [vmem:[#allocation40_spill] sm:$0xff] %v3722_v43 }
 0x23a   :  { %v681_v11 = vadd.f32 %v680_v1, %v679_v15 }
 0x23c   :  { %v683_v47 = vadd.f32 %v682_v49, %v681_v11  ;;  %v692_v49 = vsel %vm568_vm2, %v3722_v43, 0.0 }
 0x23e   :  { %v685_v53 = vadd.f32 %v684_v39, %v683_v47 }
 0x240   :  { %v687_v3 = vadd.f32 %v686_v9, %v685_v53  ;;  %v3728_v41 = vpop.f32.mrf.mxu3 }
 0x241   :  { %v694_v47 = vsel %vm568_vm2, %v3728_v41, 0.0 }
 0x242   :  { %v689_v1 = vadd.f32 %v688_v7, %v687_v3 }
 0x244   :  { %v691_v15 = vadd.f32 %v690_v14, %v689_v1 }
 0x246   :  { %v693_v11 = vadd.f32 %v692_v49, %v691_v15 }
 0x248   :  { %v695_v9 = vadd.f32 %v694_v47, %v693_v11 }
 0x24a   :  { %v696_v39 = vrot.slane %v695_v9, 4 }
 0x24c   :  { %v697_v53 = vadd.f32 %v696_v39, %v695_v9 }
 0x24e   :  { %v698_v23 = vrot.slane %v697_v53, 2 }
 0x250   :  { %v699_v21 = vadd.f32 %v698_v23, %v697_v53 }
 0x252   :  { %v700_v29 = vrot.slane %v699_v21, 1 }
 0x254   :  { %v701_v3 = vadd.f32 %v700_v29, %v699_v21 }
 0x256   :  { %v3734_v7 = vmul.f32 0.001953125, %v701_v3 }
 0x258   :  { %v703_v1 = vsub.f32 %v3286_v18, %v3734_v7  ;;  %v704_v14 = vsub.f32 %v3292_v20, %v3734_v7  ;;  %v705_v15 = vsub.f32 %v3298_v22, %v3734_v7  ;;  %v706_v49 = vsub.f32 %v3304_v24, %v3734_v7 }
 0x259   :  { %v707_v23 = vsub.f32 %v3310_v26, %v3734_v7  ;;  %v708_v21 = vsub.f32 %v3316_v28, %v3734_v7  ;;  %v709_v22 = vsub.f32 %v3322_v30, %v3734_v7  ;;  %v710_v26 = vsub.f32 %v3328_v32, %v3734_v7 }
 0x25a   :  { %v767_v11 = vmul.f32 %v703_v1, %v703_v1  ;;  %v768_v47 = vmul.f32 %v704_v14, %v704_v14  ;;  %v769_v29 = vmul.f32 %v705_v15, %v705_v15  ;;  %v770_v9 = vmul.f32 %v706_v49, %v706_v49 }
 0x25b   :  { %v771_v20 = vmul.f32 %v707_v23, %v707_v23  ;;  %v772_v15 = vmul.f32 %v708_v21, %v708_v21  ;;  %v711_v49 = vsub.f32 %v3334_v34, %v3734_v7  ;;  %v712_v23 = vsub.f32 %v3340_v36, %v3734_v7 }
 0x25c   :  { %v831_v39 = vsel %vm568_vm2, %v767_v11, 0.0  ;;  %v832_v53 = vsel %vm568_vm2, %v768_v47, 0.0  ;;  %v834_v1 = vsel %vm568_vm2, %v769_v29, 0.0  ;;  %v836_v24 = vsel %vm568_vm2, %v770_v9, 0.0 }
 0x25d   :  { %v833_v3 = vadd.f32 %v832_v53, %v831_v39  ;;  %v773_v11 = vmul.f32 %v709_v22, %v709_v22  ;;  %v838_v47 = vsel %vm568_vm2, %v771_v20, 0.0  ;;  %v774_v53 = vmul.f32 %v710_v26, %v710_v26 }
 0x25e   :  { %v840_v29 = vsel %vm568_vm2, %v772_v15, 0.0  ;;  %v713_v21 = vsub.f32 %v3346_v38, %v3734_v7  ;;  %v714_v22 = vsub.f32 %v3352_v40, %v3734_v7  ;;  %v715_v26 = vsub.f32 %v3358_v42, %v3734_v7 }
 0x25f   :  { %v835_v14 = vadd.f32 %v834_v1, %v833_v3  ;;  %v775_v1 = vmul.f32 %v711_v49, %v711_v49  ;;  %v844_v20 = vsel %vm568_vm2, %v774_v53, 0.0  ;;  %v716_v49 = vsub.f32 %v3364_v44, %v3734_v7 }
 0x261   :  { %v837_v28 = vadd.f32 %v836_v24, %v835_v14  ;;  %v842_v24 = vsel %vm568_vm2, %v773_v11, 0.0  ;;  %v776_v14 = vmul.f32 %v712_v23, %v712_v23  ;;  %v846_v15 = vsel %vm568_vm2, %v775_v1, 0.0 }
 0x262   :  { %v717_v23 = vsub.f32 %v3370_v46, %v3734_v7 }
 0x263   :  { %v839_v39 = vadd.f32 %v838_v47, %v837_v28  ;;  %v777_v47 = vmul.f32 %v713_v21, %v713_v21  ;;  %v848_v11 = vsel %vm568_vm2, %v776_v14, 0.0  ;;  %v718_v21 = vsub.f32 %v3376_v48, %v3734_v7 }
 0x265   :  { %v841_v3 = vadd.f32 %v840_v29, %v839_v39  ;;  %v778_v29 = vmul.f32 %v714_v22, %v714_v22  ;;  %v850_v53 = vsel %vm568_vm2, %v777_v47, 0.0  ;;  %v719_v22 = vsub.f32 %v3382_v50, %v3734_v7 }
 0x267   :  { %v843_v9 = vadd.f32 %v842_v24, %v841_v3  ;;  %v779_v24 = vmul.f32 %v715_v26, %v715_v26  ;;  %v852_v1 = vsel %vm568_vm2, %v778_v29, 0.0  ;;  %v720_v26 = vsub.f32 %v3388_v52, %v3734_v7 }
 0x269   :  { %v845_v28 = vadd.f32 %v844_v20, %v843_v9  ;;  %v780_v20 = vmul.f32 %v716_v49, %v716_v49  ;;  %v854_v14 = vsel %vm568_vm2, %v779_v24, 0.0  ;;  %v721_v49 = vsub.f32 %v3394_v54, %v3734_v7 }
 0x26b   :  { %v847_v39 = vadd.f32 %v846_v15, %v845_v28  ;;  %v781_v15 = vmul.f32 %v717_v23, %v717_v23  ;;  %v856_v47 = vsel %vm568_vm2, %v780_v20, 0.0  ;;  %v722_v23 = vsub.f32 %v3400_v56, %v3734_v7 }
 0x26d   :  { %v849_v3 = vadd.f32 %v848_v11, %v847_v39  ;;  %v782_v11 = vmul.f32 %v718_v21, %v718_v21  ;;  %v858_v29 = vsel %vm568_vm2, %v781_v15, 0.0  ;;  %v723_v21 = vsub.f32 %v3406_v58, %v3734_v7 }
 0x26f   :  { %v851_v9 = vadd.f32 %v850_v53, %v849_v3  ;;  %v783_v53 = vmul.f32 %v719_v22, %v719_v22  ;;  %v860_v24 = vsel %vm568_vm2, %v782_v11, 0.0  ;;  %v724_v22 = vsub.f32 %v3412_v60, %v3734_v7 }
 0x271   :  { %v853_v28 = vadd.f32 %v852_v1, %v851_v9  ;;  %v784_v1 = vmul.f32 %v720_v26, %v720_v26  ;;  %v862_v20 = vsel %vm568_vm2, %v783_v53, 0.0  ;;  %v725_v26 = vsub.f32 %v3418_v62, %v3734_v7 }
 0x273   :  { %v855_v39 = vadd.f32 %v854_v14, %v853_v28  ;;  %v785_v14 = vmul.f32 %v721_v49, %v721_v49  ;;  %v864_v15 = vsel %vm568_vm2, %v784_v1, 0.0  ;;  %v726_v49 = vsub.f32 %v3424_v0, %v3734_v7 }
 0x275   :  { %v857_v3 = vadd.f32 %v856_v47, %v855_v39  ;;  %v786_v47 = vmul.f32 %v722_v23, %v722_v23  ;;  %v866_v11 = vsel %vm568_vm2, %v785_v14, 0.0  ;;  %v727_v23 = vsub.f32 %v3430_v2, %v3734_v7 }
 0x277   :  { %v859_v9 = vadd.f32 %v858_v29, %v857_v3  ;;  %v787_v29 = vmul.f32 %v723_v21, %v723_v21  ;;  %v868_v53 = vsel %vm568_vm2, %v786_v47, 0.0  ;;  %v728_v21 = vsub.f32 %v3436_v4, %v3734_v7 }
 0x279   :  { %v861_v28 = vadd.f32 %v860_v24, %v859_v9  ;;  %v788_v24 = vmul.f32 %v724_v22, %v724_v22  ;;  %v870_v1 = vsel %vm568_vm2, %v787_v29, 0.0  ;;  %v729_v22 = vsub.f32 %v3442_v6, %v3734_v7 }
 0x27b   :  { %v863_v39 = vadd.f32 %v862_v20, %v861_v28  ;;  %v789_v20 = vmul.f32 %v725_v26, %v725_v26  ;;  %v872_v14 = vsel %vm568_vm2, %v788_v24, 0.0  ;;  %v730_v26 = vsub.f32 %v3448_v8, %v3734_v7 }
 0x27d   :  { %v865_v3 = vadd.f32 %v864_v15, %v863_v39  ;;  %v790_v15 = vmul.f32 %v726_v49, %v726_v49  ;;  %v874_v47 = vsel %vm568_vm2, %v789_v20, 0.0  ;;  %v731_v49 = vsub.f32 %v3454_v10, %v3734_v7 }
 0x27f   :  { %v867_v9 = vadd.f32 %v866_v11, %v865_v3  ;;  %v791_v11 = vmul.f32 %v727_v23, %v727_v23  ;;  %v876_v29 = vsel %vm568_vm2, %v790_v15, 0.0  ;;  %v732_v23 = vsub.f32 %v3460_v12, %v3734_v7 }
 0x281   :  { %v869_v28 = vadd.f32 %v868_v53, %v867_v9  ;;  %v792_v53 = vmul.f32 %v728_v21, %v728_v21  ;;  %v878_v24 = vsel %vm568_vm2, %v791_v11, 0.0  ;;  %v733_v21 = vsub.f32 %v3474_v16, %v3734_v7 }
 0x283   :  { %v871_v39 = vadd.f32 %v870_v1, %v869_v28  ;;  %v793_v1 = vmul.f32 %v729_v22, %v729_v22  ;;  %v880_v20 = vsel %vm568_vm2, %v792_v53, 0.0  ;;  %v734_v22 = vsub.f32 %v3492_v25, %v3734_v7 }
 0x285   :  { %v873_v3 = vadd.f32 %v872_v14, %v871_v39  ;;  %v794_v14 = vmul.f32 %v730_v26, %v730_v26  ;;  %v882_v15 = vsel %vm568_vm2, %v793_v1, 0.0  ;;  %v735_v26 = vsub.f32 %v3510_v35, %v3734_v7 }
 0x287   :  { %v875_v9 = vadd.f32 %v874_v47, %v873_v3  ;;  %v795_v47 = vmul.f32 %v731_v49, %v731_v49  ;;  %v884_v11 = vsel %vm568_vm2, %v794_v14, 0.0  ;;  %v736_v49 = vsub.f32 %v3528_v45, %v3734_v7 }
 0x289   :  { %v877_v28 = vadd.f32 %v876_v29, %v875_v9  ;;  %v796_v29 = vmul.f32 %v732_v23, %v732_v23  ;;  %v886_v53 = vsel %vm568_vm2, %v795_v47, 0.0  ;;  %v737_v23 = vsub.f32 %v3538_v51, %v3734_v7 }
 0x28b   :  { %v879_v39 = vadd.f32 %v878_v24, %v877_v28  ;;  %v797_v24 = vmul.f32 %v733_v21, %v733_v21  ;;  %v888_v1 = vsel %vm568_vm2, %v796_v29, 0.0  ;;  %v738_v21 = vsub.f32 %v3544_v55, %v3734_v7 }
 0x28d   :  { %v881_v3 = vadd.f32 %v880_v20, %v879_v39  ;;  %v798_v20 = vmul.f32 %v734_v22, %v734_v22  ;;  %v890_v14 = vsel %vm568_vm2, %v797_v24, 0.0  ;;  %v739_v22 = vsub.f32 %v3550_v59, %v3734_v7 }
 0x28f   :  { %v883_v9 = vadd.f32 %v882_v15, %v881_v3  ;;  %v799_v15 = vmul.f32 %v735_v26, %v735_v26  ;;  %v892_v47 = vsel %vm568_vm2, %v798_v20, 0.0  ;;  %v740_v26 = vsub.f32 %v3552_v61, %v3734_v7 }
 0x291   :  { %v885_v28 = vadd.f32 %v884_v11, %v883_v9  ;;  %v800_v11 = vmul.f32 %v736_v49, %v736_v49  ;;  %v894_v29 = vsel %vm568_vm2, %v799_v15, 0.0  ;;  %v741_v49 = vsub.f32 %v3554_v63, %v3734_v7 }
 0x293   :  { %v887_v39 = vadd.f32 %v886_v53, %v885_v28  ;;  %v801_v53 = vmul.f32 %v737_v23, %v737_v23  ;;  %v896_v24 = vsel %vm568_vm2, %v800_v11, 0.0  ;;  %v742_v23 = vsub.f32 %v3564_v13, %v3734_v7 }
 0x295   :  { %v889_v3 = vadd.f32 %v888_v1, %v887_v39  ;;  %v802_v1 = vmul.f32 %v738_v21, %v738_v21  ;;  %v898_v20 = vsel %vm568_vm2, %v801_v53, 0.0  ;;  %v743_v21 = vsub.f32 %v3574_v31, %v3734_v7 }
 0x297   :  { %v891_v9 = vadd.f32 %v890_v14, %v889_v3  ;;  %v803_v14 = vmul.f32 %v739_v22, %v739_v22  ;;  %v900_v15 = vsel %vm568_vm2, %v802_v1, 0.0  ;;  %v744_v22 = vsub.f32 %v3584_v57, %v3734_v7 }
 0x299   :  { %v893_v28 = vadd.f32 %v892_v47, %v891_v9  ;;  %v804_v47 = vmul.f32 %v740_v26, %v740_v26  ;;  %v902_v11 = vsel %vm568_vm2, %v803_v14, 0.0  ;;  %v745_v26 = vsub.f32 %v3594_v17, %v3734_v7 }
 0x29a   :  { %v808_v31 = vmul.f32 %v744_v22, %v744_v22 }
 0x29b   :  { %v895_v39 = vadd.f32 %v894_v29, %v893_v28  ;;  %v805_v29 = vmul.f32 %v741_v49, %v741_v49  ;;  %v904_v53 = vsel %vm568_vm2, %v804_v47, 0.0  ;;  %v809_v57 = vmul.f32 %v745_v26, %v745_v26 }
 0x29d   :  { %v897_v3 = vadd.f32 %v896_v24, %v895_v39  ;;  %v806_v24 = vmul.f32 %v742_v23, %v742_v23  ;;  %v906_v1 = vsel %vm568_vm2, %v805_v29, 0.0  ;;  %v912_v29 = vsel %vm568_vm2, %v808_v31, 0.0 }
 0x29f   :  { %v899_v9 = vadd.f32 %v898_v20, %v897_v3  ;;  %v807_v20 = vmul.f32 %v743_v21, %v743_v21  ;;  %v908_v14 = vsel %vm568_vm2, %v806_v24, 0.0  ;;  %v748_v21 = vsub.f32 %v3624_v33, %v3734_v7 }
 0x2a0   :  { %v914_v24 = vsel %vm568_vm2, %v809_v57, 0.0 }
 0x2a1   :  { %v901_v28 = vadd.f32 %v900_v15, %v899_v9  ;;  %v5260_v15 = vld [vmem:[#allocation21_spill] sm:$0xff]  ;;  %v910_v47 = vsel %vm568_vm2, %v807_v20, 0.0 }
 0x2a2   :  { %v746_v49 = vsub.f32 %v5260_v15, %v3734_v7 }
 0x2a3   :  { %v903_v39 = vadd.f32 %v902_v11, %v901_v28  ;;  %v5261_v11 = vld [vmem:[#allocation22_spill] sm:$0xff] }
 0x2a4   :  { %v747_v23 = vsub.f32 %v5261_v11, %v3734_v7  ;;  %v812_v11 = vmul.f32 %v748_v21, %v748_v21  ;;  %v753_v21 = vsub.f32 %v3680_v27, %v3734_v7 }
 0x2a5   :  { %v905_v3 = vadd.f32 %v904_v53, %v903_v39  ;;  %v810_v53 = vmul.f32 %v746_v49, %v746_v49 }
 0x2a6   :  { %v811_v15 = vmul.f32 %v747_v23, %v747_v23  ;;  %v920_v57 = vsel %vm568_vm2, %v812_v11, 0.0 }
 0x2a7   :  { %v907_v9 = vadd.f32 %v906_v1, %v905_v3  ;;  %v5262_v1 = vld [vmem:[#allocation24_spill] sm:$0xff]  ;;  %v916_v20 = vsel %vm568_vm2, %v810_v53, 0.0 }
 0x2a8   :  { %v749_v22 = vsub.f32 %v5262_v1, %v3734_v7  ;;  %v918_v31 = vsel %vm568_vm2, %v811_v15, 0.0 }
 0x2a9   :  { %v909_v28 = vadd.f32 %v908_v14, %v907_v9  ;;  %v5263_v14 = vld [vmem:[#allocation25_spill] sm:$0xff] }
 0x2aa   :  { %v750_v26 = vsub.f32 %v5263_v14, %v3734_v7  ;;  %v813_v33 = vmul.f32 %v749_v22, %v749_v22  ;;  %v754_v22 = vsub.f32 %v3694_v19, %v3734_v7 }
 0x2ab   :  { %v911_v39 = vadd.f32 %v910_v47, %v909_v28  ;;  %v5264_v47 = vld [vmem:[#allocation27_spill] sm:$0xff] }
 0x2ac   :  { %v751_v49 = vsub.f32 %v5264_v47, %v3734_v7  ;;  %v814_v1 = vmul.f32 %v750_v26, %v750_v26  ;;  %v922_v53 = vsel %vm568_vm2, %v813_v33, 0.0  ;;  %v818_v27 = vmul.f32 %v754_v22, %v754_v22 }
 0x2ad   :  { %v913_v3 = vadd.f32 %v912_v29, %v911_v39  ;;  %v5265_v29 = vld [vmem:[#allocation29_spill] sm:$0xff]  ;;  %v759_v22 = vsub.f32 %v3664_v37, %v3734_v7 }
 0x2ae   :  { %v752_v23 = vsub.f32 %v5265_v29, %v3734_v7  ;;  %v924_v15 = vsel %vm568_vm2, %v814_v1, 0.0  ;;  %v817_v29 = vmul.f32 %v753_v21, %v753_v21 }
 0x2af   :  { %v915_v9 = vadd.f32 %v914_v24, %v913_v3  ;;  %v815_v24 = vmul.f32 %v751_v49, %v751_v49 }
 0x2b0   :  { %v930_v1 = vsel %vm568_vm2, %v817_v29, 0.0 }
 0x2b1   :  { %v917_v28 = vadd.f32 %v916_v20, %v915_v9  ;;  %v816_v20 = vmul.f32 %v752_v23, %v752_v23  ;;  %v926_v11 = vsel %vm568_vm2, %v815_v24, 0.0  ;;  %v932_v24 = vsel %vm568_vm2, %v818_v27, 0.0 }
 0x2b3   :  { %v919_v39 = vadd.f32 %v918_v31, %v917_v28  ;;  %v5266_v31 = vld [vmem:[#allocation26_spill] sm:$0xff]  ;;  %v928_v33 = vsel %vm568_vm2, %v816_v20, 0.0 }
 0x2b4   :  { %v755_v26 = vsub.f32 %v5266_v31, %v3734_v7 }
 0x2b5   :  { %v921_v3 = vadd.f32 %v920_v57, %v919_v39  ;;  %v5267_v57 = vld [vmem:[#allocation30_spill] sm:$0xff] }
 0x2b6   :  { %v756_v49 = vsub.f32 %v5267_v57, %v3734_v7  ;;  %v819_v19 = vmul.f32 %v755_v26, %v755_v26 }
 0x2b7   :  { %v923_v9 = vadd.f32 %v922_v53, %v921_v3  ;;  %v5268_v53 = vld [vmem:[#allocation33_spill] sm:$0xff] }
 0x2b8   :  { %v757_v23 = vsub.f32 %v5268_v53, %v3734_v7  ;;  %v820_v31 = vmul.f32 %v756_v49, %v756_v49  ;;  %v934_v20 = vsel %vm568_vm2, %v819_v19, 0.0 }
 0x2b9   :  { %v925_v28 = vadd.f32 %v924_v15, %v923_v9  ;;  %v5269_v15 = vld [vmem:[#allocation37_spill] sm:$0xff] }
 0x2ba   :  { %v758_v21 = vsub.f32 %v5269_v15, %v3734_v7  ;;  %v936_v29 = vsel %vm568_vm2, %v820_v31, 0.0  ;;  %v823_v15 = vmul.f32 %v759_v22, %v759_v22  ;;  %v764_v22 = vsub.f32 %v3710_v5, %v3734_v7 }
 0x2bb   :  { %v927_v39 = vadd.f32 %v926_v11, %v925_v28  ;;  %v821_v11 = vmul.f32 %v757_v23, %v757_v23 }
 0x2bc   :  { %v822_v53 = vmul.f32 %v758_v21, %v758_v21  ;;  %v942_v31 = vsel %vm568_vm2, %v823_v15, 0.0 }
 0x2bd   :  { %v929_v3 = vadd.f32 %v928_v33, %v927_v39  ;;  %v5270_v33 = vld [vmem:[#allocation32_spill] sm:$0xff]  ;;  %v938_v27 = vsel %vm568_vm2, %v821_v11, 0.0 }
 0x2be   :  { %v760_v26 = vsub.f32 %v5270_v33, %v3734_v7  ;;  %v940_v19 = vsel %vm568_vm2, %v822_v53, 0.0 }
 0x2bf   :  { %v931_v9 = vadd.f32 %v930_v1, %v929_v3  ;;  %v5271_v1 = vld [vmem:[#allocation36_spill] sm:$0xff] }
 0x2c0   :  { %v761_v49 = vsub.f32 %v5271_v1, %v3734_v7  ;;  %v824_v37 = vmul.f32 %v760_v26, %v760_v26  ;;  %v765_v26 = vsub.f32 %v3722_v43, %v3734_v7 }
 0x2c1   :  { %v933_v28 = vadd.f32 %v932_v24, %v931_v9  ;;  %v5272_v24 = vld [vmem:[#allocation39_spill] sm:$0xff] }
 0x2c2   :  { %v762_v23 = vsub.f32 %v5272_v24, %v3734_v7  ;;  %v825_v33 = vmul.f32 %v761_v49, %v761_v49  ;;  %v944_v11 = vsel %vm568_vm2, %v824_v37, 0.0  ;;  %v766_v49 = vsub.f32 %v3728_v41, %v3734_v7 }
 0x2c3   :  { %v935_v39 = vadd.f32 %v934_v20, %v933_v28  ;;  %v5273_v20 = vld [vmem:[#allocation34_spill] sm:$0xff] }
 0x2c4   :  { %v763_v21 = vsub.f32 %v5273_v20, %v3734_v7  ;;  %v946_v53 = vsel %vm568_vm2, %v825_v33, 0.0  ;;  %v830_v37 = vmul.f32 %v766_v49, %v766_v49 }
 0x2c5   :  { %v937_v3 = vadd.f32 %v936_v29, %v935_v39  ;;  %v826_v29 = vmul.f32 %v762_v23, %v762_v23 }
 0x2c6   :  { %v956_v33 = vsel %vm568_vm2, %v830_v37, 0.0  ;;  %v978_v37 = vld [vmem:[#allocation7] sm:$0x1] }
 0x2c7   :  { %v939_v9 = vadd.f32 %v938_v27, %v937_v3  ;;  %v827_v27 = vmul.f32 %v763_v21, %v763_v21  ;;  %v948_v15 = vsel %vm568_vm2, %v826_v29, 0.0 }
 0x2c9   :  { %v941_v28 = vadd.f32 %v940_v19, %v939_v9  ;;  %v828_v19 = vmul.f32 %v764_v22, %v764_v22  ;;  %v950_v23 = vsel %vm568_vm2, %v827_v27, 0.0 }
 0x2cb   :  { %v943_v39 = vadd.f32 %v942_v31, %v941_v28  ;;  %v829_v31 = vmul.f32 %v765_v26, %v765_v26 }
 0x2cd   :  { %v945_v3 = vadd.f32 %v944_v11, %v943_v39  ;;  %v952_v39 = vsel %vm568_vm2, %v828_v19, 0.0  ;;  %v954_v21 = vsel %vm568_vm2, %v829_v31, 0.0 }
 0x2cf   :  { %v947_v9 = vadd.f32 %v946_v53, %v945_v3 }
 0x2d1   :  { %v949_v28 = vadd.f32 %v948_v15, %v947_v9 }
 0x2d3   :  { %v951_v5 = vadd.f32 %v950_v23, %v949_v28 }
 0x2d5   :  { %v953_v11 = vadd.f32 %v952_v39, %v951_v5  ;;  %v1312_v5 = vld [vmem:[%s5174_s4 + $0x8] sm:$0xff] }
 0x2d6   :  { %1506 = vmatpush.msrb.mxu2 %v1312_v5 }
 0x2d7   :  { %v955_v43 = vadd.f32 %v954_v21, %v953_v11 }
 0x2d9   :  { %v957_v3 = vadd.f32 %v956_v33, %v955_v43  ;;  %v965_v43 = vld [vmem:[#allocation5] sm:$0x1] }
 0x2db   :  { %v958_v53 = vrot.slane %v957_v3, 4 }
 0x2dd   :  { %v959_v20 = vadd.f32 %v958_v53, %v957_v3 }
 0x2df   :  { %v960_v22 = vrot.slane %v959_v20, 2 }
 0x2e1   :  { %v961_v24 = vadd.f32 %v960_v22, %v959_v20 }
 0x2e3   :  { %v962_v29 = vrot.slane %v961_v24, 1 }
 0x2e5   :  { %v963_v9 = vadd.f32 %v962_v29, %v961_v24 }
 0x2e7   :  { %v964_v26 = vmul.f32 0.001953125, %v963_v9 }
 0x2e9   :  { %v966_v15 = vadd.f32 1e-05, %v964_v26 }
 0x2eb   :  { %3029 = vrsqrt.f32 %v966_v15  ;;  %vm973_vm4 = vweird.f32 %v966_v15 }
 0x2f1   :  { %v3030_v27 = vpop.eup %3029 }
 0x2f2   :  { %v968_v49 = vmul.f32 %v3030_v27, %v966_v15  ;;  %vm974_vm3 = vweird.f32 %v3030_v27 }
 0x2f3   :  { %vm975_vm5 = vmor %vm973_vm4, %vm974_vm3 }
 0x2f4   :  { %v969_v28 = vmul.f32 %v3030_v27, %v968_v49 }
 0x2f6   :  { %v970_v19 = vmul.f32 0.5, %v969_v28 }
 0x2f8   :  { %v971_v31 = vsub.f32 1.5, %v970_v19  ;;  %v5276_v19 = vld [vmem:[#allocation14_spill] sm:$0xff] }
 0x2fa   :  { %v972_v23 = vmul.f32 %v3030_v27, %v971_v31 }
 0x2fc   :  { %v976_v20 = vsel %vm975_vm5, %v3030_v27, %v972_v23 }
 0x2fd   :  { %v977_v24 = vmul.f32 %v976_v20, %v965_v43  ;;  %v5277_v43 = vld [vmem:[#allocation15_spill] sm:$0xff]  ;;  %v5278_v20 = vld [vmem:[#allocation16_spill] sm:$0xff] }
 0x2ff   :  { %v979_v39 = vmul.f32 %v977_v24, %v3734_v7  ;;  %v3932_v11 = vperm.slane %v977_v24, 0  ;;  %v1574_v7 = vld [vmem:[%s5174_s4 + $0x28] sm:$0xff] }
 0x300   :  { %1637 = vmatpush.msrb.mxu3 %v1574_v7 }
 0x301   :  { %v980_v21 = vsub.f32 %v978_v37, %v979_v39  ;;  %v999_v33 = vmul.f32 %v3932_v11, %v3376_v48  ;;  %v1015_v3 = vmul.f32 %v3932_v11, %v3492_v25  ;;  %v1031_v53 = vmul.f32 %v3932_v11, %v5263_v14  ;;  %v5279_v37 = vld [vmem:[#allocation17_spill] sm:$0xff] }
 0x302   :  { %v1047_v22 = vmul.f32 %v3932_v11, %v3728_v41  ;;  %v3953_v41 = vmul.f32 %v3932_v11, %v3286_v18  ;;  %v985_v31 = vmul.f32 %v3932_v11, %v5276_v19  ;;  %v986_v23 = vmul.f32 %v3932_v11, %v5277_v43  ;;  %v5287_v19 = vld [vmem:[#allocation29_spill] sm:$0xff] }
 0x303   :  { %v3942_v29 = vperm.slane %v980_v21, 0  ;;  %v987_v24 = vmul.f32 %v3932_v11, %v5278_v20  ;;  %v988_v39 = vmul.f32 %v3932_v11, %v5279_v37  ;;  %v5280_v21 = vld [vmem:[#allocation18_spill] sm:$0xff]  ;;  %v990_v18 = vmul.f32 %v3932_v11, %v3322_v30  ;;  %v5288_v20 = vld [vmem:[#allocation31_spill] sm:$0xff] }
 0x304   :  { %5275 = vst [vmem:[#allocation27_spill] sm:$0xff] %v3953_v41  ;;  %v993_v7 = vmul.f32 %v3932_v11, %v3340_v36  ;;  %v997_v30 = vmul.f32 %v3932_v11, %v3364_v44  ;;  %v1001_v36 = vmul.f32 %v3932_v11, %v3388_v52  ;;  %v1005_v44 = vmul.f32 %v3932_v11, %v3412_v60  ;;  %v5289_v37 = vld [vmem:[#allocation35_spill] sm:$0xff] }
 0x305   :  { %5274 = vst [vmem:[#allocation25_spill] sm:$0xff] %v3942_v29  ;;  %v1066_v9 = vadd.f32 %v3942_v29, %v999_v33  ;;  %v1082_v48 = vadd.f32 %v3942_v29, %v1015_v3  ;;  %v1098_v26 = vadd.f32 %v3942_v29, %v1031_v53  ;;  %v1114_v25 = vadd.f32 %v3942_v29, %v1047_v22  ;;  %v5294_v29 = vld [vmem:[#allocation32_spill] sm:$0xff]  ;;  %v5295_v41 = vld [vmem:[#allocation39_spill] sm:$0xff] }
 0x306   :  { %v989_v33 = vmul.f32 %v3932_v11, %v5280_v21  ;;  %v991_v53 = vmul.f32 %v3932_v11, %v3328_v32  ;;  %v992_v22 = vmul.f32 %v3932_v11, %v3334_v34  ;;  %v998_v32 = vmul.f32 %v3932_v11, %v3370_v46 }
 0x307   :  { %v1130_v15 = vmax.f32 %v1066_v9, 0.0  ;;  %v1146_v14 = vmax.f32 %v1082_v48, 0.0  ;;  %v1162_v27 = vmax.f32 %v1098_v26, 0.0  ;;  %v1178_v49 = vmax.f32 %v1114_v25, 0.0  ;;  %v5281_v25 = vld [vmem:[#allocation19_spill] sm:$0xff] }
 0x308   :  { %v994_v9 = vmul.f32 %v3932_v11, %v3346_v38  ;;  %v995_v48 = vmul.f32 %v3932_v11, %v3352_v40  ;;  %v996_v26 = vmul.f32 %v3932_v11, %v3358_v42  ;;  %v1000_v34 = vmul.f32 %v3932_v11, %v3382_v50 }
 0x309   :  { %v1194_v28 = vmax.f32 %v1130_v15, %v1146_v14  ;;  %v1210_v5 = vmax.f32 %v1162_v27, %v1178_v49  ;;  %v1002_v38 = vmul.f32 %v3932_v11, %v3394_v54  ;;  %v1003_v40 = vmul.f32 %v3932_v11, %v3400_v56  ;;  %v5282_v15 = vld [vmem:[#allocation20_spill] sm:$0xff]  ;;  %v5283_v14 = vld [vmem:[#allocation21_spill] sm:$0xff]  ;;  %v5284_v27 = vld [vmem:[#allocation22_spill] sm:$0xff] }
 0x30a   :  { %v1004_v42 = vmul.f32 %v3932_v11, %v3406_v58  ;;  %v1006_v46 = vmul.f32 %v3932_v11, %v3418_v62  ;;  %v1007_v50 = vmul.f32 %v3932_v11, %v3424_v0  ;;  %v1008_v52 = vmul.f32 %v3932_v11, %v3430_v2  ;;  %v5285_v49 = vld [vmem:[#allocation23_spill] sm:$0xff] }
 0x30b   :  { %v1226_v3 = vmax.f32 %v1194_v28, %v1210_v5  ;;  %v1009_v54 = vmul.f32 %v3932_v11, %v3436_v4  ;;  %v1010_v56 = vmul.f32 %v3932_v11, %v3442_v6  ;;  %v1011_v58 = vmul.f32 %v3932_v11, %v3448_v8  ;;  %v5286_v28 = vld [vmem:[#allocation24_spill] sm:$0xff] }
 0x30c   :  { %v1012_v60 = vmul.f32 %v3932_v11, %v3454_v10  ;;  %v1013_v62 = vmul.f32 %v3932_v11, %v3460_v12  ;;  %v1014_v0 = vmul.f32 %v3932_v11, %v3474_v16  ;;  %v1016_v2 = vmul.f32 %v3932_v11, %v3510_v35 }
 0x30d   :  { %1294 = vst.msk [vmem:[#allocation2 + $0x121] sm:$0xff] %vm568_vm2, %v1226_v3  ;;  %v1017_v4 = vmul.f32 %v3932_v11, %v3528_v45  ;;  %v1018_v6 = vmul.f32 %v3932_v11, %v3538_v51  ;;  %v1019_v8 = vmul.f32 %v3932_v11, %v3544_v55  ;;  %v1020_v10 = vmul.f32 %v3932_v11, %v3550_v59  ;;  %v5290_v3 = vld [vmem:[#allocation26_spill] sm:$0xff] }
 0x30e   :  { %v1021_v12 = vmul.f32 %v3932_v11, %v3552_v61  ;;  %v1022_v16 = vmul.f32 %v3932_v11, %v3554_v63  ;;  %v1023_v35 = vmul.f32 %v3932_v11, %v3564_v13  ;;  %v1024_v45 = vmul.f32 %v3932_v11, %v5281_v25 }
 0x30f   :  { %v1025_v51 = vmul.f32 %v3932_v11, %v5282_v15  ;;  %v1026_v55 = vmul.f32 %v3932_v11, %v3594_v17  ;;  %v1027_v59 = vmul.f32 %v3932_v11, %v5283_v14  ;;  %v1028_v61 = vmul.f32 %v3932_v11, %v5284_v27  ;;  %v5291_v14 = vld [vmem:[#allocation33_spill] sm:$0xff] }
 0x310   :  { %v1029_v63 = vmul.f32 %v3932_v11, %v5285_v49  ;;  %v1030_v13 = vmul.f32 %v3932_v11, %v5286_v28  ;;  %v1032_v5 = vmul.f32 %v3932_v11, %v5264_v47  ;;  %v1033_v43 = vmul.f32 %v3932_v11, %v5287_v19  ;;  %v5292_v49 = vld [vmem:[#allocation37_spill] sm:$0xff]  ;;  %v5293_v28 = vld [vmem:[#allocation28_spill] sm:$0xff] }
 0x311   :  { %v1034_v17 = vmul.f32 %v3932_v11, %v5288_v20  ;;  %v1035_v21 = vmul.f32 %v3932_v11, %v5289_v37  ;;  %v1036_v25 = vmul.f32 %v3932_v11, %v5290_v3  ;;  %v1037_v15 = vmul.f32 %v3932_v11, %v5267_v57  ;;  %v5296_v57 = vld [vmem:[#allocation34_spill] sm:$0xff] }
 0x312   :  { %v1038_v27 = vmul.f32 %v3932_v11, %v5291_v14  ;;  %v1039_v47 = vmul.f32 %v3932_v11, %v5292_v49  ;;  %v1040_v19 = vmul.f32 %v3932_v11, %v5293_v28  ;;  %v1041_v20 = vmul.f32 %v3932_v11, %v5294_v29  ;;  %v5298_v49 = vld [vmem:[#allocation38_spill] sm:$0xff]  ;;  %v5300_v29 = vld [vmem:[#allocation40_spill] sm:$0xff] }
 0x313   :  { %v1042_v37 = vmul.f32 %v3932_v11, %v5271_v1  ;;  %v1043_v3 = vmul.f32 %v3932_v11, %v5295_v41  ;;  %v4070_v14 = vmul.f32 %v3932_v11, %v5296_v57  ;;  %v4074_v28 = vmul.f32 %v3932_v11, %v5298_v49  ;;  %v5302_v41 = vld [vmem:[#allocation27_spill] sm:$0xff]  ;;  %v5303_v57 = vld [vmem:[#allocation25_spill] sm:$0xff] }
 0x314   :  { %v4078_v1 = vmul.f32 %v3932_v11, %v5300_v29  ;;  %v4085_v49 = vadd.f32 %v5303_v57, %v985_v31  ;;  %v4091_v11 = vadd.f32 %v5303_v57, %v987_v24  ;;  %v4094_v29 = vadd.f32 %v5303_v57, %v988_v39 }
 0x315   :  { %5297 = vst [vmem:[#allocation30_spill] sm:$0xff] %v4070_v14  ;;  %v4082_v14 = vadd.f32 %v5303_v57, %v5302_v41  ;;  %v4100_v41 = vadd.f32 %v5303_v57, %v990_v18  ;;  %v4106_v31 = vadd.f32 %v5303_v57, %v992_v22  ;;  %v4112_v24 = vadd.f32 %v5303_v57, %v994_v9 }
 0x316   :  { %5299 = vst [vmem:[#allocation36_spill] sm:$0xff] %v4074_v28  ;;  %v4088_v28 = vadd.f32 %v5303_v57, %v986_v23  ;;  %v4109_v23 = vadd.f32 %v5303_v57, %v993_v7  ;;  %v4115_v39 = vadd.f32 %v5303_v57, %v995_v48  ;;  %v4121_v18 = vadd.f32 %v5303_v57, %v997_v30 }
 0x317   :  { %5301 = vst [vmem:[#allocation14_spill] sm:$0xff] %v4078_v1  ;;  %v4097_v1 = vadd.f32 %v5303_v57, %v989_v33  ;;  %v4118_v33 = vadd.f32 %v5303_v57, %v996_v26  ;;  %v4127_v22 = vadd.f32 %v5303_v57, %v1000_v34  ;;  %v4130_v7 = vadd.f32 %v5303_v57, %v1001_v36 }
 0x318   :  { %5304 = vst [vmem:[#allocation15_spill] sm:$0xff] %v4082_v14  ;;  %v4103_v14 = vadd.f32 %v5303_v57, %v991_v53  ;;  %v4124_v53 = vadd.f32 %v5303_v57, %v998_v32  ;;  %v4133_v9 = vadd.f32 %v5303_v57, %v1002_v38  ;;  %v4136_v48 = vadd.f32 %v5303_v57, %v1003_v40 }
 0x319   :  { %5305 = vst [vmem:[#allocation16_spill] sm:$0xff] %v4112_v24  ;;  %v4139_v26 = vadd.f32 %v5303_v57, %v1004_v42  ;;  %v4142_v30 = vadd.f32 %v5303_v57, %v1005_v44  ;;  %v4145_v32 = vadd.f32 %v5303_v57, %v1006_v46  ;;  %v4148_v34 = vadd.f32 %v5303_v57, %v1007_v50 }
 0x31a   :  { %5306 = vst [vmem:[#allocation17_spill] sm:$0xff] %v4115_v39  ;;  %v4151_v36 = vadd.f32 %v5303_v57, %v1008_v52  ;;  %v4154_v38 = vadd.f32 %v5303_v57, %v1009_v54  ;;  %v4157_v40 = vadd.f32 %v5303_v57, %v1010_v56  ;;  %v4160_v42 = vadd.f32 %v5303_v57, %v1011_v58 }
 0x31b   :  { %5307 = vst [vmem:[#allocation18_spill] sm:$0xff] %v4118_v33  ;;  %v4163_v44 = vadd.f32 %v5303_v57, %v1012_v60  ;;  %v4166_v46 = vadd.f32 %v5303_v57, %v1013_v62  ;;  %v4169_v50 = vadd.f32 %v5303_v57, %v1014_v0  ;;  %v4172_v52 = vadd.f32 %v5303_v57, %v1016_v2 }
 0x31c   :  { %5308 = vst [vmem:[#allocation19_spill] sm:$0xff] %v4121_v18  ;;  %v4175_v54 = vadd.f32 %v5303_v57, %v1017_v4  ;;  %v4178_v56 = vadd.f32 %v5303_v57, %v1018_v6  ;;  %v4181_v58 = vadd.f32 %v5303_v57, %v1019_v8  ;;  %v4184_v60 = vadd.f32 %v5303_v57, %v1020_v10 }
 0x31d   :  { %5309 = vst [vmem:[#allocation20_spill] sm:$0xff] %v4124_v53  ;;  %v4187_v62 = vadd.f32 %v5303_v57, %v1021_v12  ;;  %v4190_v0 = vadd.f32 %v5303_v57, %v1022_v16  ;;  %v4193_v2 = vadd.f32 %v5303_v57, %v1023_v35  ;;  %v4196_v4 = vadd.f32 %v5303_v57, %v1024_v45 }
 0x31e   :  { %5310 = vst [vmem:[#allocation21_spill] sm:$0xff] %v4160_v42  ;;  %v4199_v6 = vadd.f32 %v5303_v57, %v1025_v51  ;;  %v4202_v8 = vadd.f32 %v5303_v57, %v1026_v55  ;;  %v4205_v10 = vadd.f32 %v5303_v57, %v1027_v59  ;;  %v4208_v12 = vadd.f32 %v5303_v57, %v1028_v61 }
 0x31f   :  { %5311 = vst [vmem:[#allocation22_spill] sm:$0xff] %v4163_v44  ;;  %v4211_v16 = vadd.f32 %v5303_v57, %v1029_v63  ;;  %v4214_v35 = vadd.f32 %v5303_v57, %v1030_v13  ;;  %v4217_v45 = vadd.f32 %v5303_v57, %v1032_v5  ;;  %v4220_v51 = vadd.f32 %v5303_v57, %v1033_v43 }
 0x320   :  { %5312 = vst [vmem:[#allocation23_spill] sm:$0xff] %v4166_v46  ;;  %v4223_v55 = vadd.f32 %v5303_v57, %v1034_v17  ;;  %v4226_v59 = vadd.f32 %v5303_v57, %v1035_v21  ;;  %v4229_v61 = vadd.f32 %v5303_v57, %v1036_v25  ;;  %v4232_v63 = vadd.f32 %v5303_v57, %v1037_v15  ;;  %v1330_v17 = vld [vmem:[%s5174_s4 + $0x18] sm:$0xff]  ;;  %v1311_v21 = vld [vmem:[%s5174_s4] sm:$0xff] }
 0x321   :  { %5313 = vst [vmem:[#allocation24_spill] sm:$0xff] %v4169_v50  ;;  %v4235_v13 = vadd.f32 %v5303_v57, %v1038_v27  ;;  %v4238_v5 = vadd.f32 %v5303_v57, %v1039_v47  ;;  %v4241_v43 = vadd.f32 %v5303_v57, %v1040_v19  ;;  %v4250_v25 = vadd.f32 %v5303_v57, %v1041_v20  ;;  %v5318_v47 = vld [vmem:[#allocation30_spill] sm:$0xff] }
 0x322   :  { %v4253_v15 = vadd.f32 %v5303_v57, %v1042_v37  ;;  %v4256_v27 = vadd.f32 %v5303_v57, %v1043_v3  ;;  %1393 = vmatpush.msrb.mxu1 %v1330_v17  ;;  %1507 = vmatpush.msrb.mxu2 %v1311_v21  ;;  %v4260_v19 = vadd.f32 %v5303_v57, %v5318_v47  ;;  %v1573_v3 = vld [vmem:[%s5174_s4 + $0x20] sm:$0xff]  ;;  %v1329_v17 = vld [vmem:[%s5174_s4 + $0x10] sm:$0xff]  ;;  %v1116_v21 = vmax.f32 %v4085_v49, 0.0 }
 0x323   :  { %5314 = vst [vmem:[#allocation29_spill] sm:$0xff] %v4235_v13  ;;  %v5322_v13 = vld [vmem:[#allocation14_spill] sm:$0xff]  ;;  %v1117_v47 = vmax.f32 %v4088_v28, 0.0  ;;  %1638 = vmatpush.msrb.mxu3 %v1573_v3  ;;  %v1136_v49 = vmax.f32 %v4142_v30, 0.0  ;;  %v1137_v28 = vmax.f32 %v4145_v32, 0.0  ;;  %v1140_v3 = vmax.f32 %v4154_v38, 0.0 }
 0x324   :  { %5315 = vst [vmem:[#allocation31_spill] sm:$0xff] %v4238_v5  ;;  %v4268_v20 = vadd.f32 %v5303_v57, %v5322_v13  ;;  %1394 = vmatpush.msrb.mxu1 %v1329_v17  ;;  %v1132_v17 = vmax.f32 %v4130_v7, 0.0  ;;  %v1147_v30 = vmax.f32 %v4172_v52, 0.0  ;;  %v1148_v32 = vmax.f32 %v4175_v54, 0.0 }
 0x325   :  { %5316 = vst [vmem:[#allocation35_spill] sm:$0xff] %v4241_v43  ;;  %v5320_v43 = vld [vmem:[#allocation36_spill] sm:$0xff]  ;;  %v1151_v38 = vmax.f32 %v4184_v60, 0.0  ;;  %v1153_v7 = vmax.f32 %v4190_v0, 0.0  ;;  %v1157_v52 = vmax.f32 %v4202_v8, 0.0  ;;  %v1163_v54 = vmax.f32 %v4217_v45, 0.0 }
 0x326   :  { %5317 = vst [vmem:[#allocation26_spill] sm:$0xff] %v4250_v25  ;;  %v4264_v5 = vadd.f32 %v5303_v57, %v5320_v43  ;;  %v5324_v25 = vld [vmem:[#allocation15_spill] sm:$0xff]  ;;  %v1118_v43 = vmax.f32 %v4091_v11, 0.0  ;;  %v1120_v57 = vmax.f32 %v4097_v1, 0.0  ;;  %v1131_v1 = vmax.f32 %v4127_v22, 0.0 }
 0x327   :  { %5319 = vst [vmem:[#allocation33_spill] sm:$0xff] %v4260_v19  ;;  %v1115_v37 = vmax.f32 %v5324_v25, 0.0  ;;  %v1133_v25 = vmax.f32 %v4133_v9, 0.0  ;;  %v1135_v19 = vmax.f32 %v4139_v26, 0.0  ;;  %v1138_v11 = vmax.f32 %v4148_v34, 0.0 }
 0x328   :  { %5321 = vst [vmem:[#allocation37_spill] sm:$0xff] %v4264_v5  ;;  %v1119_v5 = vmax.f32 %v4094_v29, 0.0  ;;  %v1139_v29 = vmax.f32 %v4151_v36, 0.0  ;;  %v1149_v34 = vmax.f32 %v4178_v56, 0.0  ;;  %v1150_v36 = vmax.f32 %v4181_v58, 0.0 }
 0x329   :  { %5323 = vst [vmem:[#allocation28_spill] sm:$0xff] %v4268_v20  ;;  %v1134_v20 = vmax.f32 %v4136_v48, 0.0  ;;  %v1152_v22 = vmax.f32 %v4187_v62, 0.0  ;;  %v1154_v9 = vmax.f32 %v4193_v2, 0.0  ;;  %v1155_v48 = vmax.f32 %v4196_v4, 0.0 }
 0x32a   :  { %v1156_v26 = vmax.f32 %v4199_v6, 0.0  ;;  %v1164_v56 = vmax.f32 %v4220_v51, 0.0  ;;  %v1165_v58 = vmax.f32 %v4223_v55, 0.0  ;;  %v1166_v60 = vmax.f32 %v4226_v59, 0.0  ;;  %v5325_v13 = vld [vmem:[#allocation29_spill] sm:$0xff] }
 0x32b   :  { %v1158_v62 = vmax.f32 %v4205_v10, 0.0  ;;  %v1159_v0 = vmax.f32 %v4208_v12, 0.0  ;;  %v1160_v2 = vmax.f32 %v4211_v16, 0.0  ;;  %v1167_v4 = vmax.f32 %v4229_v61, 0.0  ;;  %v5326_v53 = vld [vmem:[#allocation31_spill] sm:$0xff] }
 0x32c   :  { %v1161_v6 = vmax.f32 %v4214_v35, 0.0  ;;  %v1168_v8 = vmax.f32 %v4232_v63, 0.0  ;;  %v1169_v45 = vmax.f32 %v5325_v13, 0.0  ;;  %v1170_v51 = vmax.f32 %v5326_v53, 0.0  ;;  %v5327_v44 = vld [vmem:[#allocation35_spill] sm:$0xff] }
 0x32d   :  { %v1179_v50 = vmax.f32 %v1115_v37, %v1131_v1  ;;  %v1180_v55 = vmax.f32 %v1116_v21, %v1132_v17  ;;  %v1181_v18 = vmax.f32 %v1117_v47, %v1133_v25  ;;  %v1182_v59 = vmax.f32 %v1118_v43, %v1134_v20  ;;  %v5328_v39 = vld [vmem:[#allocation26_spill] sm:$0xff] }
 0x32e   :  { %v1195_v46 = vmax.f32 %v1147_v30, %v1163_v54  ;;  %v1196_v10 = vmax.f32 %v1148_v32, %v1164_v56  ;;  %v1197_v33 = vmax.f32 %v1149_v34, %v1165_v58  ;;  %v1198_v12 = vmax.f32 %v1150_v36, %v1166_v60  ;;  %v5341_v32 = vld [vmem:[#allocation17_spill] sm:$0xff]  ;;  %v5343_v34 = vld [vmem:[#allocation22_spill] sm:$0xff] }
 0x32f   :  { %v1171_v16 = vmax.f32 %v5327_v44, 0.0  ;;  %v1172_v61 = vmax.f32 %v5328_v39, 0.0  ;;  %v1183_v42 = vmax.f32 %v1119_v5, %v1135_v19  ;;  %v1199_v35 = vmax.f32 %v1151_v38, %v1167_v4  ;;  %v5331_v5 = vld [vmem:[#allocation33_spill] sm:$0xff]  ;;  %v5345_v38 = vld [vmem:[#allocation18_spill] sm:$0xff]  ;;  %v5349_v4 = vld [vmem:[#allocation19_spill] sm:$0xff] }
 0x330   :  { %v1173_v63 = vmax.f32 %v4253_v15, 0.0  ;;  %v1174_v13 = vmax.f32 %v4256_v27, 0.0  ;;  %v1184_v24 = vmax.f32 %v1120_v57, %v1136_v49  ;;  %v1200_v53 = vmax.f32 %v1152_v22, %v1168_v8  ;;  %v5337_v22 = vld [vmem:[#allocation16_spill] sm:$0xff] }
 0x331   :  { %v5329_v37 = vmax.f32 %v4100_v41, 0.0  ;;  %v5330_v20 = vmax.f32 %v4103_v14, 0.0  ;;  %v1201_v43 = vmax.f32 %v1153_v7, %v1169_v45  ;;  %v1211_v25 = vmax.f32 %v1179_v50, %v1195_v46  ;;  %v5333_v41 = vld [vmem:[#allocation37_spill] sm:$0xff] }
 0x332   :  { %v1202_v1 = vmax.f32 %v1154_v9, %v1170_v51  ;;  %v1212_v44 = vmax.f32 %v1180_v55, %v1196_v10  ;;  %v1213_v17 = vmax.f32 %v1181_v18, %v1197_v33  ;;  %v1214_v39 = vmax.f32 %v1182_v59, %v1198_v12  ;;  %v5335_v33 = vld [vmem:[#allocation28_spill] sm:$0xff]  ;;  %v5339_v9 = vld [vmem:[#allocation21_spill] sm:$0xff] }
 0x333   :  { %v1185_v21 = vmax.f32 %v5329_v37, %v1137_v28  ;;  %v1186_v47 = vmax.f32 %v5330_v20, %v1138_v11  ;;  %v1175_v19 = vmax.f32 %v5331_v5, 0.0  ;;  %v5332_v15 = vmax.f32 %v4106_v31, 0.0  ;;  %1279 = vst.msk [vmem:[#allocation2 + $0x11] sm:$0xff] %vm568_vm2, %v1211_v25  ;;  %v5353_v10 = vld [vmem:[#allocation20_spill] sm:$0xff]  ;;  %v1721_v20 = vld [vmem:[%s5174_s4 + $0x38] sm:$0xff] }
 0x334   :  { %v1203_v27 = vmax.f32 %v1155_v48, %v1171_v16  ;;  %v1215_v57 = vmax.f32 %v1183_v42, %v1199_v35  ;;  %v1176_v49 = vmax.f32 %v5333_v41, 0.0  ;;  %v5334_v14 = vmax.f32 %v4109_v23, 0.0  ;;  %1280 = vst.msk [vmem:[#allocation2 + $0x21] sm:$0xff] %vm568_vm2, %v1212_v44  ;;  %v1868_v37 = vld [vmem:[%s5174_s4 + $0x48] sm:$0xff]  ;;  %1784 = vmatpush.msra.mxu1 %v1721_v20 }
 0x335   :  { %v1187_v30 = vmax.f32 %v5332_v15, %v1139_v29  ;;  %v1204_v11 = vmax.f32 %v1156_v26, %v1172_v61  ;;  %v1216_v46 = vmax.f32 %v1184_v24, %v1200_v53  ;;  %v1177_v18 = vmax.f32 %v5335_v33, 0.0  ;;  %1281 = vst.msk [vmem:[#allocation2 + $0x31] sm:$0xff] %vm568_vm2, %v1213_v17  ;;  %1931 = vmatpush.msra.mxu2 %v1868_v37  ;;  %v1867_v33 = vld [vmem:[%s5174_s4 + $0x40] sm:$0xff] }
 0x336   :  { %v1188_v28 = vmax.f32 %v5334_v14, %v1140_v3  ;;  %v5336_v50 = vmax.f32 %v4157_v40, 0.0  ;;  %v5338_v31 = vmax.f32 %v5337_v22, 0.0  ;;  %v1205_v7 = vmax.f32 %v1157_v52, %v1173_v63  ;;  %1282 = vst.msk [vmem:[#allocation2 + $0x41] sm:$0xff] %vm568_vm2, %v1214_v39  ;;  %v5347_v52 = vld [vmem:[#allocation23_spill] sm:$0xff] }
 0x337   :  { %v1217_v42 = vmax.f32 %v1185_v21, %v1201_v43  ;;  %v5340_v48 = vmax.f32 %v5339_v9, 0.0  ;;  %v5342_v23 = vmax.f32 %v5341_v32, 0.0  ;;  %v1206_v26 = vmax.f32 %v1158_v62, %v1174_v13  ;;  %1283 = vst.msk [vmem:[#allocation2 + $0x51] sm:$0xff] %vm568_vm2, %v1215_v57  ;;  %v5351_v62 = vld [vmem:[#allocation24_spill] sm:$0xff]  ;;  %v2015_v21 = vld [vmem:[%s5174_s4 + $0x58] sm:$0xff]  ;;  %1932 = vmatpush.msra.mxu2 %v1867_v33 }
 0x338   :  { %v1189_v29 = vmax.f32 %v5338_v31, %v5336_v50  ;;  %v1218_v24 = vmax.f32 %v1186_v47, %v1202_v1  ;;  %v5344_v36 = vmax.f32 %v5343_v34, 0.0  ;;  %v5346_v40 = vmax.f32 %v5345_v38, 0.0  ;;  %1284 = vst.msk [vmem:[#allocation2 + $0x61] sm:$0xff] %vm568_vm2, %v1216_v46  ;;  %2078 = vmatpush.msra.mxu3 %v2015_v21  ;;  %v1720_v50 = vld [vmem:[%s5174_s4 + $0x30] sm:$0xff] }
 0x339   :  { %v1190_v3 = vmax.f32 %v5342_v23, %v5340_v48  ;;  %v1207_v56 = vmax.f32 %v1159_v0, %v1175_v19  ;;  %v1219_v58 = vmax.f32 %v1187_v30, %v1203_v27  ;;  %v5348_v60 = vmax.f32 %v5347_v52, 0.0  ;;  %1285 = vst.msk [vmem:[#allocation2 + $0x71] sm:$0xff] %vm568_vm2, %v1217_v42  ;;  %1785 = vmatpush.msra.mxu1 %v1720_v50 }
 0x33a   :  { %v1191_v54 = vmax.f32 %v5346_v40, %v5344_v36  ;;  %v5350_v8 = vmax.f32 %v5349_v4, 0.0  ;;  %v1208_v51 = vmax.f32 %v1160_v2, %v1176_v49  ;;  %v1220_v55 = vmax.f32 %v1188_v28, %v1204_v11  ;;  %1286 = vst.msk [vmem:[#allocation2 + $0x81] sm:$0xff] %vm568_vm2, %v1218_v24  ;;  %v4498_v17 = vld [vmem:[#allocation2 + $0x11] sm:$0xff] }
 0x33b   :  { %v5352_v59 = vmax.f32 %v5351_v62, 0.0  ;;  %v5354_v12 = vmax.f32 %v5353_v10, 0.0  ;;  %v1209_v61 = vmax.f32 %v1161_v6, %v1177_v18  ;;  %v1221_v35 = vmax.f32 %v1189_v29, %v1205_v7  ;;  %1287 = vst.msk [vmem:[#allocation2 + $0xb1] sm:$0xff] %vm568_vm2, %v1219_v58  ;;  %v4511_v15 = vld [vmem:[#allocation2 + $0x21] sm:$0xff]  ;;  %v2014_v18 = vld [vmem:[%s5174_s4 + $0x50] sm:$0xff] }
 0x33c   :  { %v1192_v45 = vmax.f32 %v5350_v8, %v5348_v60  ;;  %v1222_v0 = vmax.f32 %v1190_v3, %v1206_v26  ;;  %v1223_v63 = vmax.f32 %v1191_v54, %v1207_v56  ;;  %1288 = vst.msk [vmem:[#allocation2 + $0xc1] sm:$0xff] %vm568_vm2, %v1220_v55  ;;  %v3166_v6 = vmov 0.0   ;;  %v4523_v57 = vld [vmem:[#allocation2 + $0x31] sm:$0xff]  ;;  %2079 = vmatpush.msra.mxu3 %v2014_v18  ;;  %v2457_v55 = vld [vmem:[%s5174_s4 + $0x88] sm:$0xff] }
 0x33d   :  { %v1193_v16 = vmax.f32 %v5354_v12, %v5352_v59  ;;  %1289 = vst.msk [vmem:[#allocation2 + $0xd1] sm:$0xff] %vm568_vm2, %v1221_v35  ;;  %v4535_v14 = vld [vmem:[#allocation2 + $0x41] sm:$0xff] }
 0x33e   :  { %v1224_v13 = vmax.f32 %v1192_v45, %v1208_v51  ;;  %1290 = vst.msk [vmem:[#allocation2 + $0xe1] sm:$0xff] %vm568_vm2, %v1222_v0  ;;  %v4542_v46 = vld [vmem:[#allocation2 + $0x51] sm:$0xff]  ;;  %v2163_v62 = vld [vmem:[%s5174_s4 + $0x68] sm:$0xff] }
 0x33f   :  { %v1225_v2 = vmax.f32 %v1193_v16, %v1209_v61  ;;  %1291 = vst.msk [vmem:[#allocation2 + $0xf1] sm:$0xff] %vm568_vm2, %v1223_v63  ;;  %v4565_v29 = vld [vmem:[#allocation2 + $0x61] sm:$0xff]  ;;  %v2310_v45 = vld [vmem:[%s5174_s4 + $0x78] sm:$0xff] }
 0x340   :  { %1292 = vst.msk [vmem:[#allocation2 + $0x101] sm:$0xff] %vm568_vm2, %v1224_v13  ;;  %v4577_v9 = vld [vmem:[#allocation2 + $0x71] sm:$0xff] }
 0x341   :  { %1293 = vst.msk [vmem:[#allocation2 + $0x111] sm:$0xff] %vm568_vm2, %v1225_v2  ;;  %v4704_v18 = vld [vmem:[#allocation2 + $0x81] sm:$0xff] }
 0x342   :  { %1227 = vst.msk [vmem:[#allocation2] sm:$0xff] %vm568_vm2, %v3166_v6  ;;  %v4595_v24 = vld [vmem:[#allocation2 + $0xb1] sm:$0xff] }
 0x343   :  { %1238 = vst.msk [vmem:[#allocation2] sm:$0x1] %vm1237_vm6, %v3166_v6  ;;  %v4607_v38 = vld [vmem:[#allocation2 + $0xc1] sm:$0xff] }
 0x344   :  { %1230 = vst.msk [vmem:[#allocation2 + $0xa0] sm:$0xff] %vm568_vm2, %v3166_v6  ;;  %v4619_v56 = vld [vmem:[#allocation2 + $0xd1] sm:$0xff] }
 0x345   :  { %1233 = vst.msk [vmem:[#allocation2 + $0x90] sm:$0xff] %vm568_vm2, %v3166_v6  ;;  %v4631_v60 = vld [vmem:[#allocation2 + $0xe1] sm:$0xff] }
 0x346   :  { %1235 = vst.msk [vmem:[#allocation2 + $0x130] sm:$0xff] %vm568_vm2, %v3166_v6  ;;  %v4641_v8 = vld [vmem:[#allocation2 + $0xf1] sm:$0xff] }
 0x347   :  { %1239 = vst.msk [vmem:[#allocation2 + $0x10] sm:$0x1] %vm1237_vm6, %v3166_v6  ;;  %v4660_v10 = vld [vmem:[#allocation2 + $0x101] sm:$0xff] }
 0x348   :  { %1240 = vst.msk [vmem:[#allocation2 + $0x20] sm:$0x1] %vm1237_vm6, %v3166_v6  ;;  %v4670_v61 = vld [vmem:[#allocation2 + $0x111] sm:$0xff] }
 0x349   :  { %1241 = vst.msk [vmem:[#allocation2 + $0x30] sm:$0x1] %vm1237_vm6, %v3166_v6 }
 0x34a   :  { %v1295_v53 = vld [vmem:[#allocation2] sm:$0xff]  ;;  %1242 = vst.msk [vmem:[#allocation2 + $0x40] sm:$0x1] %vm1237_vm6, %v3166_v6 }
 0x34b   :  { %2887 = vmatmul.msk.f32.vlgmr.msrb.gmra.mxu2 %vm568_vm2, %v1295_v53  ;;  %1243 = vst.msk [vmem:[#allocation2 + $0x50] sm:$0x1] %vm1237_vm6, %v3166_v6 }
 0x34c   :  { %1244 = vst.msk [vmem:[#allocation2 + $0x60] sm:$0x1] %vm1237_vm6, %v3166_v6  ;;  %2373 = vmatpush.msrb.mxu2 %v2310_v45 }
 0x34d   :  { %1245 = vst.msk [vmem:[#allocation2 + $0x70] sm:$0x1] %vm1237_vm6, %v3166_v6 }
 0x34e   :  { %1246 = vst.msk [vmem:[#allocation2 + $0x80] sm:$0x1] %vm1237_vm6, %v3166_v6  ;;  %v4433_v47 = vld [vmem:[#allocation2 + $0x10] sm:$0xff] }
 0x34f   :  { %1249 = vst.msk [vmem:[#allocation2 + $0xb0] sm:$0x1] %vm1237_vm6, %v3166_v6  ;;  %v4453_v43 = vld [vmem:[#allocation2 + $0x20] sm:$0xff] }
 0x350   :  { %1250 = vst.msk [vmem:[#allocation2 + $0xc0] sm:$0x1] %vm1237_vm6, %v3166_v6  ;;  %v4472_v25 = vld [vmem:[#allocation2 + $0x30] sm:$0xff] }
 0x351   :  { %1251 = vst.msk [vmem:[#allocation2 + $0xd0] sm:$0x1] %vm1237_vm6, %v3166_v6  ;;  %v4490_v44 = vld [vmem:[#allocation2 + $0x40] sm:$0xff] }
 0x352   :  { %1252 = vst.msk [vmem:[#allocation2 + $0xe0] sm:$0x1] %vm1237_vm6, %v3166_v6  ;;  %v4503_v5 = vld [vmem:[#allocation2 + $0x50] sm:$0xff] }
 0x353   :  { %1253 = vst.msk [vmem:[#allocation2 + $0xf0] sm:$0x1] %vm1237_vm6, %v3166_v6  ;;  %2888 = vmatmul.msk.f32.gmra.mxu2 %vm568_vm2, %v4433_v47  ;;  %v4515_v30 = vld [vmem:[#allocation2 + $0x60] sm:$0xff] }
 0x354   :  { %1254 = vst.msk [vmem:[#allocation2 + $0x100] sm:$0x1] %vm1237_vm6, %v3166_v6  ;;  %v4527_v41 = vld [vmem:[#allocation2 + $0x70] sm:$0xff] }
 0x355   :  { %1255 = vst.msk [vmem:[#allocation2 + $0x110] sm:$0x1] %vm1237_vm6, %v3166_v6 }
 0x356   :  { %1256 = vst.msk [vmem:[#allocation2 + $0x120] sm:$0x1] %vm1237_vm6, %v3166_v6  ;;  %v4557_v22 = vld [vmem:[#allocation2 + $0xb0] sm:$0xff] }
 0x357   :  { %1259 = vst.msk [vmem:[#allocation2 + $0x19] sm:$0x1] %vm1237_vm6, %v3166_v6  ;;  %v4569_v7 = vld [vmem:[#allocation2 + $0xc0] sm:$0xff] }
 0x358   :  { %1260 = vst.msk [vmem:[#allocation2 + $0x29] sm:$0x1] %vm1237_vm6, %v3166_v6  ;;  %v4581_v48 = vld [vmem:[#allocation2 + $0xd0] sm:$0xff] }
 0x359   :  { %1261 = vst.msk [vmem:[#allocation2 + $0x39] sm:$0x1] %vm1237_vm6, %v3166_v6  ;;  %v4590_v3 = vld [vmem:[#allocation2 + $0xe0] sm:$0xff] }
 0x35a   :  { %1262 = vst.msk [vmem:[#allocation2 + $0x49] sm:$0x1] %vm1237_vm6, %v3166_v6  ;;  %v4599_v34 = vld [vmem:[#allocation2 + $0xf0] sm:$0xff] }
 0x35b   :  { %1263 = vst.msk [vmem:[#allocation2 + $0x59] sm:$0x1] %vm1237_vm6, %v3166_v6  ;;  %2889 = vmatmul.msk.f32.gmra.mxu2 %vm568_vm2, %v4453_v43  ;;  %v4611_v40 = vld [vmem:[#allocation2 + $0x100] sm:$0xff] }
 0x35c   :  { %1264 = vst.msk [vmem:[#allocation2 + $0x69] sm:$0x1] %vm1237_vm6, %v3166_v6  ;;  %v4623_v58 = vld [vmem:[#allocation2 + $0x110] sm:$0xff] }
 0x35d   :  { %1265 = vst.msk [vmem:[#allocation2 + $0x79] sm:$0x1] %vm1237_vm6, %v3166_v6 }
 0x35e   :  { %1266 = vst.msk [vmem:[#allocation2 + $0x89] sm:$0x1] %vm1237_vm6, %v3166_v6  ;;  %v4507_v19 = vld [vmem:[#allocation2 + $0x12] sm:$0xff] }
 0x35f   :  { %1269 = vst.msk [vmem:[#allocation2 + $0xb9] sm:$0x1] %vm1237_vm6, %v3166_v6  ;;  %v4519_v27 = vld [vmem:[#allocation2 + $0x22] sm:$0xff] }
 0x360   :  { %1270 = vst.msk [vmem:[#allocation2 + $0xc9] sm:$0x1] %vm1237_vm6, %v3166_v6  ;;  %v4531_v49 = vld [vmem:[#allocation2 + $0x32] sm:$0xff] }
 0x361   :  { %1271 = vst.msk [vmem:[#allocation2 + $0xd9] sm:$0x1] %vm1237_vm6, %v3166_v6  ;;  %v4540_v11 = vld [vmem:[#allocation2 + $0x42] sm:$0xff] }
 0x362   :  { %1272 = vst.msk [vmem:[#allocation2 + $0xe9] sm:$0x1] %vm1237_vm6, %v3166_v6  ;;  %v4561_v31 = vld [vmem:[#allocation2 + $0x52] sm:$0xff] }
 0x363   :  { %1273 = vst.msk [vmem:[#allocation2 + $0xf9] sm:$0x1] %vm1237_vm6, %v3166_v6  ;;  %2890 = vmatmul.msk.f32.gmra.mxu2 %vm568_vm2, %v4472_v25  ;;  %v4573_v42 = vld [vmem:[#allocation2 + $0x62] sm:$0xff] }
 0x364   :  { %1274 = vst.msk [vmem:[#allocation2 + $0x109] sm:$0x1] %vm1237_vm6, %v3166_v6  ;;  %v4585_v23 = vld [vmem:[#allocation2 + $0x72] sm:$0xff] }
 0x365   :  { %1275 = vst.msk [vmem:[#allocation2 + $0x119] sm:$0x1] %vm1237_vm6, %v3166_v6 }
 0x366   :  { %1276 = vst.msk [vmem:[#allocation2 + $0x129] sm:$0x1] %vm1237_vm6, %v3166_v6  ;;  %v4603_v36 = vld [vmem:[#allocation2 + $0xb2] sm:$0xff] }
 0x367   :  { %1229 = vst.msk [vmem:[#allocation2 + $0x8] sm:$0x3] %vm1228_vm7, %v3166_v6  ;;  %v4615_v54 = vld [vmem:[#allocation2 + $0xc2] sm:$0xff] }
 0x368   :  { %1231 = vst.msk [vmem:[#allocation2 + $0xa8] sm:$0x3] %vm1228_vm7, %v3166_v6  ;;  %v4627_v52 = vld [vmem:[#allocation2 + $0xd2] sm:$0xff] }
 0x369   :  { %1234 = vst.msk [vmem:[#allocation2 + $0x98] sm:$0x3] %vm1228_vm7, %v3166_v6  ;;  %v4637_v4 = vld [vmem:[#allocation2 + $0xe2] sm:$0xff] }
 0x36a   :  { %1236 = vst.msk [vmem:[#allocation2 + $0x138] sm:$0x3] %vm1228_vm7, %v3166_v6  ;;  %v4656_v59 = vld [vmem:[#allocation2 + $0xf2] sm:$0xff] }
 0x36b   :  { %1247 = vst.msk [vmem:[#allocation2 + $0x90] sm:$0x1] %vm1237_vm6, %v3166_v6  ;;  %2891 = vmatmul.msk.f32.gmra.mxu2 %vm568_vm2, %v4490_v44  ;;  %v4666_v16 = vld [vmem:[#allocation2 + $0x102] sm:$0xff] }
 0x36c   :  { %1248 = vst.msk [vmem:[#allocation2 + $0xa0] sm:$0x1] %vm1237_vm6, %v3166_v6  ;;  %v4676_v63 = vld [vmem:[#allocation2 + $0x112] sm:$0xff] }
 0x36d   :  { %1257 = vst.msk [vmem:[#allocation2 + $0x130] sm:$0x1] %vm1237_vm6, %v3166_v6 }
 0x36e   :  { %v1313_v1 = vld [vmem:[#allocation2 + $0x1] sm:$0xff]  ;;  %1258 = vst.msk [vmem:[#allocation2 + $0x9] sm:$0x1] %vm1237_vm6, %v3166_v6 }
 0x36f   :  { %2871 = vmatmul.msk.f32.vlgmr.msrb.gmra.mxu1 %vm568_vm2, %v1313_v1  ;;  %1267 = vst.msk [vmem:[#allocation2 + $0x99] sm:$0x1] %vm1237_vm6, %v3166_v6  ;;  %v1321_v32 = vld [vmem:[#allocation2 + $0xa1] sm:$0xff] }
 0x370   :  { %1268 = vst.msk [vmem:[#allocation2 + $0xa9] sm:$0x1] %vm1237_vm6, %v3166_v6  ;;  %2226 = vmatpush.msrb.mxu1 %v2163_v62 }
 0x371   :  { %1277 = vst.msk [vmem:[#allocation2 + $0x139] sm:$0x1] %vm1237_vm6, %v3166_v6 }
 0x372   :  { %5355 = vst [vmem:[#allocation32_spill] sm:$0xff] %v4599_v34 }
 0x373   :  { %2892 = vmatmul.msk.f32.gmra.mxu2 %vm568_vm2, %v4503_v5  ;;  %v1303_v28 = vld [vmem:[#allocation2 + $0xa0] sm:$0xff]  ;;  %5356 = vst [vmem:[#allocation39_spill] sm:$0xff] %v4676_v63 }
 0x375   :  { %v1557_v39 = vld [vmem:[#allocation2 + $0x2] sm:$0xff] }
 0x376   :  { %2903 = vmatmul.msk.f32.vlgmr.msrb.gmra.mxu3 %vm568_vm2, %v1557_v39 }
 0x377   :  { %2872 = vmatmul.msk.f32.gmra.mxu1 %vm568_vm2, %v4498_v17  ;;  %v1565_v26 = vld [vmem:[#allocation2 + $0xa2] sm:$0xff]  ;;  %2520 = vmatpush.msrb.mxu3 %v2457_v55 }
 0x37b   :  { %2893 = vmatmul.msk.f32.gmra.mxu2 %vm568_vm2, %v4515_v30 }
 0x37e   :  { %2904 = vmatmul.msk.f32.gmra.mxu3 %vm568_vm2, %v4507_v19 }
 0x37f   :  { %2873 = vmatmul.msk.f32.gmra.mxu1 %vm568_vm2, %v4511_v15 }
 0x383   :  { %2894 = vmatmul.msk.f32.gmra.mxu2 %vm568_vm2, %v4527_v41 }
 0x386   :  { %2905 = vmatmul.msk.f32.gmra.mxu3 %vm568_vm2, %v4519_v27 }
 0x387   :  { %2874 = vmatmul.msk.f32.gmra.mxu1 %vm568_vm2, %v4523_v57 }
 0x38b   :  { %2895 = vmatmul.msk.f32.gmra.mxu2 %vm568_vm2, %v1303_v28 }
 0x38e   :  { %2906 = vmatmul.msk.f32.gmra.mxu3 %vm568_vm2, %v4531_v49 }
 0x38f   :  { %2875 = vmatmul.msk.f32.gmra.mxu1 %vm568_vm2, %v4535_v14 }
 0x393   :  { %2896 = vmatmul.msk.f32.gmra.mxu2 %vm568_vm2, %v4557_v22 }
 0x396   :  { %2907 = vmatmul.msk.f32.gmra.mxu3 %vm568_vm2, %v4540_v11 }
 0x397   :  { %2876 = vmatmul.msk.f32.gmra.mxu1 %vm568_vm2, %v4542_v46 }
 0x39b   :  { %2897 = vmatmul.msk.f32.gmra.mxu2 %vm568_vm2, %v4569_v7 }
 0x39e   :  { %2908 = vmatmul.msk.f32.gmra.mxu3 %vm568_vm2, %v4561_v31 }
 0x39f   :  { %2877 = vmatmul.msk.f32.gmra.mxu1 %vm568_vm2, %v4565_v29 }
 0x3a3   :  { %2898 = vmatmul.msk.f32.gmra.mxu2 %vm568_vm2, %v4581_v48 }
 0x3a6   :  { %2909 = vmatmul.msk.f32.gmra.mxu3 %vm568_vm2, %v4573_v42 }
 0x3a7   :  { %2878 = vmatmul.msk.f32.gmra.mxu1 %vm568_vm2, %v4577_v9 }
 0x3ab   :  { %2899 = vmatmul.msk.f32.gmra.mxu2 %vm568_vm2, %v4590_v3 }
 0x3ae   :  { %2910 = vmatmul.msk.f32.gmra.mxu3 %vm568_vm2, %v4585_v23 }
 0x3af   :  { %2879 = vmatmul.msk.f32.gmra.mxu1 %vm568_vm2, %v1321_v32 }
 0x3b3   :  { %2900 = vmatmul.msk.f32.gmra.mxu2 %vm568_vm2, %v4599_v34 }
 0x3b6   :  { %2911 = vmatmul.msk.f32.gmra.mxu3 %vm568_vm2, %v1565_v26 }
 0x3b7   :  { %2880 = vmatmul.msk.f32.gmra.mxu1 %vm568_vm2, %v4595_v24 }
 0x3bb   :  { %2901 = vmatmul.msk.f32.gmra.mxu2 %vm568_vm2, %v4611_v40 }
 0x3be   :  { %2912 = vmatmul.msk.f32.gmra.mxu3 %vm568_vm2, %v4603_v36 }
 0x3bf   :  { %2881 = vmatmul.msk.f32.gmra.mxu1 %vm568_vm2, %v4607_v38 }
 0x3c3   :  { %2902 = vmatmul.msk.f32.gmra.mxu2 %vm568_vm2, %v4623_v58 }
 0x3c6   :  { %2913 = vmatmul.msk.f32.gmra.mxu3 %vm568_vm2, %v4615_v54 }
 0x3c7   :  { %2882 = vmatmul.msk.f32.gmra.mxu1 %vm568_vm2, %v4619_v56 }
 0x3cb   :  { %2935 = vmatmul.msk.f32.vlgmr.msra.gmra.mxu2 %vm568_vm2, %v4498_v17 }
 0x3ce   :  { %2914 = vmatmul.msk.f32.gmra.mxu3 %vm568_vm2, %v4627_v52  ;;  %v1509_v51 = vpop.f32.mrf.mxu2 }
 0x3cf   :  { %2883 = vmatmul.msk.f32.gmra.mxu1 %vm568_vm2, %v4631_v60 }
 0x3d3   :  { %2936 = vmatmul.msk.f32.gmra.mxu2 %vm568_vm2, %v4511_v15 }
 0x3d6   :  { %2915 = vmatmul.msk.f32.gmra.mxu3 %vm568_vm2, %v4637_v4  ;;  %v1512_v12 = vpop.f32.mrf.mxu2 }
 0x3d7   :  { %2884 = vmatmul.msk.f32.gmra.mxu1 %vm568_vm2, %v4641_v8 }
 0x3db   :  { %2937 = vmatmul.msk.f32.gmra.mxu2 %vm568_vm2, %v4523_v57 }
 0x3de   :  { %2916 = vmatmul.msk.f32.gmra.mxu3 %vm568_vm2, %v4656_v59  ;;  %v1515_v35 = vpop.f32.mrf.mxu2 }
 0x3df   :  { %2885 = vmatmul.msk.f32.gmra.mxu1 %vm568_vm2, %v4660_v10 }
 0x3e3   :  { %2938 = vmatmul.msk.f32.gmra.mxu2 %vm568_vm2, %v4535_v14 }
 0x3e6   :  { %2917 = vmatmul.msk.f32.gmra.mxu3 %vm568_vm2, %v4666_v16  ;;  %v1518_v13 = vpop.f32.mrf.mxu2 }
 0x3e7   :  { %2886 = vmatmul.msk.f32.gmra.mxu1 %vm568_vm2, %v4670_v61 }
 0x3eb   :  { %2939 = vmatmul.msk.f32.gmra.mxu2 %vm568_vm2, %v4542_v46 }
 0x3ec   :  { %v1396_v0 = vpop.f32.mrf.mxu1 }
 0x3ed   :  { %v1510_v6 = vadd.f32 %v1509_v51, %v1396_v0  ;;  %v2309_v0 = vld [vmem:[%s5174_s4 + $0x70] sm:$0xff] }
 0x3ee   :  { %2918 = vmatmul.msk.f32.gmra.mxu3 %vm568_vm2, %v4676_v63  ;;  %v1521_v53 = vpop.f32.mrf.mxu2  ;;  %2374 = vmatpush.msrb.mxu2 %v2309_v0 }
 0x3ef   :  { %2919 = vmatmul.msk.f32.vlgmr.msra.gmra.mxu1 %vm568_vm2, %v4433_v47 }
 0x3f3   :  { %2940 = vmatmul.msk.f32.gmra.mxu2 %vm568_vm2, %v4565_v29 }
 0x3f4   :  { %v1399_v2 = vpop.f32.mrf.mxu1 }
 0x3f5   :  { %v1513_v47 = vadd.f32 %v1512_v12, %v1399_v2 }
 0x3f6   :  { %2951 = vmatmul.msk.f32.vlgmr.msra.gmra.mxu3 %vm568_vm2, %v4507_v19  ;;  %v1524_v1 = vpop.f32.mrf.mxu2 }
 0x3f7   :  { %2920 = vmatmul.msk.f32.gmra.mxu1 %vm568_vm2, %v4453_v43 }
 0x3f9   :  { %v1640_v37 = vpop.f32.mrf.mxu3 }
 0x3fa   :  { %v4690_v21 = vadd.f32 %v1640_v37, %v1510_v6 }
 0x3fb   :  { %2941 = vmatmul.msk.f32.gmra.mxu2 %vm568_vm2, %v4577_v9 }
 0x3fc   :  { %v1402_v20 = vpop.f32.mrf.mxu1 }
 0x3fd   :  { %v1516_v28 = vadd.f32 %v1515_v35, %v1402_v20 }
 0x3fe   :  { %2952 = vmatmul.msk.f32.gmra.mxu3 %vm568_vm2, %v4519_v27  ;;  %v1527_v33 = vpop.f32.mrf.mxu2 }
 0x3ff   :  { %2921 = vmatmul.msk.f32.gmra.mxu1 %vm568_vm2, %v4472_v25 }
 0x401   :  { %v1643_v17 = vpop.f32.mrf.mxu3 }
 0x402   :  { %v4698_v39 = vadd.f32 %v1643_v17, %v1513_v47 }
 0x403   :  { %2942 = vmatmul.msk.f32.gmra.mxu2 %vm568_vm2, %v4704_v18 }
 0x404   :  { %v1405_v19 = vpop.f32.mrf.mxu1 }
 0x405   :  { %v1519_v45 = vadd.f32 %v1518_v13, %v1405_v19  ;;  %v2456_v13 = vld [vmem:[%s5174_s4 + $0x80] sm:$0xff] }
 0x406   :  { %2953 = vmatmul.msk.f32.gmra.mxu3 %vm568_vm2, %v4531_v49  ;;  %v1530_v51 = vpop.f32.mrf.mxu2 }
 0x407   :  { %2922 = vmatmul.msk.f32.gmra.mxu1 %vm568_vm2, %v4490_v44  ;;  %2521 = vmatpush.msrb.mxu3 %v2456_v13 }
 0x409   :  { %v1646_v50 = vpop.f32.mrf.mxu3 }
 0x40a   :  { %v4708_v32 = vadd.f32 %v1646_v50, %v1516_v28 }
 0x40b   :  { %2943 = vmatmul.msk.f32.gmra.mxu2 %vm568_vm2, %v4595_v24 }
 0x40c   :  { %v1408_v26 = vpop.f32.mrf.mxu1 }
 0x40d   :  { %v1522_v35 = vadd.f32 %v1521_v53, %v1408_v26  ;;  %v2162_v53 = vld [vmem:[%s5174_s4 + $0x60] sm:$0xff] }
 0x40e   :  { %2954 = vmatmul.msk.f32.gmra.mxu3 %vm568_vm2, %v4540_v11  ;;  %v1533_v2 = vpop.f32.mrf.mxu2  ;;  %2227 = vmatpush.msrb.mxu1 %v2162_v53  ;;  %v4745_v26 = vld [vmem:[#allocation2 + $0x80] sm:$0xff] }
 0x40f   :  { %2923 = vmatmul.msk.f32.gmra.mxu1 %vm568_vm2, %v4503_v5 }
 0x411   :  { %v1649_v55 = vpop.f32.mrf.mxu3 }
 0x412   :  { %v4716_v62 = vadd.f32 %v1649_v55, %v1519_v45 }
 0x413   :  { %2944 = vmatmul.msk.f32.gmra.mxu2 %vm568_vm2, %v4607_v38 }
 0x414   :  { %v1411_v12 = vpop.f32.mrf.mxu1 }
 0x415   :  { %v1525_v20 = vadd.f32 %v1524_v1, %v1411_v12 }
 0x416   :  { %2955 = vmatmul.msk.f32.gmra.mxu3 %vm568_vm2, %v4561_v31  ;;  %v1536_v47 = vpop.f32.mrf.mxu2 }
 0x417   :  { %2924 = vmatmul.msk.f32.gmra.mxu1 %vm568_vm2, %v4515_v30 }
 0x419   :  { %v1652_v24 = vpop.f32.mrf.mxu3 }
 0x41a   :  { %v4730_v6 = vadd.f32 %v1652_v24, %v1522_v35  ;;  %v4753_v35 = vld [vmem:[#allocation2 + $0x82] sm:$0xff] }
 0x41b   :  { %2945 = vmatmul.msk.f32.gmra.mxu2 %vm568_vm2, %v4619_v56 }
 0x41c   :  { %v1414_v37 = vpop.f32.mrf.mxu1 }
 0x41d   :  { %v1528_v50 = vadd.f32 %v1527_v33, %v1414_v37 }
 0x41e   :  { %2956 = vmatmul.msk.f32.gmra.mxu3 %vm568_vm2, %v4573_v42  ;;  %v1539_v45 = vpop.f32.mrf.mxu2 }
 0x41f   :  { %2925 = vmatmul.msk.f32.gmra.mxu1 %vm568_vm2, %v4527_v41 }
 0x421   :  { %v1655_v17 = vpop.f32.mrf.mxu3 }
 0x422   :  { %v4741_v19 = vadd.f32 %v1655_v17, %v1525_v20 }
 0x423   :  { %2946 = vmatmul.msk.f32.gmra.mxu2 %vm568_vm2, %v4631_v60 }
 0x424   :  { %v1417_v28 = vpop.f32.mrf.mxu1 }
 0x425   :  { %v1531_v0 = vadd.f32 %v1530_v51, %v1417_v28 }
 0x426   :  { %2957 = vmatmul.msk.f32.gmra.mxu3 %vm568_vm2, %v4585_v23  ;;  %v1542_v33 = vpop.f32.mrf.mxu2 }
 0x427   :  { %2926 = vmatmul.msk.f32.gmra.mxu1 %vm568_vm2, %v4745_v26 }
 0x429   :  { %v1658_v1 = vpop.f32.mrf.mxu3 }
 0x42a   :  { %v4751_v55 = vadd.f32 %v1658_v1, %v1528_v50 }
 0x42b   :  { %2947 = vmatmul.msk.f32.gmra.mxu2 %vm568_vm2, %v4641_v8 }
 0x42c   :  { %v1420_v12 = vpop.f32.mrf.mxu1 }
 0x42d   :  { %v1534_v37 = vadd.f32 %v1533_v2, %v1420_v12 }
 0x42e   :  { %2958 = vmatmul.msk.f32.gmra.mxu3 %vm568_vm2, %v4753_v35  ;;  %v1545_v20 = vpop.f32.mrf.mxu2 }
 0x42f   :  { %2927 = vmatmul.msk.f32.gmra.mxu1 %vm568_vm2, %v4557_v22 }
 0x431   :  { %v1661_v13 = vpop.f32.mrf.mxu3 }
 0x432   :  { %v4761_v24 = vadd.f32 %v1661_v13, %v1531_v0 }
 0x433   :  { %2948 = vmatmul.msk.f32.gmra.mxu2 %vm568_vm2, %v4660_v10 }
 0x434   :  { %v1423_v53 = vpop.f32.mrf.mxu1 }
 0x435   :  { %v1537_v28 = vadd.f32 %v1536_v47, %v1423_v53  ;;  %v4783_v47 = vld [vmem:[#allocation2 + $0x121] sm:$0xff] }
 0x436   :  { %2959 = vmatmul.msk.f32.gmra.mxu3 %vm568_vm2, %v4603_v36  ;;  %v1548_v50 = vpop.f32.mrf.mxu2 }
 0x437   :  { %2928 = vmatmul.msk.f32.gmra.mxu1 %vm568_vm2, %v4569_v7 }
 0x439   :  { %v1664_v51 = vpop.f32.mrf.mxu3 }
 0x43a   :  { %v4769_v22 = vadd.f32 %v1664_v51, %v1534_v37 }
 0x43b   :  { %2949 = vmatmul.msk.f32.gmra.mxu2 %vm568_vm2, %v4670_v61 }
 0x43c   :  { %v1426_v17 = vpop.f32.mrf.mxu1 }
 0x43d   :  { %v1540_v12 = vadd.f32 %v1539_v45, %v1426_v17 }
 0x43e   :  { %2960 = vmatmul.msk.f32.gmra.mxu3 %vm568_vm2, %v4615_v54  ;;  %v1551_v0 = vpop.f32.mrf.mxu2 }
 0x43f   :  { %2929 = vmatmul.msk.f32.gmra.mxu1 %vm568_vm2, %v4581_v48 }
 0x441   :  { %v1667_v36 = vpop.f32.mrf.mxu3 }
 0x442   :  { %v4777_v2 = vadd.f32 %v1667_v36, %v1537_v28 }
 0x443   :  { %2950 = vmatmul.msk.f32.gmra.mxu2 %vm568_vm2, %v4783_v47 }
 0x444   :  { %v1429_v1 = vpop.f32.mrf.mxu1 }
 0x445   :  { %v1543_v51 = vadd.f32 %v1542_v33, %v1429_v1 }
 0x446   :  { %2961 = vmatmul.msk.f32.gmra.mxu3 %vm568_vm2, %v4627_v52  ;;  %v1554_v28 = vpop.f32.mrf.mxu2 }
 0x447   :  { %2930 = vmatmul.msk.f32.gmra.mxu1 %vm568_vm2, %v4590_v3 }
 0x449   :  { %v1670_v13 = vpop.f32.mrf.mxu3 }
 0x44a   :  { %v4787_v53 = vadd.f32 %v1670_v13, %v1540_v12 }
 0x44b   :  { %2983 = vmatmul.msk.f32.vlgmr.msrb.gmra.mxu2 %vm568_vm2, %v4511_v15 }
 0x44c   :  { %v1432_v37 = vpop.f32.mrf.mxu1 }
 0x44d   :  { %v1546_v12 = vadd.f32 %v1545_v20, %v1432_v37 }
 0x44e   :  { %2962 = vmatmul.msk.f32.gmra.mxu3 %vm568_vm2, %v4637_v4  ;;  %v1934_v13 = vpop.f32.mrf.mxu2 }
 0x44f   :  { %2931 = vmatmul.msk.f32.gmra.mxu1 %vm568_vm2, %v4599_v34 }
 0x451   :  { %v1673_v45 = vpop.f32.mrf.mxu3 }
 0x452   :  { %v4795_v17 = vadd.f32 %v1673_v45, %v1543_v51 }
 0x453   :  { %2984 = vmatmul.msk.f32.gmra.mxu2 %vm568_vm2, %v4523_v57 }
 0x454   :  { %v1435_v36 = vpop.f32.mrf.mxu1 }
 0x455   :  { %v1549_v15 = vadd.f32 %v1548_v50, %v1435_v36 }
 0x456   :  { %2963 = vmatmul.msk.f32.gmra.mxu3 %vm568_vm2, %v4656_v59  ;;  %v1937_v51 = vpop.f32.mrf.mxu2 }
 0x457   :  { %2932 = vmatmul.msk.f32.gmra.mxu1 %vm568_vm2, %v4611_v40 }
 0x459   :  { %v1676_v33 = vpop.f32.mrf.mxu3 }
 0x45a   :  { %v4803_v1 = vadd.f32 %v1676_v33, %v1546_v12  ;;  %v4815_v12 = vld [vmem:[#allocation2 + $0x120] sm:$0xff] }
 0x45b   :  { %2985 = vmatmul.msk.f32.gmra.mxu2 %vm568_vm2, %v4535_v14  ;;  %5357 = vst [vmem:[#allocation34_spill] sm:$0xff] %v4815_v12 }
 0x45c   :  { %v1438_v34 = vpop.f32.mrf.mxu1 }
 0x45d   :  { %v1552_v57 = vadd.f32 %v1551_v0, %v1438_v34 }
 0x45e   :  { %2964 = vmatmul.msk.f32.gmra.mxu3 %vm568_vm2, %v4666_v16  ;;  %v1940_v33 = vpop.f32.mrf.mxu2 }
 0x45f   :  { %2933 = vmatmul.msk.f32.gmra.mxu1 %vm568_vm2, %v4623_v58 }
 0x461   :  { %v1679_v20 = vpop.f32.mrf.mxu3 }
 0x462   :  { %v4811_v37 = vadd.f32 %v1679_v20, %v1549_v15  ;;  %v4823_v15 = vld [vmem:[#allocation2 + $0x122] sm:$0xff] }
 0x463   :  { %2986 = vmatmul.msk.f32.gmra.mxu2 %vm568_vm2, %v4542_v46 }
 0x464   :  { %v1441_v45 = vpop.f32.mrf.mxu1 }
 0x465   :  { %v1555_v34 = vadd.f32 %v1554_v28, %v1441_v45 }
 0x466   :  { %2965 = vmatmul.msk.f32.gmra.mxu3 %vm568_vm2, %v4676_v63  ;;  %v1943_v0 = vpop.f32.mrf.mxu2 }
 0x467   :  { %2934 = vmatmul.msk.f32.gmra.mxu1 %vm568_vm2, %v4815_v12 }
 0x469   :  { %v1682_v50 = vpop.f32.mrf.mxu3 }
 0x46a   :  { %v4821_v36 = vadd.f32 %v1682_v50, %v1552_v57 }
 0x46b   :  { %2987 = vmatmul.msk.f32.gmra.mxu2 %vm568_vm2, %v4565_v29 }
 0x46c   :  { %v1787_v14 = vpop.f32.mrf.mxu1 }
 0x46d   :  { %v1835_v20 = vadd.f32 %v1787_v14, %v4690_v21 }
 0x46e   :  { %2966 = vmatmul.msk.f32.gmra.mxu3 %vm568_vm2, %v4823_v15  ;;  %v1946_v21 = vpop.f32.mrf.mxu2 }
 0x46f   :  { %2967 = vmatmul.msk.f32.vlgmr.msrb.gmra.mxu1 %vm568_vm2, %v4453_v43  ;;  %v1982_v12 = vadd.f32 %v1934_v13, %v1835_v20 }
 0x471   :  { %v1685_v63 = vpop.f32.mrf.mxu3 }
 0x472   :  { %v4832_v46 = vadd.f32 %v1685_v63, %v1555_v34 }
 0x473   :  { %2988 = vmatmul.msk.f32.gmra.mxu2 %vm568_vm2, %v4577_v9 }
 0x474   :  { %v1790_v57 = vpop.f32.mrf.mxu1 }
 0x475   :  { %v1836_v50 = vadd.f32 %v1790_v57, %v4698_v39 }
 0x476   :  { %2999 = vmatmul.msk.f32.vlgmr.msrb.gmra.mxu3 %vm568_vm2, %v4519_v27  ;;  %v1949_v39 = vpop.f32.mrf.mxu2 }
 0x477   :  { %2968 = vmatmul.msk.f32.gmra.mxu1 %vm568_vm2, %v4472_v25  ;;  %v1983_v28 = vadd.f32 %v1937_v51, %v1836_v50 }
 0x479   :  { %v2081_v45 = vpop.f32.mrf.mxu3 }
 0x47a   :  { %v4841_v43 = vadd.f32 %v2081_v45, %v1982_v12  ;;  %v2153_v45 = vld [vmem:[#allocation2 + $0x90] sm:$0xff] }
 0x47b   :  { %2989 = vmatmul.msk.f32.gmra.mxu2 %vm568_vm2, %v4704_v18 }
 0x47c   :  { %v1793_v29 = vpop.f32.mrf.mxu1 }
 0x47d   :  { %v1837_v63 = vadd.f32 %v1793_v29, %v4708_v32 }
 0x47e   :  { %3000 = vmatmul.msk.f32.gmra.mxu3 %vm568_vm2, %v4531_v49  ;;  %v1952_v32 = vpop.f32.mrf.mxu2 }
 0x47f   :  { %2969 = vmatmul.msk.f32.gmra.mxu1 %vm568_vm2, %v4490_v44  ;;  %v1984_v27 = vadd.f32 %v1940_v33, %v1837_v63  ;;  %v2300_v33 = vld [vmem:[#allocation2 + $0x91] sm:$0xff] }
 0x480   :  { %v2447_v63 = vld [vmem:[#allocation2 + $0x92] sm:$0xff] }
 0x481   :  { %v2084_v13 = vpop.f32.mrf.mxu3 }
 0x482   :  { %v4850_v25 = vadd.f32 %v2084_v13, %v1983_v28 }
 0x483   :  { %2990 = vmatmul.msk.f32.gmra.mxu2 %vm568_vm2, %v2300_v33 }
 0x484   :  { %v1796_v9 = vpop.f32.mrf.mxu1 }
 0x485   :  { %v1838_v51 = vadd.f32 %v1796_v9, %v4716_v62 }
 0x486   :  { %3001 = vmatmul.msk.f32.gmra.mxu3 %vm568_vm2, %v4540_v11  ;;  %v1955_v62 = vpop.f32.mrf.mxu2 }
 0x487   :  { %2970 = vmatmul.msk.f32.gmra.mxu1 %vm568_vm2, %v4503_v5  ;;  %v1985_v49 = vadd.f32 %v1943_v0, %v1838_v51 }
 0x489   :  { %v2087_v12 = vpop.f32.mrf.mxu3 }
 0x48a   :  { %v4857_v44 = vadd.f32 %v2087_v12, %v1984_v27 }
 0x48b   :  { %2991 = vmatmul.msk.f32.gmra.mxu2 %vm568_vm2, %v4607_v38 }
 0x48c   :  { %v1799_v18 = vpop.f32.mrf.mxu1 }
 0x48d   :  { %v1839_v14 = vadd.f32 %v1799_v18, %v4730_v6  ;;  %v5358_v18 = vld [vmem:[#allocation32_spill] sm:$0xff] }
 0x48e   :  { %3002 = vmatmul.msk.f32.gmra.mxu3 %vm568_vm2, %v4561_v31  ;;  %v1958_v6 = vpop.f32.mrf.mxu2 }
 0x48f   :  { %2971 = vmatmul.msk.f32.gmra.mxu1 %vm568_vm2, %v4515_v30  ;;  %v1986_v11 = vadd.f32 %v1946_v21, %v1839_v14 }
 0x491   :  { %v2090_v20 = vpop.f32.mrf.mxu3 }
 0x492   :  { %v4865_v5 = vadd.f32 %v2090_v20, %v1985_v49 }
 0x493   :  { %2992 = vmatmul.msk.f32.gmra.mxu2 %vm568_vm2, %v4619_v56 }
 0x494   :  { %v1802_v34 = vpop.f32.mrf.mxu1 }
 0x495   :  { %v1840_v0 = vadd.f32 %v1802_v34, %v4741_v19 }
 0x496   :  { %3003 = vmatmul.msk.f32.gmra.mxu3 %vm568_vm2, %v4573_v42  ;;  %v1961_v19 = vpop.f32.mrf.mxu2 }
 0x497   :  { %2972 = vmatmul.msk.f32.gmra.mxu1 %vm568_vm2, %v4527_v41  ;;  %v1987_v31 = vadd.f32 %v1949_v39, %v1840_v0 }
 0x499   :  { %v2093_v57 = vpop.f32.mrf.mxu3 }
 0x49a   :  { %v4874_v30 = vadd.f32 %v2093_v57, %v1986_v11 }
 0x49b   :  { %2993 = vmatmul.msk.f32.gmra.mxu2 %vm568_vm2, %v4631_v60 }
 0x49c   :  { %v1805_v50 = vpop.f32.mrf.mxu1 }
 0x49d   :  { %v1841_v38 = vadd.f32 %v1805_v50, %v4751_v55 }
 0x49e   :  { %3004 = vmatmul.msk.f32.gmra.mxu3 %vm568_vm2, %v4585_v23  ;;  %v1964_v55 = vpop.f32.mrf.mxu2 }
 0x49f   :  { %2973 = vmatmul.msk.f32.gmra.mxu1 %vm568_vm2, %v4745_v26  ;;  %v1988_v42 = vadd.f32 %v1952_v32, %v1841_v38  ;;  %v5359_v38 = vld [vmem:[#allocation39_spill] sm:$0xff] }
 0x4a1   :  { %v2096_v21 = vpop.f32.mrf.mxu3 }
 0x4a2   :  { %v4883_v41 = vadd.f32 %v2096_v21, %v1987_v31 }
 0x4a3   :  { %2994 = vmatmul.msk.f32.gmra.mxu2 %vm568_vm2, %v4641_v8 }
 0x4a4   :  { %v1808_v28 = vpop.f32.mrf.mxu1 }
 0x4a5   :  { %v1842_v56 = vadd.f32 %v1808_v28, %v4761_v24 }
 0x4a6   :  { %3005 = vmatmul.msk.f32.gmra.mxu3 %vm568_vm2, %v4753_v35  ;;  %v1967_v24 = vpop.f32.mrf.mxu2 }
 0x4a7   :  { %2974 = vmatmul.msk.f32.gmra.mxu1 %vm568_vm2, %v2153_v45  ;;  %v1989_v23 = vadd.f32 %v1955_v62, %v1842_v56  ;;  %v2308_v62 = vld [vmem:[#allocation2 + $0x131] sm:$0xff] }
 0x4a9   :  { %v2099_v29 = vpop.f32.mrf.mxu3 }
 0x4aa   :  { %v4891_v26 = vadd.f32 %v2099_v29, %v1988_v42  ;;  %v2455_v29 = vld [vmem:[#allocation2 + $0x132] sm:$0xff] }
 0x4ab   :  { %2995 = vmatmul.msk.f32.gmra.mxu2 %vm568_vm2, %v4660_v10 }
 0x4ac   :  { %v1811_v39 = vpop.f32.mrf.mxu1 }
 0x4ad   :  { %v1843_v60 = vadd.f32 %v1811_v39, %v4769_v22 }
 0x4ae   :  { %3006 = vmatmul.msk.f32.gmra.mxu3 %vm568_vm2, %v2447_v63  ;;  %v1970_v8 = vpop.f32.mrf.mxu2 }
 0x4af   :  { %2975 = vmatmul.msk.f32.gmra.mxu1 %vm568_vm2, %v4569_v7  ;;  %v1990_v35 = vadd.f32 %v1958_v6, %v1843_v60 }
 0x4b1   :  { %v2102_v27 = vpop.f32.mrf.mxu3 }
 0x4b2   :  { %v4899_v13 = vadd.f32 %v2102_v27, %v1989_v23 }
 0x4b3   :  { %2996 = vmatmul.msk.f32.gmra.mxu2 %vm568_vm2, %v4670_v61 }
 0x4b4   :  { %v1814_v9 = vpop.f32.mrf.mxu1 }
 0x4b5   :  { %v1844_v51 = vadd.f32 %v1814_v9, %v4777_v2 }
 0x4b6   :  { %3007 = vmatmul.msk.f32.gmra.mxu3 %vm568_vm2, %v4615_v54  ;;  %v1973_v2 = vpop.f32.mrf.mxu2 }
 0x4b7   :  { %2976 = vmatmul.msk.f32.gmra.mxu1 %vm568_vm2, %v4581_v48  ;;  %v1991_v22 = vadd.f32 %v1961_v19, %v1844_v51  ;;  %v5360_v19 = vld [vmem:[#allocation34_spill] sm:$0xff] }
 0x4b9   :  { %v2105_v32 = vpop.f32.mrf.mxu3 }
 0x4ba   :  { %v4908_v7 = vadd.f32 %v2105_v32, %v1990_v35 }
 0x4bb   :  { %2997 = vmatmul.msk.f32.gmra.mxu2 %vm568_vm2, %v4783_v47 }
 0x4bc   :  { %v1817_v49 = vpop.f32.mrf.mxu1 }
 0x4bd   :  { %v1845_v10 = vadd.f32 %v1817_v49, %v4787_v53 }
 0x4be   :  { %3008 = vmatmul.msk.f32.gmra.mxu3 %vm568_vm2, %v4627_v52  ;;  %v1976_v53 = vpop.f32.mrf.mxu2 }
 0x4bf   :  { %2977 = vmatmul.msk.f32.gmra.mxu1 %vm568_vm2, %v4590_v3  ;;  %v1992_v54 = vadd.f32 %v1964_v55, %v1845_v10 }
 0x4c1   :  { %v2108_v12 = vpop.f32.mrf.mxu3 }
 0x4c2   :  { %v4917_v48 = vadd.f32 %v2108_v12, %v1991_v22 }
 0x4c3   :  { %2998 = vmatmul.msk.f32.gmra.mxu2 %vm568_vm2, %v2308_v62 }
 0x4c4   :  { %v1820_v33 = vpop.f32.mrf.mxu1 }
 0x4c5   :  { %v1846_v61 = vadd.f32 %v1820_v33, %v4795_v17 }
 0x4c6   :  { %3009 = vmatmul.msk.f32.gmra.mxu3 %vm568_vm2, %v4637_v4  ;;  %v1979_v17 = vpop.f32.mrf.mxu2 }
 0x4c7   :  { %2978 = vmatmul.msk.f32.gmra.mxu1 %vm568_vm2, %v5358_v18  ;;  %v1993_v52 = vadd.f32 %v1967_v24, %v1846_v61 }
 0x4c9   :  { %v2111_v14 = vpop.f32.mrf.mxu3 }
 0x4ca   :  { %v4926_v3 = vadd.f32 %v2111_v14, %v1992_v54 }
 0x4cc   :  { %v1823_v11 = vpop.f32.mrf.mxu1 }
 0x4cd   :  { %v1847_v47 = vadd.f32 %v1823_v11, %v4803_v1 }
 0x4ce   :  { %3010 = vmatmul.msk.f32.gmra.mxu3 %vm568_vm2, %v4656_v59  ;;  %v2376_v31 = vpop.f32.mrf.mxu2 }
 0x4cf   :  { %2979 = vmatmul.msk.f32.gmra.mxu1 %vm568_vm2, %v4611_v40  ;;  %v1994_v4 = vadd.f32 %v1970_v8, %v1847_v47 }
 0x4d1   :  { %v2114_v20 = vpop.f32.mrf.mxu3 }
 0x4d2   :  { %v4934_v34 = vadd.f32 %v2114_v20, %v1993_v52 }
 0x4d4   :  { %v1826_v0 = vpop.f32.mrf.mxu1 }
 0x4d5   :  { %v1848_v6 = vadd.f32 %v1826_v0, %v4811_v37 }
 0x4d6   :  { %3011 = vmatmul.msk.f32.gmra.mxu3 %vm568_vm2, %v4666_v16  ;;  %v2379_v42 = vpop.f32.mrf.mxu2 }
 0x4d7   :  { %2980 = vmatmul.msk.f32.gmra.mxu1 %vm568_vm2, %v4623_v58  ;;  %v1995_v1 = vadd.f32 %v1973_v2, %v1848_v6  ;;  %v2161_v58 = vld [vmem:[#allocation2 + $0x130] sm:$0xff] }
 0x4d9   :  { %v2117_v59 = vpop.f32.mrf.mxu3 }
 0x4da   :  { %v4941_v57 = vadd.f32 %v2117_v59, %v1994_v4 }
 0x4dc   :  { %v1829_v50 = vpop.f32.mrf.mxu1 }
 0x4dd   :  { %v1849_v40 = vadd.f32 %v1829_v50, %v4821_v36 }
 0x4de   :  { %3012 = vmatmul.msk.f32.gmra.mxu3 %vm568_vm2, %v5359_v38  ;;  %v2382_v55 = vpop.f32.mrf.mxu2 }
 0x4df   :  { %2981 = vmatmul.msk.f32.gmra.mxu1 %vm568_vm2, %v5360_v19  ;;  %v1996_v37 = vadd.f32 %v1976_v53, %v1849_v40 }
 0x4e1   :  { %v2120_v16 = vpop.f32.mrf.mxu3 }
 0x4e2   :  { %v4948_v21 = vadd.f32 %v2120_v16, %v1995_v1 }
 0x4e4   :  { %v1832_v28 = vpop.f32.mrf.mxu1 }
 0x4e5   :  { %v1850_v45 = vadd.f32 %v1832_v28, %v4832_v46 }
 0x4e6   :  { %3013 = vmatmul.msk.f32.gmra.mxu3 %vm568_vm2, %v4823_v15  ;;  %v2385_v46 = vpop.f32.mrf.mxu2 }
 0x4e7   :  { %2982 = vmatmul.msk.f32.gmra.mxu1 %vm568_vm2, %v2161_v58  ;;  %v1997_v36 = vadd.f32 %v1979_v17, %v1850_v45 }
 0x4e9   :  { %v2123_v56 = vpop.f32.mrf.mxu3 }
 0x4ea   :  { %v4954_v23 = vadd.f32 %v2123_v56, %v1996_v37 }
 0x4ec   :  { %v2229_v63 = vpop.f32.mrf.mxu1 }
 0x4ed   :  { %v2277_v39 = vadd.f32 %v2229_v63, %v4841_v43 }
 0x4ee   :  { %3014 = vmatmul.msk.f32.gmra.mxu3 %vm568_vm2, %v2455_v29  ;;  %v2388_v49 = vpop.f32.mrf.mxu2 }
 0x4ef   :  { %v2424_v60 = vadd.f32 %v2376_v31, %v2277_v39 }
 0x4f1   :  { %v2126_v24 = vpop.f32.mrf.mxu3 }
 0x4f2   :  { %v4958_v35 = vadd.f32 %v2126_v24, %v1997_v36 }
 0x4f4   :  { %v2232_v27 = vpop.f32.mrf.mxu1 }
 0x4f5   :  { %v2278_v15 = vadd.f32 %v2232_v27, %v4850_v25 }
 0x4f6   :  { %v2391_v61 = vpop.f32.mrf.mxu2 }
 0x4f7   :  { %v2425_v9 = vadd.f32 %v2379_v42, %v2278_v15 }
 0x4f9   :  { %v2523_v51 = vpop.f32.mrf.mxu3 }
 0x4fa   :  { %v4961_v8 = vadd.f32 %v2523_v51, %v2424_v60 }
 0x4fc   :  { %v2235_v22 = vpop.f32.mrf.mxu1 }
 0x4fd   :  { %v2279_v32 = vadd.f32 %v2235_v22, %v4857_v44 }
 0x4fe   :  { %v2394_v11 = vpop.f32.mrf.mxu2 }
 0x4ff   :  { %v2426_v10 = vadd.f32 %v2382_v55, %v2279_v32 }
 0x501   :  { %v2526_v43 = vpop.f32.mrf.mxu3 }
 0x502   :  { %v4964_v2 = vadd.f32 %v2526_v43, %v2425_v9 }
 0x504   :  { %v2238_v54 = vpop.f32.mrf.mxu1  ;;  %v2589_v63 = vsel %vm2587_vm8, %v4964_v2, 0.0 }
 0x505   :  { %v2280_v12 = vadd.f32 %v2238_v54, %v4865_v5 }
 0x506   :  { %v2397_v20 = vpop.f32.mrf.mxu2 }
 0x507   :  { %v2427_v33 = vadd.f32 %v2385_v46, %v2280_v12  ;;  %v2588_v46 = vsel %vm2587_vm8, %v4961_v8, 0.0 }
 0x508   :  { %v2590_v51 = vadd.f32 %v2589_v63, %v2588_v46 }
 0x509   :  { %v2529_v53 = vpop.f32.mrf.mxu3 }
 0x50a   :  { %v4967_v18 = vadd.f32 %v2529_v53, %v2426_v10 }
 0x50c   :  { %v2241_v25 = vpop.f32.mrf.mxu1  ;;  %v2591_v27 = vsel %vm2587_vm8, %v4967_v18, 0.0 }
 0x50d   :  { %v2281_v52 = vadd.f32 %v2241_v25, %v4874_v30  ;;  %v2592_v10 = vadd.f32 %v2591_v27, %v2590_v51 }
 0x50e   :  { %v2400_v31 = vpop.f32.mrf.mxu2 }
 0x50f   :  { %v2428_v14 = vadd.f32 %v2388_v49, %v2281_v52 }
 0x511   :  { %v2532_v62 = vpop.f32.mrf.mxu3 }
 0x512   :  { %v4970_v44 = vadd.f32 %v2532_v62, %v2427_v33 }
 0x514   :  { %v2244_v47 = vpop.f32.mrf.mxu1  ;;  %v2593_v22 = vsel %vm2587_vm8, %v4970_v44, 0.0 }
 0x515   :  { %v2282_v55 = vadd.f32 %v2244_v47, %v4883_v41 }
 0x516   :  { %v2403_v50 = vpop.f32.mrf.mxu2 }
 0x517   :  { %v2429_v39 = vadd.f32 %v2391_v61, %v2282_v55 }
 0x519   :  { %v2535_v17 = vpop.f32.mrf.mxu3 }
 0x51a   :  { %v4972_v4 = vadd.f32 %v2535_v17, %v2428_v14 }
 0x51c   :  { %v2247_v0 = vpop.f32.mrf.mxu1  ;;  %v2595_v43 = vsel %vm2587_vm8, %v4972_v4, 0.0 }
 0x51d   :  { %v2283_v60 = vadd.f32 %v2247_v0, %v4891_v26 }
 0x51e   :  { %v2406_v19 = vpop.f32.mrf.mxu2 }
 0x51f   :  { %v2430_v15 = vadd.f32 %v2394_v11, %v2283_v60 }
 0x521   :  { %v2538_v5 = vpop.f32.mrf.mxu3 }
 0x522   :  { %v4985_v32 = vadd.f32 %v2538_v5, %v2429_v39 }
 0x524   :  { %v2250_v6 = vpop.f32.mrf.mxu1  ;;  %v2597_v61 = vsel %vm2587_vm8, %v4985_v32, 0.0 }
 0x525   :  { %v2284_v9 = vadd.f32 %v2250_v6, %v4899_v13  ;;  %v2594_v13 = vadd.f32 %v2593_v22, %v2592_v10 }
 0x526   :  { %v2409_v16 = vpop.f32.mrf.mxu2 }
 0x527   :  { %v2431_v49 = vadd.f32 %v2397_v20, %v2284_v9  ;;  %v2596_v14 = vadd.f32 %v2595_v43, %v2594_v13 }
 0x529   :  { %v2541_v1 = vpop.f32.mrf.mxu3 }
 0x52a   :  { %v4990_v54 = vadd.f32 %v2541_v1, %v2430_v15 }
 0x52c   :  { %v2253_v59 = vpop.f32.mrf.mxu1  ;;  %v2599_v62 = vsel %vm2587_vm8, %v4990_v54, 0.0 }
 0x52d   :  { %v2285_v26 = vadd.f32 %v2253_v59, %v4908_v7 }
 0x52e   :  { %v2412_v36 = vpop.f32.mrf.mxu2 }
 0x52f   :  { %v2432_v12 = vadd.f32 %v2400_v31, %v2285_v26 }
 0x531   :  { %v2544_v40 = vpop.f32.mrf.mxu3 }
 0x532   :  { %v4995_v53 = vadd.f32 %v2544_v40, %v2431_v49 }
 0x534   :  { %v2256_v38 = vpop.f32.mrf.mxu1  ;;  %v2601_v5 = vsel %vm2587_vm8, %v4995_v53, 0.0 }
 0x535   :  { %v2286_v33 = vadd.f32 %v2256_v38, %v4917_v48  ;;  %v2598_v48 = vadd.f32 %v2597_v61, %v2596_v14 }
 0x536   :  { %v2415_v24 = vpop.f32.mrf.mxu2 }
 0x537   :  { %v2433_v25 = vadd.f32 %v2403_v50, %v2286_v33  ;;  %v2600_v1 = vadd.f32 %v2599_v62, %v2598_v48 }
 0x539   :  { %v2547_v30 = vpop.f32.mrf.mxu3  ;;  %v2602_v38 = vadd.f32 %v2601_v5, %v2600_v1 }
 0x53a   :  { %v5000_v11 = vadd.f32 %v2547_v30, %v2432_v12 }
 0x53c   :  { %v2259_v37 = vpop.f32.mrf.mxu1  ;;  %v2603_v59 = vsel %vm2587_vm8, %v5000_v11, 0.0 }
 0x53d   :  { %v2287_v52 = vadd.f32 %v2259_v37, %v4926_v3 }
 0x53e   :  { %v2418_v0 = vpop.f32.mrf.mxu2 }
 0x53f   :  { %v2434_v47 = vadd.f32 %v2406_v19, %v2287_v52 }
 0x541   :  { %v2550_v42 = vpop.f32.mrf.mxu3 }
 0x542   :  { %v5005_v6 = vadd.f32 %v2550_v42, %v2433_v25 }
 0x544   :  { %v2262_v28 = vpop.f32.mrf.mxu1  ;;  %v2605_v30 = vsel %vm2587_vm8, %v5005_v6, 0.0 }
 0x545   :  { %v2288_v17 = vadd.f32 %v2262_v28, %v4934_v34 }
 0x546   :  { %v2421_v63 = vpop.f32.mrf.mxu2 }
 0x547   :  { %v2435_v31 = vadd.f32 %v2409_v16, %v2288_v17  ;;  %v2604_v16 = vadd.f32 %v2603_v59, %v2602_v38 }
 0x549   :  { %v2553_v58 = vpop.f32.mrf.mxu3 }
 0x54a   :  { %v5010_v50 = vadd.f32 %v2553_v58, %v2434_v47 }
 0x54c   :  { %v2265_v45 = vpop.f32.mrf.mxu1 }
 0x54d   :  { %v2289_v3 = vadd.f32 %v2265_v45, %v4941_v57  ;;  %v2607_v57 = vsel %vm2587_vm8, %v5010_v50, 0.0  ;;  %v2606_v45 = vadd.f32 %v2605_v30, %v2604_v16 }
 0x54f   :  { %v2436_v40 = vadd.f32 %v2412_v36, %v2289_v3 }
 0x551   :  { %v2556_v56 = vpop.f32.mrf.mxu3 }
 0x552   :  { %v5015_v19 = vadd.f32 %v2556_v56, %v2435_v31  ;;  %v2608_v56 = vadd.f32 %v2607_v57, %v2606_v45 }
 0x554   :  { %v2268_v29 = vpop.f32.mrf.mxu1 }
 0x555   :  { %v2290_v34 = vadd.f32 %v2268_v29, %v4948_v21  ;;  %v2609_v21 = vsel %vm2587_vm8, %v5015_v19, 0.0 }
 0x557   :  { %v2437_v37 = vadd.f32 %v2415_v24, %v2290_v34  ;;  %v2610_v24 = vadd.f32 %v2609_v21, %v2608_v56 }
 0x559   :  { %v2559_v41 = vpop.f32.mrf.mxu3 }
 0x55a   :  { %v5020_v28 = vadd.f32 %v2559_v41, %v2436_v40 }
 0x55c   :  { %v2271_v7 = vpop.f32.mrf.mxu1 }
 0x55d   :  { %v2291_v42 = vadd.f32 %v2271_v7, %v4954_v23  ;;  %v2611_v23 = vsel %vm2587_vm8, %v5020_v28, 0.0 }
 0x55e   :  { %v2612_v15 = vadd.f32 %v2611_v23, %v2610_v24 }
 0x55f   :  { %v2438_v58 = vadd.f32 %v2418_v0, %v2291_v42 }
 0x561   :  { %v2562_v20 = vpop.f32.mrf.mxu3 }
 0x562   :  { %v5024_v29 = vadd.f32 %v2562_v20, %v2437_v37 }
 0x564   :  { %v2274_v55 = vpop.f32.mrf.mxu1  ;;  %v2613_v46 = vsel %vm2587_vm8, %v5024_v29, 0.0 }
 0x565   :  { %v2292_v60 = vadd.f32 %v2274_v55, %v4958_v35  ;;  %v2614_v51 = vadd.f32 %v2613_v46, %v2612_v15 }
 0x567   :  { %v2439_v27 = vadd.f32 %v2421_v63, %v2292_v60 }
 0x569   :  { %v2565_v36 = vpop.f32.mrf.mxu3 }
 0x56a   :  { %v5028_v39 = vadd.f32 %v2565_v36, %v2438_v58 }
 0x56c   :  { %v2615_v9 = vsel %vm2587_vm8, %v5028_v39, 0.0 }
 0x56d   :  { %v2616_v49 = vadd.f32 %v2615_v9, %v2614_v51 }
 0x571   :  { %v2568_v41 = vpop.f32.mrf.mxu3 }
 0x572   :  { %v5035_v22 = vadd.f32 %v2568_v41, %v2439_v27 }
 0x574   :  { %v2617_v26 = vsel %vm2587_vm8, %v5035_v22, 0.0 }
 0x575   :  { %v2618_v10 = vadd.f32 %v2617_v26, %v2616_v49 }
 0x577   :  { %v2619_v43 = vrot.slane %v2618_v10, 4 }
 0x579   :  { %v2620_v35 = vadd.f32 %v2619_v43, %v2618_v10 }
 0x57b   :  { %v2621_v12 = vrot.slane %v2620_v35, 2 }
 0x57d   :  { %v2622_v33 = vadd.f32 %v2621_v12, %v2620_v35 }
 0x57f   :  { %v2623_v13 = vrot.slane %v2622_v33, 1 }
 0x581   :  { %v2624_v61 = vadd.f32 %v2623_v13, %v2622_v33 }
 0x583   :  { %v5039_v25 = vmul.f32 0.0078125, %v2624_v61 }
 0x585   :  { %v2626_v52 = vsub.f32 %v4961_v8, %v5039_v25  ;;  %v2627_v14 = vsub.f32 %v4964_v2, %v5039_v25  ;;  %v2628_v7 = vsub.f32 %v4967_v18, %v5039_v25  ;;  %v2629_v62 = vsub.f32 %v4970_v44, %v5039_v25 }
 0x586   :  { %v2630_v48 = vsub.f32 %v4972_v4, %v5039_v25  ;;  %v2631_v0 = vsub.f32 %v4985_v32, %v5039_v25  ;;  %v2632_v59 = vsub.f32 %v4990_v54, %v5039_v25  ;;  %v2633_v30 = vsub.f32 %v4995_v53, %v5039_v25 }
 0x587   :  { %v2642_v47 = vmul.f32 %v2626_v52, %v2626_v52  ;;  %v2643_v17 = vmul.f32 %v2627_v14, %v2627_v14  ;;  %v2644_v20 = vmul.f32 %v2628_v7, %v2628_v7  ;;  %v2645_v5 = vmul.f32 %v2629_v62, %v2629_v62 }
 0x588   :  { %v2646_v40 = vmul.f32 %v2630_v48, %v2630_v48  ;;  %v2647_v37 = vmul.f32 %v2631_v0, %v2631_v0  ;;  %v2634_v57 = vsub.f32 %v5000_v11, %v5039_v25  ;;  %v2648_v58 = vmul.f32 %v2632_v59, %v2632_v59 }
 0x589   :  { %v2658_v31 = vsel %vm2587_vm8, %v2642_v47, 0.0  ;;  %v2659_v3 = vsel %vm2587_vm8, %v2643_v17, 0.0  ;;  %v2661_v34 = vsel %vm2587_vm8, %v2644_v20, 0.0  ;;  %v2663_v42 = vsel %vm2587_vm8, %v2645_v5, 0.0 }
 0x58a   :  { %v2660_v1 = vadd.f32 %v2659_v3, %v2658_v31  ;;  %v2665_v45 = vsel %vm2587_vm8, %v2646_v40, 0.0  ;;  %v2635_v55 = vsub.f32 %v5005_v6, %v5039_v25  ;;  %v2649_v21 = vmul.f32 %v2633_v30, %v2633_v30 }
 0x58b   :  { %v2667_v56 = vsel %vm2587_vm8, %v2647_v37, 0.0  ;;  %v2636_v23 = vsub.f32 %v5010_v50, %v5039_v25  ;;  %v2650_v60 = vmul.f32 %v2634_v57, %v2634_v57  ;;  %v2669_v24 = vsel %vm2587_vm8, %v2648_v58, 0.0 }
 0x58c   :  { %v2662_v38 = vadd.f32 %v2661_v34, %v2660_v1  ;;  %v2637_v27 = vsub.f32 %v5015_v19, %v5039_v25  ;;  %v2651_v15 = vmul.f32 %v2635_v55, %v2635_v55  ;;  %v2671_v9 = vsel %vm2587_vm8, %v2649_v21, 0.0 }
 0x58d   :  { %v2638_v41 = vsub.f32 %v5020_v28, %v5039_v25  ;;  %v2652_v49 = vmul.f32 %v2636_v23, %v2636_v23  ;;  %v2673_v26 = vsel %vm2587_vm8, %v2650_v60, 0.0  ;;  %v2639_v43 = vsub.f32 %v5024_v29, %v5039_v25  ;;  %v2696_v23 = vld [vmem:[#allocation8] sm:$0x1] }
 0x58e   :  { %v2664_v16 = vadd.f32 %v2663_v42, %v2662_v38  ;;  %v2653_v35 = vmul.f32 %v2637_v27, %v2637_v27  ;;  %v2675_v12 = vsel %vm2587_vm8, %v2651_v15, 0.0  ;;  %v2640_v13 = vsub.f32 %v5028_v39, %v5039_v25  ;;  %v2709_v27 = vld [vmem:[#allocation10] sm:$0x1] }
 0x58f   :  { %v2654_v61 = vmul.f32 %v2638_v41, %v2638_v41  ;;  %v2677_v52 = vsel %vm2587_vm8, %v2652_v49, 0.0  ;;  %v2641_v7 = vsub.f32 %v5035_v22, %v5039_v25  ;;  %v2655_v62 = vmul.f32 %v2639_v43, %v2639_v43 }
 0x590   :  { %v2666_v36 = vadd.f32 %v2665_v45, %v2664_v16  ;;  %v2679_v47 = vsel %vm2587_vm8, %v2653_v35, 0.0  ;;  %v2656_v48 = vmul.f32 %v2640_v13, %v2640_v13 }
 0x591   :  { %v2681_v20 = vsel %vm2587_vm8, %v2654_v61, 0.0  ;;  %v2657_v5 = vmul.f32 %v2641_v7, %v2641_v7  ;;  %v2683_v31 = vsel %vm2587_vm8, %v2655_v62, 0.0 }
 0x592   :  { %v2668_v63 = vadd.f32 %v2667_v56, %v2666_v36  ;;  %v2685_v1 = vsel %vm2587_vm8, %v2656_v48, 0.0 }
 0x593   :  { %v2687_v40 = vsel %vm2587_vm8, %v2657_v5, 0.0 }
 0x594   :  { %v2670_v46 = vadd.f32 %v2669_v24, %v2668_v63 }
 0x596   :  { %v2672_v51 = vadd.f32 %v2671_v9, %v2670_v46 }
 0x598   :  { %v2674_v10 = vadd.f32 %v2673_v26, %v2672_v51 }
 0x59a   :  { %v2676_v33 = vadd.f32 %v2675_v12, %v2674_v10 }
 0x59c   :  { %v2678_v14 = vadd.f32 %v2677_v52, %v2676_v33 }
 0x59e   :  { %v2680_v17 = vadd.f32 %v2679_v47, %v2678_v14 }
 0x5a0   :  { %v2682_v0 = vadd.f32 %v2681_v20, %v2680_v17 }
 0x5a2   :  { %v2684_v3 = vadd.f32 %v2683_v31, %v2682_v0 }
 0x5a4   :  { %v2686_v59 = vadd.f32 %v2685_v1, %v2684_v3 }
 0x5a6   :  { %v2688_v34 = vadd.f32 %v2687_v40, %v2686_v59 }
 0x5a8   :  { %v2689_v38 = vrot.slane %v2688_v34, 4 }
 0x5aa   :  { %v2690_v30 = vadd.f32 %v2689_v38, %v2688_v34 }
 0x5ac   :  { %v2691_v37 = vrot.slane %v2690_v30, 2 }
 0x5ae   :  { %v2692_v42 = vadd.f32 %v2691_v37, %v2690_v30 }
 0x5b0   :  { %v2693_v16 = vrot.slane %v2692_v42, 1 }
 0x5b2   :  { %v2694_v57 = vadd.f32 %v2693_v16, %v2692_v42 }
 0x5b4   :  { %v2695_v58 = vmul.f32 0.0078125, %v2694_v57 }
 0x5b6   :  { %v2697_v45 = vadd.f32 1e-05, %v2695_v58 }
 0x5b8   :  { %3031 = vrsqrt.f32 %v2697_v45  ;;  %vm2704_vm10 = vweird.f32 %v2697_v45 }
 0x5be   :  { %v3032_v36 = vpop.eup %3031 }
 0x5bf   :  { %v2699_v55 = vmul.f32 %v3032_v36, %v2697_v45  ;;  %vm2705_vm9 = vweird.f32 %v3032_v36 }
 0x5c0   :  { %vm2706_vm11 = vmor %vm2704_vm10, %vm2705_vm9 }
 0x5c1   :  { %v2700_v21 = vmul.f32 %v3032_v36, %v2699_v55 }
 0x5c3   :  { %v2701_v56 = vmul.f32 0.5, %v2700_v21 }
 0x5c5   :  { %v2702_v63 = vsub.f32 1.5, %v2701_v56 }
 0x5c7   :  { %v2703_v60 = vmul.f32 %v3032_v36, %v2702_v63 }
 0x5c9   :  { %v2707_v24 = vsel %vm2706_vm11, %v3032_v36, %v2703_v60 }
 0x5ca   :  { %v2708_v46 = vmul.f32 %v2707_v24, %v2696_v23 }
 0x5cc   :  { %v2710_v15 = vmul.f32 %v2708_v46, %v5039_v25  ;;  %v2713_v51 = vperm.slane %v2708_v46, 0 }
 0x5ce   :  { %v2711_v9 = vsub.f32 %v2709_v27, %v2710_v15  ;;  %v2715_v41 = vmul.f32 %v2713_v51, %v4961_v8  ;;  %v2716_v49 = vmul.f32 %v2713_v51, %v4964_v2  ;;  %v2717_v26 = vmul.f32 %v2713_v51, %v4967_v18 }
 0x5cf   :  { %v2718_v43 = vmul.f32 %v2713_v51, %v4970_v44  ;;  %v2719_v35 = vmul.f32 %v2713_v51, %v4972_v4  ;;  %v2720_v61 = vmul.f32 %v2713_v51, %v4985_v32  ;;  %v2721_v25 = vmul.f32 %v2713_v51, %v4990_v54 }
 0x5d0   :  { %v2732_v10 = vperm.slane %v2711_v9, 0  ;;  %v2722_v8 = vmul.f32 %v2713_v51, %v4995_v53  ;;  %v2723_v2 = vmul.f32 %v2713_v51, %v5000_v11  ;;  %v2724_v4 = vmul.f32 %v2713_v51, %v5005_v6 }
 0x5d1   :  { %v2725_v17 = vmul.f32 %v2713_v51, %v5010_v50  ;;  %v2726_v32 = vmul.f32 %v2713_v51, %v5015_v19  ;;  %v2727_v53 = vmul.f32 %v2713_v51, %v5020_v28  ;;  %v2728_v6 = vmul.f32 %v2713_v51, %v5024_v29 }
 0x5d2   :  { %v2734_v12 = vadd.f32 %v2732_v10, %v2715_v41  ;;  %v2735_v33 = vadd.f32 %v2732_v10, %v2716_v49  ;;  %v2736_v13 = vadd.f32 %v2732_v10, %v2717_v26  ;;  %v2737_v52 = vadd.f32 %v2732_v10, %v2718_v43 }
 0x5d3   :  { %v2738_v14 = vadd.f32 %v2732_v10, %v2719_v35  ;;  %v2739_v7 = vadd.f32 %v2732_v10, %v2720_v61  ;;  %v2740_v18 = vadd.f32 %v2732_v10, %v2721_v25  ;;  %v2741_v48 = vadd.f32 %v2732_v10, %v2722_v8 }
 0x5d4   :  { %v2750_v62 = vmax.f32 %v2734_v12, 0.0  ;;  %v2751_v47 = vmax.f32 %v2735_v33, 0.0  ;;  %v2752_v44 = vmax.f32 %v2736_v13, 0.0  ;;  %v2753_v20 = vmax.f32 %v2737_v52, 0.0 }
 0x5d5   :  { %v2742_v0 = vadd.f32 %v2732_v10, %v2723_v2  ;;  %v2754_v54 = vmax.f32 %v2738_v14, 0.0  ;;  %v2743_v5 = vadd.f32 %v2732_v10, %v2724_v4  ;;  %v2744_v11 = vadd.f32 %v2732_v10, %v2725_v17 }
 0x5d6   :  { %v2755_v31 = vmax.f32 %v2739_v7, 0.0  ;;  %v2756_v3 = vmax.f32 %v2740_v18, 0.0  ;;  %v2766_v1 = vpack.c.bf16 %v2750_v62, %v2750_v62  ;;  %v2767_v59 = vpack.c.bf16 %v2751_v47, %v2751_v47 }
 0x5d7   :  { %v2768_v40 = vpack.c.bf16 %v2752_v44, %v2752_v44  ;;  %v2745_v34 = vadd.f32 %v2732_v10, %v2726_v32  ;;  %v2757_v50 = vmax.f32 %v2741_v48, 0.0  ;;  %v2769_v38 = vpack.c.bf16 %v2753_v20, %v2753_v20 }
 0x5d8   :  { %v2729_v30 = vmul.f32 %v2713_v51, %v5028_v39  ;;  %v2746_v19 = vadd.f32 %v2732_v10, %v2727_v53  ;;  %v2758_v37 = vmax.f32 %v2742_v0, 0.0  ;;  %v2770_v42 = vpack.c.bf16 %v2754_v54, %v2754_v54  ;;  %2783 = vst.msk [vmem:[%s5177_s7] sm:$0xf] %vm2782_vm12, %v2766_v1 }
 0x5d9   :  { %v2730_v28 = vmul.f32 %v2713_v51, %v5035_v22  ;;  %v2747_v16 = vadd.f32 %v2732_v10, %v2728_v6  ;;  %v2759_v57 = vmax.f32 %v2743_v5, 0.0  ;;  %v2771_v58 = vpack.c.bf16 %v2755_v31, %v2755_v31  ;;  %2784 = vst.msk [vmem:[%s5177_s7 + $0x4] sm:$0xf] %vm2782_vm12, %v2767_v59 }
 0x5da   :  { %v2748_v29 = vadd.f32 %v2732_v10, %v2729_v30  ;;  %v2760_v39 = vmax.f32 %v2744_v11, 0.0  ;;  %v2772_v45 = vpack.c.bf16 %v2756_v3, %v2756_v3  ;;  %2785 = vst.msk [vmem:[%s5177_s7 + $0x8] sm:$0xf] %vm2782_vm12, %v2768_v40  ;;  %v2761_v55 = vmax.f32 %v2745_v34, 0.0 }
 0x5db   :  { %v2749_v36 = vadd.f32 %v2732_v10, %v2730_v28  ;;  %v2773_v21 = vpack.c.bf16 %v2757_v50, %v2757_v50  ;;  %2786 = vst.msk [vmem:[%s5177_s7 + $0xc] sm:$0xf] %vm2782_vm12, %v2769_v38  ;;  %v2762_v22 = vmax.f32 %v2746_v19, 0.0  ;;  %v2774_v56 = vpack.c.bf16 %v2758_v37, %v2758_v37 }
 0x5dc   :  { %2787 = vst.msk [vmem:[%s5177_s7 + $0x10] sm:$0xf] %vm2782_vm12, %v2770_v42  ;;  %v2763_v63 = vmax.f32 %v2747_v16, 0.0  ;;  %v2775_v23 = vpack.c.bf16 %v2759_v57, %v2759_v57  ;;  %v2764_v60 = vmax.f32 %v2748_v29, 0.0  ;;  %v2776_v24 = vpack.c.bf16 %v2760_v39, %v2760_v39 }
 0x5dd   :  { %2788 = vst.msk [vmem:[%s5177_s7 + $0x14] sm:$0xf] %vm2782_vm12, %v2771_v58  ;;  %v2765_v46 = vmax.f32 %v2749_v36, 0.0  ;;  %v2777_v27 = vpack.c.bf16 %v2761_v55, %v2761_v55  ;;  %v2778_v15 = vpack.c.bf16 %v2762_v22, %v2762_v22 }
 0x5de   :  { %2789 = vst.msk [vmem:[%s5177_s7 + $0x18] sm:$0xf] %vm2782_vm12, %v2772_v45  ;;  %v2779_v9 = vpack.c.bf16 %v2763_v63, %v2763_v63  ;;  %v2780_v51 = vpack.c.bf16 %v2764_v60, %v2764_v60 }
 0x5df   :  { %2790 = vst.msk [vmem:[%s5177_s7 + $0x1c] sm:$0xf] %vm2782_vm12, %v2773_v21  ;;  %v2781_v41 = vpack.c.bf16 %v2765_v46, %v2765_v46 }
 0x5e0   :  { %2791 = vst.msk [vmem:[%s5177_s7 + $0x20] sm:$0xf] %vm2782_vm12, %v2774_v56 }
 0x5e1   :  { %2792 = vst.msk [vmem:[%s5177_s7 + $0x24] sm:$0xf] %vm2782_vm12, %v2775_v23 }
 0x5e2   :  { %2793 = vst.msk [vmem:[%s5177_s7 + $0x28] sm:$0xf] %vm2782_vm12, %v2776_v24 }
 0x5e3   :  { %2794 = vst.msk [vmem:[%s5177_s7 + $0x2c] sm:$0xf] %vm2782_vm12, %v2777_v27 }
 0x5e4   :  { %2795 = vst.msk [vmem:[%s5177_s7 + $0x30] sm:$0xf] %vm2782_vm12, %v2778_v15 }
 0x5e5   :  { %2796 = vst.msk [vmem:[%s5177_s7 + $0x34] sm:$0xf] %vm2782_vm12, %v2779_v9 }
 0x5e6   :  { %2797 = vst.msk [vmem:[%s5177_s7 + $0x38] sm:$0xf] %vm2782_vm12, %v2780_v51 }
 0x5e7   :  { %2798 = vst.msk [vmem:[%s5177_s7 + $0x3c] sm:$0xf] %vm2782_vm12, %v2781_v41 }
 0x5e8   :  { %2803 = vsyncpa [#allocation4], 1 }
 0x5e9   :  { %2804 = vsyncpa [#allocation6], 1 }
 0x5ea   :  { %2805 = vsyncpa [#allocation9], 1 }

// kernel: jadhav_forward.4
= control target key start
LH: loop header
LB: loop body
LE: loop exit
PB: predicated region body
PF: predicated region fallthrough
CT: control target
= control target key end

     0   :  { %8 = vsyncpa [#allocation4], 0  ;;  %s13429_s0 = inlined_call_operand.vmem [shape: bf16[2,2048], index: 0, kind: input, shape index: {}]   ;;  %s13430_s1 = inlined_call_operand.hbm [shape: bf16[2048,1024], index: 1, kind: input, shape index: {}]   ;;  %s13431_s2 = inlined_call_operand.hbm [shape: f32[1,1024], index: 2, kind: input, shape index: {}]   ;;  %s13432_s3 = inlined_call_operand.vmem [shape: f32[2,1024], index: 3, kind: output, shape index: {}]  }
   0x1   :  { %s16_s14 = sshll.u32 %s13430_s1, 4  ;;  %s17_s14 = int_to_ptr.hbm [resolvable:$true] %s16_s14 }
   0x2   :  { %9 = vsyncpa [#allocation6], 0  ;;  %s13199_s15 = smov [#allocation3]   ;;  %s30_s19 = sshll.u32 %s13431_s2, 4  ;;  %s31_s19 = int_to_ptr.hbm [resolvable:$true] %s30_s19 }
   0x3   :  { %s18_s16 = sshll.u32 %s13199_s15, 4  ;;  %s13200_s20 = smov 512   ;;  %s19_s16 = int_to_ptr.vmem [resolvable:$true] %s18_s16 }
   0x4   :  { %s13201_s21 = smov 32   ;;  %s13202_s22 = smov [#allocation5]  }
   0x5   :  { %24 = dma.hbm_to_vmem [thread:$0]  %s17_s14, 131072, %s19_s16, [#allocation4], %s13200_s20, %s13200_s20, %s13201_s21  }
   0x6   :  { %s32_s23 = sshll.u32 %s13202_s22, 4  ;;  %s33_s23 = int_to_ptr.vmem [resolvable:$true] %s32_s23 }
   0x7   :  { %35 = dma.hbm_to_vmem [thread:$0]  %s31_s19, 128, %s33_s23, [#allocation6]  }
   0x8   :  { %13195 = dma.done.wait [#allocation4], 131072  }
   0x9   :  { %13196 = vsyncadd [#allocation4], 4294836224 }
   0xa   :  { %13197 = dma.done.wait [#allocation6], 128  }
   0xb   :  { %13198 = vsyncadd [#allocation6], 4294967168  ;;  %v8192_v0 = vld [vmem:[#allocation3 + $0x1c0] sm:$0xf]  ;;  %vm7912_vm0 = vcmask 1041408   ;;  %vm7914_vm1 = vcmask 1045508  }
   0xc   :  { %v12122_v1 = vld [vmem:[#allocation3 + $0x1dc] sm:$0xf0]  ;;  %vm7916_vm2 = vcmask 1043456  }
   0xd   :  { %v8448_v2 = vld [vmem:[#allocation3 + $0x3c0] sm:$0xf]  ;;  %v8193_v3 = vor.u32 %v12122_v1, %v8192_v0 }
   0xe   :  { %v12186_v4 = vld [vmem:[#allocation3 + $0x3dc] sm:$0xf0] }
   0xf   :  { %v8704_v5 = vld [vmem:[#allocation3 + $0x5c0] sm:$0xf]  ;;  %v8449_v7 = vor.u32 %v12186_v4, %v8448_v2  ;;  %6234 = vmatpush.bf16.msra.mxu0 %v8193_v3 }
  0x10   :  { %v12250_v6 = vld [vmem:[#allocation3 + $0x5dc] sm:$0xf0] }
  0x11   :  { %v8705_v8 = vor.u32 %v12250_v6, %v8704_v5  ;;  %v8960_v9 = vld [vmem:[#allocation3 + $0x7c0] sm:$0xf]  ;;  %6247 = vmatpush.bf16.msra.mxu1 %v8449_v7 }
  0x12   :  { %v12314_v10 = vld [vmem:[#allocation3 + $0x7dc] sm:$0xf0] }
  0x13   :  { %v8160_v11 = vld [vmem:[#allocation3 + $0x180] sm:$0xf]  ;;  %v8961_v12 = vor.u32 %v12314_v10, %v8960_v9  ;;  %6260 = vmatpush.bf16.msra.mxu2 %v8705_v8 }
  0x14   :  { %v12114_v13 = vld [vmem:[#allocation3 + $0x19c] sm:$0xf0] }
  0x15   :  { %v8416_v14 = vld [vmem:[#allocation3 + $0x380] sm:$0xf]  ;;  %v8161_v16 = vor.u32 %v12114_v13, %v8160_v11  ;;  %6273 = vmatpush.bf16.msra.mxu3 %v8961_v12 }
  0x16   :  { %v12178_v15 = vld [vmem:[#allocation3 + $0x39c] sm:$0xf0] }
  0x17   :  { %v8417_v17 = vor.u32 %v12178_v15, %v8416_v14  ;;  %v8672_v18 = vld [vmem:[#allocation3 + $0x580] sm:$0xf]  ;;  %6235 = vmatpush.bf16.msra.mxu0 %v8161_v16 }
  0x18   :  { %v12242_v19 = vld [vmem:[#allocation3 + $0x59c] sm:$0xf0] }
  0x19   :  { %v8928_v20 = vld [vmem:[#allocation3 + $0x780] sm:$0xf]  ;;  %v8673_v21 = vor.u32 %v12242_v19, %v8672_v18  ;;  %6248 = vmatpush.bf16.msra.mxu1 %v8417_v17 }
  0x1a   :  { %v12306_v22 = vld [vmem:[#allocation3 + $0x79c] sm:$0xf0] }
  0x1b   :  { %v8128_v23 = vld [vmem:[#allocation3 + $0x140] sm:$0xf]  ;;  %v8929_v25 = vor.u32 %v12306_v22, %v8928_v20  ;;  %6261 = vmatpush.bf16.msra.mxu2 %v8673_v21 }
  0x1c   :  { %v12106_v24 = vld [vmem:[#allocation3 + $0x15c] sm:$0xf0] }
  0x1d   :  { %v8384_v26 = vld [vmem:[#allocation3 + $0x340] sm:$0xf]  ;;  %v8129_v29 = vor.u32 %v12106_v24, %v8128_v23  ;;  %6274 = vmatpush.bf16.msra.mxu3 %v8929_v25 }
  0x1e   :  { %v12170_v27 = vld [vmem:[#allocation3 + $0x35c] sm:$0xf0] }
  0x1f   :  { %v8640_v28 = vld [vmem:[#allocation3 + $0x540] sm:$0xf]  ;;  %v8385_v33 = vor.u32 %v12170_v27, %v8384_v26  ;;  %6236 = vmatpush.bf16.msra.mxu0 %v8129_v29 }
  0x20   :  { %v12234_v30 = vld [vmem:[#allocation3 + $0x55c] sm:$0xf0] }
  0x21   :  { %v8896_v31 = vld [vmem:[#allocation3 + $0x740] sm:$0xf]  ;;  %v8641_v34 = vor.u32 %v12234_v30, %v8640_v28  ;;  %6249 = vmatpush.bf16.msra.mxu1 %v8385_v33 }
  0x22   :  { %v12298_v32 = vld [vmem:[#allocation3 + $0x75c] sm:$0xf0] }
  0x23   :  { %v8096_v35 = vld [vmem:[#allocation3 + $0x100] sm:$0xf]  ;;  %v8897_v38 = vor.u32 %v12298_v32, %v8896_v31  ;;  %6262 = vmatpush.bf16.msra.mxu2 %v8641_v34 }
  0x24   :  { %v12098_v36 = vld [vmem:[#allocation3 + $0x11c] sm:$0xf0] }
  0x25   :  { %v8352_v37 = vld [vmem:[#allocation3 + $0x300] sm:$0xf]  ;;  %v8097_v44 = vor.u32 %v12098_v36, %v8096_v35  ;;  %6275 = vmatpush.bf16.msra.mxu3 %v8897_v38 }
  0x26   :  { %v12162_v39 = vld [vmem:[#allocation3 + $0x31c] sm:$0xf0] }
  0x27   :  { %v8608_v40 = vld [vmem:[#allocation3 + $0x500] sm:$0xf]  ;;  %v8353_v45 = vor.u32 %v12162_v39, %v8352_v37  ;;  %6237 = vmatpush.bf16.msra.mxu0 %v8097_v44 }
  0x28   :  { %v12226_v41 = vld [vmem:[#allocation3 + $0x51c] sm:$0xf0] }
  0x29   :  { %v8864_v42 = vld [vmem:[#allocation3 + $0x700] sm:$0xf]  ;;  %v8609_v46 = vor.u32 %v12226_v41, %v8608_v40  ;;  %6250 = vmatpush.bf16.msra.mxu1 %v8353_v45 }
  0x2a   :  { %v12290_v43 = vld [vmem:[#allocation3 + $0x71c] sm:$0xf0] }
  0x2b   :  { %v8064_v47 = vld [vmem:[#allocation3 + $0xc0] sm:$0xf]  ;;  %v8865_v50 = vor.u32 %v12290_v43, %v8864_v42  ;;  %6263 = vmatpush.bf16.msra.mxu2 %v8609_v46 }
  0x2c   :  { %v12090_v48 = vld [vmem:[#allocation3 + $0xdc] sm:$0xf0] }
  0x2d   :  { %v8320_v49 = vld [vmem:[#allocation3 + $0x2c0] sm:$0xf]  ;;  %v8065_v56 = vor.u32 %v12090_v48, %v8064_v47  ;;  %6276 = vmatpush.bf16.msra.mxu3 %v8865_v50 }
  0x2e   :  { %v12154_v51 = vld [vmem:[#allocation3 + $0x2dc] sm:$0xf0] }
  0x2f   :  { %v8576_v52 = vld [vmem:[#allocation3 + $0x4c0] sm:$0xf]  ;;  %v8321_v57 = vor.u32 %v12154_v51, %v8320_v49  ;;  %6238 = vmatpush.bf16.msra.mxu0 %v8065_v56 }
  0x30   :  { %v12218_v53 = vld [vmem:[#allocation3 + $0x4dc] sm:$0xf0] }
  0x31   :  { %v8832_v54 = vld [vmem:[#allocation3 + $0x6c0] sm:$0xf]  ;;  %v8577_v58 = vor.u32 %v12218_v53, %v8576_v52  ;;  %6251 = vmatpush.bf16.msra.mxu1 %v8321_v57 }
  0x32   :  { %v12282_v55 = vld [vmem:[#allocation3 + $0x6dc] sm:$0xf0] }
  0x33   :  { %v8032_v59 = vld [vmem:[#allocation3 + $0x80] sm:$0xf]  ;;  %v8833_v62 = vor.u32 %v12282_v55, %v8832_v54  ;;  %6264 = vmatpush.bf16.msra.mxu2 %v8577_v58 }
  0x34   :  { %v12082_v60 = vld [vmem:[#allocation3 + $0x9c] sm:$0xf0] }
  0x35   :  { %v8288_v61 = vld [vmem:[#allocation3 + $0x280] sm:$0xf]  ;;  %v8033_v4 = vor.u32 %v12082_v60, %v8032_v59  ;;  %6277 = vmatpush.bf16.msra.mxu3 %v8833_v62  ;;  %v52_v59 = vld [vmem:[%s13429_s0] sm:$0xff] }
  0x36   :  { %v12146_v63 = vld [vmem:[#allocation3 + $0x29c] sm:$0xf0]  ;;  %1079 = vst [vmem:[#allocation1] ss:$9 sm:$0xff] %v52_v59 }
  0x37   :  { %v8544_v0 = vld [vmem:[#allocation3 + $0x480] sm:$0xf]  ;;  %v8289_v5 = vor.u32 %v12146_v63, %v8288_v61  ;;  %6239 = vmatpush.bf16.msra.mxu0 %v8033_v4 }
  0x38   :  { %v12210_v1 = vld [vmem:[#allocation3 + $0x49c] sm:$0xf0] }
  0x39   :  { %v8800_v2 = vld [vmem:[#allocation3 + $0x680] sm:$0xf]  ;;  %v8545_v6 = vor.u32 %v12210_v1, %v8544_v0  ;;  %6252 = vmatpush.bf16.msra.mxu1 %v8289_v5 }
  0x3a   :  { %v12274_v3 = vld [vmem:[#allocation3 + $0x69c] sm:$0xf0] }
  0x3b   :  { %v8000_v7 = vld [vmem:[#allocation3 + $0x40] sm:$0xf]  ;;  %v8801_v10 = vor.u32 %v12274_v3, %v8800_v2  ;;  %6265 = vmatpush.bf16.msra.mxu2 %v8545_v6 }
  0x3c   :  { %v12074_v8 = vld [vmem:[#allocation3 + $0x5c] sm:$0xf0] }
  0x3d   :  { %v8256_v9 = vld [vmem:[#allocation3 + $0x240] sm:$0xf]  ;;  %v8001_v16 = vor.u32 %v12074_v8, %v8000_v7  ;;  %6278 = vmatpush.bf16.msra.mxu3 %v8801_v10 }
  0x3e   :  { %v12138_v11 = vld [vmem:[#allocation3 + $0x25c] sm:$0xf0] }
  0x3f   :  { %v8512_v12 = vld [vmem:[#allocation3 + $0x440] sm:$0xf]  ;;  %v8257_v19 = vor.u32 %v12138_v11, %v8256_v9  ;;  %6240 = vmatpush.bf16.msra.mxu0 %v8001_v16 }
  0x40   :  { %v12202_v13 = vld [vmem:[#allocation3 + $0x45c] sm:$0xf0] }
  0x41   :  { %v8768_v14 = vld [vmem:[#allocation3 + $0x640] sm:$0xf]  ;;  %v8513_v20 = vor.u32 %v12202_v13, %v8512_v12  ;;  %6253 = vmatpush.bf16.msra.mxu1 %v8257_v19 }
  0x42   :  { %v12266_v15 = vld [vmem:[#allocation3 + $0x65c] sm:$0xf0] }
  0x43   :  { %v7968_v17 = vld [vmem:[#allocation3] sm:$0xf]  ;;  %v8769_v24 = vor.u32 %v12266_v15, %v8768_v14  ;;  %6266 = vmatpush.bf16.msra.mxu2 %v8513_v20  ;;  %v13232_v20 = vld [vmem:[#allocation1 + $0x12] sm:$0xff] }
  0x44   :  { %v12066_v18 = vld [vmem:[#allocation3 + $0x1c] sm:$0xf0] }
  0x45   :  { %v8224_v21 = vld [vmem:[#allocation3 + $0x200] sm:$0xf]  ;;  %v7969_v31 = vor.u32 %v12066_v18, %v7968_v17  ;;  %6279 = vmatpush.bf16.msra.mxu3 %v8769_v24 }
  0x46   :  { %v12130_v22 = vld [vmem:[#allocation3 + $0x21c] sm:$0xf0] }
  0x47   :  { %v8480_v23 = vld [vmem:[#allocation3 + $0x400] sm:$0xf]  ;;  %v8225_v35 = vor.u32 %v12130_v22, %v8224_v21  ;;  %6241 = vmatpush.bf16.msra.mxu0 %v7969_v31  ;;  %v13234_v21 = vld [vmem:[#allocation1] sm:$0xff] }
  0x48   :  { %v12194_v25 = vld [vmem:[#allocation3 + $0x41c] sm:$0xf0]  ;;  %v13236_v22 = vld [vmem:[#allocation1 + $0x1b] sm:$0xff] }
  0x49   :  { %v8736_v26 = vld [vmem:[#allocation3 + $0x600] sm:$0xf]  ;;  %v8481_v36 = vor.u32 %v12194_v25, %v8480_v23  ;;  %6254 = vmatpush.bf16.msra.mxu1 %v8225_v35 }
  0x4a   :  { %v12258_v27 = vld [vmem:[#allocation3 + $0x61c] sm:$0xf0]  ;;  %6242 = vmatmul.bf16.vlgmr.msra.gmra.mxu0 %v13234_v21 }
  0x4b   :  { %v9216_v28 = vld [vmem:[#allocation3 + $0x9c0] sm:$0xf]  ;;  %v8737_v39 = vor.u32 %v12258_v27, %v8736_v26  ;;  %6267 = vmatpush.bf16.msra.mxu2 %v8481_v36 }
  0x4c   :  { %v12378_v29 = vld [vmem:[#allocation3 + $0x9dc] sm:$0xf0] }
  0x4d   :  { %v9472_v30 = vld [vmem:[#allocation3 + $0xbc0] sm:$0xf]  ;;  %v9217_v40 = vor.u32 %v12378_v29, %v9216_v28  ;;  %6280 = vmatpush.bf16.msra.mxu3 %v8737_v39 }
  0x4e   :  { %v12442_v32 = vld [vmem:[#allocation3 + $0xbdc] sm:$0xf0]  ;;  %6268 = vmatmul.bf16.vlgmr.msra.gmra.mxu2 %v13232_v20 }
  0x4f   :  { %v9728_v33 = vld [vmem:[#allocation3 + $0xdc0] sm:$0xf]  ;;  %v9473_v41 = vor.u32 %v12442_v32, %v9472_v30  ;;  %6286 = vmatpush.bf16.msrb.mxu0 %v9217_v40 }
  0x50   :  { %v12506_v34 = vld [vmem:[#allocation3 + $0xddc] sm:$0xf0]  ;;  %6281 = vmatmul.bf16.vlgmr.msra.gmra.mxu3 %v13236_v22 }
  0x51   :  { %v9984_v37 = vld [vmem:[#allocation3 + $0xfc0] sm:$0xf]  ;;  %v9729_v42 = vor.u32 %v12506_v34, %v9728_v33  ;;  %6299 = vmatpush.bf16.msrb.mxu1 %v9473_v41 }
  0x52   :  { %v12570_v38 = vld [vmem:[#allocation3 + $0xfdc] sm:$0xf0] }
  0x53   :  { %v9184_v43 = vld [vmem:[#allocation3 + $0x980] sm:$0xf]  ;;  %v9985_v46 = vor.u32 %v12570_v38, %v9984_v37  ;;  %6312 = vmatpush.bf16.msrb.mxu2 %v9729_v42 }
  0x54   :  { %v12370_v44 = vld [vmem:[#allocation3 + $0x99c] sm:$0xf0] }
  0x55   :  { %v9440_v45 = vld [vmem:[#allocation3 + $0xb80] sm:$0xf]  ;;  %v9185_v52 = vor.u32 %v12370_v44, %v9184_v43  ;;  %6325 = vmatpush.bf16.msrb.mxu3 %v9985_v46 }
  0x56   :  { %v12434_v47 = vld [vmem:[#allocation3 + $0xb9c] sm:$0xf0] }
  0x57   :  { %v9696_v48 = vld [vmem:[#allocation3 + $0xd80] sm:$0xf]  ;;  %v9441_v55 = vor.u32 %v12434_v47, %v9440_v45  ;;  %6287 = vmatpush.bf16.msrb.mxu0 %v9185_v52 }
  0x58   :  { %v12498_v49 = vld [vmem:[#allocation3 + $0xd9c] sm:$0xf0] }
  0x59   :  { %v9952_v50 = vld [vmem:[#allocation3 + $0xf80] sm:$0xf]  ;;  %v9697_v56 = vor.u32 %v12498_v49, %v9696_v48  ;;  %6300 = vmatpush.bf16.msrb.mxu1 %v9441_v55 }
  0x5a   :  { %v12562_v51 = vld [vmem:[#allocation3 + $0xf9c] sm:$0xf0] }
  0x5b   :  { %v9152_v53 = vld [vmem:[#allocation3 + $0x940] sm:$0xf]  ;;  %v9953_v60 = vor.u32 %v12562_v51, %v9952_v50  ;;  %6313 = vmatpush.bf16.msrb.mxu2 %v9697_v56 }
  0x5c   :  { %v12362_v54 = vld [vmem:[#allocation3 + $0x95c] sm:$0xf0] }
  0x5d   :  { %v9408_v57 = vld [vmem:[#allocation3 + $0xb40] sm:$0xf]  ;;  %v9153_v1 = vor.u32 %v12362_v54, %v9152_v53  ;;  %6326 = vmatpush.bf16.msrb.mxu3 %v9953_v60 }
  0x5e   :  { %v12426_v58 = vld [vmem:[#allocation3 + $0xb5c] sm:$0xf0] }
  0x5f   :  { %v9664_v61 = vld [vmem:[#allocation3 + $0xd40] sm:$0xf]  ;;  %v9409_v2 = vor.u32 %v12426_v58, %v9408_v57  ;;  %6288 = vmatpush.bf16.msrb.mxu0 %v9153_v1 }
  0x60   :  { %v12490_v62 = vld [vmem:[#allocation3 + $0xd5c] sm:$0xf0] }
  0x61   :  { %v9920_v63 = vld [vmem:[#allocation3 + $0xf40] sm:$0xf]  ;;  %v9665_v3 = vor.u32 %v12490_v62, %v9664_v61  ;;  %6301 = vmatpush.bf16.msrb.mxu1 %v9409_v2 }
  0x62   :  { %v12554_v0 = vld [vmem:[#allocation3 + $0xf5c] sm:$0xf0] }
  0x63   :  { %v9120_v4 = vld [vmem:[#allocation3 + $0x900] sm:$0xf]  ;;  %v9921_v7 = vor.u32 %v12554_v0, %v9920_v63  ;;  %6314 = vmatpush.bf16.msrb.mxu2 %v9665_v3 }
  0x64   :  { %v12354_v5 = vld [vmem:[#allocation3 + $0x91c] sm:$0xf0] }
  0x65   :  { %v9376_v6 = vld [vmem:[#allocation3 + $0xb00] sm:$0xf]  ;;  %v9121_v14 = vor.u32 %v12354_v5, %v9120_v4  ;;  %6327 = vmatpush.bf16.msrb.mxu3 %v9921_v7 }
  0x66   :  { %v12418_v8 = vld [vmem:[#allocation3 + $0xb1c] sm:$0xf0] }
  0x67   :  { %v9632_v9 = vld [vmem:[#allocation3 + $0xd00] sm:$0xf]  ;;  %v9377_v18 = vor.u32 %v12418_v8, %v9376_v6  ;;  %6289 = vmatpush.bf16.msrb.mxu0 %v9121_v14 }
  0x68   :  { %v12482_v10 = vld [vmem:[#allocation3 + $0xd1c] sm:$0xf0] }
  0x69   :  { %v9888_v11 = vld [vmem:[#allocation3 + $0xf00] sm:$0xf]  ;;  %v9633_v19 = vor.u32 %v12482_v10, %v9632_v9  ;;  %6302 = vmatpush.bf16.msrb.mxu1 %v9377_v18 }
  0x6a   :  { %v12546_v12 = vld [vmem:[#allocation3 + $0xf1c] sm:$0xf0] }
  0x6b   :  { %v9088_v13 = vld [vmem:[#allocation3 + $0x8c0] sm:$0xf]  ;;  %v9889_v23 = vor.u32 %v12546_v12, %v9888_v11  ;;  %6315 = vmatpush.bf16.msrb.mxu2 %v9633_v19 }
  0x6c   :  { %v12346_v15 = vld [vmem:[#allocation3 + $0x8dc] sm:$0xf0] }
  0x6d   :  { %v9344_v16 = vld [vmem:[#allocation3 + $0xac0] sm:$0xf]  ;;  %v9089_v29 = vor.u32 %v12346_v15, %v9088_v13  ;;  %6328 = vmatpush.bf16.msrb.mxu3 %v9889_v23 }
  0x6e   :  { %v12410_v17 = vld [vmem:[#allocation3 + $0xadc] sm:$0xf0] }
  0x6f   :  { %v9600_v24 = vld [vmem:[#allocation3 + $0xcc0] sm:$0xf]  ;;  %v9345_v30 = vor.u32 %v12410_v17, %v9344_v16  ;;  %6290 = vmatpush.bf16.msrb.mxu0 %v9089_v29  ;;  %v13244_v29 = vld [vmem:[#allocation1 + $0x36] sm:$0xff] }
  0x70   :  { %v12474_v25 = vld [vmem:[#allocation3 + $0xcdc] sm:$0xf0] }
  0x71   :  { %v13239_v26 = vld [vmem:[#allocation1 + $0x9] sm:$0xff]  ;;  %v9601_v31 = vor.u32 %v12474_v25, %v9600_v24  ;;  %6303 = vmatpush.bf16.msrb.mxu1 %v9345_v30 }
  0x72   :  { %v9856_v27 = vld [vmem:[#allocation3 + $0xec0] sm:$0xf]  ;;  %6255 = vmatmul.bf16.vlgmr.msra.gmra.mxu1 %v13239_v26 }
  0x73   :  { %v12538_v28 = vld [vmem:[#allocation3 + $0xedc] sm:$0xf0]  ;;  %6316 = vmatpush.bf16.msrb.mxu2 %v9601_v31 }
  0x74   :  { %v9056_v32 = vld [vmem:[#allocation3 + $0x880] sm:$0xf]  ;;  %v9857_v35 = vor.u32 %v12538_v28, %v9856_v27 }
  0x75   :  { %v12338_v33 = vld [vmem:[#allocation3 + $0x89c] sm:$0xf0] }
  0x76   :  { %v9312_v34 = vld [vmem:[#allocation3 + $0xa80] sm:$0xf]  ;;  %v9057_v41 = vor.u32 %v12338_v33, %v9056_v32  ;;  %6329 = vmatpush.bf16.msrb.mxu3 %v9857_v35  ;;  %v13248_v32 = vld [vmem:[#allocation1 + $0x3f] sm:$0xff] }
  0x77   :  { %v12402_v36 = vld [vmem:[#allocation3 + $0xa9c] sm:$0xf0] }
  0x78   :  { %v9568_v37 = vld [vmem:[#allocation3 + $0xc80] sm:$0xf]  ;;  %v9313_v42 = vor.u32 %v12402_v36, %v9312_v34  ;;  %6291 = vmatpush.bf16.msrb.mxu0 %v9057_v41 }
  0x79   :  { %v12466_v38 = vld [vmem:[#allocation3 + $0xc9c] sm:$0xf0] }
  0x7a   :  { %v9824_v39 = vld [vmem:[#allocation3 + $0xe80] sm:$0xf]  ;;  %v9569_v43 = vor.u32 %v12466_v38, %v9568_v37  ;;  %6304 = vmatpush.bf16.msrb.mxu1 %v9313_v42  ;;  %v13250_v38 = vld [vmem:[#allocation1 + $0x2d] sm:$0xff] }
  0x7b   :  { %v12530_v40 = vld [vmem:[#allocation3 + $0xe9c] sm:$0xf0] }
  0x7c   :  { %v9024_v44 = vld [vmem:[#allocation3 + $0x840] sm:$0xf]  ;;  %v9825_v47 = vor.u32 %v12530_v40, %v9824_v39  ;;  %6317 = vmatpush.bf16.msrb.mxu2 %v9569_v43 }
  0x7d   :  { %v12330_v45 = vld [vmem:[#allocation3 + $0x85c] sm:$0xf0] }
  0x7e   :  { %v9280_v46 = vld [vmem:[#allocation3 + $0xa40] sm:$0xf]  ;;  %v9025_v53 = vor.u32 %v12330_v45, %v9024_v44  ;;  %6330 = vmatpush.bf16.msrb.mxu3 %v9825_v47 }
  0x7f   :  { %v12394_v48 = vld [vmem:[#allocation3 + $0xa5c] sm:$0xf0] }
  0x80   :  { %v9536_v49 = vld [vmem:[#allocation3 + $0xc40] sm:$0xf]  ;;  %v9281_v56 = vor.u32 %v12394_v48, %v9280_v46  ;;  %6292 = vmatpush.bf16.msrb.mxu0 %v9025_v53 }
  0x81   :  { %v12458_v50 = vld [vmem:[#allocation3 + $0xc5c] sm:$0xf0] }
  0x82   :  { %v9792_v51 = vld [vmem:[#allocation3 + $0xe40] sm:$0xf]  ;;  %v9537_v57 = vor.u32 %v12458_v50, %v9536_v49  ;;  %6305 = vmatpush.bf16.msrb.mxu1 %v9281_v56 }
  0x83   :  { %v12522_v52 = vld [vmem:[#allocation3 + $0xe5c] sm:$0xf0] }
  0x84   :  { %v8992_v54 = vld [vmem:[#allocation3 + $0x800] sm:$0xf]  ;;  %v9793_v61 = vor.u32 %v12522_v52, %v9792_v51  ;;  %6318 = vmatpush.bf16.msrb.mxu2 %v9537_v57 }
  0x85   :  { %v12322_v55 = vld [vmem:[#allocation3 + $0x81c] sm:$0xf0] }
  0x86   :  { %v9248_v58 = vld [vmem:[#allocation3 + $0xa00] sm:$0xf]  ;;  %v8993_v4 = vor.u32 %v12322_v55, %v8992_v54  ;;  %6331 = vmatpush.bf16.msrb.mxu3 %v9793_v61 }
  0x87   :  { %v12386_v59 = vld [vmem:[#allocation3 + $0xa1c] sm:$0xf0] }
  0x88   :  { %v9504_v60 = vld [vmem:[#allocation3 + $0xc00] sm:$0xf]  ;;  %v9249_v8 = vor.u32 %v12386_v59, %v9248_v58  ;;  %6293 = vmatpush.bf16.msrb.mxu0 %v8993_v4 }
  0x89   :  { %v12450_v62 = vld [vmem:[#allocation3 + $0xc1c] sm:$0xf0] }
  0x8a   :  { %v9760_v63 = vld [vmem:[#allocation3 + $0xe00] sm:$0xf]  ;;  %v9505_v9 = vor.u32 %v12450_v62, %v9504_v60  ;;  %6306 = vmatpush.bf16.msrb.mxu1 %v9249_v8 }
  0x8b   :  { %v12514_v0 = vld [vmem:[#allocation3 + $0xe1c] sm:$0xf0] }
  0x8c   :  { %v10240_v1 = vld [vmem:[#allocation3 + $0x11c0] sm:$0xf]  ;;  %v9761_v12 = vor.u32 %v12514_v0, %v9760_v63  ;;  %6319 = vmatpush.bf16.msrb.mxu2 %v9505_v9 }
  0x8d   :  { %v12634_v2 = vld [vmem:[#allocation3 + $0x11dc] sm:$0xf0]  ;;  %6307 = vmatmul.bf16.vlgmr.msrb.gmra.mxu1 %v13250_v38 }
  0x8e   :  { %v10496_v3 = vld [vmem:[#allocation3 + $0x13c0] sm:$0xf]  ;;  %v10241_v13 = vor.u32 %v12634_v2, %v10240_v1  ;;  %6332 = vmatpush.bf16.msrb.mxu3 %v9761_v12 }
  0x8f   :  { %v12698_v5 = vld [vmem:[#allocation3 + $0x13dc] sm:$0xf0]  ;;  %6320 = vmatmul.bf16.vlgmr.msrb.gmra.mxu2 %v13244_v29 }
  0x90   :  { %v10752_v6 = vld [vmem:[#allocation3 + $0x15c0] sm:$0xf]  ;;  %v10497_v14 = vor.u32 %v12698_v5, %v10496_v3  ;;  %6338 = vmatpush.bf16.msra.mxu0 %v10241_v13 }
  0x91   :  { %v12762_v7 = vld [vmem:[#allocation3 + $0x15dc] sm:$0xf0]  ;;  %6333 = vmatmul.bf16.vlgmr.msrb.gmra.mxu3 %v13248_v32 }
  0x92   :  { %v11008_v10 = vld [vmem:[#allocation3 + $0x17c0] sm:$0xf]  ;;  %v10753_v15 = vor.u32 %v12762_v7, %v10752_v6  ;;  %6351 = vmatpush.bf16.msra.mxu1 %v10497_v14 }
  0x93   :  { %v12826_v11 = vld [vmem:[#allocation3 + $0x17dc] sm:$0xf0] }
  0x94   :  { %v10208_v16 = vld [vmem:[#allocation3 + $0x1180] sm:$0xf]  ;;  %v11009_v19 = vor.u32 %v12826_v11, %v11008_v10  ;;  %6364 = vmatpush.bf16.msra.mxu2 %v10753_v15 }
  0x95   :  { %v12626_v17 = vld [vmem:[#allocation3 + $0x119c] sm:$0xf0] }
  0x96   :  { %v10464_v18 = vld [vmem:[#allocation3 + $0x1380] sm:$0xf]  ;;  %v10209_v30 = vor.u32 %v12626_v17, %v10208_v16  ;;  %6377 = vmatpush.bf16.msra.mxu3 %v11009_v19 }
  0x97   :  { %v12690_v23 = vld [vmem:[#allocation3 + $0x139c] sm:$0xf0] }
  0x98   :  { %v10720_v24 = vld [vmem:[#allocation3 + $0x1580] sm:$0xf]  ;;  %v10465_v34 = vor.u32 %v12690_v23, %v10464_v18  ;;  %6339 = vmatpush.bf16.msra.mxu0 %v10209_v30 }
  0x99   :  { %v12754_v25 = vld [vmem:[#allocation3 + $0x159c] sm:$0xf0] }
  0x9a   :  { %v10976_v27 = vld [vmem:[#allocation3 + $0x1780] sm:$0xf]  ;;  %v10721_v35 = vor.u32 %v12754_v25, %v10720_v24  ;;  %6352 = vmatpush.bf16.msra.mxu1 %v10465_v34 }
  0x9b   :  { %v12818_v28 = vld [vmem:[#allocation3 + $0x179c] sm:$0xf0] }
  0x9c   :  { %v13246_v31 = vld [vmem:[#allocation1 + $0x24] sm:$0xff]  ;;  %v10977_v39 = vor.u32 %v12818_v28, %v10976_v27  ;;  %6365 = vmatpush.bf16.msra.mxu2 %v10721_v35 }
  0x9d   :  { %v10176_v33 = vld [vmem:[#allocation3 + $0x1140] sm:$0xf]  ;;  %6294 = vmatmul.bf16.vlgmr.msrb.gmra.mxu0 %v13246_v31 }
  0x9e   :  { %v12618_v36 = vld [vmem:[#allocation3 + $0x115c] sm:$0xf0]  ;;  %6378 = vmatpush.bf16.msra.mxu3 %v10977_v39 }
  0x9f   :  { %v10432_v37 = vld [vmem:[#allocation3 + $0x1340] sm:$0xf]  ;;  %v10177_v45 = vor.u32 %v12618_v36, %v10176_v33 }
  0xa0   :  { %v12682_v40 = vld [vmem:[#allocation3 + $0x135c] sm:$0xf0] }
  0xa1   :  { %v10688_v41 = vld [vmem:[#allocation3 + $0x1540] sm:$0xf]  ;;  %v10433_v46 = vor.u32 %v12682_v40, %v10432_v37  ;;  %6340 = vmatpush.bf16.msra.mxu0 %v10177_v45 }
  0xa2   :  { %v12746_v42 = vld [vmem:[#allocation3 + $0x155c] sm:$0xf0] }
  0xa3   :  { %v10944_v43 = vld [vmem:[#allocation3 + $0x1740] sm:$0xf]  ;;  %v10689_v47 = vor.u32 %v12746_v42, %v10688_v41  ;;  %6353 = vmatpush.bf16.msra.mxu1 %v10433_v46 }
  0xa4   :  { %v12810_v44 = vld [vmem:[#allocation3 + $0x175c] sm:$0xf0] }
  0xa5   :  { %v10144_v48 = vld [vmem:[#allocation3 + $0x1100] sm:$0xf]  ;;  %v10945_v51 = vor.u32 %v12810_v44, %v10944_v43  ;;  %6366 = vmatpush.bf16.msra.mxu2 %v10689_v47 }
  0xa6   :  { %v12610_v49 = vld [vmem:[#allocation3 + $0x111c] sm:$0xf0] }
  0xa7   :  { %v10400_v50 = vld [vmem:[#allocation3 + $0x1300] sm:$0xf]  ;;  %v10145_v58 = vor.u32 %v12610_v49, %v10144_v48  ;;  %6379 = vmatpush.bf16.msra.mxu3 %v10945_v51 }
  0xa8   :  { %v12674_v52 = vld [vmem:[#allocation3 + $0x131c] sm:$0xf0] }
  0xa9   :  { %v10656_v53 = vld [vmem:[#allocation3 + $0x1500] sm:$0xf]  ;;  %v10401_v59 = vor.u32 %v12674_v52, %v10400_v50  ;;  %6341 = vmatpush.bf16.msra.mxu0 %v10145_v58 }
  0xaa   :  { %v12738_v54 = vld [vmem:[#allocation3 + $0x151c] sm:$0xf0] }
  0xab   :  { %v10912_v55 = vld [vmem:[#allocation3 + $0x1700] sm:$0xf]  ;;  %v10657_v60 = vor.u32 %v12738_v54, %v10656_v53  ;;  %6354 = vmatpush.bf16.msra.mxu1 %v10401_v59 }
  0xac   :  { %v12802_v56 = vld [vmem:[#allocation3 + $0x171c] sm:$0xf0] }
  0xad   :  { %v53_v57 = vld [vmem:[%s13429_s0 + $0x8] sm:$0xff]  ;;  %v10913_v0 = vor.u32 %v12802_v56, %v10912_v55  ;;  %6367 = vmatpush.bf16.msra.mxu2 %v10657_v60 }
  0xae   :  { %1089 = vst [vmem:[#allocation1] ss:$9 sm:$0xff] %v53_v57  ;;  %v10112_v61 = vld [vmem:[#allocation3 + $0x10c0] sm:$0xf] }
  0xaf   :  { %v12602_v62 = vld [vmem:[#allocation3 + $0x10dc] sm:$0xf0]  ;;  %6380 = vmatpush.bf16.msra.mxu3 %v10913_v0 }
  0xb0   :  { %v10368_v63 = vld [vmem:[#allocation3 + $0x12c0] sm:$0xf]  ;;  %v10113_v6 = vor.u32 %v12602_v62, %v10112_v61 }
  0xb1   :  { %v12666_v1 = vld [vmem:[#allocation3 + $0x12dc] sm:$0xf0] }
  0xb2   :  { %v10624_v2 = vld [vmem:[#allocation3 + $0x14c0] sm:$0xf]  ;;  %v10369_v7 = vor.u32 %v12666_v1, %v10368_v63  ;;  %6342 = vmatpush.bf16.msra.mxu0 %v10113_v6 }
  0xb3   :  { %v12730_v3 = vld [vmem:[#allocation3 + $0x14dc] sm:$0xf0] }
  0xb4   :  { %v10880_v4 = vld [vmem:[#allocation3 + $0x16c0] sm:$0xf]  ;;  %v10625_v8 = vor.u32 %v12730_v3, %v10624_v2  ;;  %6355 = vmatpush.bf16.msra.mxu1 %v10369_v7 }
  0xb5   :  { %v12794_v5 = vld [vmem:[#allocation3 + $0x16dc] sm:$0xf0] }
  0xb6   :  { %v10080_v9 = vld [vmem:[#allocation3 + $0x1080] sm:$0xf]  ;;  %v10881_v12 = vor.u32 %v12794_v5, %v10880_v4  ;;  %6368 = vmatpush.bf16.msra.mxu2 %v10625_v8  ;;  %v1090_v8 = vld [vmem:[#allocation1] sm:$0xff] }
  0xb7   :  { %v12594_v10 = vld [vmem:[#allocation3 + $0x109c] sm:$0xf0] }
  0xb8   :  { %v10336_v11 = vld [vmem:[#allocation3 + $0x1280] sm:$0xf]  ;;  %v10081_v18 = vor.u32 %v12594_v10, %v10080_v9  ;;  %6381 = vmatpush.bf16.msra.mxu3 %v10881_v12 }
  0xb9   :  { %v12658_v13 = vld [vmem:[#allocation3 + $0x129c] sm:$0xf0] }
  0xba   :  { %v10592_v14 = vld [vmem:[#allocation3 + $0x1480] sm:$0xf]  ;;  %v10337_v19 = vor.u32 %v12658_v13, %v10336_v11  ;;  %6343 = vmatpush.bf16.msra.mxu0 %v10081_v18  ;;  %v1092_v11 = vld [vmem:[#allocation1 + $0x12] sm:$0xff] }
  0xbb   :  { %v12722_v15 = vld [vmem:[#allocation3 + $0x149c] sm:$0xf0] }
  0xbc   :  { %v10848_v16 = vld [vmem:[#allocation3 + $0x1680] sm:$0xf]  ;;  %v10593_v23 = vor.u32 %v12722_v15, %v10592_v14  ;;  %6356 = vmatpush.bf16.msra.mxu1 %v10337_v19  ;;  %v1093_v15 = vld [vmem:[#allocation1 + $0x1b] sm:$0xff] }
  0xbd   :  { %v12786_v17 = vld [vmem:[#allocation3 + $0x169c] sm:$0xf0] }
  0xbe   :  { %v10048_v24 = vld [vmem:[#allocation3 + $0x1040] sm:$0xf]  ;;  %v10849_v28 = vor.u32 %v12786_v17, %v10848_v16  ;;  %6369 = vmatpush.bf16.msra.mxu2 %v10593_v23 }
  0xbf   :  { %v12586_v25 = vld [vmem:[#allocation3 + $0x105c] sm:$0xf0] }
  0xc0   :  { %v10304_v27 = vld [vmem:[#allocation3 + $0x1240] sm:$0xf]  ;;  %v10049_v37 = vor.u32 %v12586_v25, %v10048_v24  ;;  %6382 = vmatpush.bf16.msra.mxu3 %v10849_v28 }
  0xc1   :  { %v12650_v30 = vld [vmem:[#allocation3 + $0x125c] sm:$0xf0] }
  0xc2   :  { %v10560_v33 = vld [vmem:[#allocation3 + $0x1440] sm:$0xf]  ;;  %v10305_v41 = vor.u32 %v12650_v30, %v10304_v27  ;;  %6344 = vmatpush.bf16.msra.mxu0 %v10049_v37 }
  0xc3   :  { %v12714_v34 = vld [vmem:[#allocation3 + $0x145c] sm:$0xf0] }
  0xc4   :  { %v10816_v35 = vld [vmem:[#allocation3 + $0x1640] sm:$0xf]  ;;  %v10561_v42 = vor.u32 %v12714_v34, %v10560_v33  ;;  %6357 = vmatpush.bf16.msra.mxu1 %v10305_v41 }
  0xc5   :  { %v12778_v36 = vld [vmem:[#allocation3 + $0x165c] sm:$0xf0] }
  0xc6   :  { %v10016_v39 = vld [vmem:[#allocation3 + $0x1000] sm:$0xf]  ;;  %v10817_v46 = vor.u32 %v12778_v36, %v10816_v35  ;;  %6370 = vmatpush.bf16.msra.mxu2 %v10561_v42 }
  0xc7   :  { %v12578_v40 = vld [vmem:[#allocation3 + $0x101c] sm:$0xf0] }
  0xc8   :  { %v10272_v43 = vld [vmem:[#allocation3 + $0x1200] sm:$0xf]  ;;  %v10017_v53 = vor.u32 %v12578_v40, %v10016_v39  ;;  %6383 = vmatpush.bf16.msra.mxu3 %v10817_v46 }
  0xc9   :  { %v12642_v44 = vld [vmem:[#allocation3 + $0x121c] sm:$0xf0] }
  0xca   :  { %v10528_v45 = vld [vmem:[#allocation3 + $0x1400] sm:$0xf]  ;;  %v10273_v57 = vor.u32 %v12642_v44, %v10272_v43  ;;  %6345 = vmatpush.bf16.msra.mxu0 %v10017_v53 }
  0xcb   :  { %v12706_v47 = vld [vmem:[#allocation3 + $0x141c] sm:$0xf0] }
  0xcc   :  { %v10784_v48 = vld [vmem:[#allocation3 + $0x1600] sm:$0xf]  ;;  %v10529_v58 = vor.u32 %v12706_v47, %v10528_v45  ;;  %6358 = vmatpush.bf16.msra.mxu1 %v10273_v57 }
  0xcd   :  { %v12770_v49 = vld [vmem:[#allocation3 + $0x161c] sm:$0xf0]  ;;  %6346 = vmatmul.bf16.vlgmr.msra.gmra.mxu0 %v1090_v8 }
  0xce   :  { %v11264_v50 = vld [vmem:[#allocation3 + $0x19c0] sm:$0xf]  ;;  %v10785_v61 = vor.u32 %v12770_v49, %v10784_v48  ;;  %6371 = vmatpush.bf16.msra.mxu2 %v10529_v58 }
  0xcf   :  { %v12890_v51 = vld [vmem:[#allocation3 + $0x19dc] sm:$0xf0] }
  0xd0   :  { %v11520_v52 = vld [vmem:[#allocation3 + $0x1bc0] sm:$0xf]  ;;  %v11265_v62 = vor.u32 %v12890_v51, %v11264_v50  ;;  %6384 = vmatpush.bf16.msra.mxu3 %v10785_v61 }
  0xd1   :  { %v12954_v54 = vld [vmem:[#allocation3 + $0x1bdc] sm:$0xf0]  ;;  %6372 = vmatmul.bf16.vlgmr.msra.gmra.mxu2 %v1092_v11 }
  0xd2   :  { %v11776_v55 = vld [vmem:[#allocation3 + $0x1dc0] sm:$0xf]  ;;  %v11521_v63 = vor.u32 %v12954_v54, %v11520_v52  ;;  %6390 = vmatpush.bf16.msrb.mxu0 %v11265_v62 }
  0xd3   :  { %v13018_v56 = vld [vmem:[#allocation3 + $0x1ddc] sm:$0xf0]  ;;  %6385 = vmatmul.bf16.vlgmr.msra.gmra.mxu3 %v1093_v15 }
  0xd4   :  { %v12032_v59 = vld [vmem:[#allocation3 + $0x1fc0] sm:$0xf]  ;;  %v11777_v0 = vor.u32 %v13018_v56, %v11776_v55  ;;  %6403 = vmatpush.bf16.msrb.mxu1 %v11521_v63 }
  0xd5   :  { %v13082_v60 = vld [vmem:[#allocation3 + $0x1fdc] sm:$0xf0] }
  0xd6   :  { %v11232_v1 = vld [vmem:[#allocation3 + $0x1980] sm:$0xf]  ;;  %v12033_v4 = vor.u32 %v13082_v60, %v12032_v59  ;;  %6416 = vmatpush.bf16.msrb.mxu2 %v11777_v0 }
  0xd7   :  { %v12882_v2 = vld [vmem:[#allocation3 + $0x199c] sm:$0xf0] }
  0xd8   :  { %v11488_v3 = vld [vmem:[#allocation3 + $0x1b80] sm:$0xf]  ;;  %v11233_v13 = vor.u32 %v12882_v2, %v11232_v1  ;;  %6429 = vmatpush.bf16.msrb.mxu3 %v12033_v4 }
  0xd9   :  { %v12946_v5 = vld [vmem:[#allocation3 + $0x1b9c] sm:$0xf0] }
  0xda   :  { %v11744_v6 = vld [vmem:[#allocation3 + $0x1d80] sm:$0xf]  ;;  %v11489_v16 = vor.u32 %v12946_v5, %v11488_v3  ;;  %6391 = vmatpush.bf16.msrb.mxu0 %v11233_v13 }
  0xdb   :  { %v13010_v7 = vld [vmem:[#allocation3 + $0x1d9c] sm:$0xf0] }
  0xdc   :  { %v12000_v9 = vld [vmem:[#allocation3 + $0x1f80] sm:$0xf]  ;;  %v11745_v17 = vor.u32 %v13010_v7, %v11744_v6  ;;  %6404 = vmatpush.bf16.msrb.mxu1 %v11489_v16 }
  0xdd   :  { %v13074_v10 = vld [vmem:[#allocation3 + $0x1f9c] sm:$0xf0] }
  0xde   :  { %v1091_v12 = vld [vmem:[#allocation1 + $0x9] sm:$0xff]  ;;  %v12001_v23 = vor.u32 %v13074_v10, %v12000_v9  ;;  %6417 = vmatpush.bf16.msrb.mxu2 %v11745_v17 }
  0xdf   :  { %v11200_v14 = vld [vmem:[#allocation3 + $0x1940] sm:$0xf]  ;;  %6359 = vmatmul.bf16.vlgmr.msra.gmra.mxu1 %v1091_v12 }
  0xe0   :  { %v12874_v18 = vld [vmem:[#allocation3 + $0x195c] sm:$0xf0]  ;;  %6430 = vmatpush.bf16.msrb.mxu3 %v12001_v23 }
  0xe1   :  { %v11456_v19 = vld [vmem:[#allocation3 + $0x1b40] sm:$0xf]  ;;  %v11201_v33 = vor.u32 %v12874_v18, %v11200_v14 }
  0xe2   :  { %v12938_v24 = vld [vmem:[#allocation3 + $0x1b5c] sm:$0xf0] }
  0xe3   :  { %v11712_v25 = vld [vmem:[#allocation3 + $0x1d40] sm:$0xf]  ;;  %v11457_v34 = vor.u32 %v12938_v24, %v11456_v19  ;;  %6392 = vmatpush.bf16.msrb.mxu0 %v11201_v33 }
  0xe4   :  { %v13002_v27 = vld [vmem:[#allocation3 + $0x1d5c] sm:$0xf0] }
  0xe5   :  { %v11968_v28 = vld [vmem:[#allocation3 + $0x1f40] sm:$0xf]  ;;  %v11713_v35 = vor.u32 %v13002_v27, %v11712_v25  ;;  %6405 = vmatpush.bf16.msrb.mxu1 %v11457_v34 }
  0xe6   :  { %v13066_v30 = vld [vmem:[#allocation3 + $0x1f5c] sm:$0xf0] }
  0xe7   :  { %v11168_v36 = vld [vmem:[#allocation3 + $0x1900] sm:$0xf]  ;;  %v11969_v40 = vor.u32 %v13066_v30, %v11968_v28  ;;  %6418 = vmatpush.bf16.msrb.mxu2 %v11713_v35 }
  0xe8   :  { %v12866_v37 = vld [vmem:[#allocation3 + $0x191c] sm:$0xf0] }
  0xe9   :  { %v11424_v39 = vld [vmem:[#allocation3 + $0x1b00] sm:$0xf]  ;;  %v11169_v46 = vor.u32 %v12866_v37, %v11168_v36  ;;  %6431 = vmatpush.bf16.msrb.mxu3 %v11969_v40  ;;  %v12118_v37 = vld [vmem:[#allocation3 + $0x1c4] sm:$0xf] }
  0xea   :  { %v12930_v41 = vld [vmem:[#allocation3 + $0x1b1c] sm:$0xf0]  ;;  %v12182_v40 = vld [vmem:[#allocation3 + $0x3c4] sm:$0xf] }
  0xeb   :  { %v11680_v42 = vld [vmem:[#allocation3 + $0x1d00] sm:$0xf]  ;;  %v11425_v47 = vor.u32 %v12930_v41, %v11424_v39  ;;  %6393 = vmatpush.bf16.msrb.mxu0 %v11169_v46  ;;  %v8194_v39 = vld [vmem:[#allocation3 + $0x1e0] sm:$0xf0] }
  0xec   :  { %v12994_v43 = vld [vmem:[#allocation3 + $0x1d1c] sm:$0xf0] }
  0xed   :  { %v11936_v44 = vld [vmem:[#allocation3 + $0x1f00] sm:$0xf]  ;;  %v11681_v48 = vor.u32 %v12994_v43, %v11680_v42  ;;  %6406 = vmatpush.bf16.msrb.mxu1 %v11425_v47  ;;  %v8450_v42 = vld [vmem:[#allocation3 + $0x3e0] sm:$0xf0] }
  0xee   :  { %v13058_v45 = vld [vmem:[#allocation3 + $0x1f1c] sm:$0xf0]  ;;  %v12246_v43 = vld [vmem:[#allocation3 + $0x5c4] sm:$0xf] }
  0xef   :  { %v11136_v49 = vld [vmem:[#allocation3 + $0x18c0] sm:$0xf]  ;;  %v11937_v52 = vor.u32 %v13058_v45, %v11936_v44  ;;  %6419 = vmatpush.bf16.msrb.mxu2 %v11681_v48  ;;  %v8706_v44 = vld [vmem:[#allocation3 + $0x5e0] sm:$0xf0] }
  0xf0   :  { %v12858_v50 = vld [vmem:[#allocation3 + $0x18dc] sm:$0xf0]  ;;  %v12310_v47 = vld [vmem:[#allocation3 + $0x7c4] sm:$0xf] }
  0xf1   :  { %v11392_v51 = vld [vmem:[#allocation3 + $0x1ac0] sm:$0xf]  ;;  %v11137_v58 = vor.u32 %v12858_v50, %v11136_v49  ;;  %6432 = vmatpush.bf16.msrb.mxu3 %v11937_v52  ;;  %v8962_v48 = vld [vmem:[#allocation3 + $0x7e0] sm:$0xf0]  ;;  %v8197_v50 = vor.u32 %v12118_v37, %v8194_v39  ;;  %v8709_v52 = vor.u32 %v12246_v43, %v8706_v44 }
  0xf2   :  { %v12922_v53 = vld [vmem:[#allocation3 + $0x1adc] sm:$0xf0]  ;;  %v8066_v37 = vld [vmem:[#allocation3 + $0xe0] sm:$0xf0] }
  0xf3   :  { %v11648_v54 = vld [vmem:[#allocation3 + $0x1cc0] sm:$0xf]  ;;  %v11393_v59 = vor.u32 %v12922_v53, %v11392_v51  ;;  %6394 = vmatpush.bf16.msrb.mxu0 %v11137_v58  ;;  %v8453_v51 = vor.u32 %v12182_v40, %v8450_v42  ;;  %v12110_v53 = vld [vmem:[#allocation3 + $0x184] sm:$0xf] }
  0xf4   :  { %v12986_v55 = vld [vmem:[#allocation3 + $0x1cdc] sm:$0xf0]  ;;  %v12238_v58 = vld [vmem:[#allocation3 + $0x584] sm:$0xf] }
  0xf5   :  { %v11904_v56 = vld [vmem:[#allocation3 + $0x1ec0] sm:$0xf]  ;;  %v11649_v60 = vor.u32 %v12986_v55, %v11648_v54  ;;  %6407 = vmatpush.bf16.msrb.mxu1 %v11393_v59  ;;  %v8162_v54 = vld [vmem:[#allocation3 + $0x1a0] sm:$0xf0] }
  0xf6   :  { %v13050_v57 = vld [vmem:[#allocation3 + $0x1edc] sm:$0xf0]  ;;  %v12174_v55 = vld [vmem:[#allocation3 + $0x384] sm:$0xf] }
  0xf7   :  { %v11104_v61 = vld [vmem:[#allocation3 + $0x1880] sm:$0xf]  ;;  %v11905_v0 = vor.u32 %v13050_v57, %v11904_v56  ;;  %6420 = vmatpush.bf16.msrb.mxu2 %v11649_v60  ;;  %v8965_v56 = vor.u32 %v12310_v47, %v8962_v48  ;;  %v8418_v57 = vld [vmem:[#allocation3 + $0x3a0] sm:$0xf0] }
  0xf8   :  { %v12850_v62 = vld [vmem:[#allocation3 + $0x189c] sm:$0xf0]  ;;  %v8674_v59 = vld [vmem:[#allocation3 + $0x5a0] sm:$0xf0] }
  0xf9   :  { %v11360_v63 = vld [vmem:[#allocation3 + $0x1a80] sm:$0xf]  ;;  %v11105_v6 = vor.u32 %v12850_v62, %v11104_v61  ;;  %6433 = vmatpush.bf16.msrb.mxu3 %v11905_v0  ;;  %v12302_v61 = vld [vmem:[#allocation3 + $0x784] sm:$0xf] }
  0xfa   :  { %v12914_v1 = vld [vmem:[#allocation3 + $0x1a9c] sm:$0xf0]  ;;  %v8930_v62 = vld [vmem:[#allocation3 + $0x7a0] sm:$0xf0] }
  0xfb   :  { %v11616_v2 = vld [vmem:[#allocation3 + $0x1c80] sm:$0xf]  ;;  %v11361_v7 = vor.u32 %v12914_v1, %v11360_v63  ;;  %6395 = vmatpush.bf16.msrb.mxu0 %v11105_v6  ;;  %v1096_v63 = vld [vmem:[#allocation1 + $0x36] sm:$0xff]  ;;  %v1095_v0 = vld [vmem:[#allocation1 + $0x2d] sm:$0xff] }
  0xfc   :  { %v12978_v3 = vld [vmem:[#allocation3 + $0x1c9c] sm:$0xf0]  ;;  %v1097_v1 = vld [vmem:[#allocation1 + $0x3f] sm:$0xff]  ;;  %v8130_v6 = vld [vmem:[#allocation3 + $0x160] sm:$0xf0] }
  0xfd   :  { %v11872_v4 = vld [vmem:[#allocation3 + $0x1e80] sm:$0xf]  ;;  %v11617_v8 = vor.u32 %v12978_v3, %v11616_v2  ;;  %6408 = vmatpush.bf16.msrb.mxu1 %v11361_v7  ;;  %v8165_v2 = vor.u32 %v12110_v53, %v8162_v54  ;;  %v8421_v3 = vor.u32 %v12174_v55, %v8418_v57  ;;  %v12166_v7 = vld [vmem:[#allocation3 + $0x344] sm:$0xf] }
  0xfe   :  { %v13042_v5 = vld [vmem:[#allocation3 + $0x1e9c] sm:$0xf0]  ;;  %v12150_v39 = vld [vmem:[#allocation3 + $0x2c4] sm:$0xf] }
  0xff   :  { %v11072_v9 = vld [vmem:[#allocation3 + $0x1840] sm:$0xf]  ;;  %v11873_v12 = vor.u32 %v13042_v5, %v11872_v4  ;;  %6421 = vmatpush.bf16.msrb.mxu2 %v11617_v8  ;;  %v8677_v4 = vor.u32 %v12238_v58, %v8674_v59  ;;  %v12102_v5 = vld [vmem:[#allocation3 + $0x144] sm:$0xf]  ;;  %v8933_v8 = vor.u32 %v12302_v61, %v8930_v62 }
 0x100   :  { %v12842_v10 = vld [vmem:[#allocation3 + $0x185c] sm:$0xf0]  ;;  %v12214_v42 = vld [vmem:[#allocation3 + $0x4c4] sm:$0xf] }
 0x101   :  { %v11328_v11 = vld [vmem:[#allocation3 + $0x1a40] sm:$0xf]  ;;  %v11073_v18 = vor.u32 %v12842_v10, %v11072_v9  ;;  %6434 = vmatpush.bf16.msrb.mxu3 %v11873_v12  ;;  %v8386_v9 = vld [vmem:[#allocation3 + $0x360] sm:$0xf0] }
 0x102   :  { %v12906_v13 = vld [vmem:[#allocation3 + $0x1a5c] sm:$0xf0]  ;;  %v12230_v10 = vld [vmem:[#allocation3 + $0x544] sm:$0xf] }
 0x103   :  { %v11584_v14 = vld [vmem:[#allocation3 + $0x1c40] sm:$0xf]  ;;  %v11329_v24 = vor.u32 %v12906_v13, %v11328_v11  ;;  %6396 = vmatpush.bf16.msrb.mxu0 %v11073_v18  ;;  %v8642_v11 = vld [vmem:[#allocation3 + $0x560] sm:$0xf0] }
 0x104   :  { %v12970_v15 = vld [vmem:[#allocation3 + $0x1c5c] sm:$0xf0]  ;;  %v12294_v12 = vld [vmem:[#allocation3 + $0x744] sm:$0xf] }
 0x105   :  { %v11840_v16 = vld [vmem:[#allocation3 + $0x1e40] sm:$0xf]  ;;  %v11585_v25 = vor.u32 %v12970_v15, %v11584_v14  ;;  %6409 = vmatpush.bf16.msrb.mxu1 %v11329_v24  ;;  %v8898_v13 = vld [vmem:[#allocation3 + $0x760] sm:$0xf0]  ;;  %v8133_v14 = vor.u32 %v12102_v5, %v8130_v6  ;;  %v8389_v15 = vor.u32 %v12166_v7, %v8386_v9 }
 0x106   :  { %v13034_v17 = vld [vmem:[#allocation3 + $0x1e5c] sm:$0xf0]  ;;  %v8098_v18 = vld [vmem:[#allocation3 + $0x120] sm:$0xf0] }
 0x107   :  { %v11040_v19 = vld [vmem:[#allocation3 + $0x1800] sm:$0xf]  ;;  %v11841_v33 = vor.u32 %v13034_v17, %v11840_v16  ;;  %6422 = vmatpush.bf16.msrb.mxu2 %v11585_v25  ;;  %v8645_v16 = vor.u32 %v12230_v10, %v8642_v11  ;;  %v12094_v17 = vld [vmem:[#allocation3 + $0x104] sm:$0xf] }
 0x108   :  { %v12834_v23 = vld [vmem:[#allocation3 + $0x181c] sm:$0xf0]  ;;  %v8354_v24 = vld [vmem:[#allocation3 + $0x320] sm:$0xf0] }
 0x109   :  { %v11296_v27 = vld [vmem:[#allocation3 + $0x1a00] sm:$0xf]  ;;  %v11041_v41 = vor.u32 %v12834_v23, %v11040_v19  ;;  %6435 = vmatpush.bf16.msrb.mxu3 %v11841_v33  ;;  %v12158_v19 = vld [vmem:[#allocation3 + $0x304] sm:$0xf]  ;;  %v8901_v23 = vor.u32 %v12294_v12, %v8898_v13  ;;  %v8101_v33 = vor.u32 %v12094_v17, %v8098_v18 }
 0x10a   :  { %v12898_v28 = vld [vmem:[#allocation3 + $0x1a1c] sm:$0xf0]  ;;  %v12222_v25 = vld [vmem:[#allocation3 + $0x504] sm:$0xf] }
 0x10b   :  { %v11552_v30 = vld [vmem:[#allocation3 + $0x1c00] sm:$0xf]  ;;  %v11297_v45 = vor.u32 %v12898_v28, %v11296_v27  ;;  %6397 = vmatpush.bf16.msrb.mxu0 %v11041_v41  ;;  %v8610_v27 = vld [vmem:[#allocation3 + $0x520] sm:$0xf0] }
 0x10c   :  { %v12962_v34 = vld [vmem:[#allocation3 + $0x1c1c] sm:$0xf0]  ;;  %v12286_v28 = vld [vmem:[#allocation3 + $0x704] sm:$0xf] }
 0x10d   :  { %v11808_v35 = vld [vmem:[#allocation3 + $0x1e00] sm:$0xf]  ;;  %v11553_v46 = vor.u32 %v12962_v34, %v11552_v30  ;;  %6410 = vmatpush.bf16.msrb.mxu1 %v11297_v45  ;;  %v8866_v30 = vld [vmem:[#allocation3 + $0x720] sm:$0xf0]  ;;  %v8357_v34 = vor.u32 %v12158_v19, %v8354_v24 }
 0x10e   :  { %v13026_v36 = vld [vmem:[#allocation3 + $0x1e1c] sm:$0xf0]  ;;  %v8869_v40 = vor.u32 %v12286_v28, %v8866_v30  ;;  %v8322_v41 = vld [vmem:[#allocation3 + $0x2e0] sm:$0xf0] }
 0x10f   :  { %v11809_v49 = vor.u32 %v13026_v36, %v11808_v35  ;;  %6423 = vmatpush.bf16.msrb.mxu2 %v11553_v46  ;;  %v1094_v60 = vld [vmem:[#allocation1 + $0x24] sm:$0xff]  ;;  %6442 = vmatpush.bf16.msra.mxu0 %v8197_v50  ;;  %v8613_v35 = vor.u32 %v12222_v25, %v8610_v27  ;;  %v12086_v36 = vld [vmem:[#allocation3 + $0xc4] sm:$0xf]  ;;  %v8325_v47 = vor.u32 %v12150_v39, %v8322_v41 }
 0x110   :  { %6398 = vmatmul.bf16.vlgmr.msrb.gmra.mxu0 %v1094_v60  ;;  %6411 = vmatmul.bf16.vlgmr.msrb.gmra.mxu1 %v1095_v0  ;;  %v8578_v43 = vld [vmem:[#allocation3 + $0x4e0] sm:$0xf0]  ;;  %v8069_v46 = vor.u32 %v12086_v36, %v8066_v37 }
 0x111   :  { %6436 = vmatpush.bf16.msrb.mxu3 %v11809_v49  ;;  %6455 = vmatpush.bf16.msra.mxu1 %v8453_v51  ;;  %v12278_v44 = vld [vmem:[#allocation3 + $0x6c4] sm:$0xf]  ;;  %v8581_v48 = vor.u32 %v12214_v42, %v8578_v43 }
 0x112   :  { %6424 = vmatmul.bf16.vlgmr.msrb.gmra.mxu2 %v1096_v63  ;;  %v8834_v45 = vld [vmem:[#allocation3 + $0x6e0] sm:$0xf0] }
 0x113   :  { %6468 = vmatpush.bf16.msra.mxu2 %v8709_v52  ;;  %6443 = vmatpush.bf16.msra.mxu0 %v8165_v2  ;;  %v12078_v49 = vld [vmem:[#allocation3 + $0x84] sm:$0xf]  ;;  %v8837_v52 = vor.u32 %v12278_v44, %v8834_v45 }
 0x114   :  { %6437 = vmatmul.bf16.vlgmr.msrb.gmra.mxu3 %v1097_v1  ;;  %v8034_v50 = vld [vmem:[#allocation3 + $0xa0] sm:$0xf0] }
 0x115   :  { %6481 = vmatpush.bf16.msra.mxu3 %v8965_v56  ;;  %6456 = vmatpush.bf16.msra.mxu1 %v8421_v3  ;;  %v12142_v51 = vld [vmem:[#allocation3 + $0x284] sm:$0xf]  ;;  %v8037_v58 = vor.u32 %v12078_v49, %v8034_v50 }
 0x116   :  { %v8290_v53 = vld [vmem:[#allocation3 + $0x2a0] sm:$0xf0] }
 0x117   :  { %6469 = vmatpush.bf16.msra.mxu2 %v8677_v4  ;;  %6444 = vmatpush.bf16.msra.mxu0 %v8133_v14  ;;  %v12206_v54 = vld [vmem:[#allocation3 + $0x484] sm:$0xf]  ;;  %v8293_v59 = vor.u32 %v12142_v51, %v8290_v53 }
 0x118   :  { %v8546_v55 = vld [vmem:[#allocation3 + $0x4a0] sm:$0xf0] }
 0x119   :  { %6482 = vmatpush.bf16.msra.mxu3 %v8933_v8  ;;  %6457 = vmatpush.bf16.msra.mxu1 %v8389_v15  ;;  %v12270_v56 = vld [vmem:[#allocation3 + $0x684] sm:$0xf]  ;;  %v8549_v60 = vor.u32 %v12206_v54, %v8546_v55 }
 0x11a   :  { %v8802_v57 = vld [vmem:[#allocation3 + $0x6a0] sm:$0xf0] }
 0x11b   :  { %6470 = vmatpush.bf16.msra.mxu2 %v8645_v16  ;;  %6445 = vmatpush.bf16.msra.mxu0 %v8101_v33  ;;  %v12070_v61 = vld [vmem:[#allocation3 + $0x44] sm:$0xf]  ;;  %v8805_v0 = vor.u32 %v12270_v56, %v8802_v57 }
 0x11c   :  { %v8002_v62 = vld [vmem:[#allocation3 + $0x60] sm:$0xf0] }
 0x11d   :  { %6483 = vmatpush.bf16.msra.mxu3 %v8901_v23  ;;  %6458 = vmatpush.bf16.msra.mxu1 %v8357_v34  ;;  %v12134_v63 = vld [vmem:[#allocation3 + $0x244] sm:$0xf]  ;;  %v8005_v6 = vor.u32 %v12070_v61, %v8002_v62 }
 0x11e   :  { %v8258_v1 = vld [vmem:[#allocation3 + $0x260] sm:$0xf0] }
 0x11f   :  { %6471 = vmatpush.bf16.msra.mxu2 %v8613_v35  ;;  %6446 = vmatpush.bf16.msra.mxu0 %v8069_v46  ;;  %v12198_v2 = vld [vmem:[#allocation3 + $0x444] sm:$0xf]  ;;  %v8261_v9 = vor.u32 %v12134_v63, %v8258_v1 }
 0x120   :  { %v8514_v3 = vld [vmem:[#allocation3 + $0x460] sm:$0xf0] }
 0x121   :  { %6484 = vmatpush.bf16.msra.mxu3 %v8869_v40  ;;  %6459 = vmatpush.bf16.msra.mxu1 %v8325_v47  ;;  %v12262_v4 = vld [vmem:[#allocation3 + $0x644] sm:$0xf]  ;;  %v8517_v10 = vor.u32 %v12198_v2, %v8514_v3 }
 0x122   :  { %v8770_v5 = vld [vmem:[#allocation3 + $0x660] sm:$0xf0] }
 0x123   :  { %6472 = vmatpush.bf16.msra.mxu2 %v8581_v48  ;;  %6447 = vmatpush.bf16.msra.mxu0 %v8037_v58  ;;  %v12062_v7 = vld [vmem:[#allocation3 + $0x4] sm:$0xf]  ;;  %v8773_v14 = vor.u32 %v12262_v4, %v8770_v5 }
 0x124   :  { %v7970_v8 = vld [vmem:[#allocation3 + $0x20] sm:$0xf0] }
 0x125   :  { %6485 = vmatpush.bf16.msra.mxu3 %v8837_v52  ;;  %6460 = vmatpush.bf16.msra.mxu1 %v8293_v59  ;;  %v12126_v11 = vld [vmem:[#allocation3 + $0x204] sm:$0xf]  ;;  %v7973_v24 = vor.u32 %v12062_v7, %v7970_v8 }
 0x126   :  { %v8226_v12 = vld [vmem:[#allocation3 + $0x220] sm:$0xf0] }
 0x127   :  { %6473 = vmatpush.bf16.msra.mxu2 %v8549_v60  ;;  %v12190_v13 = vld [vmem:[#allocation3 + $0x404] sm:$0xf]  ;;  %6448 = vmatpush.bf16.msra.mxu0 %v8005_v6  ;;  %v8229_v30 = vor.u32 %v12126_v11, %v8226_v12 }
 0x128   :  { %v8482_v15 = vld [vmem:[#allocation3 + $0x420] sm:$0xf0] }
 0x129   :  { %6486 = vmatpush.bf16.msra.mxu3 %v8805_v0  ;;  %v12254_v16 = vld [vmem:[#allocation3 + $0x604] sm:$0xf]  ;;  %6461 = vmatpush.bf16.msra.mxu1 %v8261_v9  ;;  %v8485_v33 = vor.u32 %v12190_v13, %v8482_v15 }
 0x12a   :  { %v8738_v17 = vld [vmem:[#allocation3 + $0x620] sm:$0xf0] }
 0x12b   :  { %v12374_v18 = vld [vmem:[#allocation3 + $0x9c4] sm:$0xf]  ;;  %6474 = vmatpush.bf16.msra.mxu2 %v8517_v10  ;;  %v8741_v36 = vor.u32 %v12254_v16, %v8738_v17  ;;  %6449 = vmatpush.bf16.msra.mxu0 %v7973_v24 }
 0x12c   :  { %v9218_v19 = vld [vmem:[#allocation3 + $0x9e0] sm:$0xf0] }
 0x12d   :  { %v12438_v23 = vld [vmem:[#allocation3 + $0xbc4] sm:$0xf]  ;;  %6487 = vmatpush.bf16.msra.mxu3 %v8773_v14  ;;  %v9221_v37 = vor.u32 %v12374_v18, %v9218_v19  ;;  %6462 = vmatpush.bf16.msra.mxu1 %v8229_v30 }
 0x12e   :  { %v9474_v25 = vld [vmem:[#allocation3 + $0xbe0] sm:$0xf0]  ;;  %6450 = vmatmul.bf16.vlgmr.msra.gmra.mxu0 %v13234_v21 }
 0x12f   :  { %v12502_v27 = vld [vmem:[#allocation3 + $0xdc4] sm:$0xf]  ;;  %v9477_v39 = vor.u32 %v12438_v23, %v9474_v25  ;;  %6475 = vmatpush.bf16.msra.mxu2 %v8485_v33  ;;  %6494 = vmatpush.bf16.msrb.mxu0 %v9221_v37 }
 0x130   :  { %v9730_v28 = vld [vmem:[#allocation3 + $0xde0] sm:$0xf0]  ;;  %6463 = vmatmul.bf16.vlgmr.msra.gmra.mxu1 %v13239_v26 }
 0x131   :  { %v12566_v34 = vld [vmem:[#allocation3 + $0xfc4] sm:$0xf]  ;;  %v9733_v40 = vor.u32 %v12502_v27, %v9730_v28  ;;  %6488 = vmatpush.bf16.msra.mxu3 %v8741_v36  ;;  %6507 = vmatpush.bf16.msrb.mxu1 %v9477_v39 }
 0x132   :  { %v9986_v35 = vld [vmem:[#allocation3 + $0xfe0] sm:$0xf0]  ;;  %6476 = vmatmul.bf16.vlgmr.msra.gmra.mxu2 %v13232_v20 }
 0x133   :  { %v12366_v41 = vld [vmem:[#allocation3 + $0x984] sm:$0xf]  ;;  %v9989_v44 = vor.u32 %v12566_v34, %v9986_v35  ;;  %6520 = vmatpush.bf16.msrb.mxu2 %v9733_v40 }
 0x134   :  { %v9186_v42 = vld [vmem:[#allocation3 + $0x9a0] sm:$0xf0]  ;;  %6489 = vmatmul.bf16.vlgmr.msra.gmra.mxu3 %v13236_v22 }
 0x135   :  { %v12430_v43 = vld [vmem:[#allocation3 + $0xb84] sm:$0xf]  ;;  %v9189_v50 = vor.u32 %v12366_v41, %v9186_v42  ;;  %6533 = vmatpush.bf16.msrb.mxu3 %v9989_v44 }
 0x136   :  { %v9442_v45 = vld [vmem:[#allocation3 + $0xba0] sm:$0xf0] }
 0x137   :  { %v12494_v46 = vld [vmem:[#allocation3 + $0xd84] sm:$0xf]  ;;  %v9445_v51 = vor.u32 %v12430_v43, %v9442_v45  ;;  %6495 = vmatpush.bf16.msrb.mxu0 %v9189_v50  ;;  %v6243_v43 = vpop.f32.mrf.mxu0 }
 0x138   :  { %v9698_v47 = vld [vmem:[#allocation3 + $0xda0] sm:$0xf0] }
 0x139   :  { %v12558_v48 = vld [vmem:[#allocation3 + $0xf84] sm:$0xf]  ;;  %v9701_v52 = vor.u32 %v12494_v46, %v9698_v47  ;;  %6508 = vmatpush.bf16.msrb.mxu1 %v9445_v51 }
 0x13a   :  { %v9954_v49 = vld [vmem:[#allocation3 + $0xfa0] sm:$0xf0] }
 0x13b   :  { %v12358_v53 = vld [vmem:[#allocation3 + $0x944] sm:$0xf]  ;;  %v9957_v56 = vor.u32 %v12558_v48, %v9954_v49  ;;  %6521 = vmatpush.bf16.msrb.mxu2 %v9701_v52  ;;  %v6256_v49 = vpop.f32.mrf.mxu1 }
 0x13c   :  { %v9154_v54 = vld [vmem:[#allocation3 + $0x960] sm:$0xf0] }
 0x13d   :  { %v12422_v55 = vld [vmem:[#allocation3 + $0xb44] sm:$0xf]  ;;  %v9157_v62 = vor.u32 %v12358_v53, %v9154_v54  ;;  %6534 = vmatpush.bf16.msrb.mxu3 %v9957_v56  ;;  %v6257_v54 = vadd.f32 %v6256_v49, %v6243_v43 }
 0x13e   :  { %v9410_v57 = vld [vmem:[#allocation3 + $0xb60] sm:$0xf0] }
 0x13f   :  { %v12486_v58 = vld [vmem:[#allocation3 + $0xd44] sm:$0xf]  ;;  %v9413_v63 = vor.u32 %v12422_v55, %v9410_v57  ;;  %6496 = vmatpush.bf16.msrb.mxu0 %v9157_v62 }
 0x140   :  { %v9666_v59 = vld [vmem:[#allocation3 + $0xd60] sm:$0xf0] }
 0x141   :  { %v12550_v60 = vld [vmem:[#allocation3 + $0xf44] sm:$0xf]  ;;  %v9669_v0 = vor.u32 %v12486_v58, %v9666_v59  ;;  %6509 = vmatpush.bf16.msrb.mxu1 %v9413_v63 }
 0x142   :  { %v9922_v61 = vld [vmem:[#allocation3 + $0xf60] sm:$0xf0] }
 0x143   :  { %v12350_v1 = vld [vmem:[#allocation3 + $0x904] sm:$0xf]  ;;  %v9925_v4 = vor.u32 %v12550_v60, %v9922_v61  ;;  %6522 = vmatpush.bf16.msrb.mxu2 %v9669_v0 }
 0x144   :  { %v9122_v2 = vld [vmem:[#allocation3 + $0x920] sm:$0xf0] }
 0x145   :  { %v12414_v3 = vld [vmem:[#allocation3 + $0xb04] sm:$0xf]  ;;  %v9125_v10 = vor.u32 %v12350_v1, %v9122_v2  ;;  %6535 = vmatpush.bf16.msrb.mxu3 %v9925_v4  ;;  %v6269_v1 = vpop.f32.mrf.mxu2 }
 0x146   :  { %v9378_v5 = vld [vmem:[#allocation3 + $0xb20] sm:$0xf0] }
 0x147   :  { %v12478_v6 = vld [vmem:[#allocation3 + $0xd04] sm:$0xf]  ;;  %v9381_v11 = vor.u32 %v12414_v3, %v9378_v5  ;;  %6497 = vmatpush.bf16.msrb.mxu0 %v9125_v10 }
 0x148   :  { %v9634_v7 = vld [vmem:[#allocation3 + $0xd20] sm:$0xf0] }
 0x149   :  { %v12542_v8 = vld [vmem:[#allocation3 + $0xf04] sm:$0xf]  ;;  %v9637_v12 = vor.u32 %v12478_v6, %v9634_v7  ;;  %6510 = vmatpush.bf16.msrb.mxu1 %v9381_v11  ;;  %v6270_v6 = vadd.f32 %v6269_v1, %v6257_v54  ;;  %v6282_v7 = vpop.f32.mrf.mxu3 }
 0x14a   :  { %v9890_v9 = vld [vmem:[#allocation3 + $0xf20] sm:$0xf0] }
 0x14b   :  { %v12342_v13 = vld [vmem:[#allocation3 + $0x8c4] sm:$0xf]  ;;  %v9893_v16 = vor.u32 %v12542_v8, %v9890_v9  ;;  %6523 = vmatpush.bf16.msrb.mxu2 %v9637_v12 }
 0x14c   :  { %v9090_v14 = vld [vmem:[#allocation3 + $0x8e0] sm:$0xf0] }
 0x14d   :  { %v12406_v15 = vld [vmem:[#allocation3 + $0xac4] sm:$0xf]  ;;  %v9093_v25 = vor.u32 %v12342_v13, %v9090_v14  ;;  %6536 = vmatpush.bf16.msrb.mxu3 %v9893_v16  ;;  %v6245_v16 = vpop.f32.mrf.mxu0  ;;  %v6271_v43 = vpop.f32.mrf.mxu2 }
 0x14e   :  { %v9346_v17 = vld [vmem:[#allocation3 + $0xae0] sm:$0xf0] }
 0x14f   :  { %v12470_v18 = vld [vmem:[#allocation3 + $0xcc4] sm:$0xf]  ;;  %v9349_v27 = vor.u32 %v12406_v15, %v9346_v17  ;;  %6498 = vmatpush.bf16.msrb.mxu0 %v9093_v25  ;;  %v13263_v15 = vadd.f32 %v6282_v7, %v6270_v6 }
 0x150   :  { %v9602_v19 = vld [vmem:[#allocation3 + $0xce0] sm:$0xf0] }
 0x151   :  { %v12534_v23 = vld [vmem:[#allocation3 + $0xec4] sm:$0xf]  ;;  %v9605_v28 = vor.u32 %v12470_v18, %v9602_v19  ;;  %6511 = vmatpush.bf16.msrb.mxu1 %v9349_v27 }
 0x152   :  { %v9858_v24 = vld [vmem:[#allocation3 + $0xee0] sm:$0xf0] }
 0x153   :  { %v12334_v30 = vld [vmem:[#allocation3 + $0x884] sm:$0xf]  ;;  %v9861_v35 = vor.u32 %v12534_v23, %v9858_v24  ;;  %6524 = vmatpush.bf16.msrb.mxu2 %v9605_v28  ;;  %v6258_v24 = vpop.f32.mrf.mxu1 }
 0x154   :  { %v9058_v33 = vld [vmem:[#allocation3 + $0x8a0] sm:$0xf0] }
 0x155   :  { %v12398_v34 = vld [vmem:[#allocation3 + $0xa84] sm:$0xf]  ;;  %v9061_v42 = vor.u32 %v12334_v30, %v9058_v33  ;;  %6537 = vmatpush.bf16.msrb.mxu3 %v9861_v35  ;;  %v6295_v6 = vpop.f32.mrf.mxu0 }
 0x156   :  { %v9314_v36 = vld [vmem:[#allocation3 + $0xaa0] sm:$0xf0] }
 0x157   :  { %v12462_v37 = vld [vmem:[#allocation3 + $0xc84] sm:$0xf]  ;;  %v9317_v44 = vor.u32 %v12398_v34, %v9314_v36  ;;  %6499 = vmatpush.bf16.msrb.mxu0 %v9061_v42 }
 0x158   :  { %v9570_v39 = vld [vmem:[#allocation3 + $0xca0] sm:$0xf0] }
 0x159   :  { %v12526_v40 = vld [vmem:[#allocation3 + $0xe84] sm:$0xf]  ;;  %v9573_v45 = vor.u32 %v12462_v37, %v9570_v39  ;;  %6512 = vmatpush.bf16.msrb.mxu1 %v9317_v44 }
 0x15a   :  { %v9826_v41 = vld [vmem:[#allocation3 + $0xea0] sm:$0xf0] }
 0x15b   :  { %v12326_v46 = vld [vmem:[#allocation3 + $0x844] sm:$0xf]  ;;  %v9829_v50 = vor.u32 %v12526_v40, %v9826_v41  ;;  %6525 = vmatpush.bf16.msrb.mxu2 %v9573_v45  ;;  %v6284_v45 = vpop.f32.mrf.mxu3 }
 0x15c   :  { %v9026_v47 = vld [vmem:[#allocation3 + $0x860] sm:$0xf0] }
 0x15d   :  { %v12390_v48 = vld [vmem:[#allocation3 + $0xa44] sm:$0xf]  ;;  %v9029_v57 = vor.u32 %v12326_v46, %v9026_v47  ;;  %6538 = vmatpush.bf16.msrb.mxu3 %v9829_v50 }
 0x15e   :  { %v9282_v51 = vld [vmem:[#allocation3 + $0xa60] sm:$0xf0] }
 0x15f   :  { %v12454_v52 = vld [vmem:[#allocation3 + $0xc44] sm:$0xf]  ;;  %v9285_v60 = vor.u32 %v12390_v48, %v9282_v51  ;;  %6500 = vmatpush.bf16.msrb.mxu0 %v9029_v57 }
 0x160   :  { %v9538_v53 = vld [vmem:[#allocation3 + $0xc60] sm:$0xf0] }
 0x161   :  { %v12518_v55 = vld [vmem:[#allocation3 + $0xe44] sm:$0xf]  ;;  %v9541_v61 = vor.u32 %v12454_v52, %v9538_v53  ;;  %6513 = vmatpush.bf16.msrb.mxu1 %v9285_v60 }
 0x162   :  { %v9794_v56 = vld [vmem:[#allocation3 + $0xe60] sm:$0xf0] }
 0x163   :  { %v12318_v58 = vld [vmem:[#allocation3 + $0x804] sm:$0xf]  ;;  %v9797_v2 = vor.u32 %v12518_v55, %v9794_v56  ;;  %6526 = vmatpush.bf16.msrb.mxu2 %v9541_v61 }
 0x164   :  { %v8994_v59 = vld [vmem:[#allocation3 + $0x820] sm:$0xf0] }
 0x165   :  { %v12382_v62 = vld [vmem:[#allocation3 + $0xa04] sm:$0xf]  ;;  %v8997_v11 = vor.u32 %v12318_v58, %v8994_v59  ;;  %6539 = vmatpush.bf16.msrb.mxu3 %v9797_v2 }
 0x166   :  { %v9250_v63 = vld [vmem:[#allocation3 + $0xa20] sm:$0xf0] }
 0x167   :  { %v12446_v0 = vld [vmem:[#allocation3 + $0xc04] sm:$0xf]  ;;  %v9253_v17 = vor.u32 %v12382_v62, %v9250_v63  ;;  %6501 = vmatpush.bf16.msrb.mxu0 %v8997_v11 }
 0x168   :  { %v9506_v3 = vld [vmem:[#allocation3 + $0xc20] sm:$0xf0] }
 0x169   :  { %v12510_v4 = vld [vmem:[#allocation3 + $0xe04] sm:$0xf]  ;;  %v9509_v18 = vor.u32 %v12446_v0, %v9506_v3  ;;  %6514 = vmatpush.bf16.msrb.mxu1 %v9253_v17 }
 0x16a   :  { %v9762_v5 = vld [vmem:[#allocation3 + $0xe20] sm:$0xf0]  ;;  %6502 = vmatmul.bf16.vlgmr.msrb.gmra.mxu0 %v13246_v31 }
 0x16b   :  { %v12630_v8 = vld [vmem:[#allocation3 + $0x11c4] sm:$0xf]  ;;  %v9765_v25 = vor.u32 %v12510_v4, %v9762_v5  ;;  %6527 = vmatpush.bf16.msrb.mxu2 %v9509_v18 }
 0x16c   :  { %v10242_v9 = vld [vmem:[#allocation3 + $0x11e0] sm:$0xf0]  ;;  %6515 = vmatmul.bf16.vlgmr.msrb.gmra.mxu1 %v13250_v38 }
 0x16d   :  { %v12694_v10 = vld [vmem:[#allocation3 + $0x13c4] sm:$0xf]  ;;  %v10245_v27 = vor.u32 %v12630_v8, %v10242_v9  ;;  %6540 = vmatpush.bf16.msrb.mxu3 %v9765_v25 }
 0x16e   :  { %v10498_v12 = vld [vmem:[#allocation3 + $0x13e0] sm:$0xf0]  ;;  %6528 = vmatmul.bf16.vlgmr.msrb.gmra.mxu2 %v13244_v29 }
 0x16f   :  { %v12758_v13 = vld [vmem:[#allocation3 + $0x15c4] sm:$0xf]  ;;  %v10501_v28 = vor.u32 %v12694_v10, %v10498_v12  ;;  %6546 = vmatpush.bf16.msra.mxu0 %v10245_v27  ;;  %v6296_v12 = vadd.f32 %v6295_v6, %v13263_v15 }
 0x170   :  { %v10754_v14 = vld [vmem:[#allocation3 + $0x15e0] sm:$0xf0]  ;;  %6541 = vmatmul.bf16.vlgmr.msrb.gmra.mxu3 %v13248_v32 }
 0x171   :  { %v12822_v19 = vld [vmem:[#allocation3 + $0x17c4] sm:$0xf]  ;;  %v10757_v30 = vor.u32 %v12758_v13, %v10754_v14  ;;  %6559 = vmatpush.bf16.msra.mxu1 %v10501_v28  ;;  %v6308_v13 = vpop.f32.mrf.mxu1 }
 0x172   :  { %v11010_v23 = vld [vmem:[#allocation3 + $0x17e0] sm:$0xf0]  ;;  %v6309_v24 = vadd.f32 %v6308_v13, %v6296_v12 }
 0x173   :  { %v12622_v33 = vld [vmem:[#allocation3 + $0x1184] sm:$0xf]  ;;  %v11013_v36 = vor.u32 %v12822_v19, %v11010_v23  ;;  %6572 = vmatpush.bf16.msra.mxu2 %v10757_v30 }
 0x174   :  { %v10210_v34 = vld [vmem:[#allocation3 + $0x11a0] sm:$0xf0] }
 0x175   :  { %v12686_v35 = vld [vmem:[#allocation3 + $0x1384] sm:$0xf]  ;;  %v10213_v44 = vor.u32 %v12622_v33, %v10210_v34  ;;  %6585 = vmatpush.bf16.msra.mxu3 %v11013_v36 }
 0x176   :  { %v10466_v37 = vld [vmem:[#allocation3 + $0x13a0] sm:$0xf0] }
 0x177   :  { %v12750_v39 = vld [vmem:[#allocation3 + $0x1584] sm:$0xf]  ;;  %v10469_v46 = vor.u32 %v12686_v35, %v10466_v37  ;;  %6547 = vmatpush.bf16.msra.mxu0 %v10213_v44  ;;  %v6321_v35 = vpop.f32.mrf.mxu2 }
 0x178   :  { %v10722_v40 = vld [vmem:[#allocation3 + $0x15a0] sm:$0xf0] }
 0x179   :  { %v12814_v41 = vld [vmem:[#allocation3 + $0x1784] sm:$0xf]  ;;  %v10725_v47 = vor.u32 %v12750_v39, %v10722_v40  ;;  %6560 = vmatpush.bf16.msra.mxu1 %v10469_v46  ;;  %v6322_v40 = vadd.f32 %v6321_v35, %v6309_v24  ;;  %v6297_v46 = vpop.f32.mrf.mxu0 }
 0x17a   :  { %v10978_v42 = vld [vmem:[#allocation3 + $0x17a0] sm:$0xf0] }
 0x17b   :  { %v12614_v48 = vld [vmem:[#allocation3 + $0x1144] sm:$0xf]  ;;  %v10981_v51 = vor.u32 %v12814_v41, %v10978_v42  ;;  %6573 = vmatpush.bf16.msra.mxu2 %v10725_v47  ;;  %v6334_v41 = vpop.f32.mrf.mxu3 }
 0x17c   :  { %v10178_v49 = vld [vmem:[#allocation3 + $0x1160] sm:$0xf0]  ;;  %v13270_v45 = vadd.f32 %v6334_v41, %v6322_v40 }
 0x17d   :  { %v12678_v50 = vld [vmem:[#allocation3 + $0x1344] sm:$0xf]  ;;  %v10181_v57 = vor.u32 %v12614_v48, %v10178_v49  ;;  %6586 = vmatpush.bf16.msra.mxu3 %v10981_v51 }
 0x17e   :  { %v10434_v52 = vld [vmem:[#allocation3 + $0x1360] sm:$0xf0] }
 0x17f   :  { %v12742_v53 = vld [vmem:[#allocation3 + $0x1544] sm:$0xf]  ;;  %v10437_v58 = vor.u32 %v12678_v50, %v10434_v52  ;;  %6548 = vmatpush.bf16.msra.mxu0 %v10181_v57  ;;  %v6310_v52 = vpop.f32.mrf.mxu1 }
 0x180   :  { %v10690_v54 = vld [vmem:[#allocation3 + $0x1560] sm:$0xf0] }
 0x181   :  { %v12806_v55 = vld [vmem:[#allocation3 + $0x1744] sm:$0xf]  ;;  %v10693_v59 = vor.u32 %v12742_v53, %v10690_v54  ;;  %6561 = vmatpush.bf16.msra.mxu1 %v10437_v58 }
 0x182   :  { %v10946_v56 = vld [vmem:[#allocation3 + $0x1760] sm:$0xf0] }
 0x183   :  { %v12606_v60 = vld [vmem:[#allocation3 + $0x1104] sm:$0xf]  ;;  %v10949_v63 = vor.u32 %v12806_v55, %v10946_v56  ;;  %6574 = vmatpush.bf16.msra.mxu2 %v10693_v59 }
 0x184   :  { %v10146_v61 = vld [vmem:[#allocation3 + $0x1120] sm:$0xf0] }
 0x185   :  { %v12670_v62 = vld [vmem:[#allocation3 + $0x1304] sm:$0xf]  ;;  %v10149_v5 = vor.u32 %v12606_v60, %v10146_v61  ;;  %6587 = vmatpush.bf16.msra.mxu3 %v10949_v63 }
 0x186   :  { %v10402_v0 = vld [vmem:[#allocation3 + $0x1320] sm:$0xf0] }
 0x187   :  { %v12734_v1 = vld [vmem:[#allocation3 + $0x1504] sm:$0xf]  ;;  %v10405_v7 = vor.u32 %v12670_v62, %v10402_v0  ;;  %6549 = vmatpush.bf16.msra.mxu0 %v10149_v5 }
 0x188   :  { %v10658_v2 = vld [vmem:[#allocation3 + $0x1520] sm:$0xf0] }
 0x189   :  { %v12798_v3 = vld [vmem:[#allocation3 + $0x1704] sm:$0xf]  ;;  %v10661_v8 = vor.u32 %v12734_v1, %v10658_v2  ;;  %6562 = vmatpush.bf16.msra.mxu1 %v10405_v7 }
 0x18a   :  { %v10914_v4 = vld [vmem:[#allocation3 + $0x1720] sm:$0xf0] }
 0x18b   :  { %v12598_v9 = vld [vmem:[#allocation3 + $0x10c4] sm:$0xf]  ;;  %v10917_v14 = vor.u32 %v12798_v3, %v10914_v4  ;;  %6575 = vmatpush.bf16.msra.mxu2 %v10661_v8  ;;  %v6323_v3 = vpop.f32.mrf.mxu2  ;;  %v6336_v8 = vpop.f32.mrf.mxu3 }
 0x18c   :  { %v10114_v10 = vld [vmem:[#allocation3 + $0x10e0] sm:$0xf0] }
 0x18d   :  { %v12662_v11 = vld [vmem:[#allocation3 + $0x12c4] sm:$0xf]  ;;  %v10117_v25 = vor.u32 %v12598_v9, %v10114_v10  ;;  %6588 = vmatpush.bf16.msra.mxu3 %v10917_v14 }
 0x18e   :  { %v10370_v16 = vld [vmem:[#allocation3 + $0x12e0] sm:$0xf0] }
 0x18f   :  { %v12726_v17 = vld [vmem:[#allocation3 + $0x14c4] sm:$0xf]  ;;  %v10373_v27 = vor.u32 %v12662_v11, %v10370_v16  ;;  %6550 = vmatpush.bf16.msra.mxu0 %v10117_v25 }
 0x190   :  { %v10626_v18 = vld [vmem:[#allocation3 + $0x14e0] sm:$0xf0] }
 0x191   :  { %v12790_v19 = vld [vmem:[#allocation3 + $0x16c4] sm:$0xf]  ;;  %v10629_v28 = vor.u32 %v12726_v17, %v10626_v18  ;;  %6563 = vmatpush.bf16.msra.mxu1 %v10373_v27 }
 0x192   :  { %v10882_v23 = vld [vmem:[#allocation3 + $0x16e0] sm:$0xf0] }
 0x193   :  { %v12590_v30 = vld [vmem:[#allocation3 + $0x1084] sm:$0xf]  ;;  %v10885_v15 = vor.u32 %v12790_v19, %v10882_v23  ;;  %6576 = vmatpush.bf16.msra.mxu2 %v10629_v28 }
 0x194   :  { %v10082_v33 = vld [vmem:[#allocation3 + $0x10a0] sm:$0xf0] }
 0x195   :  { %v12654_v34 = vld [vmem:[#allocation3 + $0x1284] sm:$0xf]  ;;  %v10085_v44 = vor.u32 %v12590_v30, %v10082_v33  ;;  %6589 = vmatpush.bf16.msra.mxu3 %v10885_v15 }
 0x196   :  { %v10338_v36 = vld [vmem:[#allocation3 + $0x12a0] sm:$0xf0] }
 0x197   :  { %v12718_v37 = vld [vmem:[#allocation3 + $0x1484] sm:$0xf]  ;;  %v10341_v47 = vor.u32 %v12654_v34, %v10338_v36  ;;  %6551 = vmatpush.bf16.msra.mxu0 %v10085_v44 }
 0x198   :  { %v10594_v39 = vld [vmem:[#allocation3 + $0x14a0] sm:$0xf0] }
 0x199   :  { %v12782_v42 = vld [vmem:[#allocation3 + $0x1684] sm:$0xf]  ;;  %v10597_v48 = vor.u32 %v12718_v37, %v10594_v39  ;;  %6564 = vmatpush.bf16.msra.mxu1 %v10341_v47 }
 0x19a   :  { %v10850_v43 = vld [vmem:[#allocation3 + $0x16a0] sm:$0xf0] }
 0x19b   :  { %v12582_v49 = vld [vmem:[#allocation3 + $0x1044] sm:$0xf]  ;;  %v10853_v53 = vor.u32 %v12782_v42, %v10850_v43  ;;  %6577 = vmatpush.bf16.msra.mxu2 %v10597_v48  ;;  %v13090_v48 = vld [vmem:[#allocation1] sm:$0xff] }
 0x19c   :  { %v10050_v50 = vld [vmem:[#allocation3 + $0x1060] sm:$0xf0] }
 0x19d   :  { %v12646_v51 = vld [vmem:[#allocation3 + $0x1244] sm:$0xf]  ;;  %v10053_v59 = vor.u32 %v12582_v49, %v10050_v50  ;;  %6590 = vmatpush.bf16.msra.mxu3 %v10853_v53  ;;  %v13091_v53 = vld [vmem:[#allocation1 + $0x12] sm:$0xff] }
 0x19e   :  { %v10306_v54 = vld [vmem:[#allocation3 + $0x1260] sm:$0xf0] }
 0x19f   :  { %v12710_v55 = vld [vmem:[#allocation3 + $0x1444] sm:$0xf]  ;;  %v10309_v62 = vor.u32 %v12646_v51, %v10306_v54  ;;  %6552 = vmatpush.bf16.msra.mxu0 %v10053_v59 }
 0x1a0   :  { %v10562_v56 = vld [vmem:[#allocation3 + $0x1460] sm:$0xf0] }
 0x1a1   :  { %v12774_v57 = vld [vmem:[#allocation3 + $0x1644] sm:$0xf]  ;;  %v10565_v63 = vor.u32 %v12710_v55, %v10562_v56  ;;  %6565 = vmatpush.bf16.msra.mxu1 %v10309_v62 }
 0x1a2   :  { %v10818_v58 = vld [vmem:[#allocation3 + $0x1660] sm:$0xf0] }
 0x1a3   :  { %v12574_v60 = vld [vmem:[#allocation3 + $0x1004] sm:$0xf]  ;;  %v10821_v4 = vor.u32 %v12774_v57, %v10818_v58  ;;  %6578 = vmatpush.bf16.msra.mxu2 %v10565_v63  ;;  %v13093_v57 = vld [vmem:[#allocation1 + $0x1b] sm:$0xff] }
 0x1a4   :  { %v10018_v61 = vld [vmem:[#allocation3 + $0x1020] sm:$0xf0] }
 0x1a5   :  { %v12638_v0 = vld [vmem:[#allocation3 + $0x1204] sm:$0xf]  ;;  %v10021_v12 = vor.u32 %v12574_v60, %v10018_v61  ;;  %6591 = vmatpush.bf16.msra.mxu3 %v10821_v4  ;;  %v6347_v4 = vpop.f32.mrf.mxu0 }
 0x1a6   :  { %v10274_v1 = vld [vmem:[#allocation3 + $0x1220] sm:$0xf0] }
 0x1a7   :  { %v12702_v2 = vld [vmem:[#allocation3 + $0x1404] sm:$0xf]  ;;  %v10277_v17 = vor.u32 %v12638_v0, %v10274_v1  ;;  %6553 = vmatpush.bf16.msra.mxu0 %v10021_v12 }
 0x1a8   :  { %v10530_v5 = vld [vmem:[#allocation3 + $0x1420] sm:$0xf0] }
 0x1a9   :  { %v12766_v6 = vld [vmem:[#allocation3 + $0x1604] sm:$0xf]  ;;  %v10533_v18 = vor.u32 %v12702_v2, %v10530_v5  ;;  %6566 = vmatpush.bf16.msra.mxu1 %v10277_v17 }
 0x1aa   :  { %v10786_v7 = vld [vmem:[#allocation3 + $0x1620] sm:$0xf0]  ;;  %6554 = vmatmul.bf16.vlgmr.msra.gmra.mxu0 %v13090_v48 }
 0x1ab   :  { %v12886_v9 = vld [vmem:[#allocation3 + $0x19c4] sm:$0xf]  ;;  %v10789_v24 = vor.u32 %v12766_v6, %v10786_v7  ;;  %6579 = vmatpush.bf16.msra.mxu2 %v10533_v18  ;;  %v6348_v7 = vadd.f32 %v6347_v4, %v13270_v45 }
 0x1ac   :  { %v11266_v10 = vld [vmem:[#allocation3 + $0x19e0] sm:$0xf0] }
 0x1ad   :  { %v12950_v11 = vld [vmem:[#allocation3 + $0x1bc4] sm:$0xf]  ;;  %v11269_v25 = vor.u32 %v12886_v9, %v11266_v10  ;;  %6592 = vmatpush.bf16.msra.mxu3 %v10789_v24  ;;  %v6360_v9 = vpop.f32.mrf.mxu1 }
 0x1ae   :  { %v11522_v13 = vld [vmem:[#allocation3 + $0x1be0] sm:$0xf0]  ;;  %6580 = vmatmul.bf16.vlgmr.msra.gmra.mxu2 %v13091_v53  ;;  %v6361_v17 = vadd.f32 %v6360_v9, %v6348_v7  ;;  %v8200_v9 = vld [vmem:[#allocation3 + $0x1c8] sm:$0xf] }
 0x1af   :  { %v13014_v14 = vld [vmem:[#allocation3 + $0x1dc4] sm:$0xf]  ;;  %v11525_v27 = vor.u32 %v12950_v11, %v11522_v13  ;;  %6598 = vmatpush.bf16.msrb.mxu0 %v11269_v25 }
 0x1b0   :  { %v11778_v16 = vld [vmem:[#allocation3 + $0x1de0] sm:$0xf0]  ;;  %6593 = vmatmul.bf16.vlgmr.msra.gmra.mxu3 %v13093_v57 }
 0x1b1   :  { %v13078_v19 = vld [vmem:[#allocation3 + $0x1fc4] sm:$0xf]  ;;  %v11781_v28 = vor.u32 %v13014_v14, %v11778_v16  ;;  %6611 = vmatpush.bf16.msrb.mxu1 %v11525_v27 }
 0x1b2   :  { %v12034_v23 = vld [vmem:[#allocation3 + $0x1fe0] sm:$0xf0] }
 0x1b3   :  { %v12878_v30 = vld [vmem:[#allocation3 + $0x1984] sm:$0xf]  ;;  %v12037_v35 = vor.u32 %v13078_v19, %v12034_v23  ;;  %6624 = vmatpush.bf16.msrb.mxu2 %v11781_v28 }
 0x1b4   :  { %v11234_v33 = vld [vmem:[#allocation3 + $0x19a0] sm:$0xf0] }
 0x1b5   :  { %v12942_v34 = vld [vmem:[#allocation3 + $0x1b84] sm:$0xf]  ;;  %v11237_v41 = vor.u32 %v12878_v30, %v11234_v33  ;;  %6637 = vmatpush.bf16.msrb.mxu3 %v12037_v35 }
 0x1b6   :  { %v11490_v15 = vld [vmem:[#allocation3 + $0x1ba0] sm:$0xf0] }
 0x1b7   :  { %v13006_v36 = vld [vmem:[#allocation3 + $0x1d84] sm:$0xf]  ;;  %v11493_v42 = vor.u32 %v12942_v34, %v11490_v15  ;;  %6599 = vmatpush.bf16.msrb.mxu0 %v11237_v41  ;;  %v6373_v15 = vpop.f32.mrf.mxu2  ;;  %v6386_v41 = vpop.f32.mrf.mxu3 }
 0x1b8   :  { %v11746_v37 = vld [vmem:[#allocation3 + $0x1da0] sm:$0xf0] }
 0x1b9   :  { %v13070_v39 = vld [vmem:[#allocation3 + $0x1f84] sm:$0xf]  ;;  %v11749_v43 = vor.u32 %v13006_v36, %v11746_v37  ;;  %6612 = vmatpush.bf16.msrb.mxu1 %v11493_v42 }
 0x1ba   :  { %v12002_v40 = vld [vmem:[#allocation3 + $0x1fa0] sm:$0xf0] }
 0x1bb   :  { %v12870_v44 = vld [vmem:[#allocation3 + $0x1944] sm:$0xf]  ;;  %v12005_v49 = vor.u32 %v13070_v39, %v12002_v40  ;;  %6625 = vmatpush.bf16.msrb.mxu2 %v11749_v43  ;;  %v6374_v40 = vadd.f32 %v6373_v15, %v6361_v17  ;;  %v12251_v17 = vld [vmem:[#allocation3 + $0x5e4] sm:$0xf0] }
 0x1bc   :  { %v11202_v46 = vld [vmem:[#allocation3 + $0x1960] sm:$0xf0]  ;;  %v12179_v15 = vld [vmem:[#allocation3 + $0x3a4] sm:$0xf0] }
 0x1bd   :  { %v12934_v47 = vld [vmem:[#allocation3 + $0x1b44] sm:$0xf]  ;;  %v11205_v58 = vor.u32 %v12870_v44, %v11202_v46  ;;  %6638 = vmatpush.bf16.msrb.mxu3 %v12005_v49  ;;  %v6349_v44 = vpop.f32.mrf.mxu0  ;;  %v13273_v48 = vadd.f32 %v6386_v41, %v6374_v40  ;;  %v12307_v40 = vld [vmem:[#allocation3 + $0x7a4] sm:$0xf0] }
 0x1be   :  { %v11458_v50 = vld [vmem:[#allocation3 + $0x1b60] sm:$0xf0]  ;;  %v8136_v44 = vld [vmem:[#allocation3 + $0x148] sm:$0xf] }
 0x1bf   :  { %v12998_v51 = vld [vmem:[#allocation3 + $0x1d44] sm:$0xf]  ;;  %v11461_v59 = vor.u32 %v12934_v47, %v11458_v50  ;;  %6600 = vmatpush.bf16.msrb.mxu0 %v11205_v58  ;;  %v6362_v47 = vpop.f32.mrf.mxu1 }
 0x1c0   :  { %v11714_v52 = vld [vmem:[#allocation3 + $0x1d60] sm:$0xf0]  ;;  %v8392_v47 = vld [vmem:[#allocation3 + $0x348] sm:$0xf] }
 0x1c1   :  { %v13092_v54 = vld [vmem:[#allocation1 + $0x9] sm:$0xff]  ;;  %v11717_v60 = vor.u32 %v12998_v51, %v11714_v52  ;;  %6613 = vmatpush.bf16.msrb.mxu1 %v11461_v59 }
 0x1c2   :  { %6567 = vmatmul.bf16.vlgmr.msra.gmra.mxu1 %v13092_v54  ;;  %v13062_v55 = vld [vmem:[#allocation3 + $0x1f44] sm:$0xf] }
 0x1c3   :  { %v11970_v56 = vld [vmem:[#allocation3 + $0x1f60] sm:$0xf0]  ;;  %6626 = vmatpush.bf16.msrb.mxu2 %v11717_v60 }
 0x1c4   :  { %v12862_v61 = vld [vmem:[#allocation3 + $0x1904] sm:$0xf]  ;;  %v11973_v0 = vor.u32 %v13062_v55, %v11970_v56 }
 0x1c5   :  { %v11170_v62 = vld [vmem:[#allocation3 + $0x1920] sm:$0xf0] }
 0x1c6   :  { %v12926_v63 = vld [vmem:[#allocation3 + $0x1b04] sm:$0xf]  ;;  %v11173_v8 = vor.u32 %v12862_v61, %v11170_v62  ;;  %6639 = vmatpush.bf16.msrb.mxu3 %v11973_v0 }
 0x1c7   :  { %v11426_v1 = vld [vmem:[#allocation3 + $0x1b20] sm:$0xf0] }
 0x1c8   :  { %v12990_v2 = vld [vmem:[#allocation3 + $0x1d04] sm:$0xf]  ;;  %v11429_v10 = vor.u32 %v12926_v63, %v11426_v1  ;;  %6601 = vmatpush.bf16.msrb.mxu0 %v11173_v8  ;;  %v6375_v8 = vpop.f32.mrf.mxu2 }
 0x1c9   :  { %v11682_v3 = vld [vmem:[#allocation3 + $0x1d20] sm:$0xf0] }
 0x1ca   :  { %v13054_v5 = vld [vmem:[#allocation3 + $0x1f04] sm:$0xf]  ;;  %v11685_v11 = vor.u32 %v12990_v2, %v11682_v3  ;;  %6614 = vmatpush.bf16.msrb.mxu1 %v11429_v10  ;;  %v12123_v10 = vld [vmem:[#allocation3 + $0x1e4] sm:$0xf0] }
 0x1cb   :  { %v11938_v6 = vld [vmem:[#allocation3 + $0x1f20] sm:$0xf0] }
 0x1cc   :  { %v12854_v12 = vld [vmem:[#allocation3 + $0x18c4] sm:$0xf]  ;;  %v11941_v16 = vor.u32 %v13054_v5, %v11938_v6  ;;  %6627 = vmatpush.bf16.msrb.mxu2 %v11685_v11  ;;  %v8456_v11 = vld [vmem:[#allocation3 + $0x3c8] sm:$0xf] }
 0x1cd   :  { %v11138_v13 = vld [vmem:[#allocation3 + $0x18e0] sm:$0xf0] }
 0x1ce   :  { %v12918_v14 = vld [vmem:[#allocation3 + $0x1ac4] sm:$0xf]  ;;  %v11141_v27 = vor.u32 %v12854_v12, %v11138_v13  ;;  %6640 = vmatpush.bf16.msrb.mxu3 %v11941_v16  ;;  %v6388_v12 = vpop.f32.mrf.mxu3  ;;  %v8712_v16 = vld [vmem:[#allocation3 + $0x5c8] sm:$0xf] }
 0x1cf   :  { %v11394_v18 = vld [vmem:[#allocation3 + $0x1ae0] sm:$0xf0] }
 0x1d0   :  { %v12982_v19 = vld [vmem:[#allocation3 + $0x1cc4] sm:$0xf]  ;;  %v11397_v45 = vor.u32 %v12918_v14, %v11394_v18  ;;  %6602 = vmatpush.bf16.msrb.mxu0 %v11141_v27  ;;  %v12187_v14 = vld [vmem:[#allocation3 + $0x3e4] sm:$0xf0]  ;;  %v8201_v27 = vor.u32 %v12123_v10, %v8200_v9  ;;  %v6412_v10 = vpop.f32.mrf.mxu1 }
 0x1d1   :  { %v11650_v23 = vld [vmem:[#allocation3 + $0x1ce0] sm:$0xf0] }
 0x1d2   :  { %v13046_v24 = vld [vmem:[#allocation3 + $0x1ec4] sm:$0xf]  ;;  %v11653_v28 = vor.u32 %v12982_v19, %v11650_v23  ;;  %6615 = vmatpush.bf16.msrb.mxu1 %v11397_v45  ;;  %v8968_v23 = vld [vmem:[#allocation3 + $0x7c8] sm:$0xf]  ;;  %v8457_v45 = vor.u32 %v12187_v14, %v8456_v11 }
 0x1d3   :  { %v11906_v25 = vld [vmem:[#allocation3 + $0x1ee0] sm:$0xf0]  ;;  %v12091_v14 = vld [vmem:[#allocation3 + $0xe4] sm:$0xf0] }
 0x1d4   :  { %v12846_v30 = vld [vmem:[#allocation3 + $0x1884] sm:$0xf]  ;;  %v11909_v35 = vor.u32 %v13046_v24, %v11906_v25  ;;  %6628 = vmatpush.bf16.msrb.mxu2 %v11653_v28  ;;  %v12315_v24 = vld [vmem:[#allocation3 + $0x7e4] sm:$0xf0]  ;;  %v8713_v28 = vor.u32 %v12251_v17, %v8712_v16 }
 0x1d5   :  { %v11106_v33 = vld [vmem:[#allocation3 + $0x18a0] sm:$0xf0]  ;;  %v8328_v16 = vld [vmem:[#allocation3 + $0x2c8] sm:$0xf] }
 0x1d6   :  { %v12910_v34 = vld [vmem:[#allocation3 + $0x1a84] sm:$0xf]  ;;  %v11109_v46 = vor.u32 %v12846_v30, %v11106_v33  ;;  %6641 = vmatpush.bf16.msrb.mxu3 %v11909_v35  ;;  %v8168_v30 = vld [vmem:[#allocation3 + $0x188] sm:$0xf]  ;;  %v8969_v35 = vor.u32 %v12315_v24, %v8968_v23 }
 0x1d7   :  { %v11362_v36 = vld [vmem:[#allocation3 + $0x1aa0] sm:$0xf0]  ;;  %v12115_v33 = vld [vmem:[#allocation3 + $0x1a4] sm:$0xf0] }
 0x1d8   :  { %v12974_v37 = vld [vmem:[#allocation3 + $0x1c84] sm:$0xf]  ;;  %v11365_v49 = vor.u32 %v12910_v34, %v11362_v36  ;;  %6603 = vmatpush.bf16.msrb.mxu0 %v11109_v46  ;;  %v8424_v34 = vld [vmem:[#allocation3 + $0x388] sm:$0xf]  ;;  %v8169_v41 = vor.u32 %v12115_v33, %v8168_v30 }
 0x1d9   :  { %v11618_v39 = vld [vmem:[#allocation3 + $0x1ca0] sm:$0xf0]  ;;  %v8680_v36 = vld [vmem:[#allocation3 + $0x588] sm:$0xf] }
 0x1da   :  { %v13038_v42 = vld [vmem:[#allocation3 + $0x1e84] sm:$0xf]  ;;  %v11621_v50 = vor.u32 %v12974_v37, %v11618_v39  ;;  %6616 = vmatpush.bf16.msrb.mxu1 %v11365_v49  ;;  %v12243_v37 = vld [vmem:[#allocation3 + $0x5a4] sm:$0xf0]  ;;  %v13094_v49 = vld [vmem:[#allocation1 + $0x24] sm:$0xff] }
 0x1db   :  { %v11874_v43 = vld [vmem:[#allocation3 + $0x1ea0] sm:$0xf0]  ;;  %v8936_v39 = vld [vmem:[#allocation3 + $0x788] sm:$0xf] }
 0x1dc   :  { %v12838_v51 = vld [vmem:[#allocation3 + $0x1844] sm:$0xf]  ;;  %v11877_v54 = vor.u32 %v13038_v42, %v11874_v43  ;;  %6629 = vmatpush.bf16.msrb.mxu2 %v11621_v50  ;;  %v8425_v42 = vor.u32 %v12179_v15, %v8424_v34  ;;  %v8681_v43 = vor.u32 %v12243_v37, %v8680_v36  ;;  %v12107_v46 = vld [vmem:[#allocation3 + $0x164] sm:$0xf0]  ;;  %v8937_v50 = vor.u32 %v12307_v40, %v8936_v39  ;;  %v6425_v15 = vpop.f32.mrf.mxu2 }
 0x1dd   :  { %v11074_v52 = vld [vmem:[#allocation3 + $0x1860] sm:$0xf0]  ;;  %v8584_v23 = vld [vmem:[#allocation3 + $0x4c8] sm:$0xf] }
 0x1de   :  { %v12902_v53 = vld [vmem:[#allocation3 + $0x1a44] sm:$0xf]  ;;  %v11077_v60 = vor.u32 %v12838_v51, %v11074_v52  ;;  %6642 = vmatpush.bf16.msrb.mxu3 %v11877_v54  ;;  %v12171_v51 = vld [vmem:[#allocation3 + $0x364] sm:$0xf0]  ;;  %v13095_v54 = vld [vmem:[#allocation1 + $0x36] sm:$0xff] }
 0x1df   :  { %v11330_v55 = vld [vmem:[#allocation3 + $0x1a60] sm:$0xf0]  ;;  %v8648_v52 = vld [vmem:[#allocation3 + $0x548] sm:$0xf] }
 0x1e0   :  { %v12966_v56 = vld [vmem:[#allocation3 + $0x1c44] sm:$0xf]  ;;  %v11333_v63 = vor.u32 %v12902_v53, %v11330_v55  ;;  %6604 = vmatpush.bf16.msrb.mxu0 %v11077_v60  ;;  %v12235_v53 = vld [vmem:[#allocation3 + $0x564] sm:$0xf0]  ;;  %v8393_v60 = vor.u32 %v12171_v51, %v8392_v47  ;;  %v6414_v47 = vpop.f32.mrf.mxu1 }
 0x1e1   :  { %v11586_v57 = vld [vmem:[#allocation3 + $0x1c60] sm:$0xf0]  ;;  %v12219_v24 = vld [vmem:[#allocation3 + $0x4e4] sm:$0xf0] }
 0x1e2   :  { %v13030_v58 = vld [vmem:[#allocation3 + $0x1e44] sm:$0xf]  ;;  %v11589_v0 = vor.u32 %v12966_v56, %v11586_v57  ;;  %6617 = vmatpush.bf16.msrb.mxu1 %v11333_v63  ;;  %v8904_v56 = vld [vmem:[#allocation3 + $0x748] sm:$0xf] }
 0x1e3   :  { %v11842_v59 = vld [vmem:[#allocation3 + $0x1e60] sm:$0xf0]  ;;  %v12299_v57 = vld [vmem:[#allocation3 + $0x764] sm:$0xf0] }
 0x1e4   :  { %v12830_v61 = vld [vmem:[#allocation3 + $0x1804] sm:$0xf]  ;;  %v11845_v4 = vor.u32 %v13030_v58, %v11842_v59  ;;  %6630 = vmatpush.bf16.msrb.mxu2 %v11589_v0  ;;  %v13097_v58 = vld [vmem:[#allocation1 + $0x3f] sm:$0xff]  ;;  %v8137_v59 = vor.u32 %v12107_v46, %v8136_v44  ;;  %v12099_v63 = vld [vmem:[#allocation3 + $0x124] sm:$0xf0] }
 0x1e5   :  { %v11042_v62 = vld [vmem:[#allocation3 + $0x1820] sm:$0xf0]  ;;  %v8360_v0 = vld [vmem:[#allocation3 + $0x308] sm:$0xf] }
 0x1e6   :  { %v12894_v1 = vld [vmem:[#allocation3 + $0x1a04] sm:$0xf]  ;;  %v11045_v13 = vor.u32 %v12830_v61, %v11042_v62  ;;  %6643 = vmatpush.bf16.msrb.mxu3 %v11845_v4  ;;  %v8649_v61 = vor.u32 %v12235_v53, %v8648_v52  ;;  %v8104_v62 = vld [vmem:[#allocation3 + $0x108] sm:$0xf] }
 0x1e7   :  { %v11298_v2 = vld [vmem:[#allocation3 + $0x1a20] sm:$0xf0]  ;;  %v12227_v4 = vld [vmem:[#allocation3 + $0x524] sm:$0xf0]  ;;  %v8105_v9 = vor.u32 %v12099_v63, %v8104_v62 }
 0x1e8   :  { %v12958_v3 = vld [vmem:[#allocation3 + $0x1c04] sm:$0xf]  ;;  %v11301_v18 = vor.u32 %v12894_v1, %v11298_v2  ;;  %6605 = vmatpush.bf16.msrb.mxu0 %v11045_v13  ;;  %v8905_v1 = vor.u32 %v12299_v57, %v8904_v56  ;;  %v12163_v2 = vld [vmem:[#allocation3 + $0x324] sm:$0xf0] }
 0x1e9   :  { %v11554_v5 = vld [vmem:[#allocation3 + $0x1c20] sm:$0xf0]  ;;  %v8361_v11 = vor.u32 %v12163_v2, %v8360_v0  ;;  %v8072_v13 = vld [vmem:[#allocation3 + $0xc8] sm:$0xf] }
 0x1ea   :  { %v13022_v6 = vld [vmem:[#allocation3 + $0x1e04] sm:$0xf]  ;;  %v11557_v19 = vor.u32 %v12958_v3, %v11554_v5  ;;  %6618 = vmatpush.bf16.msrb.mxu1 %v11301_v18  ;;  %v8616_v3 = vld [vmem:[#allocation3 + $0x508] sm:$0xf]  ;;  %v6399_v5 = vpop.f32.mrf.mxu0 }
 0x1eb   :  { %v11810_v7 = vld [vmem:[#allocation3 + $0x1e20] sm:$0xf0]  ;;  %6606 = vmatmul.bf16.vlgmr.msrb.gmra.mxu0 %v13094_v49  ;;  %v6400_v8 = vadd.f32 %v6399_v5, %v13273_v48  ;;  %v8617_v12 = vor.u32 %v12227_v4, %v8616_v3  ;;  %v8040_v30 = vld [vmem:[#allocation3 + $0x88] sm:$0xf] }
 0x1ec   :  { %v11813_v25 = vor.u32 %v13022_v6, %v11810_v7  ;;  %6631 = vmatpush.bf16.msrb.mxu2 %v11557_v19  ;;  %6650 = vmatpush.bf16.msra.mxu0 %v8201_v27  ;;  %v13096_v55 = vld [vmem:[#allocation1 + $0x2d] sm:$0xff] }
 0x1ed   :  { %6619 = vmatmul.bf16.vlgmr.msrb.gmra.mxu1 %v13096_v55  ;;  %v8872_v6 = vld [vmem:[#allocation3 + $0x708] sm:$0xf]  ;;  %v6413_v18 = vadd.f32 %v6412_v10, %v6400_v8 }
 0x1ee   :  { %6644 = vmatpush.bf16.msrb.mxu3 %v11813_v25  ;;  %6663 = vmatpush.bf16.msra.mxu1 %v8457_v45  ;;  %v12291_v7 = vld [vmem:[#allocation3 + $0x724] sm:$0xf0]  ;;  %v8073_v45 = vor.u32 %v12091_v14, %v8072_v13 }
 0x1ef   :  { %6632 = vmatmul.bf16.vlgmr.msrb.gmra.mxu2 %v13095_v54  ;;  %v8873_v17 = vor.u32 %v12291_v7, %v8872_v6  ;;  %v12155_v19 = vld [vmem:[#allocation3 + $0x2e4] sm:$0xf0]  ;;  %v6426_v40 = vadd.f32 %v6425_v15, %v6413_v18 }
 0x1f0   :  { %6676 = vmatpush.bf16.msra.mxu2 %v8713_v28  ;;  %6651 = vmatpush.bf16.msra.mxu0 %v8169_v41  ;;  %v8840_v25 = vld [vmem:[#allocation3 + $0x6c8] sm:$0xf]  ;;  %v8329_v48 = vor.u32 %v12155_v19, %v8328_v16  ;;  %v8585_v28 = vor.u32 %v12219_v24, %v8584_v23  ;;  %v6438_v41 = vpop.f32.mrf.mxu3 }
 0x1f1   :  { %6645 = vmatmul.bf16.vlgmr.msrb.gmra.mxu3 %v13097_v58  ;;  %v12283_v27 = vld [vmem:[#allocation3 + $0x6e4] sm:$0xf0]  ;;  %v13276_v49 = vadd.f32 %v6438_v41, %v6426_v40 }
 0x1f2   :  { %6689 = vmatpush.bf16.msra.mxu3 %v8969_v35  ;;  %6664 = vmatpush.bf16.msra.mxu1 %v8425_v42  ;;  %v12083_v33 = vld [vmem:[#allocation3 + $0xa4] sm:$0xf0]  ;;  %v8841_v35 = vor.u32 %v12283_v27, %v8840_v25  ;;  %v6401_v44 = vpop.f32.mrf.mxu0 }
 0x1f3   :  { %v8296_v34 = vld [vmem:[#allocation3 + $0x288] sm:$0xf]  ;;  %v8041_v46 = vor.u32 %v12083_v33, %v8040_v30 }
 0x1f4   :  { %6677 = vmatpush.bf16.msra.mxu2 %v8681_v43  ;;  %6652 = vmatpush.bf16.msra.mxu0 %v8137_v59  ;;  %v12147_v36 = vld [vmem:[#allocation3 + $0x2a4] sm:$0xf0] }
 0x1f5   :  { %v8552_v37 = vld [vmem:[#allocation3 + $0x488] sm:$0xf] }
 0x1f6   :  { %6690 = vmatpush.bf16.msra.mxu3 %v8937_v50  ;;  %6665 = vmatpush.bf16.msra.mxu1 %v8393_v60  ;;  %v12211_v39 = vld [vmem:[#allocation3 + $0x4a4] sm:$0xf0]  ;;  %v8297_v50 = vor.u32 %v12147_v36, %v8296_v34 }
 0x1f7   :  { %v8808_v42 = vld [vmem:[#allocation3 + $0x688] sm:$0xf]  ;;  %v8553_v51 = vor.u32 %v12211_v39, %v8552_v37 }
 0x1f8   :  { %6678 = vmatpush.bf16.msra.mxu2 %v8649_v61  ;;  %6653 = vmatpush.bf16.msra.mxu0 %v8105_v9  ;;  %v12275_v43 = vld [vmem:[#allocation3 + $0x6a4] sm:$0xf0]  ;;  %v6427_v9 = vpop.f32.mrf.mxu2  ;;  %v6440_v13 = vpop.f32.mrf.mxu3 }
 0x1f9   :  { %v8008_v52 = vld [vmem:[#allocation3 + $0x48] sm:$0xf]  ;;  %v8809_v55 = vor.u32 %v12275_v43, %v8808_v42 }
 0x1fa   :  { %6691 = vmatpush.bf16.msra.mxu3 %v8905_v1  ;;  %6666 = vmatpush.bf16.msra.mxu1 %v8361_v11  ;;  %v12075_v53 = vld [vmem:[#allocation3 + $0x64] sm:$0xf0] }
 0x1fb   :  { %v8264_v54 = vld [vmem:[#allocation3 + $0x248] sm:$0xf]  ;;  %v8009_v61 = vor.u32 %v12075_v53, %v8008_v52 }
 0x1fc   :  { %6679 = vmatpush.bf16.msra.mxu2 %v8617_v12  ;;  %6654 = vmatpush.bf16.msra.mxu0 %v8073_v45  ;;  %v12139_v56 = vld [vmem:[#allocation3 + $0x264] sm:$0xf0] }
 0x1fd   :  { %v8520_v57 = vld [vmem:[#allocation3 + $0x448] sm:$0xf]  ;;  %v8265_v0 = vor.u32 %v12139_v56, %v8264_v54 }
 0x1fe   :  { %6692 = vmatpush.bf16.msra.mxu3 %v8873_v17  ;;  %6667 = vmatpush.bf16.msra.mxu1 %v8329_v48  ;;  %v12203_v58 = vld [vmem:[#allocation3 + $0x464] sm:$0xf0] }
 0x1ff   :  { %v8776_v59 = vld [vmem:[#allocation3 + $0x648] sm:$0xf]  ;;  %v8521_v1 = vor.u32 %v12203_v58, %v8520_v57 }
 0x200   :  { %6680 = vmatpush.bf16.msra.mxu2 %v8585_v28  ;;  %v12267_v60 = vld [vmem:[#allocation3 + $0x664] sm:$0xf0]  ;;  %6655 = vmatpush.bf16.msra.mxu0 %v8041_v46 }
 0x201   :  { %v7976_v62 = vld [vmem:[#allocation3 + $0x8] sm:$0xf]  ;;  %v8777_v5 = vor.u32 %v12267_v60, %v8776_v59 }
 0x202   :  { %6693 = vmatpush.bf16.msra.mxu3 %v8841_v35  ;;  %v12067_v63 = vld [vmem:[#allocation3 + $0x24] sm:$0xf0]  ;;  %6668 = vmatpush.bf16.msra.mxu1 %v8297_v50 }
 0x203   :  { %v8232_v2 = vld [vmem:[#allocation3 + $0x208] sm:$0xf]  ;;  %v7977_v14 = vor.u32 %v12067_v63, %v7976_v62 }
 0x204   :  { %6681 = vmatpush.bf16.msra.mxu2 %v8553_v51  ;;  %v12131_v3 = vld [vmem:[#allocation3 + $0x224] sm:$0xf0]  ;;  %6656 = vmatpush.bf16.msra.mxu0 %v8009_v61 }
 0x205   :  { %v8488_v4 = vld [vmem:[#allocation3 + $0x408] sm:$0xf]  ;;  %v8233_v19 = vor.u32 %v12131_v3, %v8232_v2 }
 0x206   :  { %6694 = vmatpush.bf16.msra.mxu3 %v8809_v55  ;;  %v12195_v6 = vld [vmem:[#allocation3 + $0x424] sm:$0xf0]  ;;  %6669 = vmatpush.bf16.msra.mxu1 %v8265_v0 }
 0x207   :  { %v8744_v7 = vld [vmem:[#allocation3 + $0x608] sm:$0xf]  ;;  %v8489_v23 = vor.u32 %v12195_v6, %v8488_v4 }
 0x208   :  { %v12259_v8 = vld [vmem:[#allocation3 + $0x624] sm:$0xf0]  ;;  %6682 = vmatpush.bf16.msra.mxu2 %v8521_v1  ;;  %6657 = vmatpush.bf16.msra.mxu0 %v7977_v14 }
 0x209   :  { %v9224_v10 = vld [vmem:[#allocation3 + $0x9c8] sm:$0xf]  ;;  %v8745_v27 = vor.u32 %v12259_v8, %v8744_v7 }
 0x20a   :  { %v12379_v11 = vld [vmem:[#allocation3 + $0x9e4] sm:$0xf0]  ;;  %6695 = vmatpush.bf16.msra.mxu3 %v8777_v5  ;;  %6670 = vmatpush.bf16.msra.mxu1 %v8233_v19  ;;  %v6451_v5 = vpop.f32.mrf.mxu0 }
 0x20b   :  { %v9480_v12 = vld [vmem:[#allocation3 + $0xbc8] sm:$0xf]  ;;  %v9225_v45 = vor.u32 %v12379_v11, %v9224_v10  ;;  %6658 = vmatmul.bf16.vlgmr.msra.gmra.mxu0 %v13234_v21  ;;  %v6464_v11 = vpop.f32.mrf.mxu1 }
 0x20c   :  { %v12443_v16 = vld [vmem:[#allocation3 + $0xbe4] sm:$0xf0]  ;;  %6683 = vmatpush.bf16.msra.mxu2 %v8489_v23 }
 0x20d   :  { %v9736_v17 = vld [vmem:[#allocation3 + $0xdc8] sm:$0xf]  ;;  %v9481_v48 = vor.u32 %v12443_v16, %v9480_v12  ;;  %6702 = vmatpush.bf16.msrb.mxu0 %v9225_v45  ;;  %6671 = vmatmul.bf16.vlgmr.msra.gmra.mxu1 %v13239_v26 }
 0x20e   :  { %v12507_v18 = vld [vmem:[#allocation3 + $0xde4] sm:$0xf0]  ;;  %6696 = vmatpush.bf16.msra.mxu3 %v8745_v27 }
 0x20f   :  { %v9992_v24 = vld [vmem:[#allocation3 + $0xfc8] sm:$0xf]  ;;  %v9737_v28 = vor.u32 %v12507_v18, %v9736_v17  ;;  %6715 = vmatpush.bf16.msrb.mxu1 %v9481_v48  ;;  %6684 = vmatmul.bf16.vlgmr.msra.gmra.mxu2 %v13232_v20  ;;  %v6465_v17 = vadd.f32 %v6464_v11, %v6451_v5 }
 0x210   :  { %v12571_v25 = vld [vmem:[#allocation3 + $0xfe4] sm:$0xf0] }
 0x211   :  { %v9192_v30 = vld [vmem:[#allocation3 + $0x988] sm:$0xf]  ;;  %v9993_v35 = vor.u32 %v12571_v25, %v9992_v24  ;;  %6728 = vmatpush.bf16.msrb.mxu2 %v9737_v28  ;;  %6697 = vmatmul.bf16.vlgmr.msra.gmra.mxu3 %v13236_v22  ;;  %v6477_v28 = vpop.f32.mrf.mxu2 }
 0x212   :  { %v12371_v33 = vld [vmem:[#allocation3 + $0x9a4] sm:$0xf0] }
 0x213   :  { %v9448_v34 = vld [vmem:[#allocation3 + $0xb88] sm:$0xf]  ;;  %v9193_v41 = vor.u32 %v12371_v33, %v9192_v30  ;;  %6741 = vmatpush.bf16.msrb.mxu3 %v9993_v35 }
 0x214   :  { %v12435_v15 = vld [vmem:[#allocation3 + $0xba4] sm:$0xf0] }
 0x215   :  { %v9704_v36 = vld [vmem:[#allocation3 + $0xd88] sm:$0xf]  ;;  %v9449_v42 = vor.u32 %v12435_v15, %v9448_v34  ;;  %6703 = vmatpush.bf16.msrb.mxu0 %v9193_v41  ;;  %v6478_v15 = vadd.f32 %v6477_v28, %v6465_v17 }
 0x216   :  { %v12499_v37 = vld [vmem:[#allocation3 + $0xda4] sm:$0xf0] }
 0x217   :  { %v9960_v39 = vld [vmem:[#allocation3 + $0xf88] sm:$0xf]  ;;  %v9705_v43 = vor.u32 %v12499_v37, %v9704_v36  ;;  %6716 = vmatpush.bf16.msrb.mxu1 %v9449_v42  ;;  %v6490_v36 = vpop.f32.mrf.mxu3  ;;  %v6453_v42 = vpop.f32.mrf.mxu0 }
 0x218   :  { %v12563_v40 = vld [vmem:[#allocation3 + $0xfa4] sm:$0xf0]  ;;  %v13282_v41 = vadd.f32 %v6490_v36, %v6478_v15 }
 0x219   :  { %v9160_v44 = vld [vmem:[#allocation3 + $0x948] sm:$0xf]  ;;  %v9961_v50 = vor.u32 %v12563_v40, %v9960_v39  ;;  %6729 = vmatpush.bf16.msrb.mxu2 %v9705_v43 }
 0x21a   :  { %v12363_v46 = vld [vmem:[#allocation3 + $0x964] sm:$0xf0] }
 0x21b   :  { %v9416_v47 = vld [vmem:[#allocation3 + $0xb48] sm:$0xf]  ;;  %v9161_v56 = vor.u32 %v12363_v46, %v9160_v44  ;;  %6742 = vmatpush.bf16.msrb.mxu3 %v9961_v50 }
 0x21c   :  { %v12427_v51 = vld [vmem:[#allocation3 + $0xb64] sm:$0xf0] }
 0x21d   :  { %v9672_v52 = vld [vmem:[#allocation3 + $0xd48] sm:$0xf]  ;;  %v9417_v57 = vor.u32 %v12427_v51, %v9416_v47  ;;  %6704 = vmatpush.bf16.msrb.mxu0 %v9161_v56  ;;  %v6466_v51 = vpop.f32.mrf.mxu1 }
 0x21e   :  { %v12491_v53 = vld [vmem:[#allocation3 + $0xd64] sm:$0xf0] }
 0x21f   :  { %v9928_v54 = vld [vmem:[#allocation3 + $0xf48] sm:$0xf]  ;;  %v9673_v58 = vor.u32 %v12491_v53, %v9672_v52  ;;  %6717 = vmatpush.bf16.msrb.mxu1 %v9417_v57 }
 0x220   :  { %v12555_v55 = vld [vmem:[#allocation3 + $0xf64] sm:$0xf0] }
 0x221   :  { %v9128_v59 = vld [vmem:[#allocation3 + $0x908] sm:$0xf]  ;;  %v9929_v62 = vor.u32 %v12555_v55, %v9928_v54  ;;  %6730 = vmatpush.bf16.msrb.mxu2 %v9673_v58 }
 0x222   :  { %v12355_v60 = vld [vmem:[#allocation3 + $0x924] sm:$0xf0] }
 0x223   :  { %v9384_v61 = vld [vmem:[#allocation3 + $0xb08] sm:$0xf]  ;;  %v9129_v4 = vor.u32 %v12355_v60, %v9128_v59  ;;  %6743 = vmatpush.bf16.msrb.mxu3 %v9929_v62 }
 0x224   :  { %v12419_v63 = vld [vmem:[#allocation3 + $0xb24] sm:$0xf0] }
 0x225   :  { %v9640_v0 = vld [vmem:[#allocation3 + $0xd08] sm:$0xf]  ;;  %v9385_v6 = vor.u32 %v12419_v63, %v9384_v61  ;;  %6705 = vmatpush.bf16.msrb.mxu0 %v9129_v4 }
 0x226   :  { %v12483_v1 = vld [vmem:[#allocation3 + $0xd24] sm:$0xf0] }
 0x227   :  { %v9896_v2 = vld [vmem:[#allocation3 + $0xf08] sm:$0xf]  ;;  %v9641_v7 = vor.u32 %v12483_v1, %v9640_v0  ;;  %6718 = vmatpush.bf16.msrb.mxu1 %v9385_v6 }
 0x228   :  { %v12547_v3 = vld [vmem:[#allocation3 + $0xf24] sm:$0xf0] }
 0x229   :  { %v9096_v8 = vld [vmem:[#allocation3 + $0x8c8] sm:$0xf]  ;;  %v9897_v12 = vor.u32 %v12547_v3, %v9896_v2  ;;  %6731 = vmatpush.bf16.msrb.mxu2 %v9641_v7  ;;  %v6479_v2 = vpop.f32.mrf.mxu2  ;;  %v6492_v7 = vpop.f32.mrf.mxu3 }
 0x22a   :  { %v12347_v9 = vld [vmem:[#allocation3 + $0x8e4] sm:$0xf0] }
 0x22b   :  { %v9352_v10 = vld [vmem:[#allocation3 + $0xac8] sm:$0xf]  ;;  %v9097_v23 = vor.u32 %v12347_v9, %v9096_v8  ;;  %6744 = vmatpush.bf16.msrb.mxu3 %v9897_v12 }
 0x22c   :  { %v12411_v13 = vld [vmem:[#allocation3 + $0xae4] sm:$0xf0] }
 0x22d   :  { %v9608_v14 = vld [vmem:[#allocation3 + $0xcc8] sm:$0xf]  ;;  %v9353_v24 = vor.u32 %v12411_v13, %v9352_v10  ;;  %6706 = vmatpush.bf16.msrb.mxu0 %v9097_v23 }
 0x22e   :  { %v12475_v16 = vld [vmem:[#allocation3 + $0xce4] sm:$0xf0] }
 0x22f   :  { %v9864_v18 = vld [vmem:[#allocation3 + $0xec8] sm:$0xf]  ;;  %v9609_v25 = vor.u32 %v12475_v16, %v9608_v14  ;;  %6719 = vmatpush.bf16.msrb.mxu1 %v9353_v24 }
 0x230   :  { %v12539_v19 = vld [vmem:[#allocation3 + $0xee4] sm:$0xf0] }
 0x231   :  { %v9064_v27 = vld [vmem:[#allocation3 + $0x888] sm:$0xf]  ;;  %v9865_v30 = vor.u32 %v12539_v19, %v9864_v18  ;;  %6732 = vmatpush.bf16.msrb.mxu2 %v9609_v25 }
 0x232   :  { %v12339_v45 = vld [vmem:[#allocation3 + $0x8a4] sm:$0xf0] }
 0x233   :  { %v9320_v48 = vld [vmem:[#allocation3 + $0xa88] sm:$0xf]  ;;  %v9065_v40 = vor.u32 %v12339_v45, %v9064_v27  ;;  %6745 = vmatpush.bf16.msrb.mxu3 %v9865_v30 }
 0x234   :  { %v12403_v33 = vld [vmem:[#allocation3 + $0xaa4] sm:$0xf0] }
 0x235   :  { %v9576_v34 = vld [vmem:[#allocation3 + $0xc88] sm:$0xf]  ;;  %v9321_v43 = vor.u32 %v12403_v33, %v9320_v48  ;;  %6707 = vmatpush.bf16.msrb.mxu0 %v9065_v40 }
 0x236   :  { %v12467_v35 = vld [vmem:[#allocation3 + $0xca4] sm:$0xf0] }
 0x237   :  { %v9832_v37 = vld [vmem:[#allocation3 + $0xe88] sm:$0xf]  ;;  %v9577_v44 = vor.u32 %v12467_v35, %v9576_v34  ;;  %6720 = vmatpush.bf16.msrb.mxu1 %v9321_v43 }
 0x238   :  { %v12531_v39 = vld [vmem:[#allocation3 + $0xea4] sm:$0xf0] }
 0x239   :  { %v9032_v46 = vld [vmem:[#allocation3 + $0x848] sm:$0xf]  ;;  %v9833_v52 = vor.u32 %v12531_v39, %v9832_v37  ;;  %6733 = vmatpush.bf16.msrb.mxu2 %v9577_v44 }
 0x23a   :  { %v12331_v47 = vld [vmem:[#allocation3 + $0x864] sm:$0xf0] }
 0x23b   :  { %v9288_v50 = vld [vmem:[#allocation3 + $0xa48] sm:$0xf]  ;;  %v9033_v58 = vor.u32 %v12331_v47, %v9032_v46  ;;  %6746 = vmatpush.bf16.msrb.mxu3 %v9833_v52 }
 0x23c   :  { %v12395_v53 = vld [vmem:[#allocation3 + $0xa64] sm:$0xf0] }
 0x23d   :  { %v9544_v54 = vld [vmem:[#allocation3 + $0xc48] sm:$0xf]  ;;  %v9289_v61 = vor.u32 %v12395_v53, %v9288_v50  ;;  %6708 = vmatpush.bf16.msrb.mxu0 %v9033_v58 }
 0x23e   :  { %v12459_v55 = vld [vmem:[#allocation3 + $0xc64] sm:$0xf0] }
 0x23f   :  { %v9800_v56 = vld [vmem:[#allocation3 + $0xe48] sm:$0xf]  ;;  %v9545_v62 = vor.u32 %v12459_v55, %v9544_v54  ;;  %6721 = vmatpush.bf16.msrb.mxu1 %v9289_v61 }
 0x240   :  { %v12523_v57 = vld [vmem:[#allocation3 + $0xe64] sm:$0xf0] }
 0x241   :  { %v9000_v59 = vld [vmem:[#allocation3 + $0x808] sm:$0xf]  ;;  %v9801_v3 = vor.u32 %v12523_v57, %v9800_v56  ;;  %6734 = vmatpush.bf16.msrb.mxu2 %v9545_v62 }
 0x242   :  { %v12323_v60 = vld [vmem:[#allocation3 + $0x824] sm:$0xf0] }
 0x243   :  { %v9256_v63 = vld [vmem:[#allocation3 + $0xa08] sm:$0xf]  ;;  %v9001_v11 = vor.u32 %v12323_v60, %v9000_v59  ;;  %6747 = vmatpush.bf16.msrb.mxu3 %v9801_v3  ;;  %v6503_v3 = vpop.f32.mrf.mxu0 }
 0x244   :  { %v12387_v0 = vld [vmem:[#allocation3 + $0xa24] sm:$0xf0] }
 0x245   :  { %v9512_v1 = vld [vmem:[#allocation3 + $0xc08] sm:$0xf]  ;;  %v9257_v16 = vor.u32 %v12387_v0, %v9256_v63  ;;  %6709 = vmatpush.bf16.msrb.mxu0 %v9001_v11 }
 0x246   :  { %v12451_v4 = vld [vmem:[#allocation3 + $0xc24] sm:$0xf0] }
 0x247   :  { %v9768_v5 = vld [vmem:[#allocation3 + $0xe08] sm:$0xf]  ;;  %v9513_v17 = vor.u32 %v12451_v4, %v9512_v1  ;;  %6722 = vmatpush.bf16.msrb.mxu1 %v9257_v16 }
 0x248   :  { %v12515_v6 = vld [vmem:[#allocation3 + $0xe24] sm:$0xf0]  ;;  %6710 = vmatmul.bf16.vlgmr.msrb.gmra.mxu0 %v13246_v31 }
 0x249   :  { %v10248_v8 = vld [vmem:[#allocation3 + $0x11c8] sm:$0xf]  ;;  %v9769_v23 = vor.u32 %v12515_v6, %v9768_v5  ;;  %6735 = vmatpush.bf16.msrb.mxu2 %v9513_v17 }
 0x24a   :  { %v12635_v9 = vld [vmem:[#allocation3 + $0x11e4] sm:$0xf0]  ;;  %6723 = vmatmul.bf16.vlgmr.msrb.gmra.mxu1 %v13250_v38 }
 0x24b   :  { %v10504_v10 = vld [vmem:[#allocation3 + $0x13c8] sm:$0xf]  ;;  %v10249_v24 = vor.u32 %v12635_v9, %v10248_v8  ;;  %6748 = vmatpush.bf16.msrb.mxu3 %v9769_v23  ;;  %v6504_v9 = vadd.f32 %v6503_v3, %v13282_v41 }
 0x24c   :  { %v12699_v12 = vld [vmem:[#allocation3 + $0x13e4] sm:$0xf0]  ;;  %6736 = vmatmul.bf16.vlgmr.msrb.gmra.mxu2 %v13244_v29 }
 0x24d   :  { %v10760_v13 = vld [vmem:[#allocation3 + $0x15c8] sm:$0xf]  ;;  %v10505_v25 = vor.u32 %v12699_v12, %v10504_v10  ;;  %6754 = vmatpush.bf16.msra.mxu0 %v10249_v24  ;;  %v6516_v10 = vpop.f32.mrf.mxu1 }
 0x24e   :  { %v12763_v14 = vld [vmem:[#allocation3 + $0x15e4] sm:$0xf0]  ;;  %6749 = vmatmul.bf16.vlgmr.msrb.gmra.mxu3 %v13248_v32 }
 0x24f   :  { %v11016_v18 = vld [vmem:[#allocation3 + $0x17c8] sm:$0xf]  ;;  %v10761_v27 = vor.u32 %v12763_v14, %v10760_v13  ;;  %6767 = vmatpush.bf16.msra.mxu1 %v10505_v25 }
 0x250   :  { %v12827_v19 = vld [vmem:[#allocation3 + $0x17e4] sm:$0xf0] }
 0x251   :  { %v10216_v45 = vld [vmem:[#allocation3 + $0x1188] sm:$0xf]  ;;  %v11017_v30 = vor.u32 %v12827_v19, %v11016_v18  ;;  %6780 = vmatpush.bf16.msra.mxu2 %v10761_v27  ;;  %v6517_v18 = vadd.f32 %v6516_v10, %v6504_v9 }
 0x252   :  { %v12627_v48 = vld [vmem:[#allocation3 + $0x11a4] sm:$0xf0] }
 0x253   :  { %v10472_v28 = vld [vmem:[#allocation3 + $0x1388] sm:$0xf]  ;;  %v10217_v37 = vor.u32 %v12627_v48, %v10216_v45  ;;  %6793 = vmatpush.bf16.msra.mxu3 %v11017_v30  ;;  %v6529_v48 = vpop.f32.mrf.mxu2 }
 0x254   :  { %v12691_v33 = vld [vmem:[#allocation3 + $0x13a4] sm:$0xf0] }
 0x255   :  { %v10728_v34 = vld [vmem:[#allocation3 + $0x1588] sm:$0xf]  ;;  %v10473_v39 = vor.u32 %v12691_v33, %v10472_v28  ;;  %6755 = vmatpush.bf16.msra.mxu0 %v10217_v37 }
 0x256   :  { %v12755_v35 = vld [vmem:[#allocation3 + $0x15a4] sm:$0xf0] }
 0x257   :  { %v10984_v15 = vld [vmem:[#allocation3 + $0x1788] sm:$0xf]  ;;  %v10729_v40 = vor.u32 %v12755_v35, %v10728_v34  ;;  %6768 = vmatpush.bf16.msra.mxu1 %v10473_v39  ;;  %v6530_v34 = vadd.f32 %v6529_v48, %v6517_v18  ;;  %v6542_v35 = vpop.f32.mrf.mxu3 }
 0x258   :  { %v12819_v36 = vld [vmem:[#allocation3 + $0x17a4] sm:$0xf0] }
 0x259   :  { %v10184_v42 = vld [vmem:[#allocation3 + $0x1148] sm:$0xf]  ;;  %v10985_v46 = vor.u32 %v12819_v36, %v10984_v15  ;;  %6781 = vmatpush.bf16.msra.mxu2 %v10729_v40  ;;  %v13289_v39 = vadd.f32 %v6542_v35, %v6530_v34  ;;  %v6505_v40 = vpop.f32.mrf.mxu0 }
 0x25a   :  { %v12619_v43 = vld [vmem:[#allocation3 + $0x1164] sm:$0xf0] }
 0x25b   :  { %v10440_v44 = vld [vmem:[#allocation3 + $0x1348] sm:$0xf]  ;;  %v10185_v54 = vor.u32 %v12619_v43, %v10184_v42  ;;  %6794 = vmatpush.bf16.msra.mxu3 %v10985_v46 }
 0x25c   :  { %v12683_v47 = vld [vmem:[#allocation3 + $0x1364] sm:$0xf0] }
 0x25d   :  { %v10696_v50 = vld [vmem:[#allocation3 + $0x1548] sm:$0xf]  ;;  %v10441_v55 = vor.u32 %v12683_v47, %v10440_v44  ;;  %6756 = vmatpush.bf16.msra.mxu0 %v10185_v54 }
 0x25e   :  { %v12747_v51 = vld [vmem:[#allocation3 + $0x1564] sm:$0xf0] }
 0x25f   :  { %v10952_v52 = vld [vmem:[#allocation3 + $0x1748] sm:$0xf]  ;;  %v10697_v56 = vor.u32 %v12747_v51, %v10696_v50  ;;  %6769 = vmatpush.bf16.msra.mxu1 %v10441_v55  ;;  %v6518_v50 = vpop.f32.mrf.mxu1 }
 0x260   :  { %v12811_v53 = vld [vmem:[#allocation3 + $0x1764] sm:$0xf0] }
 0x261   :  { %v10152_v57 = vld [vmem:[#allocation3 + $0x1108] sm:$0xf]  ;;  %v10953_v60 = vor.u32 %v12811_v53, %v10952_v52  ;;  %6782 = vmatpush.bf16.msra.mxu2 %v10697_v56 }
 0x262   :  { %v12611_v58 = vld [vmem:[#allocation3 + $0x1124] sm:$0xf0] }
 0x263   :  { %v10408_v59 = vld [vmem:[#allocation3 + $0x1308] sm:$0xf]  ;;  %v10153_v2 = vor.u32 %v12611_v58, %v10152_v57  ;;  %6795 = vmatpush.bf16.msra.mxu3 %v10953_v60 }
 0x264   :  { %v12675_v61 = vld [vmem:[#allocation3 + $0x1324] sm:$0xf0] }
 0x265   :  { %v10664_v62 = vld [vmem:[#allocation3 + $0x1508] sm:$0xf]  ;;  %v10409_v4 = vor.u32 %v12675_v61, %v10408_v59  ;;  %6757 = vmatpush.bf16.msra.mxu0 %v10153_v2 }
 0x266   :  { %v12739_v63 = vld [vmem:[#allocation3 + $0x1524] sm:$0xf0] }
 0x267   :  { %v10920_v0 = vld [vmem:[#allocation3 + $0x1708] sm:$0xf]  ;;  %v10665_v5 = vor.u32 %v12739_v63, %v10664_v62  ;;  %6770 = vmatpush.bf16.msra.mxu1 %v10409_v4 }
 0x268   :  { %v12803_v1 = vld [vmem:[#allocation3 + $0x1724] sm:$0xf0] }
 0x269   :  { %v10120_v6 = vld [vmem:[#allocation3 + $0x10c8] sm:$0xf]  ;;  %v10921_v11 = vor.u32 %v12803_v1, %v10920_v0  ;;  %6783 = vmatpush.bf16.msra.mxu2 %v10665_v5  ;;  %v6531_v1 = vpop.f32.mrf.mxu2 }
 0x26a   :  { %v12603_v7 = vld [vmem:[#allocation3 + $0x10e4] sm:$0xf0] }
 0x26b   :  { %v10376_v8 = vld [vmem:[#allocation3 + $0x12c8] sm:$0xf]  ;;  %v10121_v19 = vor.u32 %v12603_v7, %v10120_v6  ;;  %6796 = vmatpush.bf16.msra.mxu3 %v10921_v11  ;;  %v6544_v6 = vpop.f32.mrf.mxu3 }
 0x26c   :  { %v12667_v12 = vld [vmem:[#allocation3 + $0x12e4] sm:$0xf0] }
 0x26d   :  { %v10632_v13 = vld [vmem:[#allocation3 + $0x14c8] sm:$0xf]  ;;  %v10377_v23 = vor.u32 %v12667_v12, %v10376_v8  ;;  %6758 = vmatpush.bf16.msra.mxu0 %v10121_v19 }
 0x26e   :  { %v12731_v14 = vld [vmem:[#allocation3 + $0x14e4] sm:$0xf0] }
 0x26f   :  { %v10888_v16 = vld [vmem:[#allocation3 + $0x16c8] sm:$0xf]  ;;  %v10633_v24 = vor.u32 %v12731_v14, %v10632_v13  ;;  %6771 = vmatpush.bf16.msra.mxu1 %v10377_v23 }
 0x270   :  { %v12795_v17 = vld [vmem:[#allocation3 + $0x16e4] sm:$0xf0] }
 0x271   :  { %v10088_v25 = vld [vmem:[#allocation3 + $0x1088] sm:$0xf]  ;;  %v10889_v41 = vor.u32 %v12795_v17, %v10888_v16  ;;  %6784 = vmatpush.bf16.msra.mxu2 %v10633_v24 }
 0x272   :  { %v12595_v27 = vld [vmem:[#allocation3 + $0x10a4] sm:$0xf0] }
 0x273   :  { %v10344_v45 = vld [vmem:[#allocation3 + $0x1288] sm:$0xf]  ;;  %v10089_v37 = vor.u32 %v12595_v27, %v10088_v25  ;;  %6797 = vmatpush.bf16.msra.mxu3 %v10889_v41 }
 0x274   :  { %v12659_v28 = vld [vmem:[#allocation3 + $0x12a4] sm:$0xf0] }
 0x275   :  { %v10600_v30 = vld [vmem:[#allocation3 + $0x1488] sm:$0xf]  ;;  %v10345_v42 = vor.u32 %v12659_v28, %v10344_v45  ;;  %6759 = vmatpush.bf16.msra.mxu0 %v10089_v37 }
 0x276   :  { %v12723_v33 = vld [vmem:[#allocation3 + $0x14a4] sm:$0xf0] }
 0x277   :  { %v10856_v15 = vld [vmem:[#allocation3 + $0x1688] sm:$0xf]  ;;  %v10601_v43 = vor.u32 %v12723_v33, %v10600_v30  ;;  %6772 = vmatpush.bf16.msra.mxu1 %v10345_v42 }
 0x278   :  { %v12787_v36 = vld [vmem:[#allocation3 + $0x16a4] sm:$0xf0] }
 0x279   :  { %v10056_v44 = vld [vmem:[#allocation3 + $0x1048] sm:$0xf]  ;;  %v10857_v51 = vor.u32 %v12787_v36, %v10856_v15  ;;  %6785 = vmatpush.bf16.msra.mxu2 %v10601_v43 }
 0x27a   :  { %v12587_v46 = vld [vmem:[#allocation3 + $0x1064] sm:$0xf0] }
 0x27b   :  { %v10312_v47 = vld [vmem:[#allocation3 + $0x1248] sm:$0xf]  ;;  %v10057_v57 = vor.u32 %v12587_v46, %v10056_v44  ;;  %6798 = vmatpush.bf16.msra.mxu3 %v10857_v51  ;;  %v13098_v44 = vld [vmem:[#allocation1] sm:$0xff] }
 0x27c   :  { %v12651_v52 = vld [vmem:[#allocation3 + $0x1264] sm:$0xf0] }
 0x27d   :  { %v10568_v53 = vld [vmem:[#allocation3 + $0x1448] sm:$0xf]  ;;  %v10313_v60 = vor.u32 %v12651_v52, %v10312_v47  ;;  %6760 = vmatpush.bf16.msra.mxu0 %v10057_v57 }
 0x27e   :  { %v12715_v54 = vld [vmem:[#allocation3 + $0x1464] sm:$0xf0] }
 0x27f   :  { %v10824_v55 = vld [vmem:[#allocation3 + $0x1648] sm:$0xf]  ;;  %v10569_v61 = vor.u32 %v12715_v54, %v10568_v53  ;;  %6773 = vmatpush.bf16.msra.mxu1 %v10313_v60 }
 0x280   :  { %v12779_v56 = vld [vmem:[#allocation3 + $0x1664] sm:$0xf0] }
 0x281   :  { %v10024_v58 = vld [vmem:[#allocation3 + $0x1008] sm:$0xf]  ;;  %v10825_v2 = vor.u32 %v12779_v56, %v10824_v55  ;;  %6786 = vmatpush.bf16.msra.mxu2 %v10569_v61  ;;  %v13101_v56 = vld [vmem:[#allocation1 + $0x1b] sm:$0xff] }
 0x282   :  { %v12579_v59 = vld [vmem:[#allocation3 + $0x1024] sm:$0xf0] }
 0x283   :  { %v10280_v62 = vld [vmem:[#allocation3 + $0x1208] sm:$0xf]  ;;  %v10025_v10 = vor.u32 %v12579_v59, %v10024_v58  ;;  %6799 = vmatpush.bf16.msra.mxu3 %v10825_v2 }
 0x284   :  { %v12643_v63 = vld [vmem:[#allocation3 + $0x1224] sm:$0xf0] }
 0x285   :  { %v10536_v0 = vld [vmem:[#allocation3 + $0x1408] sm:$0xf]  ;;  %v10281_v14 = vor.u32 %v12643_v63, %v10280_v62  ;;  %6761 = vmatpush.bf16.msra.mxu0 %v10025_v10 }
 0x286   :  { %v12707_v3 = vld [vmem:[#allocation3 + $0x1424] sm:$0xf0] }
 0x287   :  { %v10792_v4 = vld [vmem:[#allocation3 + $0x1608] sm:$0xf]  ;;  %v10537_v16 = vor.u32 %v12707_v3, %v10536_v0  ;;  %6774 = vmatpush.bf16.msra.mxu1 %v10281_v14  ;;  %v6555_v3 = vpop.f32.mrf.mxu0 }
 0x288   :  { %v12771_v5 = vld [vmem:[#allocation3 + $0x1624] sm:$0xf0]  ;;  %6762 = vmatmul.bf16.vlgmr.msra.gmra.mxu0 %v13098_v44  ;;  %v6556_v6 = vadd.f32 %v6555_v3, %v13289_v39 }
 0x289   :  { %v11272_v7 = vld [vmem:[#allocation3 + $0x19c8] sm:$0xf]  ;;  %v10793_v19 = vor.u32 %v12771_v5, %v10792_v4  ;;  %6787 = vmatpush.bf16.msra.mxu2 %v10537_v16 }
 0x28a   :  { %v12891_v8 = vld [vmem:[#allocation3 + $0x19e4] sm:$0xf0] }
 0x28b   :  { %v11528_v9 = vld [vmem:[#allocation3 + $0x1bc8] sm:$0xf]  ;;  %v11273_v23 = vor.u32 %v12891_v8, %v11272_v7  ;;  %6800 = vmatpush.bf16.msra.mxu3 %v10793_v19  ;;  %v6568_v8 = vpop.f32.mrf.mxu1 }
 0x28c   :  { %v12955_v11 = vld [vmem:[#allocation3 + $0x1be4] sm:$0xf0]  ;;  %v6569_v16 = vadd.f32 %v6568_v8, %v6556_v6 }
 0x28d   :  { %v11784_v12 = vld [vmem:[#allocation3 + $0x1dc8] sm:$0xf]  ;;  %v11529_v24 = vor.u32 %v12955_v11, %v11528_v9  ;;  %6806 = vmatpush.bf16.msrb.mxu0 %v11273_v23 }
 0x28e   :  { %v13019_v13 = vld [vmem:[#allocation3 + $0x1de4] sm:$0xf0]  ;;  %6801 = vmatmul.bf16.vlgmr.msra.gmra.mxu3 %v13101_v56 }
 0x28f   :  { %v12040_v17 = vld [vmem:[#allocation3 + $0x1fc8] sm:$0xf]  ;;  %v11785_v25 = vor.u32 %v13019_v13, %v11784_v12  ;;  %6819 = vmatpush.bf16.msrb.mxu1 %v11529_v24 }
 0x290   :  { %v13083_v18 = vld [vmem:[#allocation3 + $0x1fe4] sm:$0xf0] }
 0x291   :  { %v11240_v27 = vld [vmem:[#allocation3 + $0x1988] sm:$0xf]  ;;  %v12041_v41 = vor.u32 %v13083_v18, %v12040_v17  ;;  %6832 = vmatpush.bf16.msrb.mxu2 %v11785_v25 }
 0x292   :  { %v12883_v45 = vld [vmem:[#allocation3 + $0x19a4] sm:$0xf0] }
 0x293   :  { %v11496_v48 = vld [vmem:[#allocation3 + $0x1b88] sm:$0xf]  ;;  %v11241_v15 = vor.u32 %v12883_v45, %v11240_v27  ;;  %6845 = vmatpush.bf16.msrb.mxu3 %v12041_v41  ;;  %v6570_v44 = vpop.f32.mrf.mxu1 }
 0x294   :  { %v12947_v28 = vld [vmem:[#allocation3 + $0x1ba4] sm:$0xf0]  ;;  %v8138_v44 = vld [vmem:[#allocation3 + $0x168] sm:$0xf0] }
 0x295   :  { %v11752_v30 = vld [vmem:[#allocation3 + $0x1d88] sm:$0xf]  ;;  %v11497_v36 = vor.u32 %v12947_v28, %v11496_v48  ;;  %6807 = vmatpush.bf16.msrb.mxu0 %v11241_v15 }
 0x296   :  { %v13011_v33 = vld [vmem:[#allocation3 + $0x1da4] sm:$0xf0] }
 0x297   :  { %v12008_v34 = vld [vmem:[#allocation3 + $0x1f88] sm:$0xf]  ;;  %v11753_v37 = vor.u32 %v13011_v33, %v11752_v30  ;;  %6820 = vmatpush.bf16.msrb.mxu1 %v11497_v36  ;;  %v6581_v30 = vpop.f32.mrf.mxu2  ;;  %v6594_v36 = vpop.f32.mrf.mxu3 }
 0x298   :  { %v13075_v35 = vld [vmem:[#allocation3 + $0x1fa4] sm:$0xf0]  ;;  %v6582_v15 = vadd.f32 %v6581_v30, %v6569_v16  ;;  %v12247_v16 = vld [vmem:[#allocation3 + $0x5cc] sm:$0xf] }
 0x299   :  { %v11208_v40 = vld [vmem:[#allocation3 + $0x1948] sm:$0xf]  ;;  %v12009_v46 = vor.u32 %v13075_v35, %v12008_v34  ;;  %6833 = vmatpush.bf16.msrb.mxu2 %v11753_v37 }
 0x29a   :  { %v12875_v42 = vld [vmem:[#allocation3 + $0x1964] sm:$0xf0] }
 0x29b   :  { %v11464_v43 = vld [vmem:[#allocation3 + $0x1b48] sm:$0xf]  ;;  %v11209_v57 = vor.u32 %v12875_v42, %v11208_v40  ;;  %6846 = vmatpush.bf16.msrb.mxu3 %v12009_v46  ;;  %v6557_v42 = vpop.f32.mrf.mxu0  ;;  %v13292_v46 = vadd.f32 %v6594_v36, %v6582_v15  ;;  %v12303_v15 = vld [vmem:[#allocation3 + $0x78c] sm:$0xf] }
 0x29c   :  { %v12939_v47 = vld [vmem:[#allocation3 + $0x1b64] sm:$0xf0]  ;;  %v8938_v36 = vld [vmem:[#allocation3 + $0x7a8] sm:$0xf0] }
 0x29d   :  { %v11720_v50 = vld [vmem:[#allocation3 + $0x1d48] sm:$0xf]  ;;  %v11465_v58 = vor.u32 %v12939_v47, %v11464_v43  ;;  %6808 = vmatpush.bf16.msrb.mxu0 %v11209_v57 }
 0x29e   :  { %v13003_v51 = vld [vmem:[#allocation3 + $0x1d64] sm:$0xf0] }
 0x29f   :  { %v13099_v52 = vld [vmem:[#allocation1 + $0x12] sm:$0xff]  ;;  %v13100_v53 = vld [vmem:[#allocation1 + $0x9] sm:$0xff]  ;;  %v11721_v59 = vor.u32 %v13003_v51, %v11720_v50  ;;  %6821 = vmatpush.bf16.msrb.mxu1 %v11465_v58  ;;  %v6583_v8 = vpop.f32.mrf.mxu2 }
 0x2a0   :  { %6788 = vmatmul.bf16.vlgmr.msra.gmra.mxu2 %v13099_v52  ;;  %6775 = vmatmul.bf16.vlgmr.msra.gmra.mxu1 %v13100_v53  ;;  %v11976_v54 = vld [vmem:[#allocation3 + $0x1f48] sm:$0xf]  ;;  %v8874_v8 = vld [vmem:[#allocation3 + $0x728] sm:$0xf0] }
 0x2a1   :  { %v13067_v55 = vld [vmem:[#allocation3 + $0x1f64] sm:$0xf0]  ;;  %6834 = vmatpush.bf16.msrb.mxu2 %v11721_v59 }
 0x2a2   :  { %v11176_v60 = vld [vmem:[#allocation3 + $0x1908] sm:$0xf]  ;;  %v11977_v63 = vor.u32 %v13067_v55, %v11976_v54 }
 0x2a3   :  { %v12867_v61 = vld [vmem:[#allocation3 + $0x1924] sm:$0xf0] }
 0x2a4   :  { %v11432_v62 = vld [vmem:[#allocation3 + $0x1b08] sm:$0xf]  ;;  %v11177_v7 = vor.u32 %v12867_v61, %v11176_v60  ;;  %6847 = vmatpush.bf16.msrb.mxu3 %v11977_v63 }
 0x2a5   :  { %v12931_v0 = vld [vmem:[#allocation3 + $0x1b24] sm:$0xf0] }
 0x2a6   :  { %v11688_v1 = vld [vmem:[#allocation3 + $0x1d08] sm:$0xf]  ;;  %v11433_v9 = vor.u32 %v12931_v0, %v11432_v62  ;;  %6809 = vmatpush.bf16.msrb.mxu0 %v11177_v7 }
 0x2a7   :  { %v12995_v2 = vld [vmem:[#allocation3 + $0x1d24] sm:$0xf0] }
 0x2a8   :  { %v11944_v4 = vld [vmem:[#allocation3 + $0x1f08] sm:$0xf]  ;;  %v11689_v10 = vor.u32 %v12995_v2, %v11688_v1  ;;  %6822 = vmatpush.bf16.msrb.mxu1 %v11433_v9  ;;  %v12119_v9 = vld [vmem:[#allocation3 + $0x1cc] sm:$0xf] }
 0x2a9   :  { %v13059_v5 = vld [vmem:[#allocation3 + $0x1f24] sm:$0xf0] }
 0x2aa   :  { %v11144_v11 = vld [vmem:[#allocation3 + $0x18c8] sm:$0xf]  ;;  %v11945_v14 = vor.u32 %v13059_v5, %v11944_v4  ;;  %6835 = vmatpush.bf16.msrb.mxu2 %v11689_v10  ;;  %v8202_v10 = vld [vmem:[#allocation3 + $0x1e8] sm:$0xf0] }
 0x2ab   :  { %v12859_v12 = vld [vmem:[#allocation3 + $0x18e4] sm:$0xf0] }
 0x2ac   :  { %v11400_v13 = vld [vmem:[#allocation3 + $0x1ac8] sm:$0xf]  ;;  %v11145_v25 = vor.u32 %v12859_v12, %v11144_v11  ;;  %6848 = vmatpush.bf16.msrb.mxu3 %v11945_v14  ;;  %v12183_v11 = vld [vmem:[#allocation3 + $0x3cc] sm:$0xf]  ;;  %v6596_v12 = vpop.f32.mrf.mxu3 }
 0x2ad   :  { %v12923_v17 = vld [vmem:[#allocation3 + $0x1ae4] sm:$0xf0]  ;;  %v8458_v14 = vld [vmem:[#allocation3 + $0x3e8] sm:$0xf0] }
 0x2ae   :  { %v11656_v18 = vld [vmem:[#allocation3 + $0x1cc8] sm:$0xf]  ;;  %v11401_v39 = vor.u32 %v12923_v17, %v11400_v13  ;;  %6810 = vmatpush.bf16.msrb.mxu0 %v11145_v25  ;;  %v8714_v17 = vld [vmem:[#allocation3 + $0x5e8] sm:$0xf0] }
 0x2af   :  { %v12987_v19 = vld [vmem:[#allocation3 + $0x1ce4] sm:$0xf0] }
 0x2b0   :  { %v11912_v23 = vld [vmem:[#allocation3 + $0x1ec8] sm:$0xf]  ;;  %v11657_v27 = vor.u32 %v12987_v19, %v11656_v18  ;;  %6823 = vmatpush.bf16.msrb.mxu1 %v11401_v39  ;;  %v8205_v39 = vor.u32 %v12119_v9, %v8202_v10 }
 0x2b1   :  { %v13051_v24 = vld [vmem:[#allocation3 + $0x1ee4] sm:$0xf0] }
 0x2b2   :  { %v11112_v45 = vld [vmem:[#allocation3 + $0x1888] sm:$0xf]  ;;  %v11913_v28 = vor.u32 %v13051_v24, %v11912_v23  ;;  %6836 = vmatpush.bf16.msrb.mxu2 %v11657_v27  ;;  %v12311_v23 = vld [vmem:[#allocation3 + $0x7cc] sm:$0xf]  ;;  %v8461_v27 = vor.u32 %v12183_v11, %v8458_v14  ;;  %v6620_v11 = vpop.f32.mrf.mxu1 }
 0x2b3   :  { %v12851_v48 = vld [vmem:[#allocation3 + $0x18a4] sm:$0xf0]  ;;  %v8970_v24 = vld [vmem:[#allocation3 + $0x7e8] sm:$0xf0] }
 0x2b4   :  { %v11368_v41 = vld [vmem:[#allocation3 + $0x1a88] sm:$0xf]  ;;  %v11113_v43 = vor.u32 %v12851_v48, %v11112_v45  ;;  %6849 = vmatpush.bf16.msrb.mxu3 %v11913_v28  ;;  %v8717_v45 = vor.u32 %v12247_v16, %v8714_v17  ;;  %v12111_v48 = vld [vmem:[#allocation3 + $0x18c] sm:$0xf]  ;;  %v8973_v30 = vor.u32 %v12311_v23, %v8970_v24 }
 0x2b5   :  { %v12915_v33 = vld [vmem:[#allocation3 + $0x1aa4] sm:$0xf0]  ;;  %v12175_v28 = vld [vmem:[#allocation3 + $0x38c] sm:$0xf] }
 0x2b6   :  { %v11624_v34 = vld [vmem:[#allocation3 + $0x1c88] sm:$0xf]  ;;  %v11369_v47 = vor.u32 %v12915_v33, %v11368_v41  ;;  %6811 = vmatpush.bf16.msrb.mxu0 %v11113_v43  ;;  %v8170_v41 = vld [vmem:[#allocation3 + $0x1a8] sm:$0xf0] }
 0x2b7   :  { %v12979_v35 = vld [vmem:[#allocation3 + $0x1ca4] sm:$0xf0]  ;;  %v8426_v33 = vld [vmem:[#allocation3 + $0x3a8] sm:$0xf0] }
 0x2b8   :  { %v11880_v37 = vld [vmem:[#allocation3 + $0x1e88] sm:$0xf]  ;;  %v11625_v50 = vor.u32 %v12979_v35, %v11624_v34  ;;  %6824 = vmatpush.bf16.msrb.mxu1 %v11369_v47  ;;  %v12239_v34 = vld [vmem:[#allocation3 + $0x58c] sm:$0xf] }
 0x2b9   :  { %v13043_v40 = vld [vmem:[#allocation3 + $0x1ea4] sm:$0xf0]  ;;  %v8682_v35 = vld [vmem:[#allocation3 + $0x5a8] sm:$0xf0] }
 0x2ba   :  { %v11080_v51 = vld [vmem:[#allocation3 + $0x1848] sm:$0xf]  ;;  %v11881_v54 = vor.u32 %v13043_v40, %v11880_v37  ;;  %6837 = vmatpush.bf16.msrb.mxu2 %v11625_v50  ;;  %v8173_v37 = vor.u32 %v12111_v48, %v8170_v41  ;;  %v8429_v40 = vor.u32 %v12175_v28, %v8426_v33  ;;  %v8685_v42 = vor.u32 %v12239_v34, %v8682_v35  ;;  %v12103_v43 = vld [vmem:[#allocation3 + $0x14c] sm:$0xf]  ;;  %v13102_v50 = vld [vmem:[#allocation1 + $0x24] sm:$0xff]  ;;  %v6633_v34 = vpop.f32.mrf.mxu2 }
 0x2bb   :  { %v12843_v52 = vld [vmem:[#allocation3 + $0x1864] sm:$0xf0]  ;;  %v12167_v47 = vld [vmem:[#allocation3 + $0x34c] sm:$0xf] }
 0x2bc   :  { %v11336_v53 = vld [vmem:[#allocation3 + $0x1a48] sm:$0xf]  ;;  %v11081_v60 = vor.u32 %v12843_v52, %v11080_v51  ;;  %6850 = vmatpush.bf16.msrb.mxu3 %v11881_v54  ;;  %v8941_v51 = vor.u32 %v12303_v15, %v8938_v36  ;;  %v8394_v52 = vld [vmem:[#allocation3 + $0x368] sm:$0xf0] }
 0x2bd   :  { %v12907_v55 = vld [vmem:[#allocation3 + $0x1a64] sm:$0xf0]  ;;  %v8650_v54 = vld [vmem:[#allocation3 + $0x568] sm:$0xf0] }
 0x2be   :  { %v11592_v56 = vld [vmem:[#allocation3 + $0x1c48] sm:$0xf]  ;;  %v11337_v63 = vor.u32 %v12907_v55, %v11336_v53  ;;  %6812 = vmatpush.bf16.msrb.mxu0 %v11081_v60  ;;  %v12231_v53 = vld [vmem:[#allocation3 + $0x54c] sm:$0xf]  ;;  %v8141_v60 = vor.u32 %v12103_v43, %v8138_v44 }
 0x2bf   :  { %v12971_v57 = vld [vmem:[#allocation3 + $0x1c64] sm:$0xf0]  ;;  %v13103_v55 = vld [vmem:[#allocation1 + $0x36] sm:$0xff] }
 0x2c0   :  { %v11848_v58 = vld [vmem:[#allocation3 + $0x1e48] sm:$0xf]  ;;  %v11593_v0 = vor.u32 %v12971_v57, %v11592_v56  ;;  %6825 = vmatpush.bf16.msrb.mxu1 %v11337_v63  ;;  %v12295_v57 = vld [vmem:[#allocation3 + $0x74c] sm:$0xf] }
 0x2c1   :  { %v13035_v59 = vld [vmem:[#allocation3 + $0x1e64] sm:$0xf0]  ;;  %v12095_v63 = vld [vmem:[#allocation3 + $0x10c] sm:$0xf] }
 0x2c2   :  { %v11048_v61 = vld [vmem:[#allocation3 + $0x1808] sm:$0xf]  ;;  %v11849_v4 = vor.u32 %v13035_v59, %v11848_v58  ;;  %6838 = vmatpush.bf16.msrb.mxu2 %v11593_v0  ;;  %v8906_v58 = vld [vmem:[#allocation3 + $0x768] sm:$0xf0]  ;;  %v13105_v59 = vld [vmem:[#allocation1 + $0x3f] sm:$0xff] }
 0x2c3   :  { %v12835_v62 = vld [vmem:[#allocation3 + $0x1824] sm:$0xf0]  ;;  %v8106_v0 = vld [vmem:[#allocation3 + $0x128] sm:$0xf0] }
 0x2c4   :  { %v11304_v1 = vld [vmem:[#allocation3 + $0x1a08] sm:$0xf]  ;;  %v11049_v13 = vor.u32 %v12835_v62, %v11048_v61  ;;  %6851 = vmatpush.bf16.msrb.mxu3 %v11849_v4  ;;  %v8397_v61 = vor.u32 %v12167_v47, %v8394_v52  ;;  %v8653_v62 = vor.u32 %v12231_v53, %v8650_v54  ;;  %v12223_v4 = vld [vmem:[#allocation3 + $0x50c] sm:$0xf]  ;;  %v8109_v10 = vor.u32 %v12095_v63, %v8106_v0 }
 0x2c5   :  { %v12899_v2 = vld [vmem:[#allocation3 + $0x1a24] sm:$0xf0]  ;;  %v12087_v14 = vld [vmem:[#allocation3 + $0xcc] sm:$0xf] }
 0x2c6   :  { %v11560_v3 = vld [vmem:[#allocation3 + $0x1c08] sm:$0xf]  ;;  %v11305_v18 = vor.u32 %v12899_v2, %v11304_v1  ;;  %6813 = vmatpush.bf16.msrb.mxu0 %v11049_v13  ;;  %v12159_v1 = vld [vmem:[#allocation3 + $0x30c] sm:$0xf]  ;;  %v8909_v2 = vor.u32 %v12295_v57, %v8906_v58 }
 0x2c7   :  { %v12963_v5 = vld [vmem:[#allocation3 + $0x1c24] sm:$0xf0]  ;;  %v8074_v16 = vld [vmem:[#allocation3 + $0xe8] sm:$0xf0] }
 0x2c8   :  { %v11816_v6 = vld [vmem:[#allocation3 + $0x1e08] sm:$0xf]  ;;  %v11561_v19 = vor.u32 %v12963_v5, %v11560_v3  ;;  %6826 = vmatpush.bf16.msrb.mxu1 %v11305_v18  ;;  %v8362_v3 = vld [vmem:[#allocation3 + $0x328] sm:$0xf0] }
 0x2c9   :  { %v13027_v7 = vld [vmem:[#allocation3 + $0x1e24] sm:$0xf0]  ;;  %6814 = vmatmul.bf16.vlgmr.msrb.gmra.mxu0 %v13102_v50  ;;  %v8618_v5 = vld [vmem:[#allocation3 + $0x528] sm:$0xf0]  ;;  %v8365_v12 = vor.u32 %v12159_v1, %v8362_v3  ;;  %v6622_v50 = vpop.f32.mrf.mxu1 }
 0x2ca   :  { %v11817_v25 = vor.u32 %v13027_v7, %v11816_v6  ;;  %6839 = vmatpush.bf16.msrb.mxu2 %v11561_v19  ;;  %6858 = vmatpush.bf16.msra.mxu0 %v8205_v39  ;;  %v13104_v56 = vld [vmem:[#allocation1 + $0x2d] sm:$0xff]  ;;  %v6607_v6 = vpop.f32.mrf.mxu0  ;;  %v8621_v13 = vor.u32 %v12223_v4, %v8618_v5 }
 0x2cb   :  { %6827 = vmatmul.bf16.vlgmr.msrb.gmra.mxu1 %v13104_v56  ;;  %v12287_v7 = vld [vmem:[#allocation3 + $0x70c] sm:$0xf]  ;;  %v6608_v9 = vadd.f32 %v6607_v6, %v13292_v46 }
 0x2cc   :  { %6852 = vmatpush.bf16.msrb.mxu3 %v11817_v25  ;;  %6871 = vmatpush.bf16.msra.mxu1 %v8461_v27  ;;  %v12151_v17 = vld [vmem:[#allocation3 + $0x2cc] sm:$0xf]  ;;  %v8877_v18 = vor.u32 %v12287_v7, %v8874_v8 }
 0x2cd   :  { %6840 = vmatmul.bf16.vlgmr.msrb.gmra.mxu2 %v13103_v55  ;;  %v6621_v19 = vadd.f32 %v6620_v11, %v6608_v9  ;;  %v8330_v23 = vld [vmem:[#allocation3 + $0x2e8] sm:$0xf0] }
 0x2ce   :  { %6884 = vmatpush.bf16.msra.mxu2 %v8717_v45  ;;  %6859 = vmatpush.bf16.msra.mxu0 %v8173_v37  ;;  %v12215_v24 = vld [vmem:[#allocation3 + $0x4cc] sm:$0xf]  ;;  %v8077_v45 = vor.u32 %v12087_v14, %v8074_v16  ;;  %v8333_v46 = vor.u32 %v12151_v17, %v8330_v23 }
 0x2cf   :  { %6853 = vmatmul.bf16.vlgmr.msrb.gmra.mxu3 %v13105_v59  ;;  %v8586_v25 = vld [vmem:[#allocation3 + $0x4e8] sm:$0xf0]  ;;  %v6634_v37 = vadd.f32 %v6633_v34, %v6621_v19 }
 0x2d0   :  { %6897 = vmatpush.bf16.msra.mxu3 %v8973_v30  ;;  %6872 = vmatpush.bf16.msra.mxu1 %v8429_v40  ;;  %v12279_v39 = vld [vmem:[#allocation3 + $0x6cc] sm:$0xf]  ;;  %v8589_v48 = vor.u32 %v12215_v24, %v8586_v25  ;;  %v6646_v40 = vpop.f32.mrf.mxu3 }
 0x2d1   :  { %v8842_v27 = vld [vmem:[#allocation3 + $0x6e8] sm:$0xf0] }
 0x2d2   :  { %6885 = vmatpush.bf16.msra.mxu2 %v8685_v42  ;;  %6860 = vmatpush.bf16.msra.mxu0 %v8141_v60  ;;  %v12079_v41 = vld [vmem:[#allocation3 + $0x8c] sm:$0xf]  ;;  %v8845_v33 = vor.u32 %v12279_v39, %v8842_v27  ;;  %v6609_v44 = vpop.f32.mrf.mxu0 }
 0x2d3   :  { %v8042_v28 = vld [vmem:[#allocation3 + $0xa8] sm:$0xf0] }
 0x2d4   :  { %6898 = vmatpush.bf16.msra.mxu3 %v8941_v51  ;;  %6873 = vmatpush.bf16.msra.mxu1 %v8397_v61  ;;  %v12143_v30 = vld [vmem:[#allocation3 + $0x28c] sm:$0xf]  ;;  %v8045_v47 = vor.u32 %v12079_v41, %v8042_v28  ;;  %v6647_v51 = vadd.f32 %v6646_v40, %v6634_v37 }
 0x2d5   :  { %v8298_v35 = vld [vmem:[#allocation3 + $0x2a8] sm:$0xf0] }
 0x2d6   :  { %6886 = vmatpush.bf16.msra.mxu2 %v8653_v62  ;;  %6861 = vmatpush.bf16.msra.mxu0 %v8109_v10  ;;  %v12207_v15 = vld [vmem:[#allocation3 + $0x48c] sm:$0xf]  ;;  %v8301_v52 = vor.u32 %v12143_v30, %v8298_v35  ;;  %v7906_v61 = vrot.slane %v6647_v51, 6 }
 0x2d7   :  { %v8554_v36 = vld [vmem:[#allocation3 + $0x4a8] sm:$0xf0] }
 0x2d8   :  { %6899 = vmatpush.bf16.msra.mxu3 %v8909_v2  ;;  %6874 = vmatpush.bf16.msra.mxu1 %v8365_v12  ;;  %v12271_v42 = vld [vmem:[#allocation3 + $0x68c] sm:$0xf]  ;;  %v8557_v53 = vor.u32 %v12207_v15, %v8554_v36  ;;  %v13297_v3 = vsel %vm7912_vm0, %v13276_v49, %v7906_v61 }
 0x2d9   :  { %v8810_v43 = vld [vmem:[#allocation3 + $0x6a8] sm:$0xf0] }
 0x2da   :  { %6887 = vmatpush.bf16.msra.mxu2 %v8621_v13  ;;  %6862 = vmatpush.bf16.msra.mxu0 %v8077_v45  ;;  %v12071_v54 = vld [vmem:[#allocation3 + $0x4c] sm:$0xf]  ;;  %v8813_v57 = vor.u32 %v12271_v42, %v8810_v43  ;;  %v6635_v13 = vpop.f32.mrf.mxu2 }
 0x2db   :  { %v8010_v55 = vld [vmem:[#allocation3 + $0x68] sm:$0xf0] }
 0x2dc   :  { %6900 = vmatpush.bf16.msra.mxu3 %v8877_v18  ;;  %6875 = vmatpush.bf16.msra.mxu1 %v8333_v46  ;;  %v12135_v56 = vld [vmem:[#allocation3 + $0x24c] sm:$0xf]  ;;  %v8013_v0 = vor.u32 %v12071_v54, %v8010_v55  ;;  %v6648_v18 = vpop.f32.mrf.mxu3 }
 0x2dd   :  { %v8266_v58 = vld [vmem:[#allocation3 + $0x268] sm:$0xf0] }
 0x2de   :  { %6888 = vmatpush.bf16.msra.mxu2 %v8589_v48  ;;  %v12199_v59 = vld [vmem:[#allocation3 + $0x44c] sm:$0xf]  ;;  %6863 = vmatpush.bf16.msra.mxu0 %v8045_v47  ;;  %v8269_v4 = vor.u32 %v12135_v56, %v8266_v58 }
 0x2df   :  { %v8522_v60 = vld [vmem:[#allocation3 + $0x468] sm:$0xf0] }
 0x2e0   :  { %6901 = vmatpush.bf16.msra.mxu3 %v8845_v33  ;;  %v12263_v62 = vld [vmem:[#allocation3 + $0x64c] sm:$0xf]  ;;  %6876 = vmatpush.bf16.msra.mxu1 %v8301_v52  ;;  %v8525_v5 = vor.u32 %v12199_v59, %v8522_v60 }
 0x2e1   :  { %v8778_v63 = vld [vmem:[#allocation3 + $0x668] sm:$0xf0] }
 0x2e2   :  { %v12063_v1 = vld [vmem:[#allocation3 + $0xc] sm:$0xf]  ;;  %6889 = vmatpush.bf16.msra.mxu2 %v8557_v53  ;;  %v8781_v9 = vor.u32 %v12263_v62, %v8778_v63  ;;  %6864 = vmatpush.bf16.msra.mxu0 %v8013_v0 }
 0x2e3   :  { %v7978_v2 = vld [vmem:[#allocation3 + $0x28] sm:$0xf0] }
 0x2e4   :  { %v12127_v6 = vld [vmem:[#allocation3 + $0x20c] sm:$0xf]  ;;  %6902 = vmatpush.bf16.msra.mxu3 %v8813_v57  ;;  %v7981_v49 = vor.u32 %v12063_v1, %v7978_v2  ;;  %6877 = vmatpush.bf16.msra.mxu1 %v8269_v4 }
 0x2e5   :  { %v8234_v7 = vld [vmem:[#allocation3 + $0x228] sm:$0xf0] }
 0x2e6   :  { %v12191_v8 = vld [vmem:[#allocation3 + $0x40c] sm:$0xf]  ;;  %6890 = vmatpush.bf16.msra.mxu2 %v8525_v5  ;;  %v8237_v25 = vor.u32 %v12127_v6, %v8234_v7  ;;  %6865 = vmatpush.bf16.msra.mxu0 %v7981_v49 }
 0x2e7   :  { %v8490_v10 = vld [vmem:[#allocation3 + $0x428] sm:$0xf0] }
 0x2e8   :  { %v12255_v11 = vld [vmem:[#allocation3 + $0x60c] sm:$0xf]  ;;  %v8493_v39 = vor.u32 %v12191_v8, %v8490_v10  ;;  %6903 = vmatpush.bf16.msra.mxu3 %v8781_v9  ;;  %6878 = vmatpush.bf16.msra.mxu1 %v8237_v25  ;;  %v6659_v9 = vpop.f32.mrf.mxu0 }
 0x2e9   :  { %v8746_v12 = vld [vmem:[#allocation3 + $0x628] sm:$0xf0]  ;;  %6866 = vmatmul.bf16.vlgmr.msra.gmra.mxu0 %v13234_v21 }
 0x2ea   :  { %v12375_v14 = vld [vmem:[#allocation3 + $0x9cc] sm:$0xf]  ;;  %v8749_v46 = vor.u32 %v12255_v11, %v8746_v12  ;;  %6891 = vmatpush.bf16.msra.mxu2 %v8493_v39 }
 0x2eb   :  { %v9226_v16 = vld [vmem:[#allocation3 + $0x9e8] sm:$0xf0]  ;;  %6879 = vmatmul.bf16.vlgmr.msra.gmra.mxu1 %v13239_v26 }
 0x2ec   :  { %v12439_v17 = vld [vmem:[#allocation3 + $0xbcc] sm:$0xf]  ;;  %v9229_v48 = vor.u32 %v12375_v14, %v9226_v16  ;;  %6904 = vmatpush.bf16.msra.mxu3 %v8749_v46  ;;  %v6672_v16 = vpop.f32.mrf.mxu1 }
 0x2ed   :  { %v9482_v19 = vld [vmem:[#allocation3 + $0xbe8] sm:$0xf0]  ;;  %6892 = vmatmul.bf16.vlgmr.msra.gmra.mxu2 %v13232_v20 }
 0x2ee   :  { %v12503_v23 = vld [vmem:[#allocation3 + $0xdcc] sm:$0xf]  ;;  %v9485_v41 = vor.u32 %v12439_v17, %v9482_v19  ;;  %6910 = vmatpush.bf16.msrb.mxu0 %v9229_v48 }
 0x2ef   :  { %v9738_v24 = vld [vmem:[#allocation3 + $0xde8] sm:$0xf0]  ;;  %6905 = vmatmul.bf16.vlgmr.msra.gmra.mxu3 %v13236_v22 }
 0x2f0   :  { %v12567_v27 = vld [vmem:[#allocation3 + $0xfcc] sm:$0xf]  ;;  %v9741_v28 = vor.u32 %v12503_v23, %v9738_v24  ;;  %6923 = vmatpush.bf16.msrb.mxu1 %v9485_v41  ;;  %v6673_v23 = vadd.f32 %v6672_v16, %v6659_v9 }
 0x2f1   :  { %v9994_v45 = vld [vmem:[#allocation3 + $0xfe8] sm:$0xf0] }
 0x2f2   :  { %v12367_v30 = vld [vmem:[#allocation3 + $0x98c] sm:$0xf]  ;;  %v9997_v35 = vor.u32 %v12567_v27, %v9994_v45  ;;  %6936 = vmatpush.bf16.msrb.mxu2 %v9741_v28  ;;  %v6685_v28 = vpop.f32.mrf.mxu2 }
 0x2f3   :  { %v9194_v33 = vld [vmem:[#allocation3 + $0x9a8] sm:$0xf0] }
 0x2f4   :  { %v12431_v34 = vld [vmem:[#allocation3 + $0xb8c] sm:$0xf]  ;;  %v9197_v43 = vor.u32 %v12367_v30, %v9194_v33  ;;  %6949 = vmatpush.bf16.msrb.mxu3 %v9997_v35 }
 0x2f5   :  { %v9450_v15 = vld [vmem:[#allocation3 + $0xba8] sm:$0xf0] }
 0x2f6   :  { %v12495_v36 = vld [vmem:[#allocation3 + $0xd8c] sm:$0xf]  ;;  %v9453_v44 = vor.u32 %v12431_v34, %v9450_v15  ;;  %6911 = vmatpush.bf16.msrb.mxu0 %v9197_v43  ;;  %v6686_v15 = vadd.f32 %v6685_v28, %v6673_v23 }
 0x2f7   :  { %v9706_v37 = vld [vmem:[#allocation3 + $0xda8] sm:$0xf0] }
 0x2f8   :  { %v12559_v40 = vld [vmem:[#allocation3 + $0xf8c] sm:$0xf]  ;;  %v9709_v47 = vor.u32 %v12495_v36, %v9706_v37  ;;  %6924 = vmatpush.bf16.msrb.mxu1 %v9453_v44  ;;  %v6698_v36 = vpop.f32.mrf.mxu3  ;;  %v6661_v44 = vpop.f32.mrf.mxu0 }
 0x2f9   :  { %v9962_v42 = vld [vmem:[#allocation3 + $0xfa8] sm:$0xf0]  ;;  %v13303_v43 = vadd.f32 %v6698_v36, %v6686_v15 }
 0x2fa   :  { %v12359_v50 = vld [vmem:[#allocation3 + $0x94c] sm:$0xf]  ;;  %v9965_v53 = vor.u32 %v12559_v40, %v9962_v42  ;;  %6937 = vmatpush.bf16.msrb.mxu2 %v9709_v47 }
 0x2fb   :  { %v9162_v51 = vld [vmem:[#allocation3 + $0x968] sm:$0xf0] }
 0x2fc   :  { %v12423_v52 = vld [vmem:[#allocation3 + $0xb4c] sm:$0xf]  ;;  %v9165_v59 = vor.u32 %v12359_v50, %v9162_v51  ;;  %6950 = vmatpush.bf16.msrb.mxu3 %v9965_v53 }
 0x2fd   :  { %v9418_v54 = vld [vmem:[#allocation3 + $0xb68] sm:$0xf0] }
 0x2fe   :  { %v12487_v55 = vld [vmem:[#allocation3 + $0xd4c] sm:$0xf]  ;;  %v9421_v60 = vor.u32 %v12423_v52, %v9418_v54  ;;  %6912 = vmatpush.bf16.msrb.mxu0 %v9165_v59  ;;  %v6674_v54 = vpop.f32.mrf.mxu1 }
 0x2ff   :  { %v9674_v56 = vld [vmem:[#allocation3 + $0xd68] sm:$0xf0] }
 0x300   :  { %v12551_v57 = vld [vmem:[#allocation3 + $0xf4c] sm:$0xf]  ;;  %v9677_v61 = vor.u32 %v12487_v55, %v9674_v56  ;;  %6925 = vmatpush.bf16.msrb.mxu1 %v9421_v60 }
 0x301   :  { %v9930_v58 = vld [vmem:[#allocation3 + $0xf68] sm:$0xf0] }
 0x302   :  { %v12351_v62 = vld [vmem:[#allocation3 + $0x90c] sm:$0xf]  ;;  %v9933_v1 = vor.u32 %v12551_v57, %v9930_v58  ;;  %6938 = vmatpush.bf16.msrb.mxu2 %v9677_v61 }
 0x303   :  { %v9130_v63 = vld [vmem:[#allocation3 + $0x928] sm:$0xf0] }
 0x304   :  { %v12415_v0 = vld [vmem:[#allocation3 + $0xb0c] sm:$0xf]  ;;  %v9133_v8 = vor.u32 %v12351_v62, %v9130_v63  ;;  %6951 = vmatpush.bf16.msrb.mxu3 %v9933_v1 }
 0x305   :  { %v9386_v2 = vld [vmem:[#allocation3 + $0xb28] sm:$0xf0] }
 0x306   :  { %v12479_v4 = vld [vmem:[#allocation3 + $0xd0c] sm:$0xf]  ;;  %v9389_v10 = vor.u32 %v12415_v0, %v9386_v2  ;;  %6913 = vmatpush.bf16.msrb.mxu0 %v9133_v8 }
 0x307   :  { %v9642_v5 = vld [vmem:[#allocation3 + $0xd28] sm:$0xf0] }
 0x308   :  { %v12543_v6 = vld [vmem:[#allocation3 + $0xf0c] sm:$0xf]  ;;  %v9645_v11 = vor.u32 %v12479_v4, %v9642_v5  ;;  %6926 = vmatpush.bf16.msrb.mxu1 %v9389_v10 }
 0x309   :  { %v9898_v7 = vld [vmem:[#allocation3 + $0xf28] sm:$0xf0] }
 0x30a   :  { %v12343_v12 = vld [vmem:[#allocation3 + $0x8cc] sm:$0xf]  ;;  %v9901_v17 = vor.u32 %v12543_v6, %v9898_v7  ;;  %6939 = vmatpush.bf16.msrb.mxu2 %v9645_v11  ;;  %v6687_v6 = vpop.f32.mrf.mxu2  ;;  %v6700_v11 = vpop.f32.mrf.mxu3 }
 0x30b   :  { %v9098_v13 = vld [vmem:[#allocation3 + $0x8e8] sm:$0xf0] }
 0x30c   :  { %v12407_v14 = vld [vmem:[#allocation3 + $0xacc] sm:$0xf]  ;;  %v9101_v39 = vor.u32 %v12343_v12, %v9098_v13  ;;  %6952 = vmatpush.bf16.msrb.mxu3 %v9901_v17 }
 0x30d   :  { %v9354_v18 = vld [vmem:[#allocation3 + $0xae8] sm:$0xf0] }
 0x30e   :  { %v12471_v49 = vld [vmem:[#allocation3 + $0xccc] sm:$0xf]  ;;  %v9357_v27 = vor.u32 %v12407_v14, %v9354_v18  ;;  %6914 = vmatpush.bf16.msrb.mxu0 %v9101_v39 }
 0x30f   :  { %v9610_v19 = vld [vmem:[#allocation3 + $0xce8] sm:$0xf0] }
 0x310   :  { %v12535_v24 = vld [vmem:[#allocation3 + $0xecc] sm:$0xf]  ;;  %v9613_v45 = vor.u32 %v12471_v49, %v9610_v19  ;;  %6927 = vmatpush.bf16.msrb.mxu1 %v9357_v27 }
 0x311   :  { %v9866_v25 = vld [vmem:[#allocation3 + $0xee8] sm:$0xf0] }
 0x312   :  { %v12335_v46 = vld [vmem:[#allocation3 + $0x88c] sm:$0xf]  ;;  %v9869_v30 = vor.u32 %v12535_v24, %v9866_v25  ;;  %6940 = vmatpush.bf16.msrb.mxu2 %v9613_v45 }
 0x313   :  { %v9066_v48 = vld [vmem:[#allocation3 + $0x8a8] sm:$0xf0] }
 0x314   :  { %v12399_v41 = vld [vmem:[#allocation3 + $0xa8c] sm:$0xf]  ;;  %v9069_v42 = vor.u32 %v12335_v46, %v9066_v48  ;;  %6953 = vmatpush.bf16.msrb.mxu3 %v9869_v30 }
 0x315   :  { %v9322_v33 = vld [vmem:[#allocation3 + $0xaa8] sm:$0xf0] }
 0x316   :  { %v12463_v34 = vld [vmem:[#allocation3 + $0xc8c] sm:$0xf]  ;;  %v9325_v47 = vor.u32 %v12399_v41, %v9322_v33  ;;  %6915 = vmatpush.bf16.msrb.mxu0 %v9069_v42 }
 0x317   :  { %v9578_v35 = vld [vmem:[#allocation3 + $0xca8] sm:$0xf0] }
 0x318   :  { %v12527_v37 = vld [vmem:[#allocation3 + $0xe8c] sm:$0xf]  ;;  %v9581_v50 = vor.u32 %v12463_v34, %v9578_v35  ;;  %6928 = vmatpush.bf16.msrb.mxu1 %v9325_v47 }
 0x319   :  { %v9834_v40 = vld [vmem:[#allocation3 + $0xea8] sm:$0xf0] }
 0x31a   :  { %v12327_v51 = vld [vmem:[#allocation3 + $0x84c] sm:$0xf]  ;;  %v9837_v55 = vor.u32 %v12527_v37, %v9834_v40  ;;  %6941 = vmatpush.bf16.msrb.mxu2 %v9581_v50 }
 0x31b   :  { %v9034_v52 = vld [vmem:[#allocation3 + $0x868] sm:$0xf0] }
 0x31c   :  { %v12391_v53 = vld [vmem:[#allocation3 + $0xa4c] sm:$0xf]  ;;  %v9037_v61 = vor.u32 %v12327_v51, %v9034_v52  ;;  %6954 = vmatpush.bf16.msrb.mxu3 %v9837_v55 }
 0x31d   :  { %v9290_v56 = vld [vmem:[#allocation3 + $0xa68] sm:$0xf0] }
 0x31e   :  { %v12455_v57 = vld [vmem:[#allocation3 + $0xc4c] sm:$0xf]  ;;  %v9293_v0 = vor.u32 %v12391_v53, %v9290_v56  ;;  %6916 = vmatpush.bf16.msrb.mxu0 %v9037_v61 }
 0x31f   :  { %v9546_v58 = vld [vmem:[#allocation3 + $0xc68] sm:$0xf0] }
 0x320   :  { %v12519_v59 = vld [vmem:[#allocation3 + $0xe4c] sm:$0xf]  ;;  %v9549_v1 = vor.u32 %v12455_v57, %v9546_v58  ;;  %6929 = vmatpush.bf16.msrb.mxu1 %v9293_v0 }
 0x321   :  { %v9802_v60 = vld [vmem:[#allocation3 + $0xe68] sm:$0xf0] }
 0x322   :  { %v12319_v62 = vld [vmem:[#allocation3 + $0x80c] sm:$0xf]  ;;  %v9805_v7 = vor.u32 %v12519_v59, %v9802_v60  ;;  %6942 = vmatpush.bf16.msrb.mxu2 %v9549_v1 }
 0x323   :  { %v9002_v63 = vld [vmem:[#allocation3 + $0x828] sm:$0xf0] }
 0x324   :  { %v12383_v2 = vld [vmem:[#allocation3 + $0xa0c] sm:$0xf]  ;;  %v9005_v16 = vor.u32 %v12319_v62, %v9002_v63  ;;  %6955 = vmatpush.bf16.msrb.mxu3 %v9805_v7  ;;  %v6711_v7 = vpop.f32.mrf.mxu0 }
 0x325   :  { %v9258_v4 = vld [vmem:[#allocation3 + $0xa28] sm:$0xf0] }
 0x326   :  { %v12447_v5 = vld [vmem:[#allocation3 + $0xc0c] sm:$0xf]  ;;  %v9261_v19 = vor.u32 %v12383_v2, %v9258_v4  ;;  %6917 = vmatpush.bf16.msrb.mxu0 %v9005_v16 }
 0x327   :  { %v9514_v8 = vld [vmem:[#allocation3 + $0xc28] sm:$0xf0] }
 0x328   :  { %v12511_v9 = vld [vmem:[#allocation3 + $0xe0c] sm:$0xf]  ;;  %v9517_v23 = vor.u32 %v12447_v5, %v9514_v8  ;;  %6930 = vmatpush.bf16.msrb.mxu1 %v9261_v19 }
 0x329   :  { %v9770_v10 = vld [vmem:[#allocation3 + $0xe28] sm:$0xf0]  ;;  %6918 = vmatmul.bf16.vlgmr.msrb.gmra.mxu0 %v13246_v31 }
 0x32a   :  { %v12631_v12 = vld [vmem:[#allocation3 + $0x11cc] sm:$0xf]  ;;  %v9773_v39 = vor.u32 %v12511_v9, %v9770_v10  ;;  %6943 = vmatpush.bf16.msrb.mxu2 %v9517_v23 }
 0x32b   :  { %v10250_v13 = vld [vmem:[#allocation3 + $0x11e8] sm:$0xf0]  ;;  %6931 = vmatmul.bf16.vlgmr.msrb.gmra.mxu1 %v13250_v38 }
 0x32c   :  { %v12695_v14 = vld [vmem:[#allocation3 + $0x13cc] sm:$0xf]  ;;  %v10253_v27 = vor.u32 %v12631_v12, %v10250_v13  ;;  %6956 = vmatpush.bf16.msrb.mxu3 %v9773_v39  ;;  %v6712_v13 = vadd.f32 %v6711_v7, %v13303_v43 }
 0x32d   :  { %v10506_v17 = vld [vmem:[#allocation3 + $0x13e8] sm:$0xf0]  ;;  %6944 = vmatmul.bf16.vlgmr.msrb.gmra.mxu2 %v13244_v29 }
 0x32e   :  { %v12759_v18 = vld [vmem:[#allocation3 + $0x15cc] sm:$0xf]  ;;  %v10509_v45 = vor.u32 %v12695_v14, %v10506_v17  ;;  %6962 = vmatpush.bf16.msra.mxu0 %v10253_v27  ;;  %v6724_v14 = vpop.f32.mrf.mxu1 }
 0x32f   :  { %v10762_v49 = vld [vmem:[#allocation3 + $0x15e8] sm:$0xf0]  ;;  %6957 = vmatmul.bf16.vlgmr.msrb.gmra.mxu3 %v13248_v32 }
 0x330   :  { %v12823_v24 = vld [vmem:[#allocation3 + $0x17cc] sm:$0xf]  ;;  %v10765_v46 = vor.u32 %v12759_v18, %v10762_v49  ;;  %6975 = vmatpush.bf16.msra.mxu1 %v10509_v45 }
 0x331   :  { %v11018_v25 = vld [vmem:[#allocation3 + $0x17e8] sm:$0xf0] }
 0x332   :  { %v12623_v48 = vld [vmem:[#allocation3 + $0x118c] sm:$0xf]  ;;  %v11021_v30 = vor.u32 %v12823_v24, %v11018_v25  ;;  %6988 = vmatpush.bf16.msra.mxu2 %v10765_v46  ;;  %v6725_v24 = vadd.f32 %v6724_v14, %v6712_v13 }
 0x333   :  { %v10218_v41 = vld [vmem:[#allocation3 + $0x11a8] sm:$0xf0] }
 0x334   :  { %v12687_v28 = vld [vmem:[#allocation3 + $0x138c] sm:$0xf]  ;;  %v10221_v37 = vor.u32 %v12623_v48, %v10218_v41  ;;  %7001 = vmatpush.bf16.msra.mxu3 %v11021_v30  ;;  %v6737_v41 = vpop.f32.mrf.mxu2 }
 0x335   :  { %v10474_v33 = vld [vmem:[#allocation3 + $0x13a8] sm:$0xf0] }
 0x336   :  { %v12751_v34 = vld [vmem:[#allocation3 + $0x158c] sm:$0xf]  ;;  %v10477_v40 = vor.u32 %v12687_v28, %v10474_v33  ;;  %6963 = vmatpush.bf16.msra.mxu0 %v10221_v37 }
 0x337   :  { %v10730_v35 = vld [vmem:[#allocation3 + $0x15a8] sm:$0xf0] }
 0x338   :  { %v12815_v15 = vld [vmem:[#allocation3 + $0x178c] sm:$0xf]  ;;  %v10733_v42 = vor.u32 %v12751_v34, %v10730_v35  ;;  %6976 = vmatpush.bf16.msra.mxu1 %v10477_v40  ;;  %v6738_v34 = vadd.f32 %v6737_v41, %v6725_v24  ;;  %v6750_v35 = vpop.f32.mrf.mxu3 }
 0x339   :  { %v10986_v36 = vld [vmem:[#allocation3 + $0x17a8] sm:$0xf0] }
 0x33a   :  { %v12615_v44 = vld [vmem:[#allocation3 + $0x114c] sm:$0xf]  ;;  %v10989_v51 = vor.u32 %v12815_v15, %v10986_v36  ;;  %6989 = vmatpush.bf16.msra.mxu2 %v10733_v42  ;;  %v13310_v40 = vadd.f32 %v6750_v35, %v6738_v34  ;;  %v6713_v42 = vpop.f32.mrf.mxu0 }
 0x33b   :  { %v10186_v47 = vld [vmem:[#allocation3 + $0x1168] sm:$0xf0] }
 0x33c   :  { %v12679_v50 = vld [vmem:[#allocation3 + $0x134c] sm:$0xf]  ;;  %v10189_v57 = vor.u32 %v12615_v44, %v10186_v47  ;;  %7002 = vmatpush.bf16.msra.mxu3 %v10989_v51 }
 0x33d   :  { %v10442_v52 = vld [vmem:[#allocation3 + $0x1368] sm:$0xf0] }
 0x33e   :  { %v12743_v53 = vld [vmem:[#allocation3 + $0x154c] sm:$0xf]  ;;  %v10445_v58 = vor.u32 %v12679_v50, %v10442_v52  ;;  %6964 = vmatpush.bf16.msra.mxu0 %v10189_v57 }
 0x33f   :  { %v10698_v54 = vld [vmem:[#allocation3 + $0x1568] sm:$0xf0] }
 0x340   :  { %v12807_v55 = vld [vmem:[#allocation3 + $0x174c] sm:$0xf]  ;;  %v10701_v59 = vor.u32 %v12743_v53, %v10698_v54  ;;  %6977 = vmatpush.bf16.msra.mxu1 %v10445_v58  ;;  %v6726_v53 = vpop.f32.mrf.mxu1 }
 0x341   :  { %v10954_v56 = vld [vmem:[#allocation3 + $0x1768] sm:$0xf0] }
 0x342   :  { %v12607_v60 = vld [vmem:[#allocation3 + $0x110c] sm:$0xf]  ;;  %v10957_v63 = vor.u32 %v12807_v55, %v10954_v56  ;;  %6990 = vmatpush.bf16.msra.mxu2 %v10701_v59 }
 0x343   :  { %v10154_v61 = vld [vmem:[#allocation3 + $0x1128] sm:$0xf0] }
 0x344   :  { %v12671_v62 = vld [vmem:[#allocation3 + $0x130c] sm:$0xf]  ;;  %v10157_v6 = vor.u32 %v12607_v60, %v10154_v61  ;;  %7003 = vmatpush.bf16.msra.mxu3 %v10957_v63 }
 0x345   :  { %v10410_v0 = vld [vmem:[#allocation3 + $0x1328] sm:$0xf0] }
 0x346   :  { %v12735_v1 = vld [vmem:[#allocation3 + $0x150c] sm:$0xf]  ;;  %v10413_v8 = vor.u32 %v12671_v62, %v10410_v0  ;;  %6965 = vmatpush.bf16.msra.mxu0 %v10157_v6 }
 0x347   :  { %v10666_v2 = vld [vmem:[#allocation3 + $0x1528] sm:$0xf0] }
 0x348   :  { %v12799_v4 = vld [vmem:[#allocation3 + $0x170c] sm:$0xf]  ;;  %v10669_v9 = vor.u32 %v12735_v1, %v10666_v2  ;;  %6978 = vmatpush.bf16.msra.mxu1 %v10413_v8 }
 0x349   :  { %v10922_v5 = vld [vmem:[#allocation3 + $0x1728] sm:$0xf0] }
 0x34a   :  { %v12599_v10 = vld [vmem:[#allocation3 + $0x10cc] sm:$0xf]  ;;  %v10925_v16 = vor.u32 %v12799_v4, %v10922_v5  ;;  %6991 = vmatpush.bf16.msra.mxu2 %v10669_v9  ;;  %v6739_v5 = vpop.f32.mrf.mxu2 }
 0x34b   :  { %v10122_v11 = vld [vmem:[#allocation3 + $0x10e8] sm:$0xf0] }
 0x34c   :  { %v12663_v12 = vld [vmem:[#allocation3 + $0x12cc] sm:$0xf]  ;;  %v10125_v25 = vor.u32 %v12599_v10, %v10122_v11  ;;  %7004 = vmatpush.bf16.msra.mxu3 %v10925_v16  ;;  %v6752_v10 = vpop.f32.mrf.mxu3 }
 0x34d   :  { %v10378_v17 = vld [vmem:[#allocation3 + $0x12e8] sm:$0xf0] }
 0x34e   :  { %v12727_v18 = vld [vmem:[#allocation3 + $0x14cc] sm:$0xf]  ;;  %v10381_v39 = vor.u32 %v12663_v12, %v10378_v17  ;;  %6966 = vmatpush.bf16.msra.mxu0 %v10125_v25 }
 0x34f   :  { %v10634_v49 = vld [vmem:[#allocation3 + $0x14e8] sm:$0xf0] }
 0x350   :  { %v12791_v19 = vld [vmem:[#allocation3 + $0x16cc] sm:$0xf]  ;;  %v10637_v27 = vor.u32 %v12727_v18, %v10634_v49  ;;  %6979 = vmatpush.bf16.msra.mxu1 %v10381_v39 }
 0x351   :  { %v10890_v23 = vld [vmem:[#allocation3 + $0x16e8] sm:$0xf0] }
 0x352   :  { %v12591_v45 = vld [vmem:[#allocation3 + $0x108c] sm:$0xf]  ;;  %v10893_v43 = vor.u32 %v12791_v19, %v10890_v23  ;;  %6992 = vmatpush.bf16.msra.mxu2 %v10637_v27 }
 0x353   :  { %v10090_v46 = vld [vmem:[#allocation3 + $0x10a8] sm:$0xf0] }
 0x354   :  { %v12655_v48 = vld [vmem:[#allocation3 + $0x128c] sm:$0xf]  ;;  %v10093_v37 = vor.u32 %v12591_v45, %v10090_v46  ;;  %7005 = vmatpush.bf16.msra.mxu3 %v10893_v43 }
 0x355   :  { %v10346_v28 = vld [vmem:[#allocation3 + $0x12a8] sm:$0xf0] }
 0x356   :  { %v12719_v30 = vld [vmem:[#allocation3 + $0x148c] sm:$0xf]  ;;  %v10349_v44 = vor.u32 %v12655_v48, %v10346_v28  ;;  %6967 = vmatpush.bf16.msra.mxu0 %v10093_v37 }
 0x357   :  { %v10602_v33 = vld [vmem:[#allocation3 + $0x14a8] sm:$0xf0] }
 0x358   :  { %v12783_v15 = vld [vmem:[#allocation3 + $0x168c] sm:$0xf]  ;;  %v10605_v47 = vor.u32 %v12719_v30, %v10602_v33  ;;  %6980 = vmatpush.bf16.msra.mxu1 %v10349_v44 }
 0x359   :  { %v10858_v36 = vld [vmem:[#allocation3 + $0x16a8] sm:$0xf0] }
 0x35a   :  { %v12583_v50 = vld [vmem:[#allocation3 + $0x104c] sm:$0xf]  ;;  %v10861_v54 = vor.u32 %v12783_v15, %v10858_v36  ;;  %6993 = vmatpush.bf16.msra.mxu2 %v10605_v47 }
 0x35b   :  { %v10058_v51 = vld [vmem:[#allocation3 + $0x1068] sm:$0xf0] }
 0x35c   :  { %v12647_v52 = vld [vmem:[#allocation3 + $0x124c] sm:$0xf]  ;;  %v10061_v60 = vor.u32 %v12583_v50, %v10058_v51  ;;  %7006 = vmatpush.bf16.msra.mxu3 %v10861_v54  ;;  %v13106_v50 = vld [vmem:[#allocation1] sm:$0xff] }
 0x35d   :  { %v10314_v55 = vld [vmem:[#allocation3 + $0x1268] sm:$0xf0] }
 0x35e   :  { %v12711_v56 = vld [vmem:[#allocation3 + $0x144c] sm:$0xf]  ;;  %v10317_v63 = vor.u32 %v12647_v52, %v10314_v55  ;;  %6968 = vmatpush.bf16.msra.mxu0 %v10061_v60 }
 0x35f   :  { %v10570_v57 = vld [vmem:[#allocation3 + $0x1468] sm:$0xf0] }
 0x360   :  { %v12775_v58 = vld [vmem:[#allocation3 + $0x164c] sm:$0xf]  ;;  %v10573_v0 = vor.u32 %v12711_v56, %v10570_v57  ;;  %6981 = vmatpush.bf16.msra.mxu1 %v10317_v63  ;;  %v13108_v56 = vld [vmem:[#allocation1 + $0x9] sm:$0xff] }
 0x361   :  { %v10826_v59 = vld [vmem:[#allocation3 + $0x1668] sm:$0xf0] }
 0x362   :  { %v12575_v61 = vld [vmem:[#allocation3 + $0x100c] sm:$0xf]  ;;  %v10829_v6 = vor.u32 %v12775_v58, %v10826_v59  ;;  %6994 = vmatpush.bf16.msra.mxu2 %v10573_v0  ;;  %v13109_v59 = vld [vmem:[#allocation1 + $0x1b] sm:$0xff] }
 0x363   :  { %v10026_v62 = vld [vmem:[#allocation3 + $0x1028] sm:$0xf0] }
 0x364   :  { %v12639_v1 = vld [vmem:[#allocation3 + $0x120c] sm:$0xf]  ;;  %v10029_v14 = vor.u32 %v12575_v61, %v10026_v62  ;;  %7007 = vmatpush.bf16.msra.mxu3 %v10829_v6 }
 0x365   :  { %v10282_v2 = vld [vmem:[#allocation3 + $0x1228] sm:$0xf0] }
 0x366   :  { %v12703_v4 = vld [vmem:[#allocation3 + $0x140c] sm:$0xf]  ;;  %v10285_v49 = vor.u32 %v12639_v1, %v10282_v2  ;;  %6969 = vmatpush.bf16.msra.mxu0 %v10029_v14 }
 0x367   :  { %v10538_v7 = vld [vmem:[#allocation3 + $0x1428] sm:$0xf0] }
 0x368   :  { %v12767_v8 = vld [vmem:[#allocation3 + $0x160c] sm:$0xf]  ;;  %v10541_v19 = vor.u32 %v12703_v4, %v10538_v7  ;;  %6982 = vmatpush.bf16.msra.mxu1 %v10285_v49  ;;  %v6763_v7 = vpop.f32.mrf.mxu0 }
 0x369   :  { %v10794_v9 = vld [vmem:[#allocation3 + $0x1628] sm:$0xf0]  ;;  %6970 = vmatmul.bf16.vlgmr.msra.gmra.mxu0 %v13106_v50  ;;  %v6764_v10 = vadd.f32 %v6763_v7, %v13310_v40 }
 0x36a   :  { %v12887_v11 = vld [vmem:[#allocation3 + $0x19cc] sm:$0xf]  ;;  %v10797_v25 = vor.u32 %v12767_v8, %v10794_v9  ;;  %6995 = vmatpush.bf16.msra.mxu2 %v10541_v19 }
 0x36b   :  { %v11274_v12 = vld [vmem:[#allocation3 + $0x19e8] sm:$0xf0]  ;;  %6983 = vmatmul.bf16.vlgmr.msra.gmra.mxu1 %v13108_v56 }
 0x36c   :  { %v12951_v13 = vld [vmem:[#allocation3 + $0x1bcc] sm:$0xf]  ;;  %v11277_v39 = vor.u32 %v12887_v11, %v11274_v12  ;;  %7008 = vmatpush.bf16.msra.mxu3 %v10797_v25  ;;  %v6776_v12 = vpop.f32.mrf.mxu1 }
 0x36d   :  { %v11530_v16 = vld [vmem:[#allocation3 + $0x1be8] sm:$0xf0]  ;;  %v6777_v19 = vadd.f32 %v6776_v12, %v6764_v10 }
 0x36e   :  { %v13015_v17 = vld [vmem:[#allocation3 + $0x1dcc] sm:$0xf]  ;;  %v11533_v27 = vor.u32 %v12951_v13, %v11530_v16  ;;  %7014 = vmatpush.bf16.msrb.mxu0 %v11277_v39 }
 0x36f   :  { %v11786_v18 = vld [vmem:[#allocation3 + $0x1de8] sm:$0xf0]  ;;  %7009 = vmatmul.bf16.vlgmr.msra.gmra.mxu3 %v13109_v59 }
 0x370   :  { %v13079_v23 = vld [vmem:[#allocation3 + $0x1fcc] sm:$0xf]  ;;  %v11789_v45 = vor.u32 %v13015_v17, %v11786_v18  ;;  %7027 = vmatpush.bf16.msrb.mxu1 %v11533_v27 }
 0x371   :  { %v12042_v24 = vld [vmem:[#allocation3 + $0x1fe8] sm:$0xf0] }
 0x372   :  { %v12879_v46 = vld [vmem:[#allocation3 + $0x198c] sm:$0xf]  ;;  %v12045_v43 = vor.u32 %v13079_v23, %v12042_v24  ;;  %7040 = vmatpush.bf16.msrb.mxu2 %v11789_v45 }
 0x373   :  { %v11242_v48 = vld [vmem:[#allocation3 + $0x19a8] sm:$0xf0] }
 0x374   :  { %v12943_v41 = vld [vmem:[#allocation3 + $0x1b8c] sm:$0xf]  ;;  %v11245_v15 = vor.u32 %v12879_v46, %v11242_v48  ;;  %7053 = vmatpush.bf16.msrb.mxu3 %v12045_v43  ;;  %v6778_v50 = vpop.f32.mrf.mxu1 }
 0x375   :  { %v11498_v28 = vld [vmem:[#allocation3 + $0x1ba8] sm:$0xf0]  ;;  %v12108_v50 = vld [vmem:[#allocation3 + $0x16c] sm:$0xf0] }
 0x376   :  { %v13007_v30 = vld [vmem:[#allocation3 + $0x1d8c] sm:$0xf]  ;;  %v11501_v36 = vor.u32 %v12943_v41, %v11498_v28  ;;  %7015 = vmatpush.bf16.msrb.mxu0 %v11245_v15 }
 0x377   :  { %v11754_v33 = vld [vmem:[#allocation3 + $0x1da8] sm:$0xf0] }
 0x378   :  { %v13071_v34 = vld [vmem:[#allocation3 + $0x1f8c] sm:$0xf]  ;;  %v11757_v37 = vor.u32 %v13007_v30, %v11754_v33  ;;  %7028 = vmatpush.bf16.msrb.mxu1 %v11501_v36  ;;  %v6789_v30 = vpop.f32.mrf.mxu2  ;;  %v6802_v36 = vpop.f32.mrf.mxu3 }
 0x379   :  { %v12010_v35 = vld [vmem:[#allocation3 + $0x1fa8] sm:$0xf0]  ;;  %v6790_v15 = vadd.f32 %v6789_v30, %v6777_v19  ;;  %v8720_v19 = vld [vmem:[#allocation3 + $0x5d0] sm:$0xf] }
 0x37a   :  { %v12871_v42 = vld [vmem:[#allocation3 + $0x194c] sm:$0xf]  ;;  %v12013_v51 = vor.u32 %v13071_v34, %v12010_v35  ;;  %7041 = vmatpush.bf16.msrb.mxu2 %v11757_v37 }
 0x37b   :  { %v11210_v44 = vld [vmem:[#allocation3 + $0x1968] sm:$0xf0] }
 0x37c   :  { %v12935_v47 = vld [vmem:[#allocation3 + $0x1b4c] sm:$0xf]  ;;  %v11213_v60 = vor.u32 %v12871_v42, %v11210_v44  ;;  %7054 = vmatpush.bf16.msrb.mxu3 %v12013_v51  ;;  %v6765_v44 = vpop.f32.mrf.mxu0  ;;  %v13313_v51 = vadd.f32 %v6802_v36, %v6790_v15  ;;  %v8944_v15 = vld [vmem:[#allocation3 + $0x790] sm:$0xf] }
 0x37d   :  { %v11466_v52 = vld [vmem:[#allocation3 + $0x1b68] sm:$0xf0]  ;;  %v12308_v36 = vld [vmem:[#allocation3 + $0x7ac] sm:$0xf0] }
 0x37e   :  { %v12999_v53 = vld [vmem:[#allocation3 + $0x1d4c] sm:$0xf]  ;;  %v11469_v61 = vor.u32 %v12935_v47, %v11466_v52  ;;  %7016 = vmatpush.bf16.msrb.mxu0 %v11213_v60 }
 0x37f   :  { %v11722_v54 = vld [vmem:[#allocation3 + $0x1d68] sm:$0xf0] }
 0x380   :  { %v13107_v55 = vld [vmem:[#allocation1 + $0x12] sm:$0xff]  ;;  %v11725_v62 = vor.u32 %v12999_v53, %v11722_v54  ;;  %7029 = vmatpush.bf16.msrb.mxu1 %v11469_v61  ;;  %v6791_v12 = vpop.f32.mrf.mxu2 }
 0x381   :  { %6996 = vmatmul.bf16.vlgmr.msra.gmra.mxu2 %v13107_v55  ;;  %v13063_v57 = vld [vmem:[#allocation3 + $0x1f4c] sm:$0xf]  ;;  %v12292_v12 = vld [vmem:[#allocation3 + $0x72c] sm:$0xf0] }
 0x382   :  { %v11978_v58 = vld [vmem:[#allocation3 + $0x1f68] sm:$0xf0]  ;;  %7042 = vmatpush.bf16.msrb.mxu2 %v11725_v62 }
 0x383   :  { %v12863_v63 = vld [vmem:[#allocation3 + $0x190c] sm:$0xf]  ;;  %v11981_v2 = vor.u32 %v13063_v57, %v11978_v58 }
 0x384   :  { %v11178_v0 = vld [vmem:[#allocation3 + $0x1928] sm:$0xf0] }
 0x385   :  { %v12927_v1 = vld [vmem:[#allocation3 + $0x1b0c] sm:$0xf]  ;;  %v11181_v11 = vor.u32 %v12863_v63, %v11178_v0  ;;  %7055 = vmatpush.bf16.msrb.mxu3 %v11981_v2 }
 0x386   :  { %v11434_v4 = vld [vmem:[#allocation3 + $0x1b28] sm:$0xf0] }
 0x387   :  { %v12991_v5 = vld [vmem:[#allocation3 + $0x1d0c] sm:$0xf]  ;;  %v11437_v13 = vor.u32 %v12927_v1, %v11434_v4  ;;  %7017 = vmatpush.bf16.msrb.mxu0 %v11181_v11 }
 0x388   :  { %v11690_v6 = vld [vmem:[#allocation3 + $0x1d28] sm:$0xf0] }
 0x389   :  { %v13055_v8 = vld [vmem:[#allocation3 + $0x1f0c] sm:$0xf]  ;;  %v11693_v14 = vor.u32 %v12991_v5, %v11690_v6  ;;  %7030 = vmatpush.bf16.msrb.mxu1 %v11437_v13  ;;  %v8208_v13 = vld [vmem:[#allocation3 + $0x1d0] sm:$0xf] }
 0x38a   :  { %v11946_v9 = vld [vmem:[#allocation3 + $0x1f28] sm:$0xf0] }
 0x38b   :  { %v12855_v16 = vld [vmem:[#allocation3 + $0x18cc] sm:$0xf]  ;;  %v11949_v49 = vor.u32 %v13055_v8, %v11946_v9  ;;  %7043 = vmatpush.bf16.msrb.mxu2 %v11693_v14  ;;  %v12124_v14 = vld [vmem:[#allocation3 + $0x1ec] sm:$0xf0] }
 0x38c   :  { %v11146_v17 = vld [vmem:[#allocation3 + $0x18e8] sm:$0xf0] }
 0x38d   :  { %v12919_v18 = vld [vmem:[#allocation3 + $0x1acc] sm:$0xf]  ;;  %v11149_v45 = vor.u32 %v12855_v16, %v11146_v17  ;;  %7056 = vmatpush.bf16.msrb.mxu3 %v11949_v49  ;;  %v8464_v16 = vld [vmem:[#allocation3 + $0x3d0] sm:$0xf]  ;;  %v6804_v17 = vpop.f32.mrf.mxu3 }
 0x38e   :  { %v11402_v23 = vld [vmem:[#allocation3 + $0x1ae8] sm:$0xf0]  ;;  %v12188_v49 = vld [vmem:[#allocation3 + $0x3ec] sm:$0xf0] }
 0x38f   :  { %v12983_v24 = vld [vmem:[#allocation3 + $0x1ccc] sm:$0xf]  ;;  %v11405_v40 = vor.u32 %v12919_v18, %v11402_v23  ;;  %7018 = vmatpush.bf16.msrb.mxu0 %v11149_v45  ;;  %v12252_v23 = vld [vmem:[#allocation3 + $0x5ec] sm:$0xf0] }
 0x390   :  { %v11658_v25 = vld [vmem:[#allocation3 + $0x1ce8] sm:$0xf0] }
 0x391   :  { %v13047_v39 = vld [vmem:[#allocation3 + $0x1ecc] sm:$0xf]  ;;  %v11661_v46 = vor.u32 %v12983_v24, %v11658_v25  ;;  %7031 = vmatpush.bf16.msrb.mxu1 %v11405_v40  ;;  %v8209_v40 = vor.u32 %v12124_v14, %v8208_v13 }
 0x392   :  { %v11914_v27 = vld [vmem:[#allocation3 + $0x1ee8] sm:$0xf0] }
 0x393   :  { %v12847_v48 = vld [vmem:[#allocation3 + $0x188c] sm:$0xf]  ;;  %v11917_v28 = vor.u32 %v13047_v39, %v11914_v27  ;;  %7044 = vmatpush.bf16.msrb.mxu2 %v11661_v46  ;;  %v8976_v39 = vld [vmem:[#allocation3 + $0x7d0] sm:$0xf]  ;;  %v8465_v46 = vor.u32 %v12188_v49, %v8464_v16  ;;  %v6828_v16 = vpop.f32.mrf.mxu1 }
 0x394   :  { %v11114_v41 = vld [vmem:[#allocation3 + $0x18a8] sm:$0xf0]  ;;  %v12316_v27 = vld [vmem:[#allocation3 + $0x7ec] sm:$0xf0] }
 0x395   :  { %v12911_v43 = vld [vmem:[#allocation3 + $0x1a8c] sm:$0xf]  ;;  %v11117_v47 = vor.u32 %v12847_v48, %v11114_v41  ;;  %7057 = vmatpush.bf16.msrb.mxu3 %v11917_v28  ;;  %v8721_v48 = vor.u32 %v12252_v23, %v8720_v19  ;;  %v8176_v41 = vld [vmem:[#allocation3 + $0x190] sm:$0xf]  ;;  %v8977_v30 = vor.u32 %v12316_v27, %v8976_v39 }
 0x396   :  { %v11370_v33 = vld [vmem:[#allocation3 + $0x1aa8] sm:$0xf0]  ;;  %v8432_v28 = vld [vmem:[#allocation3 + $0x390] sm:$0xf] }
 0x397   :  { %v12975_v34 = vld [vmem:[#allocation3 + $0x1c8c] sm:$0xf]  ;;  %v11373_v52 = vor.u32 %v12911_v43, %v11370_v33  ;;  %7019 = vmatpush.bf16.msrb.mxu0 %v11117_v47  ;;  %v12116_v43 = vld [vmem:[#allocation3 + $0x1ac] sm:$0xf0] }
 0x398   :  { %v11626_v35 = vld [vmem:[#allocation3 + $0x1ca8] sm:$0xf0]  ;;  %v12180_v33 = vld [vmem:[#allocation3 + $0x3ac] sm:$0xf0] }
 0x399   :  { %v13039_v37 = vld [vmem:[#allocation3 + $0x1e8c] sm:$0xf]  ;;  %v11629_v53 = vor.u32 %v12975_v34, %v11626_v35  ;;  %7032 = vmatpush.bf16.msrb.mxu1 %v11373_v52  ;;  %v8688_v34 = vld [vmem:[#allocation3 + $0x590] sm:$0xf] }
 0x39a   :  { %v11882_v42 = vld [vmem:[#allocation3 + $0x1ea8] sm:$0xf0]  ;;  %v12244_v35 = vld [vmem:[#allocation3 + $0x5ac] sm:$0xf0] }
 0x39b   :  { %v12839_v54 = vld [vmem:[#allocation3 + $0x184c] sm:$0xf]  ;;  %v11885_v57 = vor.u32 %v13039_v37, %v11882_v42  ;;  %7045 = vmatpush.bf16.msrb.mxu2 %v11629_v53  ;;  %v8177_v37 = vor.u32 %v12116_v43, %v8176_v41  ;;  %v8433_v42 = vor.u32 %v12180_v33, %v8432_v28  ;;  %v8689_v44 = vor.u32 %v12244_v35, %v8688_v34  ;;  %v8144_v47 = vld [vmem:[#allocation3 + $0x150] sm:$0xf]  ;;  %v13110_v53 = vld [vmem:[#allocation1 + $0x24] sm:$0xff]  ;;  %v6841_v34 = vpop.f32.mrf.mxu2 }
 0x39c   :  { %v11082_v55 = vld [vmem:[#allocation3 + $0x1868] sm:$0xf0]  ;;  %v8400_v52 = vld [vmem:[#allocation3 + $0x350] sm:$0xf] }
 0x39d   :  { %v12903_v56 = vld [vmem:[#allocation3 + $0x1a4c] sm:$0xf]  ;;  %v11085_v63 = vor.u32 %v12839_v54, %v11082_v55  ;;  %7058 = vmatpush.bf16.msrb.mxu3 %v11885_v57  ;;  %v8945_v54 = vor.u32 %v12308_v36, %v8944_v15  ;;  %v12172_v55 = vld [vmem:[#allocation3 + $0x36c] sm:$0xf0] }
 0x39e   :  { %v11338_v58 = vld [vmem:[#allocation3 + $0x1a68] sm:$0xf0]  ;;  %v12236_v57 = vld [vmem:[#allocation3 + $0x56c] sm:$0xf0] }
 0x39f   :  { %v12967_v59 = vld [vmem:[#allocation3 + $0x1c4c] sm:$0xf]  ;;  %v11341_v2 = vor.u32 %v12903_v56, %v11338_v58  ;;  %7020 = vmatpush.bf16.msrb.mxu0 %v11085_v63  ;;  %v8656_v56 = vld [vmem:[#allocation3 + $0x550] sm:$0xf]  ;;  %v8145_v63 = vor.u32 %v12108_v50, %v8144_v47 }
 0x3a0   :  { %v11594_v60 = vld [vmem:[#allocation3 + $0x1c68] sm:$0xf0]  ;;  %v8080_v49 = vld [vmem:[#allocation3 + $0xd0] sm:$0xf] }
 0x3a1   :  { %v13031_v61 = vld [vmem:[#allocation3 + $0x1e4c] sm:$0xf]  ;;  %v11597_v4 = vor.u32 %v12967_v59, %v11594_v60  ;;  %7033 = vmatpush.bf16.msrb.mxu1 %v11341_v2  ;;  %v8912_v60 = vld [vmem:[#allocation3 + $0x750] sm:$0xf] }
 0x3a2   :  { %v11850_v62 = vld [vmem:[#allocation3 + $0x1e68] sm:$0xf0]  ;;  %v8112_v2 = vld [vmem:[#allocation3 + $0x110] sm:$0xf] }
 0x3a3   :  { %v12831_v0 = vld [vmem:[#allocation3 + $0x180c] sm:$0xf]  ;;  %v11853_v8 = vor.u32 %v13031_v61, %v11850_v62  ;;  %7046 = vmatpush.bf16.msrb.mxu2 %v11597_v4  ;;  %v12300_v61 = vld [vmem:[#allocation3 + $0x76c] sm:$0xf0]  ;;  %v13113_v62 = vld [vmem:[#allocation1 + $0x3f] sm:$0xff] }
 0x3a4   :  { %v11050_v1 = vld [vmem:[#allocation3 + $0x1828] sm:$0xf0]  ;;  %v12100_v4 = vld [vmem:[#allocation3 + $0x12c] sm:$0xf0] }
 0x3a5   :  { %v12895_v5 = vld [vmem:[#allocation3 + $0x1a0c] sm:$0xf]  ;;  %v11053_v18 = vor.u32 %v12831_v0, %v11050_v1  ;;  %7059 = vmatpush.bf16.msrb.mxu3 %v11853_v8  ;;  %v8401_v0 = vor.u32 %v12172_v55, %v8400_v52  ;;  %v8657_v1 = vor.u32 %v12236_v57, %v8656_v56  ;;  %v8624_v8 = vld [vmem:[#allocation3 + $0x510] sm:$0xf]  ;;  %v8113_v14 = vor.u32 %v12100_v4, %v8112_v2 }
 0x3a6   :  { %v11306_v6 = vld [vmem:[#allocation3 + $0x1a28] sm:$0xf0]  ;;  %v12092_v19 = vld [vmem:[#allocation3 + $0xec] sm:$0xf0] }
 0x3a7   :  { %v12959_v7 = vld [vmem:[#allocation3 + $0x1c0c] sm:$0xf]  ;;  %v11309_v24 = vor.u32 %v12895_v5, %v11306_v6  ;;  %7021 = vmatpush.bf16.msrb.mxu0 %v11053_v18  ;;  %v8368_v5 = vld [vmem:[#allocation3 + $0x310] sm:$0xf]  ;;  %v8913_v6 = vor.u32 %v12300_v61, %v8912_v60 }
 0x3a8   :  { %v11562_v9 = vld [vmem:[#allocation3 + $0x1c28] sm:$0xf0]  ;;  %v8336_v23 = vld [vmem:[#allocation3 + $0x2d0] sm:$0xf] }
 0x3a9   :  { %v13023_v10 = vld [vmem:[#allocation3 + $0x1e0c] sm:$0xf]  ;;  %v11565_v25 = vor.u32 %v12959_v7, %v11562_v9  ;;  %7034 = vmatpush.bf16.msrb.mxu1 %v11309_v24  ;;  %v12164_v7 = vld [vmem:[#allocation3 + $0x32c] sm:$0xf0] }
 0x3aa   :  { %v11818_v11 = vld [vmem:[#allocation3 + $0x1e28] sm:$0xf0]  ;;  %7022 = vmatmul.bf16.vlgmr.msrb.gmra.mxu0 %v13110_v53  ;;  %v12228_v9 = vld [vmem:[#allocation3 + $0x52c] sm:$0xf0]  ;;  %v8369_v17 = vor.u32 %v12164_v7, %v8368_v5  ;;  %v6830_v53 = vpop.f32.mrf.mxu1 }
 0x3ab   :  { %v11821_v45 = vor.u32 %v13023_v10, %v11818_v11  ;;  %7047 = vmatpush.bf16.msrb.mxu2 %v11565_v25  ;;  %7066 = vmatpush.bf16.msra.mxu0 %v8209_v40  ;;  %v13111_v58 = vld [vmem:[#allocation1 + $0x36] sm:$0xff]  ;;  %v13112_v59 = vld [vmem:[#allocation1 + $0x2d] sm:$0xff]  ;;  %v6815_v10 = vpop.f32.mrf.mxu0  ;;  %v8625_v18 = vor.u32 %v12228_v9, %v8624_v8 }
 0x3ac   :  { %7035 = vmatmul.bf16.vlgmr.msrb.gmra.mxu1 %v13112_v59  ;;  %v8880_v11 = vld [vmem:[#allocation3 + $0x710] sm:$0xf]  ;;  %v6816_v13 = vadd.f32 %v6815_v10, %v13313_v51 }
 0x3ad   :  { %7060 = vmatpush.bf16.msrb.mxu3 %v11821_v45  ;;  %7079 = vmatpush.bf16.msra.mxu1 %v8465_v46  ;;  %v8881_v24 = vor.u32 %v12292_v12, %v8880_v11  ;;  %v12156_v39 = vld [vmem:[#allocation3 + $0x2ec] sm:$0xf0] }
 0x3ae   :  { %7048 = vmatmul.bf16.vlgmr.msrb.gmra.mxu2 %v13111_v58  ;;  %v6829_v25 = vadd.f32 %v6828_v16, %v6816_v13  ;;  %v8592_v27 = vld [vmem:[#allocation3 + $0x4d0] sm:$0xf]  ;;  %v8337_v51 = vor.u32 %v12156_v39, %v8336_v23  ;;  %v6843_v16 = vpop.f32.mrf.mxu2 }
 0x3af   :  { %7092 = vmatpush.bf16.msra.mxu2 %v8721_v48  ;;  %7067 = vmatpush.bf16.msra.mxu0 %v8177_v37  ;;  %v12220_v45 = vld [vmem:[#allocation3 + $0x4ec] sm:$0xf0]  ;;  %v8081_v48 = vor.u32 %v12092_v19, %v8080_v49 }
 0x3b0   :  { %7061 = vmatmul.bf16.vlgmr.msrb.gmra.mxu3 %v13113_v62  ;;  %v8848_v40 = vld [vmem:[#allocation3 + $0x6d0] sm:$0xf]  ;;  %v8593_v41 = vor.u32 %v12220_v45, %v8592_v27  ;;  %v6842_v37 = vadd.f32 %v6841_v34, %v6829_v25 }
 0x3b1   :  { %7105 = vmatpush.bf16.msra.mxu3 %v8977_v30  ;;  %7080 = vmatpush.bf16.msra.mxu1 %v8433_v42  ;;  %v12284_v46 = vld [vmem:[#allocation3 + $0x6ec] sm:$0xf0]  ;;  %v6854_v42 = vpop.f32.mrf.mxu3 }
 0x3b2   :  { %v8048_v43 = vld [vmem:[#allocation3 + $0x90] sm:$0xf]  ;;  %v8849_v33 = vor.u32 %v12284_v46, %v8848_v40 }
 0x3b3   :  { %7093 = vmatpush.bf16.msra.mxu2 %v8689_v44  ;;  %7068 = vmatpush.bf16.msra.mxu0 %v8145_v63  ;;  %v12084_v28 = vld [vmem:[#allocation3 + $0xac] sm:$0xf0]  ;;  %v6817_v50 = vpop.f32.mrf.mxu0 }
 0x3b4   :  { %v8304_v30 = vld [vmem:[#allocation3 + $0x290] sm:$0xf]  ;;  %v8049_v52 = vor.u32 %v12084_v28, %v8048_v43 }
 0x3b5   :  { %7106 = vmatpush.bf16.msra.mxu3 %v8945_v54  ;;  %7081 = vmatpush.bf16.msra.mxu1 %v8401_v0  ;;  %v12148_v35 = vld [vmem:[#allocation3 + $0x2ac] sm:$0xf0]  ;;  %v13316_v54 = vadd.f32 %v6854_v42, %v6842_v37 }
 0x3b6   :  { %v8560_v15 = vld [vmem:[#allocation3 + $0x490] sm:$0xf]  ;;  %v8305_v55 = vor.u32 %v12148_v35, %v8304_v30 }
 0x3b7   :  { %7094 = vmatpush.bf16.msra.mxu2 %v8657_v1  ;;  %7069 = vmatpush.bf16.msra.mxu0 %v8113_v14  ;;  %v12212_v36 = vld [vmem:[#allocation3 + $0x4ac] sm:$0xf0] }
 0x3b8   :  { %v8816_v44 = vld [vmem:[#allocation3 + $0x690] sm:$0xf]  ;;  %v8561_v56 = vor.u32 %v12212_v36, %v8560_v15 }
 0x3b9   :  { %7107 = vmatpush.bf16.msra.mxu3 %v8913_v6  ;;  %7082 = vmatpush.bf16.msra.mxu1 %v8369_v17  ;;  %v12276_v47 = vld [vmem:[#allocation3 + $0x6ac] sm:$0xf0]  ;;  %v6856_v19 = vpop.f32.mrf.mxu3 }
 0x3ba   :  { %v8016_v57 = vld [vmem:[#allocation3 + $0x50] sm:$0xf]  ;;  %v8817_v60 = vor.u32 %v12276_v47, %v8816_v44 }
 0x3bb   :  { %7095 = vmatpush.bf16.msra.mxu2 %v8625_v18  ;;  %7070 = vmatpush.bf16.msra.mxu0 %v8081_v48  ;;  %v12076_v58 = vld [vmem:[#allocation3 + $0x6c] sm:$0xf0] }
 0x3bc   :  { %v8272_v59 = vld [vmem:[#allocation3 + $0x250] sm:$0xf]  ;;  %v8017_v2 = vor.u32 %v12076_v58, %v8016_v57 }
 0x3bd   :  { %7108 = vmatpush.bf16.msra.mxu3 %v8881_v24  ;;  %7083 = vmatpush.bf16.msra.mxu1 %v8337_v51  ;;  %v12140_v61 = vld [vmem:[#allocation3 + $0x26c] sm:$0xf0] }
 0x3be   :  { %v8528_v62 = vld [vmem:[#allocation3 + $0x450] sm:$0xf]  ;;  %v8273_v6 = vor.u32 %v12140_v61, %v8272_v59 }
 0x3bf   :  { %7096 = vmatpush.bf16.msra.mxu2 %v8593_v41  ;;  %v12204_v63 = vld [vmem:[#allocation3 + $0x46c] sm:$0xf0]  ;;  %7071 = vmatpush.bf16.msra.mxu0 %v8049_v52 }
 0x3c0   :  { %v8784_v0 = vld [vmem:[#allocation3 + $0x650] sm:$0xf]  ;;  %v8529_v7 = vor.u32 %v12204_v63, %v8528_v62 }
 0x3c1   :  { %7109 = vmatpush.bf16.msra.mxu3 %v8849_v33  ;;  %v12268_v1 = vld [vmem:[#allocation3 + $0x66c] sm:$0xf0]  ;;  %7084 = vmatpush.bf16.msra.mxu1 %v8305_v55 }
 0x3c2   :  { %v7984_v4 = vld [vmem:[#allocation3 + $0x10] sm:$0xf]  ;;  %v8785_v11 = vor.u32 %v12268_v1, %v8784_v0 }
 0x3c3   :  { %v12068_v5 = vld [vmem:[#allocation3 + $0x2c] sm:$0xf0]  ;;  %7097 = vmatpush.bf16.msra.mxu2 %v8561_v56  ;;  %7072 = vmatpush.bf16.msra.mxu0 %v8017_v2 }
 0x3c4   :  { %v8240_v8 = vld [vmem:[#allocation3 + $0x210] sm:$0xf]  ;;  %v7985_v23 = vor.u32 %v12068_v5, %v7984_v4 }
 0x3c5   :  { %v12132_v9 = vld [vmem:[#allocation3 + $0x22c] sm:$0xf0]  ;;  %7110 = vmatpush.bf16.msra.mxu3 %v8817_v60  ;;  %7085 = vmatpush.bf16.msra.mxu1 %v8273_v6 }
 0x3c6   :  { %v8496_v10 = vld [vmem:[#allocation3 + $0x410] sm:$0xf]  ;;  %v8241_v27 = vor.u32 %v12132_v9, %v8240_v8 }
 0x3c7   :  { %v12196_v12 = vld [vmem:[#allocation3 + $0x42c] sm:$0xf0]  ;;  %7098 = vmatpush.bf16.msra.mxu2 %v8529_v7  ;;  %7073 = vmatpush.bf16.msra.mxu0 %v7985_v23 }
 0x3c8   :  { %v8752_v13 = vld [vmem:[#allocation3 + $0x610] sm:$0xf]  ;;  %v8497_v45 = vor.u32 %v12196_v12, %v8496_v10  ;;  %v6867_v12 = vpop.f32.mrf.mxu0 }
 0x3c9   :  { %v12260_v14 = vld [vmem:[#allocation3 + $0x62c] sm:$0xf0]  ;;  %7111 = vmatpush.bf16.msra.mxu3 %v8785_v11  ;;  %7086 = vmatpush.bf16.msra.mxu1 %v8241_v27 }
 0x3ca   :  { %v9232_v17 = vld [vmem:[#allocation3 + $0x9d0] sm:$0xf]  ;;  %v8753_v48 = vor.u32 %v12260_v14, %v8752_v13  ;;  %7074 = vmatmul.bf16.vlgmr.msra.gmra.mxu0 %v13234_v21 }
 0x3cb   :  { %v12380_v18 = vld [vmem:[#allocation3 + $0x9ec] sm:$0xf0]  ;;  %7099 = vmatpush.bf16.msra.mxu2 %v8497_v45 }
 0x3cc   :  { %v9488_v49 = vld [vmem:[#allocation3 + $0xbd0] sm:$0xf]  ;;  %v9233_v51 = vor.u32 %v12380_v18, %v9232_v17  ;;  %7087 = vmatmul.bf16.vlgmr.msra.gmra.mxu1 %v13239_v26 }
 0x3cd   :  { %v12444_v24 = vld [vmem:[#allocation3 + $0xbec] sm:$0xf0]  ;;  %7112 = vmatpush.bf16.msra.mxu3 %v8753_v48 }
 0x3ce   :  { %v9744_v25 = vld [vmem:[#allocation3 + $0xdd0] sm:$0xf]  ;;  %v9489_v41 = vor.u32 %v12444_v24, %v9488_v49  ;;  %7118 = vmatpush.bf16.msrb.mxu0 %v9233_v51  ;;  %7100 = vmatmul.bf16.vlgmr.msra.gmra.mxu2 %v13232_v20  ;;  %v6880_v49 = vpop.f32.mrf.mxu1 }
 0x3cf   :  { %v12508_v39 = vld [vmem:[#allocation3 + $0xdec] sm:$0xf0] }
 0x3d0   :  { %v10000_v40 = vld [vmem:[#allocation3 + $0xfd0] sm:$0xf]  ;;  %v9745_v43 = vor.u32 %v12508_v39, %v9744_v25  ;;  %7131 = vmatpush.bf16.msrb.mxu1 %v9489_v41  ;;  %7113 = vmatmul.bf16.vlgmr.msra.gmra.mxu3 %v13236_v22  ;;  %v6881_v39 = vadd.f32 %v6880_v49, %v6867_v12 }
 0x3d1   :  { %v12572_v46 = vld [vmem:[#allocation3 + $0xfec] sm:$0xf0] }
 0x3d2   :  { %v9200_v28 = vld [vmem:[#allocation3 + $0x990] sm:$0xf]  ;;  %v10001_v34 = vor.u32 %v12572_v46, %v10000_v40  ;;  %7144 = vmatpush.bf16.msrb.mxu2 %v9745_v43 }
 0x3d3   :  { %v12372_v30 = vld [vmem:[#allocation3 + $0x9ac] sm:$0xf0] }
 0x3d4   :  { %v9456_v33 = vld [vmem:[#allocation3 + $0xb90] sm:$0xf]  ;;  %v9201_v44 = vor.u32 %v12372_v30, %v9200_v28  ;;  %7157 = vmatpush.bf16.msrb.mxu3 %v10001_v34  ;;  %v6893_v28 = vpop.f32.mrf.mxu2 }
 0x3d5   :  { %v12436_v35 = vld [vmem:[#allocation3 + $0xbac] sm:$0xf0] }
 0x3d6   :  { %v9712_v15 = vld [vmem:[#allocation3 + $0xd90] sm:$0xf]  ;;  %v9457_v47 = vor.u32 %v12436_v35, %v9456_v33  ;;  %7119 = vmatpush.bf16.msrb.mxu0 %v9201_v44 }
 0x3d7   :  { %v12500_v36 = vld [vmem:[#allocation3 + $0xdac] sm:$0xf0] }
 0x3d8   :  { %v9968_v37 = vld [vmem:[#allocation3 + $0xf90] sm:$0xf]  ;;  %v9713_v50 = vor.u32 %v12500_v36, %v9712_v15  ;;  %7132 = vmatpush.bf16.msrb.mxu1 %v9457_v47  ;;  %v6894_v15 = vadd.f32 %v6893_v28, %v6881_v39  ;;  %v6906_v36 = vpop.f32.mrf.mxu3 }
 0x3d9   :  { %v12564_v42 = vld [vmem:[#allocation3 + $0xfac] sm:$0xf0] }
 0x3da   :  { %v9168_v52 = vld [vmem:[#allocation3 + $0x950] sm:$0xf]  ;;  %v9969_v56 = vor.u32 %v12564_v42, %v9968_v37  ;;  %7145 = vmatpush.bf16.msrb.mxu2 %v9713_v50  ;;  %v13322_v47 = vadd.f32 %v6906_v36, %v6894_v15  ;;  %v6869_v50 = vpop.f32.mrf.mxu0 }
 0x3db   :  { %v12364_v53 = vld [vmem:[#allocation3 + $0x96c] sm:$0xf0] }
 0x3dc   :  { %v9424_v55 = vld [vmem:[#allocation3 + $0xb50] sm:$0xf]  ;;  %v9169_v62 = vor.u32 %v12364_v53, %v9168_v52  ;;  %7158 = vmatpush.bf16.msrb.mxu3 %v9969_v56 }
 0x3dd   :  { %v12428_v57 = vld [vmem:[#allocation3 + $0xb6c] sm:$0xf0] }
 0x3de   :  { %v9680_v58 = vld [vmem:[#allocation3 + $0xd50] sm:$0xf]  ;;  %v9425_v63 = vor.u32 %v12428_v57, %v9424_v55  ;;  %7120 = vmatpush.bf16.msrb.mxu0 %v9169_v62 }
 0x3df   :  { %v12492_v59 = vld [vmem:[#allocation3 + $0xd6c] sm:$0xf0] }
 0x3e0   :  { %v9936_v60 = vld [vmem:[#allocation3 + $0xf50] sm:$0xf]  ;;  %v9681_v0 = vor.u32 %v12492_v59, %v9680_v58  ;;  %7133 = vmatpush.bf16.msrb.mxu1 %v9425_v63  ;;  %v6882_v58 = vpop.f32.mrf.mxu1 }
 0x3e1   :  { %v12556_v61 = vld [vmem:[#allocation3 + $0xf6c] sm:$0xf0] }
 0x3e2   :  { %v9136_v1 = vld [vmem:[#allocation3 + $0x910] sm:$0xf]  ;;  %v9937_v5 = vor.u32 %v12556_v61, %v9936_v60  ;;  %7146 = vmatpush.bf16.msrb.mxu2 %v9681_v0 }
 0x3e3   :  { %v12356_v2 = vld [vmem:[#allocation3 + $0x92c] sm:$0xf0] }
 0x3e4   :  { %v9392_v4 = vld [vmem:[#allocation3 + $0xb10] sm:$0xf]  ;;  %v9137_v11 = vor.u32 %v12356_v2, %v9136_v1  ;;  %7159 = vmatpush.bf16.msrb.mxu3 %v9937_v5 }
 0x3e5   :  { %v12420_v6 = vld [vmem:[#allocation3 + $0xb2c] sm:$0xf0] }
 0x3e6   :  { %v9648_v7 = vld [vmem:[#allocation3 + $0xd10] sm:$0xf]  ;;  %v9393_v13 = vor.u32 %v12420_v6, %v9392_v4  ;;  %7121 = vmatpush.bf16.msrb.mxu0 %v9137_v11 }
 0x3e7   :  { %v12484_v8 = vld [vmem:[#allocation3 + $0xd2c] sm:$0xf0] }
 0x3e8   :  { %v9904_v9 = vld [vmem:[#allocation3 + $0xf10] sm:$0xf]  ;;  %v9649_v14 = vor.u32 %v12484_v8, %v9648_v7  ;;  %7134 = vmatpush.bf16.msrb.mxu1 %v9393_v13 }
 0x3e9   :  { %v12548_v10 = vld [vmem:[#allocation3 + $0xf2c] sm:$0xf0] }
 0x3ea   :  { %v9104_v16 = vld [vmem:[#allocation3 + $0x8d0] sm:$0xf]  ;;  %v9905_v19 = vor.u32 %v12548_v10, %v9904_v9  ;;  %7147 = vmatpush.bf16.msrb.mxu2 %v9649_v14  ;;  %v6895_v10 = vpop.f32.mrf.mxu2 }
 0x3eb   :  { %v12348_v17 = vld [vmem:[#allocation3 + $0x8ec] sm:$0xf0] }
 0x3ec   :  { %v9360_v18 = vld [vmem:[#allocation3 + $0xad0] sm:$0xf]  ;;  %v9105_v40 = vor.u32 %v12348_v17, %v9104_v16  ;;  %7160 = vmatpush.bf16.msrb.mxu3 %v9905_v19  ;;  %v6908_v16 = vpop.f32.mrf.mxu3 }
 0x3ed   :  { %v12412_v23 = vld [vmem:[#allocation3 + $0xaec] sm:$0xf0] }
 0x3ee   :  { %v9616_v24 = vld [vmem:[#allocation3 + $0xcd0] sm:$0xf]  ;;  %v9361_v46 = vor.u32 %v12412_v23, %v9360_v18  ;;  %7122 = vmatpush.bf16.msrb.mxu0 %v9105_v40 }
 0x3ef   :  { %v12476_v25 = vld [vmem:[#allocation3 + $0xcec] sm:$0xf0] }
 0x3f0   :  { %v9872_v27 = vld [vmem:[#allocation3 + $0xed0] sm:$0xf]  ;;  %v9617_v48 = vor.u32 %v12476_v25, %v9616_v24  ;;  %7135 = vmatpush.bf16.msrb.mxu1 %v9361_v46 }
 0x3f1   :  { %v12540_v45 = vld [vmem:[#allocation3 + $0xeec] sm:$0xf0] }
 0x3f2   :  { %v9072_v51 = vld [vmem:[#allocation3 + $0x890] sm:$0xf]  ;;  %v9873_v30 = vor.u32 %v12540_v45, %v9872_v27  ;;  %7148 = vmatpush.bf16.msrb.mxu2 %v9617_v48 }
 0x3f3   :  { %v12340_v41 = vld [vmem:[#allocation3 + $0x8ac] sm:$0xf0] }
 0x3f4   :  { %v9328_v43 = vld [vmem:[#allocation3 + $0xa90] sm:$0xf]  ;;  %v9073_v44 = vor.u32 %v12340_v41, %v9072_v51  ;;  %7161 = vmatpush.bf16.msrb.mxu3 %v9873_v30 }
 0x3f5   :  { %v12404_v33 = vld [vmem:[#allocation3 + $0xaac] sm:$0xf0] }
 0x3f6   :  { %v9584_v34 = vld [vmem:[#allocation3 + $0xc90] sm:$0xf]  ;;  %v9329_v52 = vor.u32 %v12404_v33, %v9328_v43  ;;  %7123 = vmatpush.bf16.msrb.mxu0 %v9073_v44 }
 0x3f7   :  { %v12468_v35 = vld [vmem:[#allocation3 + $0xcac] sm:$0xf0] }
 0x3f8   :  { %v9840_v37 = vld [vmem:[#allocation3 + $0xe90] sm:$0xf]  ;;  %v9585_v53 = vor.u32 %v12468_v35, %v9584_v34  ;;  %7136 = vmatpush.bf16.msrb.mxu1 %v9329_v52 }
 0x3f9   :  { %v12532_v42 = vld [vmem:[#allocation3 + $0xeac] sm:$0xf0] }
 0x3fa   :  { %v9040_v55 = vld [vmem:[#allocation3 + $0x850] sm:$0xf]  ;;  %v9841_v59 = vor.u32 %v12532_v42, %v9840_v37  ;;  %7149 = vmatpush.bf16.msrb.mxu2 %v9585_v53 }
 0x3fb   :  { %v12332_v56 = vld [vmem:[#allocation3 + $0x86c] sm:$0xf0] }
 0x3fc   :  { %v9296_v57 = vld [vmem:[#allocation3 + $0xa50] sm:$0xf]  ;;  %v9041_v1 = vor.u32 %v12332_v56, %v9040_v55  ;;  %7162 = vmatpush.bf16.msrb.mxu3 %v9841_v59 }
 0x3fd   :  { %v12396_v60 = vld [vmem:[#allocation3 + $0xa6c] sm:$0xf0] }
 0x3fe   :  { %v9552_v61 = vld [vmem:[#allocation3 + $0xc50] sm:$0xf]  ;;  %v9297_v5 = vor.u32 %v12396_v60, %v9296_v57  ;;  %7124 = vmatpush.bf16.msrb.mxu0 %v9041_v1 }
 0x3ff   :  { %v12460_v62 = vld [vmem:[#allocation3 + $0xc6c] sm:$0xf0] }
 0x400   :  { %v9808_v63 = vld [vmem:[#allocation3 + $0xe50] sm:$0xf]  ;;  %v9553_v6 = vor.u32 %v12460_v62, %v9552_v61  ;;  %7137 = vmatpush.bf16.msrb.mxu1 %v9297_v5 }
 0x401   :  { %v12524_v0 = vld [vmem:[#allocation3 + $0xe6c] sm:$0xf0] }
 0x402   :  { %v9008_v2 = vld [vmem:[#allocation3 + $0x810] sm:$0xf]  ;;  %v9809_v11 = vor.u32 %v12524_v0, %v9808_v63  ;;  %7150 = vmatpush.bf16.msrb.mxu2 %v9553_v6 }
 0x403   :  { %v12324_v4 = vld [vmem:[#allocation3 + $0x82c] sm:$0xf0] }
 0x404   :  { %v9264_v7 = vld [vmem:[#allocation3 + $0xa10] sm:$0xf]  ;;  %v9009_v19 = vor.u32 %v12324_v4, %v9008_v2  ;;  %7163 = vmatpush.bf16.msrb.mxu3 %v9809_v11 }
 0x405   :  { %v12388_v8 = vld [vmem:[#allocation3 + $0xa2c] sm:$0xf0] }
 0x406   :  { %v9520_v9 = vld [vmem:[#allocation3 + $0xc10] sm:$0xf]  ;;  %v9265_v39 = vor.u32 %v12388_v8, %v9264_v7  ;;  %7125 = vmatpush.bf16.msrb.mxu0 %v9009_v19 }
 0x407   :  { %v12452_v12 = vld [vmem:[#allocation3 + $0xc2c] sm:$0xf0] }
 0x408   :  { %v9776_v13 = vld [vmem:[#allocation3 + $0xe10] sm:$0xf]  ;;  %v9521_v27 = vor.u32 %v12452_v12, %v9520_v9  ;;  %7138 = vmatpush.bf16.msrb.mxu1 %v9265_v39  ;;  %v13328_v12 = vpop.f32.mrf.mxu0 }
 0x409   :  { %v12516_v14 = vld [vmem:[#allocation3 + $0xe2c] sm:$0xf0]  ;;  %7126 = vmatmul.bf16.vlgmr.msrb.gmra.mxu0 %v13246_v31 }
 0x40a   :  { %v10256_v17 = vld [vmem:[#allocation3 + $0x11d0] sm:$0xf]  ;;  %v9777_v46 = vor.u32 %v12516_v14, %v9776_v13  ;;  %7151 = vmatpush.bf16.msrb.mxu2 %v9521_v27 }
 0x40b   :  { %v12636_v18 = vld [vmem:[#allocation3 + $0x11ec] sm:$0xf0]  ;;  %7139 = vmatmul.bf16.vlgmr.msrb.gmra.mxu1 %v13250_v38 }
 0x40c   :  { %v10512_v49 = vld [vmem:[#allocation3 + $0x13d0] sm:$0xf]  ;;  %v10257_v48 = vor.u32 %v12636_v18, %v10256_v17  ;;  %7164 = vmatpush.bf16.msrb.mxu3 %v9777_v46 }
 0x40d   :  { %v12700_v23 = vld [vmem:[#allocation3 + $0x13ec] sm:$0xf0]  ;;  %7152 = vmatmul.bf16.vlgmr.msrb.gmra.mxu2 %v13244_v29 }
 0x40e   :  { %v10768_v24 = vld [vmem:[#allocation3 + $0x15d0] sm:$0xf]  ;;  %v10513_v51 = vor.u32 %v12700_v23, %v10512_v49  ;;  %7170 = vmatpush.bf16.msra.mxu0 %v10257_v48  ;;  %v13330_v49 = vpop.f32.mrf.mxu1 }
 0x40f   :  { %v12764_v25 = vld [vmem:[#allocation3 + $0x15ec] sm:$0xf0]  ;;  %7165 = vmatmul.bf16.vlgmr.msrb.gmra.mxu3 %v13248_v32 }
 0x410   :  { %v11024_v45 = vld [vmem:[#allocation3 + $0x17d0] sm:$0xf]  ;;  %v10769_v41 = vor.u32 %v12764_v25, %v10768_v24  ;;  %7183 = vmatpush.bf16.msra.mxu1 %v10513_v51 }
 0x411   :  { %v12828_v40 = vld [vmem:[#allocation3 + $0x17ec] sm:$0xf0] }
 0x412   :  { %v10224_v43 = vld [vmem:[#allocation3 + $0x1190] sm:$0xf]  ;;  %v11025_v33 = vor.u32 %v12828_v40, %v11024_v45  ;;  %7196 = vmatpush.bf16.msra.mxu2 %v10769_v41 }
 0x413   :  { %v12628_v28 = vld [vmem:[#allocation3 + $0x11ac] sm:$0xf0] }
 0x414   :  { %v10480_v30 = vld [vmem:[#allocation3 + $0x1390] sm:$0xf]  ;;  %v10225_v42 = vor.u32 %v12628_v28, %v10224_v43  ;;  %7209 = vmatpush.bf16.msra.mxu3 %v11025_v33  ;;  %v13332_v43 = vpop.f32.mrf.mxu2 }
 0x415   :  { %v12692_v34 = vld [vmem:[#allocation3 + $0x13ac] sm:$0xf0] }
 0x416   :  { %v10736_v35 = vld [vmem:[#allocation3 + $0x1590] sm:$0xf]  ;;  %v10481_v44 = vor.u32 %v12692_v34, %v10480_v30  ;;  %7171 = vmatpush.bf16.msra.mxu0 %v10225_v42  ;;  %v6921_v42 = vpop.f32.mrf.mxu0 }
 0x417   :  { %v12756_v15 = vld [vmem:[#allocation3 + $0x15ac] sm:$0xf0] }
 0x418   :  { %v10992_v36 = vld [vmem:[#allocation3 + $0x1790] sm:$0xf]  ;;  %v10737_v50 = vor.u32 %v12756_v15, %v10736_v35  ;;  %7184 = vmatpush.bf16.msra.mxu1 %v10481_v44  ;;  %v13334_v35 = vpop.f32.mrf.mxu3 }
 0x419   :  { %v12820_v37 = vld [vmem:[#allocation3 + $0x17ac] sm:$0xf0] }
 0x41a   :  { %v10192_v52 = vld [vmem:[#allocation3 + $0x1150] sm:$0xf]  ;;  %v10993_v56 = vor.u32 %v12820_v37, %v10992_v36  ;;  %7197 = vmatpush.bf16.msra.mxu2 %v10737_v50 }
 0x41b   :  { %v12620_v53 = vld [vmem:[#allocation3 + $0x116c] sm:$0xf0] }
 0x41c   :  { %v10448_v55 = vld [vmem:[#allocation3 + $0x1350] sm:$0xf]  ;;  %v10193_v62 = vor.u32 %v12620_v53, %v10192_v52  ;;  %7210 = vmatpush.bf16.msra.mxu3 %v10993_v56  ;;  %v6934_v56 = vpop.f32.mrf.mxu1 }
 0x41d   :  { %v12684_v57 = vld [vmem:[#allocation3 + $0x136c] sm:$0xf0] }
 0x41e   :  { %v10704_v58 = vld [vmem:[#allocation3 + $0x1550] sm:$0xf]  ;;  %v10449_v63 = vor.u32 %v12684_v57, %v10448_v55  ;;  %7172 = vmatpush.bf16.msra.mxu0 %v10193_v62 }
 0x41f   :  { %v12748_v59 = vld [vmem:[#allocation3 + $0x156c] sm:$0xf0] }
 0x420   :  { %v10960_v60 = vld [vmem:[#allocation3 + $0x1750] sm:$0xf]  ;;  %v10705_v0 = vor.u32 %v12748_v59, %v10704_v58  ;;  %7185 = vmatpush.bf16.msra.mxu1 %v10449_v63 }
 0x421   :  { %v12812_v61 = vld [vmem:[#allocation3 + $0x176c] sm:$0xf0] }
 0x422   :  { %v10160_v1 = vld [vmem:[#allocation3 + $0x1110] sm:$0xf]  ;;  %v10961_v5 = vor.u32 %v12812_v61, %v10960_v60  ;;  %7198 = vmatpush.bf16.msra.mxu2 %v10705_v0 }
 0x423   :  { %v12612_v2 = vld [vmem:[#allocation3 + $0x112c] sm:$0xf0] }
 0x424   :  { %v10416_v4 = vld [vmem:[#allocation3 + $0x1310] sm:$0xf]  ;;  %v10161_v11 = vor.u32 %v12612_v2, %v10160_v1  ;;  %7211 = vmatpush.bf16.msra.mxu3 %v10961_v5 }
 0x425   :  { %v12676_v6 = vld [vmem:[#allocation3 + $0x132c] sm:$0xf0] }
 0x426   :  { %v10672_v7 = vld [vmem:[#allocation3 + $0x1510] sm:$0xf]  ;;  %v10417_v13 = vor.u32 %v12676_v6, %v10416_v4  ;;  %7173 = vmatpush.bf16.msra.mxu0 %v10161_v11 }
 0x427   :  { %v12740_v8 = vld [vmem:[#allocation3 + $0x152c] sm:$0xf0] }
 0x428   :  { %v10928_v9 = vld [vmem:[#allocation3 + $0x1710] sm:$0xf]  ;;  %v10673_v14 = vor.u32 %v12740_v8, %v10672_v7  ;;  %7186 = vmatpush.bf16.msra.mxu1 %v10417_v13  ;;  %v6947_v8 = vpop.f32.mrf.mxu2 }
 0x429   :  { %v12804_v10 = vld [vmem:[#allocation3 + $0x172c] sm:$0xf0] }
 0x42a   :  { %v10128_v16 = vld [vmem:[#allocation3 + $0x10d0] sm:$0xf]  ;;  %v10929_v19 = vor.u32 %v12804_v10, %v10928_v9  ;;  %7199 = vmatpush.bf16.msra.mxu2 %v10673_v14  ;;  %v6960_v14 = vpop.f32.mrf.mxu3 }
 0x42b   :  { %v12604_v17 = vld [vmem:[#allocation3 + $0x10ec] sm:$0xf0] }
 0x42c   :  { %v10384_v18 = vld [vmem:[#allocation3 + $0x12d0] sm:$0xf]  ;;  %v10129_v45 = vor.u32 %v12604_v17, %v10128_v16  ;;  %7212 = vmatpush.bf16.msra.mxu3 %v10929_v19 }
 0x42d   :  { %v12668_v23 = vld [vmem:[#allocation3 + $0x12ec] sm:$0xf0] }
 0x42e   :  { %v10640_v24 = vld [vmem:[#allocation3 + $0x14d0] sm:$0xf]  ;;  %v10385_v40 = vor.u32 %v12668_v23, %v10384_v18  ;;  %7174 = vmatpush.bf16.msra.mxu0 %v10129_v45 }
 0x42f   :  { %v12732_v25 = vld [vmem:[#allocation3 + $0x14ec] sm:$0xf0] }
 0x430   :  { %v10896_v39 = vld [vmem:[#allocation3 + $0x16d0] sm:$0xf]  ;;  %v10641_v46 = vor.u32 %v12732_v25, %v10640_v24  ;;  %7187 = vmatpush.bf16.msra.mxu1 %v10385_v40 }
 0x431   :  { %v12796_v27 = vld [vmem:[#allocation3 + $0x16ec] sm:$0xf0] }
 0x432   :  { %v10096_v48 = vld [vmem:[#allocation3 + $0x1090] sm:$0xf]  ;;  %v10897_v28 = vor.u32 %v12796_v27, %v10896_v39  ;;  %7200 = vmatpush.bf16.msra.mxu2 %v10641_v46 }
 0x433   :  { %v12596_v51 = vld [vmem:[#allocation3 + $0x10ac] sm:$0xf0] }
 0x434   :  { %v10352_v41 = vld [vmem:[#allocation3 + $0x1290] sm:$0xf]  ;;  %v10097_v37 = vor.u32 %v12596_v51, %v10096_v48  ;;  %7213 = vmatpush.bf16.msra.mxu3 %v10897_v28 }
 0x435   :  { %v12660_v30 = vld [vmem:[#allocation3 + $0x12ac] sm:$0xf0] }
 0x436   :  { %v10608_v33 = vld [vmem:[#allocation3 + $0x1490] sm:$0xf]  ;;  %v10353_v44 = vor.u32 %v12660_v30, %v10352_v41  ;;  %7175 = vmatpush.bf16.msra.mxu0 %v10097_v37 }
 0x437   :  { %v12724_v34 = vld [vmem:[#allocation3 + $0x14ac] sm:$0xf0] }
 0x438   :  { %v10864_v15 = vld [vmem:[#allocation3 + $0x1690] sm:$0xf]  ;;  %v10609_v50 = vor.u32 %v12724_v34, %v10608_v33  ;;  %7188 = vmatpush.bf16.msra.mxu1 %v10353_v44 }
 0x439   :  { %v12788_v36 = vld [vmem:[#allocation3 + $0x16ac] sm:$0xf0] }
 0x43a   :  { %v10064_v52 = vld [vmem:[#allocation3 + $0x1050] sm:$0xf]  ;;  %v10865_v57 = vor.u32 %v12788_v36, %v10864_v15  ;;  %7201 = vmatpush.bf16.msra.mxu2 %v10609_v50 }
 0x43b   :  { %v12588_v53 = vld [vmem:[#allocation3 + $0x106c] sm:$0xf0] }
 0x43c   :  { %v10320_v55 = vld [vmem:[#allocation3 + $0x1250] sm:$0xf]  ;;  %v10065_v63 = vor.u32 %v12588_v53, %v10064_v52  ;;  %7214 = vmatpush.bf16.msra.mxu3 %v10865_v57 }
 0x43d   :  { %v12652_v58 = vld [vmem:[#allocation3 + $0x126c] sm:$0xf0] }
 0x43e   :  { %v10576_v59 = vld [vmem:[#allocation3 + $0x1450] sm:$0xf]  ;;  %v10321_v2 = vor.u32 %v12652_v58, %v10320_v55  ;;  %7176 = vmatpush.bf16.msra.mxu0 %v10065_v63  ;;  %v13114_v58 = vld [vmem:[#allocation1] sm:$0xff] }
 0x43f   :  { %v12716_v60 = vld [vmem:[#allocation3 + $0x146c] sm:$0xf0] }
 0x440   :  { %v10832_v61 = vld [vmem:[#allocation3 + $0x1650] sm:$0xf]  ;;  %v10577_v4 = vor.u32 %v12716_v60, %v10576_v59  ;;  %7189 = vmatpush.bf16.msra.mxu1 %v10321_v2 }
 0x441   :  { %v12780_v62 = vld [vmem:[#allocation3 + $0x166c] sm:$0xf0] }
 0x442   :  { %v10032_v0 = vld [vmem:[#allocation3 + $0x1010] sm:$0xf]  ;;  %v10833_v9 = vor.u32 %v12780_v62, %v10832_v61  ;;  %7202 = vmatpush.bf16.msra.mxu2 %v10577_v4 }
 0x443   :  { %v12580_v1 = vld [vmem:[#allocation3 + $0x102c] sm:$0xf0] }
 0x444   :  { %v10288_v5 = vld [vmem:[#allocation3 + $0x1210] sm:$0xf]  ;;  %v10033_v19 = vor.u32 %v12580_v1, %v10032_v0  ;;  %7215 = vmatpush.bf16.msra.mxu3 %v10833_v9  ;;  %v13116_v0 = vld [vmem:[#allocation1 + $0x9] sm:$0xff] }
 0x445   :  { %v12644_v6 = vld [vmem:[#allocation3 + $0x122c] sm:$0xf0] }
 0x446   :  { %v10544_v7 = vld [vmem:[#allocation3 + $0x1410] sm:$0xf]  ;;  %v10289_v39 = vor.u32 %v12644_v6, %v10288_v5  ;;  %7177 = vmatpush.bf16.msra.mxu0 %v10033_v19 }
 0x447   :  { %v12708_v10 = vld [vmem:[#allocation3 + $0x142c] sm:$0xf0] }
 0x448   :  { %v10800_v11 = vld [vmem:[#allocation3 + $0x1610] sm:$0xf]  ;;  %v10545_v27 = vor.u32 %v12708_v10, %v10544_v7  ;;  %7190 = vmatpush.bf16.msra.mxu1 %v10289_v39 }
 0x449   :  { %v12772_v13 = vld [vmem:[#allocation3 + $0x162c] sm:$0xf0]  ;;  %7178 = vmatmul.bf16.vlgmr.msra.gmra.mxu0 %v13114_v58 }
 0x44a   :  { %v11280_v16 = vld [vmem:[#allocation3 + $0x19d0] sm:$0xf]  ;;  %v10801_v46 = vor.u32 %v12772_v13, %v10800_v11  ;;  %7203 = vmatpush.bf16.msra.mxu2 %v10545_v27 }
 0x44b   :  { %v12892_v17 = vld [vmem:[#allocation3 + $0x19ec] sm:$0xf0]  ;;  %7191 = vmatmul.bf16.vlgmr.msra.gmra.mxu1 %v13116_v0 }
 0x44c   :  { %v11536_v18 = vld [vmem:[#allocation3 + $0x1bd0] sm:$0xf]  ;;  %v11281_v48 = vor.u32 %v12892_v17, %v11280_v16  ;;  %7216 = vmatpush.bf16.msra.mxu3 %v10801_v46  ;;  %v13336_v17 = vpop.f32.mrf.mxu0 }
 0x44d   :  { %v12956_v23 = vld [vmem:[#allocation3 + $0x1bec] sm:$0xf0] }
 0x44e   :  { %v11792_v24 = vld [vmem:[#allocation3 + $0x1dd0] sm:$0xf]  ;;  %v11537_v51 = vor.u32 %v12956_v23, %v11536_v18  ;;  %7222 = vmatpush.bf16.msrb.mxu0 %v11281_v48 }
 0x44f   :  { %v13020_v25 = vld [vmem:[#allocation3 + $0x1dec] sm:$0xf0] }
 0x450   :  { %v12048_v45 = vld [vmem:[#allocation3 + $0x1fd0] sm:$0xf]  ;;  %v11793_v41 = vor.u32 %v13020_v25, %v11792_v24  ;;  %7235 = vmatpush.bf16.msrb.mxu1 %v11537_v51  ;;  %v13338_v24 = vpop.f32.mrf.mxu1 }
 0x451   :  { %v13084_v40 = vld [vmem:[#allocation3 + $0x1fec] sm:$0xf0] }
 0x452   :  { %v11248_v28 = vld [vmem:[#allocation3 + $0x1990] sm:$0xf]  ;;  %v12049_v34 = vor.u32 %v13084_v40, %v12048_v45  ;;  %7248 = vmatpush.bf16.msrb.mxu2 %v11793_v41 }
 0x453   :  { %v12884_v30 = vld [vmem:[#allocation3 + $0x19ac] sm:$0xf0] }
 0x454   :  { %v11504_v33 = vld [vmem:[#allocation3 + $0x1b90] sm:$0xf]  ;;  %v11249_v50 = vor.u32 %v12884_v30, %v11248_v28  ;;  %7261 = vmatpush.bf16.msrb.mxu3 %v12049_v34  ;;  %v6920_v34 = vadd.f32 %v13328_v12, %v13322_v47 }
 0x455   :  { %v12948_v15 = vld [vmem:[#allocation3 + $0x1bac] sm:$0xf0] }
 0x456   :  { %v11760_v36 = vld [vmem:[#allocation3 + $0x1d90] sm:$0xf]  ;;  %v11505_v52 = vor.u32 %v12948_v15, %v11504_v33  ;;  %7223 = vmatpush.bf16.msrb.mxu0 %v11249_v50 }
 0x457   :  { %v13012_v37 = vld [vmem:[#allocation3 + $0x1dac] sm:$0xf0] }
 0x458   :  { %v12016_v42 = vld [vmem:[#allocation3 + $0x1f90] sm:$0xf]  ;;  %v11761_v53 = vor.u32 %v13012_v37, %v11760_v36  ;;  %7236 = vmatpush.bf16.msrb.mxu1 %v11505_v52  ;;  %v13342_v52 = vpop.f32.mrf.mxu2  ;;  %v6986_v12 = vpop.f32.mrf.mxu1 }
 0x459   :  { %v13076_v44 = vld [vmem:[#allocation3 + $0x1fac] sm:$0xf0]  ;;  %v8434_v12 = vld [vmem:[#allocation3 + $0x3b0] sm:$0xf0] }
 0x45a   :  { %v11216_v55 = vld [vmem:[#allocation3 + $0x1950] sm:$0xf]  ;;  %v12017_v59 = vor.u32 %v13076_v44, %v12016_v42  ;;  %7249 = vmatpush.bf16.msrb.mxu2 %v11761_v53 }
 0x45b   :  { %v12876_v56 = vld [vmem:[#allocation3 + $0x196c] sm:$0xf0] }
 0x45c   :  { %v11472_v57 = vld [vmem:[#allocation3 + $0x1b50] sm:$0xf]  ;;  %v11217_v5 = vor.u32 %v12876_v56, %v11216_v55  ;;  %7262 = vmatpush.bf16.msrb.mxu3 %v12017_v59 }
 0x45d   :  { %v12940_v60 = vld [vmem:[#allocation3 + $0x1b6c] sm:$0xf0] }
 0x45e   :  { %v11728_v61 = vld [vmem:[#allocation3 + $0x1d50] sm:$0xf]  ;;  %v11473_v6 = vor.u32 %v12940_v60, %v11472_v57  ;;  %7224 = vmatpush.bf16.msrb.mxu0 %v11217_v5  ;;  %v13344_v57 = vpop.f32.mrf.mxu3  ;;  %v6973_v60 = vpop.f32.mrf.mxu0 }
 0x45f   :  { %v13004_v62 = vld [vmem:[#allocation3 + $0x1d6c] sm:$0xf0]  ;;  %v12176_v60 = vld [vmem:[#allocation3 + $0x394] sm:$0xf] }
 0x460   :  { %v13115_v63 = vld [vmem:[#allocation1 + $0x12] sm:$0xff]  ;;  %v13117_v4 = vld [vmem:[#allocation1 + $0x1b] sm:$0xff]  ;;  %v11729_v7 = vor.u32 %v13004_v62, %v11728_v61  ;;  %7237 = vmatpush.bf16.msrb.mxu1 %v11473_v6  ;;  %v6933_v61 = vadd.f32 %v13330_v49, %v6920_v34 }
 0x461   :  { %7204 = vmatmul.bf16.vlgmr.msra.gmra.mxu2 %v13115_v63  ;;  %v11984_v1 = vld [vmem:[#allocation3 + $0x1f50] sm:$0xf]  ;;  %7217 = vmatmul.bf16.vlgmr.msra.gmra.mxu3 %v13117_v4 }
 0x462   :  { %v13068_v2 = vld [vmem:[#allocation3 + $0x1f6c] sm:$0xf0]  ;;  %7250 = vmatpush.bf16.msrb.mxu2 %v11729_v7  ;;  %v6946_v49 = vadd.f32 %v13332_v43, %v6933_v61  ;;  %v8466_v43 = vld [vmem:[#allocation3 + $0x3f0] sm:$0xf0] }
 0x463   :  { %v11184_v8 = vld [vmem:[#allocation3 + $0x1910] sm:$0xf]  ;;  %v11985_v11 = vor.u32 %v13068_v2, %v11984_v1  ;;  %v8690_v61 = vld [vmem:[#allocation3 + $0x5b0] sm:$0xf0] }
 0x464   :  { %v12868_v9 = vld [vmem:[#allocation3 + $0x192c] sm:$0xf0]  ;;  %v6959_v34 = vadd.f32 %v13334_v35, %v6946_v49  ;;  %v12240_v35 = vld [vmem:[#allocation3 + $0x594] sm:$0xf] }
 0x465   :  { %v11440_v10 = vld [vmem:[#allocation3 + $0x1b10] sm:$0xf]  ;;  %v11185_v23 = vor.u32 %v12868_v9, %v11184_v8  ;;  %7263 = vmatpush.bf16.msrb.mxu3 %v11985_v11 }
 0x466   :  { %v12932_v13 = vld [vmem:[#allocation3 + $0x1b2c] sm:$0xf0] }
 0x467   :  { %v11696_v14 = vld [vmem:[#allocation3 + $0x1d10] sm:$0xf]  ;;  %v11441_v25 = vor.u32 %v12932_v13, %v11440_v10  ;;  %7225 = vmatpush.bf16.msrb.mxu0 %v11185_v23 }
 0x468   :  { %v12996_v16 = vld [vmem:[#allocation3 + $0x1d2c] sm:$0xf0] }
 0x469   :  { %v11952_v18 = vld [vmem:[#allocation3 + $0x1f10] sm:$0xf]  ;;  %v11697_v39 = vor.u32 %v12996_v16, %v11696_v14  ;;  %7238 = vmatpush.bf16.msrb.mxu1 %v11441_v25 }
 0x46a   :  { %v13060_v19 = vld [vmem:[#allocation3 + $0x1f2c] sm:$0xf0] }
 0x46b   :  { %v11152_v27 = vld [vmem:[#allocation3 + $0x18d0] sm:$0xf]  ;;  %v11953_v46 = vor.u32 %v13060_v19, %v11952_v18  ;;  %7251 = vmatpush.bf16.msrb.mxu2 %v11697_v39 }
 0x46c   :  { %v12860_v45 = vld [vmem:[#allocation3 + $0x18ec] sm:$0xf0] }
 0x46d   :  { %v11408_v40 = vld [vmem:[#allocation3 + $0x1ad0] sm:$0xf]  ;;  %v11153_v33 = vor.u32 %v12860_v45, %v11152_v27  ;;  %7264 = vmatpush.bf16.msrb.mxu3 %v11953_v46  ;;  %v12120_v46 = vld [vmem:[#allocation3 + $0x1d4] sm:$0xf] }
 0x46e   :  { %v12924_v48 = vld [vmem:[#allocation3 + $0x1aec] sm:$0xf0] }
 0x46f   :  { %v11664_v51 = vld [vmem:[#allocation3 + $0x1cd0] sm:$0xf]  ;;  %v11409_v15 = vor.u32 %v12924_v48, %v11408_v40  ;;  %7226 = vmatpush.bf16.msrb.mxu0 %v11153_v33  ;;  %v6999_v40 = vpop.f32.mrf.mxu2  ;;  %v8210_v48 = vld [vmem:[#allocation3 + $0x1f0] sm:$0xf0] }
 0x470   :  { %v12988_v41 = vld [vmem:[#allocation3 + $0x1cec] sm:$0xf0]  ;;  %v8722_v33 = vld [vmem:[#allocation3 + $0x5f0] sm:$0xf0] }
 0x471   :  { %v11920_v28 = vld [vmem:[#allocation3 + $0x1ed0] sm:$0xf]  ;;  %v11665_v36 = vor.u32 %v12988_v41, %v11664_v51  ;;  %7239 = vmatpush.bf16.msrb.mxu1 %v11409_v15  ;;  %v12184_v51 = vld [vmem:[#allocation3 + $0x3d4] sm:$0xf]  ;;  %v7012_v41 = vpop.f32.mrf.mxu3 }
 0x472   :  { %v13052_v30 = vld [vmem:[#allocation3 + $0x1eec] sm:$0xf0]  ;;  %v8370_v40 = vld [vmem:[#allocation3 + $0x330] sm:$0xf0]  ;;  %v7932_v41 = vld [vmem:[#allocation5] sm:$0xff] }
 0x473   :  { %v11120_v37 = vld [vmem:[#allocation3 + $0x1890] sm:$0xf]  ;;  %v11921_v50 = vor.u32 %v13052_v30, %v11920_v28  ;;  %7252 = vmatpush.bf16.msrb.mxu2 %v11665_v36  ;;  %v12248_v30 = vld [vmem:[#allocation3 + $0x5d4] sm:$0xf] }
 0x474   :  { %v12852_v42 = vld [vmem:[#allocation3 + $0x18ac] sm:$0xf0] }
 0x475   :  { %v11376_v44 = vld [vmem:[#allocation3 + $0x1a90] sm:$0xf]  ;;  %v11121_v47 = vor.u32 %v12852_v42, %v11120_v37  ;;  %7265 = vmatpush.bf16.msrb.mxu3 %v11921_v50  ;;  %v12312_v37 = vld [vmem:[#allocation3 + $0x7d4] sm:$0xf]  ;;  %v8213_v50 = vor.u32 %v12120_v46, %v8210_v48 }
 0x476   :  { %v12916_v53 = vld [vmem:[#allocation3 + $0x1aac] sm:$0xf0]  ;;  %v8978_v42 = vld [vmem:[#allocation3 + $0x7f0] sm:$0xf0] }
 0x477   :  { %v11632_v55 = vld [vmem:[#allocation3 + $0x1c90] sm:$0xf]  ;;  %v11377_v62 = vor.u32 %v12916_v53, %v11376_v44  ;;  %7227 = vmatpush.bf16.msrb.mxu0 %v11121_v47  ;;  %v6972_v53 = vadd.f32 %v13336_v17, %v6959_v34  ;;  %v8981_v47 = vor.u32 %v12312_v37, %v8978_v42  ;;  %v8437_v17 = vor.u32 %v12176_v60, %v8434_v12  ;;  %v12224_v46 = vld [vmem:[#allocation3 + $0x514] sm:$0xf]  ;;  %v7036_v42 = vpop.f32.mrf.mxu1 }
 0x478   :  { %v12980_v56 = vld [vmem:[#allocation3 + $0x1cac] sm:$0xf0]  ;;  %v8082_v34 = vld [vmem:[#allocation3 + $0xf0] sm:$0xf0]  ;;  %v7937_v60 = vperm.slane %v7932_v41, 3 }
 0x479   :  { %v11888_v58 = vld [vmem:[#allocation3 + $0x1e90] sm:$0xf]  ;;  %v11633_v63 = vor.u32 %v12980_v56, %v11632_v55  ;;  %7240 = vmatpush.bf16.msrb.mxu1 %v11377_v62  ;;  %v8469_v55 = vor.u32 %v12184_v51, %v8466_v43  ;;  %v8725_v56 = vor.u32 %v12248_v30, %v8722_v33  ;;  %v12304_v62 = vld [vmem:[#allocation3 + $0x794] sm:$0xf]  ;;  %v7023_v43 = vpop.f32.mrf.mxu0 }
 0x47a   :  { %v13044_v59 = vld [vmem:[#allocation3 + $0x1eac] sm:$0xf0]  ;;  %v12288_v51 = vld [vmem:[#allocation3 + $0x714] sm:$0xf] }
 0x47b   :  { %v11088_v0 = vld [vmem:[#allocation3 + $0x1850] sm:$0xf]  ;;  %v11889_v4 = vor.u32 %v13044_v59, %v11888_v58  ;;  %7253 = vmatpush.bf16.msrb.mxu2 %v11633_v63  ;;  %v12112_v58 = vld [vmem:[#allocation3 + $0x194] sm:$0xf] }
 0x47c   :  { %v12844_v1 = vld [vmem:[#allocation3 + $0x186c] sm:$0xf0]  ;;  %v8178_v59 = vld [vmem:[#allocation3 + $0x1b0] sm:$0xf0] }
 0x47d   :  { %v11344_v2 = vld [vmem:[#allocation3 + $0x1a50] sm:$0xf]  ;;  %v11089_v10 = vor.u32 %v12844_v1, %v11088_v0  ;;  %7266 = vmatpush.bf16.msrb.mxu3 %v11889_v4  ;;  %v8946_v63 = vld [vmem:[#allocation3 + $0x7b0] sm:$0xf0]  ;;  %v8181_v0 = vor.u32 %v12112_v58, %v8178_v59  ;;  %v6985_v1 = vadd.f32 %v13338_v24, %v6972_v53  ;;  %v7935_v58 = vperm.slane %v7932_v41, 1 }
 0x47e   :  { %v12908_v5 = vld [vmem:[#allocation3 + $0x1a6c] sm:$0xf0]  ;;  %v12104_v4 = vld [vmem:[#allocation3 + $0x154] sm:$0xf]  ;;  %v7936_v59 = vperm.slane %v7932_v41, 2 }
 0x47f   :  { %v11600_v6 = vld [vmem:[#allocation3 + $0x1c50] sm:$0xf]  ;;  %v11345_v14 = vor.u32 %v12908_v5, %v11344_v2  ;;  %7228 = vmatpush.bf16.msrb.mxu0 %v11089_v10  ;;  %v8693_v2 = vor.u32 %v12240_v35, %v8690_v61  ;;  %v8146_v5 = vld [vmem:[#allocation3 + $0x170] sm:$0xf0] }
 0x480   :  { %v12972_v7 = vld [vmem:[#allocation3 + $0x1c6c] sm:$0xf0]  ;;  %v12232_v10 = vld [vmem:[#allocation3 + $0x554] sm:$0xf] }
 0x481   :  { %v11856_v8 = vld [vmem:[#allocation3 + $0x1e50] sm:$0xf]  ;;  %v11601_v16 = vor.u32 %v12972_v7, %v11600_v6  ;;  %7241 = vmatpush.bf16.msrb.mxu1 %v11345_v14  ;;  %v12168_v6 = vld [vmem:[#allocation3 + $0x354] sm:$0xf]  ;;  %v13118_v7 = vld [vmem:[#allocation1 + $0x24] sm:$0xff] }
 0x482   :  { %v13036_v9 = vld [vmem:[#allocation3 + $0x1e6c] sm:$0xf0]  ;;  %v13120_v14 = vld [vmem:[#allocation1 + $0x2d] sm:$0xff]  ;;  %v12296_v24 = vld [vmem:[#allocation3 + $0x754] sm:$0xf] }
 0x483   :  { %v11056_v11 = vld [vmem:[#allocation3 + $0x1810] sm:$0xf]  ;;  %v11857_v25 = vor.u32 %v13036_v9, %v11856_v8  ;;  %7254 = vmatpush.bf16.msrb.mxu2 %v11601_v16  ;;  %v8949_v8 = vor.u32 %v12304_v62, %v8946_v63  ;;  %v8402_v9 = vld [vmem:[#allocation3 + $0x370] sm:$0xf0] }
 0x484   :  { %v12836_v13 = vld [vmem:[#allocation3 + $0x182c] sm:$0xf0]  ;;  %v8914_v16 = vld [vmem:[#allocation3 + $0x770] sm:$0xf0] }
 0x485   :  { %v11312_v18 = vld [vmem:[#allocation3 + $0x1a10] sm:$0xf]  ;;  %v11057_v28 = vor.u32 %v12836_v13, %v11056_v11  ;;  %7267 = vmatpush.bf16.msrb.mxu3 %v11857_v25  ;;  %v8658_v11 = vld [vmem:[#allocation3 + $0x570] sm:$0xf0]  ;;  %v6998_v13 = vadd.f32 %v13342_v52, %v6985_v1  ;;  %v8917_v48 = vor.u32 %v12296_v24, %v8914_v16  ;;  %v7025_v16 = vpop.f32.mrf.mxu0 }
 0x486   :  { %v12900_v19 = vld [vmem:[#allocation3 + $0x1a2c] sm:$0xf0]  ;;  %v8114_v25 = vld [vmem:[#allocation3 + $0x130] sm:$0xf0] }
 0x487   :  { %v11568_v23 = vld [vmem:[#allocation3 + $0x1c10] sm:$0xf]  ;;  %v11313_v15 = vor.u32 %v12900_v19, %v11312_v18  ;;  %7229 = vmatpush.bf16.msrb.mxu0 %v11057_v28  ;;  %v13121_v18 = vld [vmem:[#allocation1 + $0x3f] sm:$0xff]  ;;  %v8149_v19 = vor.u32 %v12104_v4, %v8146_v5  ;;  %v7011_v28 = vadd.f32 %v13344_v57, %v6998_v13 }
 0x488   :  { %v12964_v39 = vld [vmem:[#allocation3 + $0x1c2c] sm:$0xf0]  ;;  %v8626_v52 = vld [vmem:[#allocation3 + $0x530] sm:$0xf0] }
 0x489   :  { %v11824_v27 = vld [vmem:[#allocation3 + $0x1e10] sm:$0xf]  ;;  %v11569_v36 = vor.u32 %v12964_v39, %v11568_v23  ;;  %7242 = vmatpush.bf16.msrb.mxu1 %v11313_v15  ;;  %v12096_v23 = vld [vmem:[#allocation3 + $0x114] sm:$0xf]  ;;  %v8629_v37 = vor.u32 %v12224_v46, %v8626_v52 }
 0x48a   :  { %v13028_v45 = vld [vmem:[#allocation3 + $0x1e2c] sm:$0xf0]  ;;  %7230 = vmatmul.bf16.vlgmr.msrb.gmra.mxu0 %v13118_v7  ;;  %v12160_v39 = vld [vmem:[#allocation3 + $0x314] sm:$0xf]  ;;  %v8117_v15 = vor.u32 %v12096_v23, %v8114_v25  ;;  %v7943_v7 = vrot.slane %v7936_v59, 4  ;;  %v7038_v25 = vpop.f32.mrf.mxu1 }
 0x48b   :  { %v11825_v44 = vor.u32 %v13028_v45, %v11824_v27  ;;  %7255 = vmatpush.bf16.msrb.mxu2 %v11569_v36  ;;  %7274 = vmatpush.bf16.msra.mxu0 %v8213_v50  ;;  %v13119_v49 = vld [vmem:[#allocation1 + $0x36] sm:$0xff]  ;;  %v8405_v27 = vor.u32 %v12168_v6, %v8402_v9  ;;  %v8661_v45 = vor.u32 %v12232_v10, %v8658_v11  ;;  %v7942_v6 = vrot.slane %v7935_v58, 6  ;;  %v7049_v11 = vpop.f32.mrf.mxu2 }
 0x48c   :  { %7243 = vmatmul.bf16.vlgmr.msrb.gmra.mxu1 %v13120_v14  ;;  %v8882_v30 = vld [vmem:[#allocation3 + $0x730] sm:$0xf0]  ;;  %v8373_v36 = vor.u32 %v12160_v39, %v8370_v40 }
 0x48d   :  { %7268 = vmatpush.bf16.msrb.mxu3 %v11825_v44  ;;  %7287 = vmatpush.bf16.msra.mxu1 %v8469_v55  ;;  %v12088_v33 = vld [vmem:[#allocation3 + $0xd4] sm:$0xf]  ;;  %v7024_v55 = vadd.f32 %v7023_v43, %v7011_v28  ;;  %v8885_v57 = vor.u32 %v12288_v51, %v8882_v30  ;;  %v7907_v43 = vrot.slane %v13316_v54, 4 }
 0x48e   :  { %7256 = vmatmul.bf16.vlgmr.msrb.gmra.mxu2 %v13119_v49  ;;  %v12152_v44 = vld [vmem:[#allocation3 + $0x2d4] sm:$0xf]  ;;  %v8085_v63 = vor.u32 %v12088_v33, %v8082_v34  ;;  %v7062_v49 = vpop.f32.mrf.mxu3 }
 0x48f   :  { %7300 = vmatpush.bf16.msra.mxu2 %v8725_v56  ;;  %7275 = vmatpush.bf16.msra.mxu0 %v8181_v0  ;;  %v8338_v50 = vld [vmem:[#allocation3 + $0x2f0] sm:$0xf0]  ;;  %v7037_v5 = vadd.f32 %v7036_v42, %v7024_v55 }
 0x490   :  { %7269 = vmatmul.bf16.vlgmr.msrb.gmra.mxu3 %v13121_v18  ;;  %v12216_v53 = vld [vmem:[#allocation3 + $0x4d4] sm:$0xf]  ;;  %v8341_v0 = vor.u32 %v12152_v44, %v8338_v50 }
 0x491   :  { %7313 = vmatpush.bf16.msra.mxu3 %v8981_v47  ;;  %7288 = vmatpush.bf16.msra.mxu1 %v8437_v17  ;;  %v8594_v56 = vld [vmem:[#allocation3 + $0x4f0] sm:$0xf0]  ;;  %v7934_v17 = vperm.slane %v7932_v41, 0  ;;  %v7050_v13 = vadd.f32 %v7049_v11, %v7037_v5 }
 0x492   :  { %v12280_v47 = vld [vmem:[#allocation3 + $0x6d4] sm:$0xf]  ;;  %v8597_v1 = vor.u32 %v12216_v53, %v8594_v56 }
 0x493   :  { %7301 = vmatpush.bf16.msra.mxu2 %v8693_v2  ;;  %7276 = vmatpush.bf16.msra.mxu0 %v8149_v19  ;;  %v8850_v12 = vld [vmem:[#allocation3 + $0x6f0] sm:$0xf0]  ;;  %v7063_v39 = vadd.f32 %v7062_v49, %v7050_v13 }
 0x494   :  { %v12080_v35 = vld [vmem:[#allocation3 + $0x94] sm:$0xf]  ;;  %v8853_v10 = vor.u32 %v12280_v47, %v8850_v12  ;;  %v7051_v12 = vpop.f32.mrf.mxu2 }
 0x495   :  { %7314 = vmatpush.bf16.msra.mxu3 %v8949_v8  ;;  %7289 = vmatpush.bf16.msra.mxu1 %v8405_v27  ;;  %v8050_v61 = vld [vmem:[#allocation3 + $0xb0] sm:$0xf0]  ;;  %v7944_v8 = vrot.slane %v7937_v60, 2  ;;  %v7948_v27 = vsel %vm7912_vm0, %v7934_v17, %v7942_v6  ;;  %v7908_v30 = vrot.slane %v7063_v39, 2 }
 0x496   :  { %v12144_v62 = vld [vmem:[#allocation3 + $0x294] sm:$0xf]  ;;  %v8053_v18 = vor.u32 %v12080_v35, %v8050_v61 }
 0x497   :  { %7302 = vmatpush.bf16.msra.mxu2 %v8661_v45  ;;  %7277 = vmatpush.bf16.msra.mxu0 %v8117_v15  ;;  %v8306_v2 = vld [vmem:[#allocation3 + $0x2b0] sm:$0xf0]  ;;  %v7949_v45 = vsel %vm7914_vm1, %v7943_v7, %v7944_v8  ;;  %v7915_v44 = vsel %vm7914_vm1, %v7907_v43, %v7908_v30 }
 0x498   :  { %v12208_v4 = vld [vmem:[#allocation3 + $0x494] sm:$0xf]  ;;  %v8309_v19 = vor.u32 %v12144_v62, %v8306_v2  ;;  %v7950_v15 = vsel %vm7916_vm2, %v7948_v27, %v7949_v45  ;;  %v7917_v54 = vsel %vm7916_vm2, %v13297_v3, %v7915_v44 }
 0x499   :  { %7315 = vmatpush.bf16.msra.mxu3 %v8917_v48  ;;  %7290 = vmatpush.bf16.msra.mxu1 %v8373_v36  ;;  %v8562_v9 = vld [vmem:[#allocation3 + $0x4b0] sm:$0xf0]  ;;  %v7956_v35 = vadd.f32 %v7950_v15, %v7917_v54 }
 0x49a   :  { %v12272_v14 = vld [vmem:[#allocation3 + $0x694] sm:$0xf]  ;;  %v8565_v23 = vor.u32 %v12208_v4, %v8562_v9 }
 0x49b   :  { %7303 = vmatpush.bf16.msra.mxu2 %v8629_v37  ;;  %v8818_v24 = vld [vmem:[#allocation3 + $0x6b0] sm:$0xf0]  ;;  %7278 = vmatpush.bf16.msra.mxu0 %v8085_v63  ;;  %7958 = vst [vmem:[%s13432_s3] sm:$0xff] %v7956_v35 }
 0x49c   :  { %v12072_v40 = vld [vmem:[#allocation3 + $0x54] sm:$0xf]  ;;  %v8821_v48 = vor.u32 %v12272_v14, %v8818_v24 }
 0x49d   :  { %7316 = vmatpush.bf16.msra.mxu3 %v8885_v57  ;;  %7291 = vmatpush.bf16.msra.mxu1 %v8341_v0  ;;  %v8018_v46 = vld [vmem:[#allocation3 + $0x70] sm:$0xf0]  ;;  %v7064_v0 = vpop.f32.mrf.mxu3 }
 0x49e   :  { %v12136_v52 = vld [vmem:[#allocation3 + $0x254] sm:$0xf]  ;;  %v8021_v36 = vor.u32 %v12072_v40, %v8018_v46 }
 0x49f   :  { %7304 = vmatpush.bf16.msra.mxu2 %v8597_v1  ;;  %v8274_v51 = vld [vmem:[#allocation3 + $0x270] sm:$0xf0]  ;;  %7279 = vmatpush.bf16.msra.mxu0 %v8053_v18 }
 0x4a0   :  { %v12200_v41 = vld [vmem:[#allocation3 + $0x454] sm:$0xf]  ;;  %v8277_v50 = vor.u32 %v12136_v52, %v8274_v51 }
 0x4a1   :  { %7317 = vmatpush.bf16.msra.mxu3 %v8853_v10  ;;  %v8530_v28 = vld [vmem:[#allocation3 + $0x470] sm:$0xf0]  ;;  %7292 = vmatpush.bf16.msra.mxu1 %v8309_v19 }
 0x4a2   :  { %v12264_v33 = vld [vmem:[#allocation3 + $0x654] sm:$0xf]  ;;  %v8533_v53 = vor.u32 %v12200_v41, %v8530_v28 }
 0x4a3   :  { %v8786_v34 = vld [vmem:[#allocation3 + $0x670] sm:$0xf0]  ;;  %7305 = vmatpush.bf16.msra.mxu2 %v8565_v23  ;;  %7280 = vmatpush.bf16.msra.mxu0 %v8021_v36 }
 0x4a4   :  { %v12064_v37 = vld [vmem:[#allocation3 + $0x14] sm:$0xf]  ;;  %v8789_v59 = vor.u32 %v12264_v33, %v8786_v34 }
 0x4a5   :  { %v7986_v42 = vld [vmem:[#allocation3 + $0x30] sm:$0xf0]  ;;  %7318 = vmatpush.bf16.msra.mxu3 %v8821_v48  ;;  %7293 = vmatpush.bf16.msra.mxu1 %v8277_v50 }
 0x4a6   :  { %v12128_v55 = vld [vmem:[#allocation3 + $0x214] sm:$0xf]  ;;  %v7989_v1 = vor.u32 %v12064_v37, %v7986_v42 }
 0x4a7   :  { %v8242_v56 = vld [vmem:[#allocation3 + $0x230] sm:$0xf0]  ;;  %7306 = vmatpush.bf16.msra.mxu2 %v8533_v53 }
 0x4a8   :  { %v12192_v58 = vld [vmem:[#allocation3 + $0x414] sm:$0xf]  ;;  %v8245_v3 = vor.u32 %v12128_v55, %v8242_v56  ;;  %7281 = vmatpush.bf16.msra.mxu0 %v7989_v1 }
 0x4a9   :  { %v8498_v60 = vld [vmem:[#allocation3 + $0x430] sm:$0xf0]  ;;  %7319 = vmatpush.bf16.msra.mxu3 %v8789_v59  ;;  %v7075_v59 = vpop.f32.mrf.mxu0 }
 0x4aa   :  { %v12256_v57 = vld [vmem:[#allocation3 + $0x614] sm:$0xf]  ;;  %v8501_v5 = vor.u32 %v12192_v58, %v8498_v60  ;;  %7294 = vmatpush.bf16.msra.mxu1 %v8245_v3 }
 0x4ab   :  { %v8754_v47 = vld [vmem:[#allocation3 + $0x630] sm:$0xf0]  ;;  %7282 = vmatmul.bf16.vlgmr.msra.gmra.mxu0 %v13234_v21 }
 0x4ac   :  { %v12376_v61 = vld [vmem:[#allocation3 + $0x9d4] sm:$0xf]  ;;  %v8757_v8 = vor.u32 %v12256_v57, %v8754_v47  ;;  %7307 = vmatpush.bf16.msra.mxu2 %v8501_v5 }
 0x4ad   :  { %v9234_v62 = vld [vmem:[#allocation3 + $0x9f0] sm:$0xf0]  ;;  %7295 = vmatmul.bf16.vlgmr.msra.gmra.mxu1 %v13239_v26 }
 0x4ae   :  { %v12440_v63 = vld [vmem:[#allocation3 + $0xbd4] sm:$0xf]  ;;  %v9237_v9 = vor.u32 %v12376_v61, %v9234_v62  ;;  %7320 = vmatpush.bf16.msra.mxu3 %v8757_v8  ;;  %v7088_v61 = vpop.f32.mrf.mxu1 }
 0x4af   :  { %v9490_v17 = vld [vmem:[#allocation3 + $0xbf0] sm:$0xf0]  ;;  %7308 = vmatmul.bf16.vlgmr.msra.gmra.mxu2 %v13232_v20 }
 0x4b0   :  { %v12504_v2 = vld [vmem:[#allocation3 + $0xdd4] sm:$0xf]  ;;  %v9493_v10 = vor.u32 %v12440_v63, %v9490_v17  ;;  %7326 = vmatpush.bf16.msrb.mxu0 %v9237_v9  ;;  %v7089_v17 = vadd.f32 %v7088_v61, %v7075_v59 }
 0x4b1   :  { %v9746_v4 = vld [vmem:[#allocation3 + $0xdf0] sm:$0xf0]  ;;  %7321 = vmatmul.bf16.vlgmr.msra.gmra.mxu3 %v13236_v22 }
 0x4b2   :  { %v12568_v6 = vld [vmem:[#allocation3 + $0xfd4] sm:$0xf]  ;;  %v9749_v11 = vor.u32 %v12504_v2, %v9746_v4  ;;  %7339 = vmatpush.bf16.msrb.mxu1 %v9493_v10  ;;  %v7101_v10 = vpop.f32.mrf.mxu2 }
 0x4b3   :  { %v10002_v7 = vld [vmem:[#allocation3 + $0xff0] sm:$0xf0] }
 0x4b4   :  { %v12368_v13 = vld [vmem:[#allocation3 + $0x994] sm:$0xf]  ;;  %v10005_v24 = vor.u32 %v12568_v6, %v10002_v7  ;;  %7352 = vmatpush.bf16.msrb.mxu2 %v9749_v11 }
 0x4b5   :  { %v9202_v49 = vld [vmem:[#allocation3 + $0x9b0] sm:$0xf0] }
 0x4b6   :  { %v12432_v14 = vld [vmem:[#allocation3 + $0xb94] sm:$0xf]  ;;  %v9205_v39 = vor.u32 %v12368_v13, %v9202_v49  ;;  %7365 = vmatpush.bf16.msrb.mxu3 %v10005_v24  ;;  %v7102_v24 = vadd.f32 %v7101_v10, %v7089_v17 }
 0x4b7   :  { %v9458_v16 = vld [vmem:[#allocation3 + $0xbb0] sm:$0xf0] }
 0x4b8   :  { %v12496_v18 = vld [vmem:[#allocation3 + $0xd94] sm:$0xf]  ;;  %v9461_v27 = vor.u32 %v12432_v14, %v9458_v16  ;;  %7327 = vmatpush.bf16.msrb.mxu0 %v9205_v39  ;;  %v7114_v16 = vpop.f32.mrf.mxu3  ;;  %v7077_v39 = vpop.f32.mrf.mxu0 }
 0x4b9   :  { %v9714_v19 = vld [vmem:[#allocation3 + $0xdb0] sm:$0xf0] }
 0x4ba   :  { %v12560_v23 = vld [vmem:[#allocation3 + $0xf94] sm:$0xf]  ;;  %v9717_v45 = vor.u32 %v12496_v18, %v9714_v19  ;;  %7340 = vmatpush.bf16.msrb.mxu1 %v9461_v27 }
 0x4bb   :  { %v9970_v25 = vld [vmem:[#allocation3 + $0xfb0] sm:$0xf0] }
 0x4bc   :  { %v12360_v40 = vld [vmem:[#allocation3 + $0x954] sm:$0xf]  ;;  %v9973_v48 = vor.u32 %v12560_v23, %v9970_v25  ;;  %7353 = vmatpush.bf16.msrb.mxu2 %v9717_v45  ;;  %v13367_v25 = vadd.f32 %v7114_v16, %v7102_v24 }
 0x4bd   :  { %v9170_v46 = vld [vmem:[#allocation3 + $0x970] sm:$0xf0] }
 0x4be   :  { %v12424_v52 = vld [vmem:[#allocation3 + $0xb54] sm:$0xf]  ;;  %v9173_v33 = vor.u32 %v12360_v40, %v9170_v46  ;;  %7366 = vmatpush.bf16.msrb.mxu3 %v9973_v48  ;;  %v7090_v48 = vpop.f32.mrf.mxu1 }
 0x4bf   :  { %v9426_v51 = vld [vmem:[#allocation3 + $0xb70] sm:$0xf0] }
 0x4c0   :  { %v12488_v41 = vld [vmem:[#allocation3 + $0xd54] sm:$0xf]  ;;  %v9429_v34 = vor.u32 %v12424_v52, %v9426_v51  ;;  %7328 = vmatpush.bf16.msrb.mxu0 %v9173_v33 }
 0x4c1   :  { %v9682_v28 = vld [vmem:[#allocation3 + $0xd70] sm:$0xf0] }
 0x4c2   :  { %v12552_v43 = vld [vmem:[#allocation3 + $0xf54] sm:$0xf]  ;;  %v9685_v15 = vor.u32 %v12488_v41, %v9682_v28  ;;  %7341 = vmatpush.bf16.msrb.mxu1 %v9429_v34 }
 0x4c3   :  { %v9938_v30 = vld [vmem:[#allocation3 + $0xf70] sm:$0xf0] }
 0x4c4   :  { %v12352_v36 = vld [vmem:[#allocation3 + $0x914] sm:$0xf]  ;;  %v9941_v44 = vor.u32 %v12552_v43, %v9938_v30  ;;  %7354 = vmatpush.bf16.msrb.mxu2 %v9685_v15 }
 0x4c5   :  { %v9138_v37 = vld [vmem:[#allocation3 + $0x930] sm:$0xf0] }
 0x4c6   :  { %v12416_v42 = vld [vmem:[#allocation3 + $0xb14] sm:$0xf]  ;;  %v9141_v54 = vor.u32 %v12352_v36, %v9138_v37  ;;  %7367 = vmatpush.bf16.msrb.mxu3 %v9941_v44 }
 0x4c7   :  { %v9394_v50 = vld [vmem:[#allocation3 + $0xb30] sm:$0xf0] }
 0x4c8   :  { %v12480_v53 = vld [vmem:[#allocation3 + $0xd14] sm:$0xf]  ;;  %v9397_v60 = vor.u32 %v12416_v42, %v9394_v50  ;;  %7329 = vmatpush.bf16.msrb.mxu0 %v9141_v54 }
 0x4c9   :  { %v9650_v55 = vld [vmem:[#allocation3 + $0xd30] sm:$0xf0] }
 0x4ca   :  { %v12544_v56 = vld [vmem:[#allocation3 + $0xf14] sm:$0xf]  ;;  %v9653_v57 = vor.u32 %v12480_v53, %v9650_v55  ;;  %7342 = vmatpush.bf16.msrb.mxu1 %v9397_v60  ;;  %v7103_v55 = vpop.f32.mrf.mxu2  ;;  %v7116_v60 = vpop.f32.mrf.mxu3 }
 0x4cb   :  { %v9906_v58 = vld [vmem:[#allocation3 + $0xf30] sm:$0xf0]  ;;  %v7127_v55 = vpop.f32.mrf.mxu0 }
 0x4cc   :  { %v12344_v47 = vld [vmem:[#allocation3 + $0x8d4] sm:$0xf]  ;;  %v9909_v62 = vor.u32 %v12544_v56, %v9906_v58  ;;  %7355 = vmatpush.bf16.msrb.mxu2 %v9653_v57 }
 0x4cd   :  { %v9106_v12 = vld [vmem:[#allocation3 + $0x8f0] sm:$0xf0] }
 0x4ce   :  { %v12408_v35 = vld [vmem:[#allocation3 + $0xad4] sm:$0xf]  ;;  %v9109_v3 = vor.u32 %v12344_v47, %v9106_v12  ;;  %7368 = vmatpush.bf16.msrb.mxu3 %v9909_v62 }
 0x4cf   :  { %v9362_v63 = vld [vmem:[#allocation3 + $0xaf0] sm:$0xf0] }
 0x4d0   :  { %v12472_v0 = vld [vmem:[#allocation3 + $0xcd4] sm:$0xf]  ;;  %v9365_v5 = vor.u32 %v12408_v35, %v9362_v63  ;;  %7330 = vmatpush.bf16.msrb.mxu0 %v9109_v3 }
 0x4d1   :  { %v9618_v1 = vld [vmem:[#allocation3 + $0xcf0] sm:$0xf0] }
 0x4d2   :  { %v12536_v2 = vld [vmem:[#allocation3 + $0xed4] sm:$0xf]  ;;  %v9621_v6 = vor.u32 %v12472_v0, %v9618_v1  ;;  %7343 = vmatpush.bf16.msrb.mxu1 %v9365_v5 }
 0x4d3   :  { %v9874_v4 = vld [vmem:[#allocation3 + $0xef0] sm:$0xf0] }
 0x4d4   :  { %v12336_v7 = vld [vmem:[#allocation3 + $0x894] sm:$0xf]  ;;  %v9877_v11 = vor.u32 %v12536_v2, %v9874_v4  ;;  %7356 = vmatpush.bf16.msrb.mxu2 %v9621_v6 }
 0x4d5   :  { %v9074_v8 = vld [vmem:[#allocation3 + $0x8b0] sm:$0xf0] }
 0x4d6   :  { %v12400_v9 = vld [vmem:[#allocation3 + $0xa94] sm:$0xf]  ;;  %v9077_v23 = vor.u32 %v12336_v7, %v9074_v8  ;;  %7369 = vmatpush.bf16.msrb.mxu3 %v9877_v11 }
 0x4d7   :  { %v9330_v13 = vld [vmem:[#allocation3 + $0xab0] sm:$0xf0] }
 0x4d8   :  { %v12464_v49 = vld [vmem:[#allocation3 + $0xc94] sm:$0xf]  ;;  %v9333_v27 = vor.u32 %v12400_v9, %v9330_v13  ;;  %7331 = vmatpush.bf16.msrb.mxu0 %v9077_v23 }
 0x4d9   :  { %v9586_v14 = vld [vmem:[#allocation3 + $0xcb0] sm:$0xf0] }
 0x4da   :  { %v12528_v18 = vld [vmem:[#allocation3 + $0xe94] sm:$0xf]  ;;  %v9589_v45 = vor.u32 %v12464_v49, %v9586_v14  ;;  %7344 = vmatpush.bf16.msrb.mxu1 %v9333_v27 }
 0x4db   :  { %v9842_v19 = vld [vmem:[#allocation3 + $0xeb0] sm:$0xf0] }
 0x4dc   :  { %v12328_v40 = vld [vmem:[#allocation3 + $0x854] sm:$0xf]  ;;  %v9845_v51 = vor.u32 %v12528_v18, %v9842_v19  ;;  %7357 = vmatpush.bf16.msrb.mxu2 %v9589_v45 }
 0x4dd   :  { %v9042_v46 = vld [vmem:[#allocation3 + $0x870] sm:$0xf0] }
 0x4de   :  { %v12392_v52 = vld [vmem:[#allocation3 + $0xa54] sm:$0xf]  ;;  %v9045_v34 = vor.u32 %v12328_v40, %v9042_v46  ;;  %7370 = vmatpush.bf16.msrb.mxu3 %v9845_v51 }
 0x4df   :  { %v9298_v41 = vld [vmem:[#allocation3 + $0xa70] sm:$0xf0] }
 0x4e0   :  { %v12456_v28 = vld [vmem:[#allocation3 + $0xc54] sm:$0xf]  ;;  %v9301_v37 = vor.u32 %v12392_v52, %v9298_v41  ;;  %7332 = vmatpush.bf16.msrb.mxu0 %v9045_v34 }
 0x4e1   :  { %v9554_v43 = vld [vmem:[#allocation3 + $0xc70] sm:$0xf0] }
 0x4e2   :  { %v12520_v30 = vld [vmem:[#allocation3 + $0xe54] sm:$0xf]  ;;  %v9557_v42 = vor.u32 %v12456_v28, %v9554_v43  ;;  %7345 = vmatpush.bf16.msrb.mxu1 %v9301_v37 }
 0x4e3   :  { %v9810_v33 = vld [vmem:[#allocation3 + $0xe70] sm:$0xf0] }
 0x4e4   :  { %v12320_v15 = vld [vmem:[#allocation3 + $0x814] sm:$0xf]  ;;  %v9813_v56 = vor.u32 %v12520_v30, %v9810_v33  ;;  %7358 = vmatpush.bf16.msrb.mxu2 %v9557_v42 }
 0x4e5   :  { %v9010_v36 = vld [vmem:[#allocation3 + $0x830] sm:$0xf0] }
 0x4e6   :  { %v12384_v44 = vld [vmem:[#allocation3 + $0xa14] sm:$0xf]  ;;  %v9013_v35 = vor.u32 %v12320_v15, %v9010_v36  ;;  %7371 = vmatpush.bf16.msrb.mxu3 %v9813_v56 }
 0x4e7   :  { %v9266_v50 = vld [vmem:[#allocation3 + $0xa30] sm:$0xf0] }
 0x4e8   :  { %v12448_v53 = vld [vmem:[#allocation3 + $0xc14] sm:$0xf]  ;;  %v9269_v0 = vor.u32 %v12384_v44, %v9266_v50  ;;  %7333 = vmatpush.bf16.msrb.mxu0 %v9013_v35 }
 0x4e9   :  { %v9522_v58 = vld [vmem:[#allocation3 + $0xc30] sm:$0xf0] }
 0x4ea   :  { %v12512_v54 = vld [vmem:[#allocation3 + $0xe14] sm:$0xf]  ;;  %v9525_v1 = vor.u32 %v12448_v53, %v9522_v58  ;;  %7346 = vmatpush.bf16.msrb.mxu1 %v9269_v0 }
 0x4eb   :  { %v9778_v59 = vld [vmem:[#allocation3 + $0xe30] sm:$0xf0]  ;;  %7334 = vmatmul.bf16.vlgmr.msrb.gmra.mxu0 %v13246_v31 }
 0x4ec   :  { %v12632_v57 = vld [vmem:[#allocation3 + $0x11d4] sm:$0xf]  ;;  %v9781_v4 = vor.u32 %v12512_v54, %v9778_v59  ;;  %7359 = vmatpush.bf16.msrb.mxu2 %v9525_v1 }
 0x4ed   :  { %v10258_v47 = vld [vmem:[#allocation3 + $0x11f0] sm:$0xf0]  ;;  %7347 = vmatmul.bf16.vlgmr.msrb.gmra.mxu1 %v13250_v38 }
 0x4ee   :  { %v12696_v12 = vld [vmem:[#allocation3 + $0x13d4] sm:$0xf]  ;;  %v10261_v3 = vor.u32 %v12632_v57, %v10258_v47  ;;  %7372 = vmatpush.bf16.msrb.mxu3 %v9781_v4  ;;  %v7128_v57 = vadd.f32 %v7127_v55, %v13367_v25  ;;  %v7140_v47 = vpop.f32.mrf.mxu1 }
 0x4ef   :  { %v10514_v61 = vld [vmem:[#allocation3 + $0x13f0] sm:$0xf0]  ;;  %7360 = vmatmul.bf16.vlgmr.msrb.gmra.mxu2 %v13244_v29 }
 0x4f0   :  { %v12760_v62 = vld [vmem:[#allocation3 + $0x15d4] sm:$0xf]  ;;  %v10517_v5 = vor.u32 %v12696_v12, %v10514_v61  ;;  %7378 = vmatpush.bf16.msra.mxu0 %v10261_v3  ;;  %v7141_v1 = vadd.f32 %v7140_v47, %v7128_v57 }
 0x4f1   :  { %v10770_v63 = vld [vmem:[#allocation3 + $0x15f0] sm:$0xf0]  ;;  %7373 = vmatmul.bf16.vlgmr.msrb.gmra.mxu3 %v13248_v32 }
 0x4f2   :  { %v12824_v17 = vld [vmem:[#allocation3 + $0x17d4] sm:$0xf]  ;;  %v10773_v6 = vor.u32 %v12760_v62, %v10770_v63  ;;  %7391 = vmatpush.bf16.msra.mxu1 %v10517_v5 }
 0x4f3   :  { %v11026_v2 = vld [vmem:[#allocation3 + $0x17f0] sm:$0xf0] }
 0x4f4   :  { %v12624_v7 = vld [vmem:[#allocation3 + $0x1194] sm:$0xf]  ;;  %v11029_v10 = vor.u32 %v12824_v17, %v11026_v2  ;;  %7404 = vmatpush.bf16.msra.mxu2 %v10773_v6 }
 0x4f5   :  { %v10226_v8 = vld [vmem:[#allocation3 + $0x11b0] sm:$0xf0] }
 0x4f6   :  { %v12688_v9 = vld [vmem:[#allocation3 + $0x1394] sm:$0xf]  ;;  %v10229_v16 = vor.u32 %v12624_v7, %v10226_v8  ;;  %7417 = vmatpush.bf16.msra.mxu3 %v11029_v10  ;;  %v7153_v7 = vpop.f32.mrf.mxu2 }
 0x4f7   :  { %v10482_v11 = vld [vmem:[#allocation3 + $0x13b0] sm:$0xf0] }
 0x4f8   :  { %v12752_v13 = vld [vmem:[#allocation3 + $0x1594] sm:$0xf]  ;;  %v10485_v18 = vor.u32 %v12688_v9, %v10482_v11  ;;  %7379 = vmatpush.bf16.msra.mxu0 %v10229_v16  ;;  %v7154_v11 = vadd.f32 %v7153_v7, %v7141_v1 }
 0x4f9   :  { %v10738_v49 = vld [vmem:[#allocation3 + $0x15b0] sm:$0xf0] }
 0x4fa   :  { %v12816_v14 = vld [vmem:[#allocation3 + $0x1794] sm:$0xf]  ;;  %v10741_v19 = vor.u32 %v12752_v13, %v10738_v49  ;;  %7392 = vmatpush.bf16.msra.mxu1 %v10485_v18  ;;  %v7166_v13 = vpop.f32.mrf.mxu3  ;;  %v7129_v18 = vpop.f32.mrf.mxu0 }
 0x4fb   :  { %v10994_v24 = vld [vmem:[#allocation3 + $0x17b0] sm:$0xf0]  ;;  %v13374_v16 = vadd.f32 %v7166_v13, %v7154_v11 }
 0x4fc   :  { %v12616_v23 = vld [vmem:[#allocation3 + $0x1154] sm:$0xf]  ;;  %v10997_v45 = vor.u32 %v12816_v14, %v10994_v24  ;;  %7405 = vmatpush.bf16.msra.mxu2 %v10741_v19 }
 0x4fd   :  { %v10194_v39 = vld [vmem:[#allocation3 + $0x1170] sm:$0xf0] }
 0x4fe   :  { %v12680_v27 = vld [vmem:[#allocation3 + $0x1354] sm:$0xf]  ;;  %v10197_v41 = vor.u32 %v12616_v23, %v10194_v39  ;;  %7418 = vmatpush.bf16.msra.mxu3 %v10997_v45 }
 0x4ff   :  { %v10450_v40 = vld [vmem:[#allocation3 + $0x1370] sm:$0xf0] }
 0x500   :  { %v12744_v46 = vld [vmem:[#allocation3 + $0x1554] sm:$0xf]  ;;  %v10453_v28 = vor.u32 %v12680_v27, %v10450_v40  ;;  %7380 = vmatpush.bf16.msra.mxu0 %v10197_v41  ;;  %v7142_v40 = vpop.f32.mrf.mxu1 }
 0x501   :  { %v10706_v52 = vld [vmem:[#allocation3 + $0x1570] sm:$0xf0] }
 0x502   :  { %v12808_v48 = vld [vmem:[#allocation3 + $0x1754] sm:$0xf]  ;;  %v10709_v43 = vor.u32 %v12744_v46, %v10706_v52  ;;  %7393 = vmatpush.bf16.msra.mxu1 %v10453_v28 }
 0x503   :  { %v10962_v51 = vld [vmem:[#allocation3 + $0x1770] sm:$0xf0] }
 0x504   :  { %v12608_v30 = vld [vmem:[#allocation3 + $0x1114] sm:$0xf]  ;;  %v10965_v15 = vor.u32 %v12808_v48, %v10962_v51  ;;  %7406 = vmatpush.bf16.msra.mxu2 %v10709_v43 }
 0x505   :  { %v10162_v33 = vld [vmem:[#allocation3 + $0x1130] sm:$0xf0] }
 0x506   :  { %v12672_v34 = vld [vmem:[#allocation3 + $0x1314] sm:$0xf]  ;;  %v10165_v53 = vor.u32 %v12608_v30, %v10162_v33  ;;  %7419 = vmatpush.bf16.msra.mxu3 %v10965_v15 }
 0x507   :  { %v10418_v36 = vld [vmem:[#allocation3 + $0x1330] sm:$0xf0] }
 0x508   :  { %v12736_v37 = vld [vmem:[#allocation3 + $0x1514] sm:$0xf]  ;;  %v10421_v56 = vor.u32 %v12672_v34, %v10418_v36  ;;  %7381 = vmatpush.bf16.msra.mxu0 %v10165_v53 }
 0x509   :  { %v10674_v42 = vld [vmem:[#allocation3 + $0x1530] sm:$0xf0] }
 0x50a   :  { %v12800_v44 = vld [vmem:[#allocation3 + $0x1714] sm:$0xf]  ;;  %v10677_v58 = vor.u32 %v12736_v37, %v10674_v42  ;;  %7394 = vmatpush.bf16.msra.mxu1 %v10421_v56 }
 0x50b   :  { %v10930_v50 = vld [vmem:[#allocation3 + $0x1730] sm:$0xf0] }
 0x50c   :  { %v12600_v54 = vld [vmem:[#allocation3 + $0x10d4] sm:$0xf]  ;;  %v10933_v12 = vor.u32 %v12800_v44, %v10930_v50  ;;  %7407 = vmatpush.bf16.msra.mxu2 %v10677_v58  ;;  %v7155_v44 = vpop.f32.mrf.mxu2  ;;  %v7168_v58 = vpop.f32.mrf.mxu3 }
 0x50d   :  { %v10130_v59 = vld [vmem:[#allocation3 + $0x10f0] sm:$0xf0] }
 0x50e   :  { %v12664_v60 = vld [vmem:[#allocation3 + $0x12d4] sm:$0xf]  ;;  %v10133_v17 = vor.u32 %v12600_v54, %v10130_v59  ;;  %7420 = vmatpush.bf16.msra.mxu3 %v10933_v12 }
 0x50f   :  { %v10386_v35 = vld [vmem:[#allocation3 + $0x12f0] sm:$0xf0] }
 0x510   :  { %v12728_v61 = vld [vmem:[#allocation3 + $0x14d4] sm:$0xf]  ;;  %v10389_v2 = vor.u32 %v12664_v60, %v10386_v35  ;;  %7382 = vmatpush.bf16.msra.mxu0 %v10133_v17 }
 0x511   :  { %v10642_v62 = vld [vmem:[#allocation3 + $0x14f0] sm:$0xf0] }
 0x512   :  { %v12792_v63 = vld [vmem:[#allocation3 + $0x16d4] sm:$0xf]  ;;  %v10645_v4 = vor.u32 %v12728_v61, %v10642_v62  ;;  %7395 = vmatpush.bf16.msra.mxu1 %v10389_v2 }
 0x513   :  { %v10898_v0 = vld [vmem:[#allocation3 + $0x16f0] sm:$0xf0] }
 0x514   :  { %v12592_v3 = vld [vmem:[#allocation3 + $0x1094] sm:$0xf]  ;;  %v10901_v25 = vor.u32 %v12792_v63, %v10898_v0  ;;  %7408 = vmatpush.bf16.msra.mxu2 %v10645_v4 }
 0x515   :  { %v10098_v5 = vld [vmem:[#allocation3 + $0x10b0] sm:$0xf0] }
 0x516   :  { %v12656_v6 = vld [vmem:[#allocation3 + $0x1294] sm:$0xf]  ;;  %v10101_v24 = vor.u32 %v12592_v3, %v10098_v5  ;;  %7421 = vmatpush.bf16.msra.mxu3 %v10901_v25 }
 0x517   :  { %v10354_v8 = vld [vmem:[#allocation3 + $0x12b0] sm:$0xf0] }
 0x518   :  { %v12720_v9 = vld [vmem:[#allocation3 + $0x1494] sm:$0xf]  ;;  %v10357_v19 = vor.u32 %v12656_v6, %v10354_v8  ;;  %7383 = vmatpush.bf16.msra.mxu0 %v10101_v24 }
 0x519   :  { %v10610_v10 = vld [vmem:[#allocation3 + $0x14b0] sm:$0xf0] }
 0x51a   :  { %v12784_v49 = vld [vmem:[#allocation3 + $0x1694] sm:$0xf]  ;;  %v10613_v23 = vor.u32 %v12720_v9, %v10610_v10  ;;  %7396 = vmatpush.bf16.msra.mxu1 %v10357_v19 }
 0x51b   :  { %v10866_v14 = vld [vmem:[#allocation3 + $0x16b0] sm:$0xf0] }
 0x51c   :  { %v12584_v39 = vld [vmem:[#allocation3 + $0x1054] sm:$0xf]  ;;  %v10869_v46 = vor.u32 %v12784_v49, %v10866_v14  ;;  %7409 = vmatpush.bf16.msra.mxu2 %v10613_v23  ;;  %v13122_v23 = vld [vmem:[#allocation1] sm:$0xff] }
 0x51d   :  { %v10066_v27 = vld [vmem:[#allocation3 + $0x1070] sm:$0xf0] }
 0x51e   :  { %v12648_v45 = vld [vmem:[#allocation3 + $0x1254] sm:$0xf]  ;;  %v10069_v43 = vor.u32 %v12584_v39, %v10066_v27  ;;  %7422 = vmatpush.bf16.msra.mxu3 %v10869_v46  ;;  %v13123_v46 = vld [vmem:[#allocation1 + $0x12] sm:$0xff] }
 0x51f   :  { %v10322_v52 = vld [vmem:[#allocation3 + $0x1270] sm:$0xf0] }
 0x520   :  { %v12712_v48 = vld [vmem:[#allocation3 + $0x1454] sm:$0xf]  ;;  %v10325_v34 = vor.u32 %v12648_v45, %v10322_v52  ;;  %7384 = vmatpush.bf16.msra.mxu0 %v10069_v43  ;;  %v13124_v52 = vld [vmem:[#allocation1 + $0x9] sm:$0xff] }
 0x521   :  { %v10578_v51 = vld [vmem:[#allocation3 + $0x1470] sm:$0xf0] }
 0x522   :  { %v12776_v41 = vld [vmem:[#allocation3 + $0x1654] sm:$0xf]  ;;  %v10581_v15 = vor.u32 %v12712_v48, %v10578_v51  ;;  %7397 = vmatpush.bf16.msra.mxu1 %v10325_v34 }
 0x523   :  { %v10834_v28 = vld [vmem:[#allocation3 + $0x1670] sm:$0xf0] }
 0x524   :  { %v12576_v30 = vld [vmem:[#allocation3 + $0x1014] sm:$0xf]  ;;  %v10837_v50 = vor.u32 %v12776_v41, %v10834_v28  ;;  %7410 = vmatpush.bf16.msra.mxu2 %v10581_v15 }
 0x525   :  { %v10034_v33 = vld [vmem:[#allocation3 + $0x1030] sm:$0xf0] }
 0x526   :  { %v12640_v36 = vld [vmem:[#allocation3 + $0x1214] sm:$0xf]  ;;  %v10037_v57 = vor.u32 %v12576_v30, %v10034_v33  ;;  %7423 = vmatpush.bf16.msra.mxu3 %v10837_v50  ;;  %v7179_v50 = vpop.f32.mrf.mxu0 }
 0x527   :  { %v10290_v37 = vld [vmem:[#allocation3 + $0x1230] sm:$0xf0] }
 0x528   :  { %v12704_v42 = vld [vmem:[#allocation3 + $0x1414] sm:$0xf]  ;;  %v10293_v61 = vor.u32 %v12640_v36, %v10290_v37  ;;  %7385 = vmatpush.bf16.msra.mxu0 %v10037_v57 }
 0x529   :  { %v10546_v53 = vld [vmem:[#allocation3 + $0x1430] sm:$0xf0] }
 0x52a   :  { %v12768_v55 = vld [vmem:[#allocation3 + $0x1614] sm:$0xf]  ;;  %v10549_v62 = vor.u32 %v12704_v42, %v10546_v53  ;;  %7398 = vmatpush.bf16.msra.mxu1 %v10293_v61 }
 0x52b   :  { %v10802_v56 = vld [vmem:[#allocation3 + $0x1630] sm:$0xf0]  ;;  %7386 = vmatmul.bf16.vlgmr.msra.gmra.mxu0 %v13122_v23 }
 0x52c   :  { %v12888_v54 = vld [vmem:[#allocation3 + $0x19d4] sm:$0xf]  ;;  %v10805_v1 = vor.u32 %v12768_v55, %v10802_v56  ;;  %7411 = vmatpush.bf16.msra.mxu2 %v10549_v62  ;;  %v7180_v56 = vadd.f32 %v7179_v50, %v13374_v16 }
 0x52d   :  { %v11282_v59 = vld [vmem:[#allocation3 + $0x19f0] sm:$0xf0]  ;;  %7399 = vmatmul.bf16.vlgmr.msra.gmra.mxu1 %v13124_v52 }
 0x52e   :  { %v12952_v60 = vld [vmem:[#allocation3 + $0x1bd4] sm:$0xf]  ;;  %v11285_v17 = vor.u32 %v12888_v54, %v11282_v59  ;;  %7424 = vmatpush.bf16.msra.mxu3 %v10805_v1  ;;  %v7192_v54 = vpop.f32.mrf.mxu1 }
 0x52f   :  { %v11538_v47 = vld [vmem:[#allocation3 + $0x1bf0] sm:$0xf0]  ;;  %7412 = vmatmul.bf16.vlgmr.msra.gmra.mxu2 %v13123_v46  ;;  %v7193_v61 = vadd.f32 %v7192_v54, %v7180_v56  ;;  %v8216_v54 = vld [vmem:[#allocation3 + $0x1d8] sm:$0xf] }
 0x530   :  { %v13016_v12 = vld [vmem:[#allocation3 + $0x1dd4] sm:$0xf]  ;;  %v11541_v2 = vor.u32 %v12952_v60, %v11538_v47  ;;  %7430 = vmatpush.bf16.msrb.mxu0 %v11285_v17 }
 0x531   :  { %v11794_v35 = vld [vmem:[#allocation3 + $0x1df0] sm:$0xf0] }
 0x532   :  { %v13080_v63 = vld [vmem:[#allocation3 + $0x1fd4] sm:$0xf]  ;;  %v11797_v4 = vor.u32 %v13016_v12, %v11794_v35  ;;  %7443 = vmatpush.bf16.msrb.mxu1 %v11541_v2 }
 0x533   :  { %v12050_v0 = vld [vmem:[#allocation3 + $0x1ff0] sm:$0xf0] }
 0x534   :  { %v12880_v3 = vld [vmem:[#allocation3 + $0x1994] sm:$0xf]  ;;  %v12053_v7 = vor.u32 %v13080_v63, %v12050_v0  ;;  %7456 = vmatpush.bf16.msrb.mxu2 %v11797_v4 }
 0x535   :  { %v11250_v5 = vld [vmem:[#allocation3 + $0x19b0] sm:$0xf0] }
 0x536   :  { %v12944_v6 = vld [vmem:[#allocation3 + $0x1b94] sm:$0xf]  ;;  %v11253_v13 = vor.u32 %v12880_v3, %v11250_v5  ;;  %7469 = vmatpush.bf16.msrb.mxu3 %v12053_v7 }
 0x537   :  { %v11506_v25 = vld [vmem:[#allocation3 + $0x1bb0] sm:$0xf0] }
 0x538   :  { %v13008_v8 = vld [vmem:[#allocation3 + $0x1d94] sm:$0xf]  ;;  %v11509_v49 = vor.u32 %v12944_v6, %v11506_v25  ;;  %7431 = vmatpush.bf16.msrb.mxu0 %v11253_v13  ;;  %v7205_v25 = vpop.f32.mrf.mxu2  ;;  %v7218_v13 = vpop.f32.mrf.mxu3 }
 0x539   :  { %v11762_v9 = vld [vmem:[#allocation3 + $0x1db0] sm:$0xf0] }
 0x53a   :  { %v13072_v10 = vld [vmem:[#allocation3 + $0x1f94] sm:$0xf]  ;;  %v11765_v14 = vor.u32 %v13008_v8, %v11762_v9  ;;  %7444 = vmatpush.bf16.msrb.mxu1 %v11509_v49 }
 0x53b   :  { %v12018_v11 = vld [vmem:[#allocation3 + $0x1fb0] sm:$0xf0] }
 0x53c   :  { %v12872_v24 = vld [vmem:[#allocation3 + $0x1954] sm:$0xf]  ;;  %v12021_v39 = vor.u32 %v13072_v10, %v12018_v11  ;;  %7457 = vmatpush.bf16.msrb.mxu2 %v11765_v14  ;;  %v7206_v11 = vadd.f32 %v7205_v25, %v7193_v61  ;;  %v12253_v61 = vld [vmem:[#allocation3 + $0x5f4] sm:$0xf0] }
 0x53d   :  { %v11218_v18 = vld [vmem:[#allocation3 + $0x1970] sm:$0xf0]  ;;  %v12181_v25 = vld [vmem:[#allocation3 + $0x3b4] sm:$0xf0] }
 0x53e   :  { %v12936_v19 = vld [vmem:[#allocation3 + $0x1b54] sm:$0xf]  ;;  %v11221_v28 = vor.u32 %v12872_v24, %v11218_v18  ;;  %7470 = vmatpush.bf16.msrb.mxu3 %v12021_v39  ;;  %v7181_v24 = vpop.f32.mrf.mxu0  ;;  %v13377_v23 = vadd.f32 %v7218_v13, %v7206_v11  ;;  %v12309_v11 = vld [vmem:[#allocation3 + $0x7b4] sm:$0xf0] }
 0x53f   :  { %v11474_v27 = vld [vmem:[#allocation3 + $0x1b70] sm:$0xf0]  ;;  %v8152_v24 = vld [vmem:[#allocation3 + $0x158] sm:$0xf] }
 0x540   :  { %v13000_v45 = vld [vmem:[#allocation3 + $0x1d54] sm:$0xf]  ;;  %v11477_v43 = vor.u32 %v12936_v19, %v11474_v27  ;;  %7432 = vmatpush.bf16.msrb.mxu0 %v11221_v28  ;;  %v7194_v19 = vpop.f32.mrf.mxu1 }
 0x541   :  { %v11730_v40 = vld [vmem:[#allocation3 + $0x1d70] sm:$0xf0]  ;;  %v8408_v19 = vld [vmem:[#allocation3 + $0x358] sm:$0xf] }
 0x542   :  { %v13064_v48 = vld [vmem:[#allocation3 + $0x1f54] sm:$0xf]  ;;  %v11733_v30 = vor.u32 %v13000_v45, %v11730_v40  ;;  %7445 = vmatpush.bf16.msrb.mxu1 %v11477_v43 }
 0x543   :  { %v11986_v51 = vld [vmem:[#allocation3 + $0x1f70] sm:$0xf0] }
 0x544   :  { %v13125_v41 = vld [vmem:[#allocation1 + $0x1b] sm:$0xff]  ;;  %v11989_v36 = vor.u32 %v13064_v48, %v11986_v51  ;;  %7458 = vmatpush.bf16.msrb.mxu2 %v11733_v30 }
 0x545   :  { %7425 = vmatmul.bf16.vlgmr.msra.gmra.mxu3 %v13125_v41  ;;  %v12864_v33 = vld [vmem:[#allocation3 + $0x1914] sm:$0xf] }
 0x546   :  { %v11186_v34 = vld [vmem:[#allocation3 + $0x1930] sm:$0xf0]  ;;  %7471 = vmatpush.bf16.msrb.mxu3 %v11989_v36 }
 0x547   :  { %v12928_v15 = vld [vmem:[#allocation3 + $0x1b14] sm:$0xf]  ;;  %v11189_v58 = vor.u32 %v12864_v33, %v11186_v34 }
 0x548   :  { %v11442_v37 = vld [vmem:[#allocation3 + $0x1b30] sm:$0xf0] }
 0x549   :  { %v12992_v42 = vld [vmem:[#allocation3 + $0x1d14] sm:$0xf]  ;;  %v11445_v59 = vor.u32 %v12928_v15, %v11442_v37  ;;  %7433 = vmatpush.bf16.msrb.mxu0 %v11189_v58  ;;  %v7207_v58 = vpop.f32.mrf.mxu2 }
 0x54a   :  { %v11698_v44 = vld [vmem:[#allocation3 + $0x1d30] sm:$0xf0] }
 0x54b   :  { %v13056_v53 = vld [vmem:[#allocation3 + $0x1f14] sm:$0xf]  ;;  %v11701_v60 = vor.u32 %v12992_v42, %v11698_v44  ;;  %7446 = vmatpush.bf16.msrb.mxu1 %v11445_v59  ;;  %v12125_v59 = vld [vmem:[#allocation3 + $0x1f4] sm:$0xf0] }
 0x54c   :  { %v11954_v55 = vld [vmem:[#allocation3 + $0x1f30] sm:$0xf0] }
 0x54d   :  { %v12856_v57 = vld [vmem:[#allocation3 + $0x18d4] sm:$0xf]  ;;  %v11957_v35 = vor.u32 %v13056_v53, %v11954_v55  ;;  %7459 = vmatpush.bf16.msrb.mxu2 %v11701_v60  ;;  %v8472_v60 = vld [vmem:[#allocation3 + $0x3d8] sm:$0xf] }
 0x54e   :  { %v11154_v47 = vld [vmem:[#allocation3 + $0x18f0] sm:$0xf0] }
 0x54f   :  { %v12920_v12 = vld [vmem:[#allocation3 + $0x1ad4] sm:$0xf]  ;;  %v11157_v2 = vor.u32 %v12856_v57, %v11154_v47  ;;  %7472 = vmatpush.bf16.msrb.mxu3 %v11957_v35  ;;  %v7220_v57 = vpop.f32.mrf.mxu3  ;;  %v8728_v35 = vld [vmem:[#allocation3 + $0x5d8] sm:$0xf] }
 0x550   :  { %v11410_v62 = vld [vmem:[#allocation3 + $0x1af0] sm:$0xf0] }
 0x551   :  { %v12984_v63 = vld [vmem:[#allocation3 + $0x1cd4] sm:$0xf]  ;;  %v11413_v16 = vor.u32 %v12920_v12, %v11410_v62  ;;  %7434 = vmatpush.bf16.msrb.mxu0 %v11157_v2  ;;  %v12189_v12 = vld [vmem:[#allocation3 + $0x3f4] sm:$0xf0]  ;;  %v8217_v2 = vor.u32 %v12125_v59, %v8216_v54  ;;  %v7244_v59 = vpop.f32.mrf.mxu1 }
 0x552   :  { %v11666_v0 = vld [vmem:[#allocation3 + $0x1cf0] sm:$0xf0] }
 0x553   :  { %v13048_v1 = vld [vmem:[#allocation3 + $0x1ed4] sm:$0xf]  ;;  %v11669_v4 = vor.u32 %v12984_v63, %v11666_v0  ;;  %7447 = vmatpush.bf16.msrb.mxu1 %v11413_v16  ;;  %v8984_v0 = vld [vmem:[#allocation3 + $0x7d8] sm:$0xf]  ;;  %v8473_v16 = vor.u32 %v12189_v12, %v8472_v60 }
 0x554   :  { %v11922_v17 = vld [vmem:[#allocation3 + $0x1ef0] sm:$0xf0]  ;;  %v12093_v12 = vld [vmem:[#allocation3 + $0xf4] sm:$0xf0] }
 0x555   :  { %v12848_v3 = vld [vmem:[#allocation3 + $0x1894] sm:$0xf]  ;;  %v11925_v7 = vor.u32 %v13048_v1, %v11922_v17  ;;  %7460 = vmatpush.bf16.msrb.mxu2 %v11669_v4  ;;  %v12317_v1 = vld [vmem:[#allocation3 + $0x7f4] sm:$0xf0]  ;;  %v8729_v4 = vor.u32 %v12253_v61, %v8728_v35 }
 0x556   :  { %v11122_v5 = vld [vmem:[#allocation3 + $0x18b0] sm:$0xf0]  ;;  %v8344_v35 = vld [vmem:[#allocation3 + $0x2d8] sm:$0xf] }
 0x557   :  { %v12912_v6 = vld [vmem:[#allocation3 + $0x1a94] sm:$0xf]  ;;  %v11125_v18 = vor.u32 %v12848_v3, %v11122_v5  ;;  %7473 = vmatpush.bf16.msrb.mxu3 %v11925_v7  ;;  %v8184_v3 = vld [vmem:[#allocation3 + $0x198] sm:$0xf]  ;;  %v8985_v7 = vor.u32 %v12317_v1, %v8984_v0 }
 0x558   :  { %v11378_v8 = vld [vmem:[#allocation3 + $0x1ab0] sm:$0xf0]  ;;  %v12117_v5 = vld [vmem:[#allocation3 + $0x1b4] sm:$0xf0] }
 0x559   :  { %v12976_v9 = vld [vmem:[#allocation3 + $0x1c94] sm:$0xf]  ;;  %v11381_v39 = vor.u32 %v12912_v6, %v11378_v8  ;;  %7435 = vmatpush.bf16.msrb.mxu0 %v11125_v18  ;;  %v8440_v6 = vld [vmem:[#allocation3 + $0x398] sm:$0xf]  ;;  %v8185_v13 = vor.u32 %v12117_v5, %v8184_v3 }
 0x55a   :  { %v11634_v10 = vld [vmem:[#allocation3 + $0x1cb0] sm:$0xf0]  ;;  %v8696_v8 = vld [vmem:[#allocation3 + $0x598] sm:$0xf] }
 0x55b   :  { %v13040_v49 = vld [vmem:[#allocation3 + $0x1e94] sm:$0xf]  ;;  %v11637_v27 = vor.u32 %v12976_v9, %v11634_v10  ;;  %7448 = vmatpush.bf16.msrb.mxu1 %v11381_v39  ;;  %v12245_v9 = vld [vmem:[#allocation3 + $0x5b4] sm:$0xf0]  ;;  %v13126_v39 = vld [vmem:[#allocation1 + $0x24] sm:$0xff] }
 0x55c   :  { %v11890_v14 = vld [vmem:[#allocation3 + $0x1eb0] sm:$0xf0]  ;;  %v8952_v10 = vld [vmem:[#allocation3 + $0x798] sm:$0xf] }
 0x55d   :  { %v12840_v45 = vld [vmem:[#allocation3 + $0x1854] sm:$0xf]  ;;  %v11893_v52 = vor.u32 %v13040_v49, %v11890_v14  ;;  %7461 = vmatpush.bf16.msrb.mxu2 %v11637_v27  ;;  %v8441_v49 = vor.u32 %v12181_v25, %v8440_v6  ;;  %v8697_v14 = vor.u32 %v12245_v9, %v8696_v8  ;;  %v12109_v18 = vld [vmem:[#allocation3 + $0x174] sm:$0xf0]  ;;  %v8953_v27 = vor.u32 %v12309_v11, %v8952_v10  ;;  %v7257_v25 = vpop.f32.mrf.mxu2 }
 0x55e   :  { %v11090_v40 = vld [vmem:[#allocation3 + $0x1870] sm:$0xf0]  ;;  %v8600_v0 = vld [vmem:[#allocation3 + $0x4d8] sm:$0xf] }
 0x55f   :  { %v12904_v46 = vld [vmem:[#allocation3 + $0x1a54] sm:$0xf]  ;;  %v11093_v30 = vor.u32 %v12840_v45, %v11090_v40  ;;  %7474 = vmatpush.bf16.msrb.mxu3 %v11893_v52  ;;  %v12173_v45 = vld [vmem:[#allocation3 + $0x374] sm:$0xf0] }
 0x560   :  { %v11346_v48 = vld [vmem:[#allocation3 + $0x1a70] sm:$0xf0]  ;;  %v8664_v40 = vld [vmem:[#allocation3 + $0x558] sm:$0xf] }
 0x561   :  { %v12968_v51 = vld [vmem:[#allocation3 + $0x1c54] sm:$0xf]  ;;  %v11349_v15 = vor.u32 %v12904_v46, %v11346_v48  ;;  %7436 = vmatpush.bf16.msrb.mxu0 %v11093_v30  ;;  %v12237_v46 = vld [vmem:[#allocation3 + $0x574] sm:$0xf0]  ;;  %v13128_v48 = vld [vmem:[#allocation1 + $0x2d] sm:$0xff]  ;;  %v8409_v30 = vor.u32 %v12173_v45, %v8408_v19  ;;  %v7246_v19 = vpop.f32.mrf.mxu1 }
 0x562   :  { %v11602_v41 = vld [vmem:[#allocation3 + $0x1c70] sm:$0xf0]  ;;  %v12221_v1 = vld [vmem:[#allocation3 + $0x4f4] sm:$0xf0] }
 0x563   :  { %v13032_v28 = vld [vmem:[#allocation3 + $0x1e54] sm:$0xf]  ;;  %v11605_v36 = vor.u32 %v12968_v51, %v11602_v41  ;;  %7449 = vmatpush.bf16.msrb.mxu1 %v11349_v15  ;;  %v8920_v51 = vld [vmem:[#allocation3 + $0x758] sm:$0xf] }
 0x564   :  { %v11858_v43 = vld [vmem:[#allocation3 + $0x1e70] sm:$0xf0]  ;;  %v12301_v41 = vld [vmem:[#allocation3 + $0x774] sm:$0xf0] }
 0x565   :  { %v12832_v33 = vld [vmem:[#allocation3 + $0x1814] sm:$0xf]  ;;  %v11861_v50 = vor.u32 %v13032_v28, %v11858_v43  ;;  %7462 = vmatpush.bf16.msrb.mxu2 %v11605_v36  ;;  %v8153_v43 = vor.u32 %v12109_v18, %v8152_v24  ;;  %v12101_v15 = vld [vmem:[#allocation3 + $0x134] sm:$0xf0] }
 0x566   :  { %v11058_v34 = vld [vmem:[#allocation3 + $0x1830] sm:$0xf0]  ;;  %v8376_v36 = vld [vmem:[#allocation3 + $0x318] sm:$0xf] }
 0x567   :  { %v12896_v37 = vld [vmem:[#allocation3 + $0x1a14] sm:$0xf]  ;;  %v11061_v47 = vor.u32 %v12832_v33, %v11058_v34  ;;  %7475 = vmatpush.bf16.msrb.mxu3 %v11861_v50  ;;  %v8665_v33 = vor.u32 %v12237_v46, %v8664_v40  ;;  %v8120_v34 = vld [vmem:[#allocation3 + $0x118] sm:$0xf] }
 0x568   :  { %v11314_v42 = vld [vmem:[#allocation3 + $0x1a30] sm:$0xf0]  ;;  %v12229_v50 = vld [vmem:[#allocation3 + $0x534] sm:$0xf0]  ;;  %v8121_v54 = vor.u32 %v12101_v15, %v8120_v34 }
 0x569   :  { %v12960_v44 = vld [vmem:[#allocation3 + $0x1c14] sm:$0xf]  ;;  %v11317_v62 = vor.u32 %v12896_v37, %v11314_v42  ;;  %7437 = vmatpush.bf16.msrb.mxu0 %v11061_v47  ;;  %v8921_v37 = vor.u32 %v12301_v41, %v8920_v51  ;;  %v12165_v42 = vld [vmem:[#allocation3 + $0x334] sm:$0xf0] }
 0x56a   :  { %v11570_v53 = vld [vmem:[#allocation3 + $0x1c30] sm:$0xf0]  ;;  %v8377_v60 = vor.u32 %v12165_v42, %v8376_v36  ;;  %v8088_v47 = vld [vmem:[#allocation3 + $0xd8] sm:$0xf] }
 0x56b   :  { %v13024_v55 = vld [vmem:[#allocation3 + $0x1e14] sm:$0xf]  ;;  %v11573_v63 = vor.u32 %v12960_v44, %v11570_v53  ;;  %7450 = vmatpush.bf16.msrb.mxu1 %v11317_v62  ;;  %v8632_v44 = vld [vmem:[#allocation3 + $0x518] sm:$0xf]  ;;  %v7231_v53 = vpop.f32.mrf.mxu0 }
 0x56c   :  { %v11826_v56 = vld [vmem:[#allocation3 + $0x1e30] sm:$0xf0]  ;;  %7438 = vmatmul.bf16.vlgmr.msrb.gmra.mxu0 %v13126_v39  ;;  %v7232_v58 = vadd.f32 %v7231_v53, %v13377_v23  ;;  %v8633_v57 = vor.u32 %v12229_v50, %v8632_v44  ;;  %v8056_v3 = vld [vmem:[#allocation3 + $0x98] sm:$0xf] }
 0x56d   :  { %v11829_v17 = vor.u32 %v13024_v55, %v11826_v56  ;;  %7463 = vmatpush.bf16.msrb.mxu2 %v11573_v63  ;;  %7482 = vmatpush.bf16.msra.mxu0 %v8217_v2  ;;  %v13127_v52 = vld [vmem:[#allocation1 + $0x36] sm:$0xff]  ;;  %v13129_v28 = vld [vmem:[#allocation1 + $0x3f] sm:$0xff] }
 0x56e   :  { %7451 = vmatmul.bf16.vlgmr.msrb.gmra.mxu1 %v13128_v48  ;;  %v8888_v55 = vld [vmem:[#allocation3 + $0x718] sm:$0xf]  ;;  %v7245_v62 = vadd.f32 %v7244_v59, %v7232_v58 }
 0x56f   :  { %7476 = vmatpush.bf16.msrb.mxu3 %v11829_v17  ;;  %7495 = vmatpush.bf16.msra.mxu1 %v8473_v16  ;;  %v12293_v56 = vld [vmem:[#allocation3 + $0x734] sm:$0xf0]  ;;  %v8089_v16 = vor.u32 %v12093_v12, %v8088_v47 }
 0x570   :  { %7464 = vmatmul.bf16.vlgmr.msrb.gmra.mxu2 %v13127_v52  ;;  %v8889_v61 = vor.u32 %v12293_v56, %v8888_v55  ;;  %v12157_v63 = vld [vmem:[#allocation3 + $0x2f4] sm:$0xf0]  ;;  %v7258_v11 = vadd.f32 %v7257_v25, %v7245_v62 }
 0x571   :  { %7508 = vmatpush.bf16.msra.mxu2 %v8729_v4  ;;  %7483 = vmatpush.bf16.msra.mxu0 %v8185_v13  ;;  %v8856_v17 = vld [vmem:[#allocation3 + $0x6d8] sm:$0xf]  ;;  %v8345_v23 = vor.u32 %v12157_v63, %v8344_v35  ;;  %v8601_v4 = vor.u32 %v12221_v1, %v8600_v0  ;;  %v7270_v13 = vpop.f32.mrf.mxu3 }
 0x572   :  { %7477 = vmatmul.bf16.vlgmr.msrb.gmra.mxu3 %v13129_v28  ;;  %v12285_v2 = vld [vmem:[#allocation3 + $0x6f4] sm:$0xf0]  ;;  %v13380_v39 = vadd.f32 %v7270_v13, %v7258_v11 }
 0x573   :  { %7521 = vmatpush.bf16.msra.mxu3 %v8985_v7  ;;  %7496 = vmatpush.bf16.msra.mxu1 %v8441_v49  ;;  %v12085_v5 = vld [vmem:[#allocation3 + $0xb4] sm:$0xf0]  ;;  %v8857_v7 = vor.u32 %v12285_v2, %v8856_v17  ;;  %v7233_v24 = vpop.f32.mrf.mxu0 }
 0x574   :  { %v8312_v6 = vld [vmem:[#allocation3 + $0x298] sm:$0xf]  ;;  %v8057_v18 = vor.u32 %v12085_v5, %v8056_v3 }
 0x575   :  { %7509 = vmatpush.bf16.msra.mxu2 %v8697_v14  ;;  %7484 = vmatpush.bf16.msra.mxu0 %v8153_v43  ;;  %v12149_v8 = vld [vmem:[#allocation3 + $0x2b4] sm:$0xf0] }
 0x576   :  { %v8568_v9 = vld [vmem:[#allocation3 + $0x498] sm:$0xf] }
 0x577   :  { %7522 = vmatpush.bf16.msra.mxu3 %v8953_v27  ;;  %7497 = vmatpush.bf16.msra.mxu1 %v8409_v30  ;;  %v12213_v10 = vld [vmem:[#allocation3 + $0x4b4] sm:$0xf0]  ;;  %v8313_v27 = vor.u32 %v12149_v8, %v8312_v6 }
 0x578   :  { %v8824_v49 = vld [vmem:[#allocation3 + $0x698] sm:$0xf]  ;;  %v8569_v45 = vor.u32 %v12213_v10, %v8568_v9 }
 0x579   :  { %7510 = vmatpush.bf16.msra.mxu2 %v8665_v33  ;;  %7485 = vmatpush.bf16.msra.mxu0 %v8121_v54  ;;  %v12277_v14 = vld [vmem:[#allocation3 + $0x6b4] sm:$0xf0]  ;;  %v7259_v54 = vpop.f32.mrf.mxu2  ;;  %v7272_v47 = vpop.f32.mrf.mxu3 }
 0x57a   :  { %v8024_v40 = vld [vmem:[#allocation3 + $0x58] sm:$0xf]  ;;  %v8825_v48 = vor.u32 %v12277_v14, %v8824_v49 }
 0x57b   :  { %7523 = vmatpush.bf16.msra.mxu3 %v8921_v37  ;;  %7498 = vmatpush.bf16.msra.mxu1 %v8377_v60  ;;  %v12077_v46 = vld [vmem:[#allocation3 + $0x74] sm:$0xf0] }
 0x57c   :  { %v8280_v52 = vld [vmem:[#allocation3 + $0x258] sm:$0xf]  ;;  %v8025_v33 = vor.u32 %v12077_v46, %v8024_v40 }
 0x57d   :  { %7511 = vmatpush.bf16.msra.mxu2 %v8633_v57  ;;  %7486 = vmatpush.bf16.msra.mxu0 %v8089_v16  ;;  %v12141_v51 = vld [vmem:[#allocation3 + $0x274] sm:$0xf0] }
 0x57e   :  { %v8536_v41 = vld [vmem:[#allocation3 + $0x458] sm:$0xf]  ;;  %v8281_v36 = vor.u32 %v12141_v51, %v8280_v52 }
 0x57f   :  { %7524 = vmatpush.bf16.msra.mxu3 %v8889_v61  ;;  %7499 = vmatpush.bf16.msra.mxu1 %v8345_v23  ;;  %v12205_v28 = vld [vmem:[#allocation3 + $0x474] sm:$0xf0] }
 0x580   :  { %v8792_v43 = vld [vmem:[#allocation3 + $0x658] sm:$0xf]  ;;  %v8537_v37 = vor.u32 %v12205_v28, %v8536_v41 }
 0x581   :  { %7512 = vmatpush.bf16.msra.mxu2 %v8601_v4  ;;  %v12269_v30 = vld [vmem:[#allocation3 + $0x674] sm:$0xf0]  ;;  %7487 = vmatpush.bf16.msra.mxu0 %v8057_v18 }
 0x582   :  { %v7992_v34 = vld [vmem:[#allocation3 + $0x18] sm:$0xf]  ;;  %v8793_v53 = vor.u32 %v12269_v30, %v8792_v43 }
 0x583   :  { %7525 = vmatpush.bf16.msra.mxu3 %v8857_v7  ;;  %v12069_v15 = vld [vmem:[#allocation3 + $0x34] sm:$0xf0]  ;;  %7500 = vmatpush.bf16.msra.mxu1 %v8313_v27 }
 0x584   :  { %v8248_v42 = vld [vmem:[#allocation3 + $0x218] sm:$0xf]  ;;  %v7993_v12 = vor.u32 %v12069_v15, %v7992_v34 }
 0x585   :  { %7513 = vmatpush.bf16.msra.mxu2 %v8569_v45  ;;  %v12133_v44 = vld [vmem:[#allocation3 + $0x234] sm:$0xf0]  ;;  %7488 = vmatpush.bf16.msra.mxu0 %v8025_v33 }
 0x586   :  { %v8504_v50 = vld [vmem:[#allocation3 + $0x418] sm:$0xf]  ;;  %v8249_v63 = vor.u32 %v12133_v44, %v8248_v42 }
 0x587   :  { %7526 = vmatpush.bf16.msra.mxu3 %v8825_v48  ;;  %v12197_v55 = vld [vmem:[#allocation3 + $0x434] sm:$0xf0]  ;;  %7501 = vmatpush.bf16.msra.mxu1 %v8281_v36 }
 0x588   :  { %v8760_v56 = vld [vmem:[#allocation3 + $0x618] sm:$0xf]  ;;  %v8505_v0 = vor.u32 %v12197_v55, %v8504_v50 }
 0x589   :  { %v12261_v58 = vld [vmem:[#allocation3 + $0x634] sm:$0xf0]  ;;  %7514 = vmatpush.bf16.msra.mxu2 %v8537_v37  ;;  %7489 = vmatpush.bf16.msra.mxu0 %v7993_v12 }
 0x58a   :  { %v9240_v59 = vld [vmem:[#allocation3 + $0x9d8] sm:$0xf]  ;;  %v8761_v2 = vor.u32 %v12261_v58, %v8760_v56 }
 0x58b   :  { %v12381_v60 = vld [vmem:[#allocation3 + $0x9f4] sm:$0xf0]  ;;  %7527 = vmatpush.bf16.msra.mxu3 %v8793_v53  ;;  %7502 = vmatpush.bf16.msra.mxu1 %v8249_v63  ;;  %v7283_v53 = vpop.f32.mrf.mxu0 }
 0x58c   :  { %v9496_v57 = vld [vmem:[#allocation3 + $0xbd8] sm:$0xf]  ;;  %v9241_v16 = vor.u32 %v12381_v60, %v9240_v59  ;;  %7490 = vmatmul.bf16.vlgmr.msra.gmra.mxu0 %v13234_v21  ;;  %v7296_v60 = vpop.f32.mrf.mxu1 }
 0x58d   :  { %v12445_v35 = vld [vmem:[#allocation3 + $0xbf4] sm:$0xf0]  ;;  %7515 = vmatpush.bf16.msra.mxu2 %v8505_v0 }
 0x58e   :  { %v9752_v61 = vld [vmem:[#allocation3 + $0xdd8] sm:$0xf]  ;;  %v9497_v23 = vor.u32 %v12445_v35, %v9496_v57  ;;  %7534 = vmatpush.bf16.msrb.mxu0 %v9241_v16  ;;  %7503 = vmatmul.bf16.vlgmr.msra.gmra.mxu1 %v13239_v26 }
 0x58f   :  { %v12509_v62 = vld [vmem:[#allocation3 + $0xdf4] sm:$0xf0]  ;;  %7528 = vmatpush.bf16.msra.mxu3 %v8761_v2 }
 0x590   :  { %v10008_v1 = vld [vmem:[#allocation3 + $0xfd8] sm:$0xf]  ;;  %v9753_v4 = vor.u32 %v12509_v62, %v9752_v61  ;;  %7547 = vmatpush.bf16.msrb.mxu1 %v9497_v23  ;;  %7516 = vmatmul.bf16.vlgmr.msra.gmra.mxu2 %v13232_v20  ;;  %v7297_v61 = vadd.f32 %v7296_v60, %v7283_v53 }
 0x591   :  { %v12573_v17 = vld [vmem:[#allocation3 + $0xff4] sm:$0xf0] }
 0x592   :  { %v9208_v3 = vld [vmem:[#allocation3 + $0x998] sm:$0xf]  ;;  %v10009_v7 = vor.u32 %v12573_v17, %v10008_v1  ;;  %7560 = vmatpush.bf16.msrb.mxu2 %v9753_v4  ;;  %7529 = vmatmul.bf16.vlgmr.msra.gmra.mxu3 %v13236_v22  ;;  %v7309_v4 = vpop.f32.mrf.mxu2 }
 0x593   :  { %v12373_v5 = vld [vmem:[#allocation3 + $0x9b4] sm:$0xf0] }
 0x594   :  { %v9464_v6 = vld [vmem:[#allocation3 + $0xb98] sm:$0xf]  ;;  %v9209_v13 = vor.u32 %v12373_v5, %v9208_v3  ;;  %7573 = vmatpush.bf16.msrb.mxu3 %v10009_v7 }
 0x595   :  { %v12437_v25 = vld [vmem:[#allocation3 + $0xbb4] sm:$0xf0] }
 0x596   :  { %v9720_v8 = vld [vmem:[#allocation3 + $0xd98] sm:$0xf]  ;;  %v9465_v49 = vor.u32 %v12437_v25, %v9464_v6  ;;  %7535 = vmatpush.bf16.msrb.mxu0 %v9209_v13  ;;  %v7310_v25 = vadd.f32 %v7309_v4, %v7297_v61 }
 0x597   :  { %v12501_v9 = vld [vmem:[#allocation3 + $0xdb4] sm:$0xf0] }
 0x598   :  { %v9976_v10 = vld [vmem:[#allocation3 + $0xf98] sm:$0xf]  ;;  %v9721_v14 = vor.u32 %v12501_v9, %v9720_v8  ;;  %7548 = vmatpush.bf16.msrb.mxu1 %v9465_v49  ;;  %v7322_v8 = vpop.f32.mrf.mxu3  ;;  %v7285_v49 = vpop.f32.mrf.mxu0 }
 0x599   :  { %v12565_v11 = vld [vmem:[#allocation3 + $0xfb4] sm:$0xf0]  ;;  %v13386_v13 = vadd.f32 %v7322_v8, %v7310_v25 }
 0x59a   :  { %v9176_v24 = vld [vmem:[#allocation3 + $0x958] sm:$0xf]  ;;  %v9977_v27 = vor.u32 %v12565_v11, %v9976_v10  ;;  %7561 = vmatpush.bf16.msrb.mxu2 %v9721_v14 }
 0x59b   :  { %v12365_v18 = vld [vmem:[#allocation3 + $0x974] sm:$0xf0] }
 0x59c   :  { %v9432_v19 = vld [vmem:[#allocation3 + $0xb58] sm:$0xf]  ;;  %v9177_v51 = vor.u32 %v12365_v18, %v9176_v24  ;;  %7574 = vmatpush.bf16.msrb.mxu3 %v9977_v27 }
 0x59d   :  { %v12429_v45 = vld [vmem:[#allocation3 + $0xb74] sm:$0xf0] }
 0x59e   :  { %v9688_v40 = vld [vmem:[#allocation3 + $0xd58] sm:$0xf]  ;;  %v9433_v41 = vor.u32 %v12429_v45, %v9432_v19  ;;  %7536 = vmatpush.bf16.msrb.mxu0 %v9177_v51  ;;  %v7298_v45 = vpop.f32.mrf.mxu1 }
 0x59f   :  { %v12493_v46 = vld [vmem:[#allocation3 + $0xd74] sm:$0xf0] }
 0x5a0   :  { %v9944_v52 = vld [vmem:[#allocation3 + $0xf58] sm:$0xf]  ;;  %v9689_v28 = vor.u32 %v12493_v46, %v9688_v40  ;;  %7549 = vmatpush.bf16.msrb.mxu1 %v9433_v41 }
 0x5a1   :  { %v12557_v48 = vld [vmem:[#allocation3 + $0xf74] sm:$0xf0] }
 0x5a2   :  { %v9144_v43 = vld [vmem:[#allocation3 + $0x918] sm:$0xf]  ;;  %v9945_v34 = vor.u32 %v12557_v48, %v9944_v52  ;;  %7562 = vmatpush.bf16.msrb.mxu2 %v9689_v28 }
 0x5a3   :  { %v12357_v30 = vld [vmem:[#allocation3 + $0x934] sm:$0xf0] }
 0x5a4   :  { %v9400_v33 = vld [vmem:[#allocation3 + $0xb18] sm:$0xf]  ;;  %v9145_v50 = vor.u32 %v12357_v30, %v9144_v43  ;;  %7575 = vmatpush.bf16.msrb.mxu3 %v9945_v34 }
 0x5a5   :  { %v12421_v15 = vld [vmem:[#allocation3 + $0xb34] sm:$0xf0] }
 0x5a6   :  { %v9656_v36 = vld [vmem:[#allocation3 + $0xd18] sm:$0xf]  ;;  %v9401_v55 = vor.u32 %v12421_v15, %v9400_v33  ;;  %7537 = vmatpush.bf16.msrb.mxu0 %v9145_v50 }
 0x5a7   :  { %v12485_v37 = vld [vmem:[#allocation3 + $0xd34] sm:$0xf0] }
 0x5a8   :  { %v9912_v42 = vld [vmem:[#allocation3 + $0xf18] sm:$0xf]  ;;  %v9657_v56 = vor.u32 %v12485_v37, %v9656_v36  ;;  %7550 = vmatpush.bf16.msrb.mxu1 %v9401_v55 }
 0x5a9   :  { %v12549_v44 = vld [vmem:[#allocation3 + $0xf34] sm:$0xf0] }
 0x5aa   :  { %v9112_v58 = vld [vmem:[#allocation3 + $0x8d8] sm:$0xf]  ;;  %v9913_v57 = vor.u32 %v12549_v44, %v9912_v42  ;;  %7563 = vmatpush.bf16.msrb.mxu2 %v9657_v56  ;;  %v7311_v42 = vpop.f32.mrf.mxu2  ;;  %v7324_v56 = vpop.f32.mrf.mxu3 }
 0x5ab   :  { %v12349_v54 = vld [vmem:[#allocation3 + $0x8f4] sm:$0xf0] }
 0x5ac   :  { %v9368_v59 = vld [vmem:[#allocation3 + $0xad8] sm:$0xf]  ;;  %v9113_v0 = vor.u32 %v12349_v54, %v9112_v58  ;;  %7576 = vmatpush.bf16.msrb.mxu3 %v9913_v57 }
 0x5ad   :  { %v12413_v47 = vld [vmem:[#allocation3 + $0xaf4] sm:$0xf0] }
 0x5ae   :  { %v9624_v12 = vld [vmem:[#allocation3 + $0xcd8] sm:$0xf]  ;;  %v9369_v1 = vor.u32 %v12413_v47, %v9368_v59  ;;  %7538 = vmatpush.bf16.msrb.mxu0 %v9113_v0 }
 0x5af   :  { %v12477_v35 = vld [vmem:[#allocation3 + $0xcf4] sm:$0xf0] }
 0x5b0   :  { %v9880_v62 = vld [vmem:[#allocation3 + $0xed8] sm:$0xf]  ;;  %v9625_v17 = vor.u32 %v12477_v35, %v9624_v12  ;;  %7551 = vmatpush.bf16.msrb.mxu1 %v9369_v1 }
 0x5b1   :  { %v12541_v63 = vld [vmem:[#allocation3 + $0xef4] sm:$0xf0] }
 0x5b2   :  { %v9080_v2 = vld [vmem:[#allocation3 + $0x898] sm:$0xf]  ;;  %v9881_v3 = vor.u32 %v12541_v63, %v9880_v62  ;;  %7564 = vmatpush.bf16.msrb.mxu2 %v9625_v17 }
 0x5b3   :  { %v12341_v16 = vld [vmem:[#allocation3 + $0x8b4] sm:$0xf0] }
 0x5b4   :  { %v9336_v23 = vld [vmem:[#allocation3 + $0xa98] sm:$0xf]  ;;  %v9081_v11 = vor.u32 %v12341_v16, %v9080_v2  ;;  %7577 = vmatpush.bf16.msrb.mxu3 %v9881_v3 }
 0x5b5   :  { %v12405_v5 = vld [vmem:[#allocation3 + $0xab4] sm:$0xf0] }
 0x5b6   :  { %v9592_v6 = vld [vmem:[#allocation3 + $0xc98] sm:$0xf]  ;;  %v9337_v14 = vor.u32 %v12405_v5, %v9336_v23  ;;  %7539 = vmatpush.bf16.msrb.mxu0 %v9081_v11 }
 0x5b7   :  { %v12469_v7 = vld [vmem:[#allocation3 + $0xcb4] sm:$0xf0] }
 0x5b8   :  { %v9848_v9 = vld [vmem:[#allocation3 + $0xe98] sm:$0xf]  ;;  %v9593_v24 = vor.u32 %v12469_v7, %v9592_v6  ;;  %7552 = vmatpush.bf16.msrb.mxu1 %v9337_v14 }
 0x5b9   :  { %v12533_v10 = vld [vmem:[#allocation3 + $0xeb4] sm:$0xf0] }
 0x5ba   :  { %v9048_v18 = vld [vmem:[#allocation3 + $0x858] sm:$0xf]  ;;  %v9849_v40 = vor.u32 %v12533_v10, %v9848_v9  ;;  %7565 = vmatpush.bf16.msrb.mxu2 %v9593_v24 }
 0x5bb   :  { %v12333_v19 = vld [vmem:[#allocation3 + $0x874] sm:$0xf0] }
 0x5bc   :  { %v9304_v27 = vld [vmem:[#allocation3 + $0xa58] sm:$0xf]  ;;  %v9049_v28 = vor.u32 %v12333_v19, %v9048_v18  ;;  %7578 = vmatpush.bf16.msrb.mxu3 %v9849_v40 }
 0x5bd   :  { %v12397_v46 = vld [vmem:[#allocation3 + $0xa74] sm:$0xf0] }
 0x5be   :  { %v9560_v52 = vld [vmem:[#allocation3 + $0xc58] sm:$0xf]  ;;  %v9305_v33 = vor.u32 %v12397_v46, %v9304_v27  ;;  %7540 = vmatpush.bf16.msrb.mxu0 %v9049_v28 }
 0x5bf   :  { %v12461_v48 = vld [vmem:[#allocation3 + $0xc74] sm:$0xf0] }
 0x5c0   :  { %v9816_v51 = vld [vmem:[#allocation3 + $0xe58] sm:$0xf]  ;;  %v9561_v34 = vor.u32 %v12461_v48, %v9560_v52  ;;  %7553 = vmatpush.bf16.msrb.mxu1 %v9305_v33 }
 0x5c1   :  { %v12525_v41 = vld [vmem:[#allocation3 + $0xe74] sm:$0xf0] }
 0x5c2   :  { %v9016_v43 = vld [vmem:[#allocation3 + $0x818] sm:$0xf]  ;;  %v9817_v44 = vor.u32 %v12525_v41, %v9816_v51  ;;  %7566 = vmatpush.bf16.msrb.mxu2 %v9561_v34 }
 0x5c3   :  { %v12325_v30 = vld [vmem:[#allocation3 + $0x834] sm:$0xf0] }
 0x5c4   :  { %v9272_v15 = vld [vmem:[#allocation3 + $0xa18] sm:$0xf]  ;;  %v9017_v60 = vor.u32 %v12325_v30, %v9016_v43  ;;  %7579 = vmatpush.bf16.msrb.mxu3 %v9817_v44  ;;  %v7335_v44 = vpop.f32.mrf.mxu0 }
 0x5c5   :  { %v12389_v36 = vld [vmem:[#allocation3 + $0xa34] sm:$0xf0] }
 0x5c6   :  { %v9528_v37 = vld [vmem:[#allocation3 + $0xc18] sm:$0xf]  ;;  %v9273_v35 = vor.u32 %v12389_v36, %v9272_v15  ;;  %7541 = vmatpush.bf16.msrb.mxu0 %v9017_v60 }
 0x5c7   :  { %v12453_v50 = vld [vmem:[#allocation3 + $0xc34] sm:$0xf0] }
 0x5c8   :  { %v9784_v53 = vld [vmem:[#allocation3 + $0xe18] sm:$0xf]  ;;  %v9529_v61 = vor.u32 %v12453_v50, %v9528_v37  ;;  %7554 = vmatpush.bf16.msrb.mxu1 %v9273_v35 }
 0x5c9   :  { %v12517_v55 = vld [vmem:[#allocation3 + $0xe34] sm:$0xf0]  ;;  %7542 = vmatmul.bf16.vlgmr.msrb.gmra.mxu0 %v13246_v31 }
 0x5ca   :  { %v10264_v58 = vld [vmem:[#allocation3 + $0x11d8] sm:$0xf]  ;;  %v9785_v0 = vor.u32 %v12517_v55, %v9784_v53  ;;  %7567 = vmatpush.bf16.msrb.mxu2 %v9529_v61 }
 0x5cb   :  { %v12637_v54 = vld [vmem:[#allocation3 + $0x11f4] sm:$0xf0]  ;;  %7555 = vmatmul.bf16.vlgmr.msrb.gmra.mxu1 %v13250_v38 }
 0x5cc   :  { %v10520_v59 = vld [vmem:[#allocation3 + $0x13d8] sm:$0xf]  ;;  %v10265_v1 = vor.u32 %v12637_v54, %v10264_v58  ;;  %7580 = vmatpush.bf16.msrb.mxu3 %v9785_v0  ;;  %v7336_v54 = vadd.f32 %v7335_v44, %v13386_v13 }
 0x5cd   :  { %v12701_v57 = vld [vmem:[#allocation3 + $0x13f4] sm:$0xf0]  ;;  %7568 = vmatmul.bf16.vlgmr.msrb.gmra.mxu2 %v13244_v29 }
 0x5ce   :  { %v10776_v47 = vld [vmem:[#allocation3 + $0x15d8] sm:$0xf]  ;;  %v10521_v17 = vor.u32 %v12701_v57, %v10520_v59  ;;  %7586 = vmatpush.bf16.msra.mxu0 %v10265_v1  ;;  %v7348_v59 = vpop.f32.mrf.mxu1 }
 0x5cf   :  { %v12765_v12 = vld [vmem:[#allocation3 + $0x15f4] sm:$0xf0]  ;;  %7581 = vmatmul.bf16.vlgmr.msrb.gmra.mxu3 %v13248_v32 }
 0x5d0   :  { %v11032_v62 = vld [vmem:[#allocation3 + $0x17d8] sm:$0xf]  ;;  %v10777_v2 = vor.u32 %v12765_v12, %v10776_v47  ;;  %7599 = vmatpush.bf16.msra.mxu1 %v10521_v17 }
 0x5d1   :  { %v12829_v63 = vld [vmem:[#allocation3 + $0x17f4] sm:$0xf0] }
 0x5d2   :  { %v10232_v16 = vld [vmem:[#allocation3 + $0x1198] sm:$0xf]  ;;  %v11033_v3 = vor.u32 %v12829_v63, %v11032_v62  ;;  %7612 = vmatpush.bf16.msra.mxu2 %v10777_v2  ;;  %v7349_v62 = vadd.f32 %v7348_v59, %v7336_v54 }
 0x5d3   :  { %v12629_v23 = vld [vmem:[#allocation3 + $0x11b4] sm:$0xf0] }
 0x5d4   :  { %v10488_v4 = vld [vmem:[#allocation3 + $0x1398] sm:$0xf]  ;;  %v10233_v9 = vor.u32 %v12629_v23, %v10232_v16  ;;  %7625 = vmatpush.bf16.msra.mxu3 %v11033_v3  ;;  %v7361_v23 = vpop.f32.mrf.mxu2 }
 0x5d5   :  { %v12693_v5 = vld [vmem:[#allocation3 + $0x13b4] sm:$0xf0] }
 0x5d6   :  { %v10744_v6 = vld [vmem:[#allocation3 + $0x1598] sm:$0xf]  ;;  %v10489_v10 = vor.u32 %v12693_v5, %v10488_v4  ;;  %7587 = vmatpush.bf16.msra.mxu0 %v10233_v9 }
 0x5d7   :  { %v12757_v7 = vld [vmem:[#allocation3 + $0x15b4] sm:$0xf0] }
 0x5d8   :  { %v11000_v25 = vld [vmem:[#allocation3 + $0x1798] sm:$0xf]  ;;  %v10745_v11 = vor.u32 %v12757_v7, %v10744_v6  ;;  %7600 = vmatpush.bf16.msra.mxu1 %v10489_v10  ;;  %v7362_v6 = vadd.f32 %v7361_v23, %v7349_v62  ;;  %v7374_v7 = vpop.f32.mrf.mxu3 }
 0x5d9   :  { %v12821_v8 = vld [vmem:[#allocation3 + $0x17b4] sm:$0xf0] }
 0x5da   :  { %v10200_v49 = vld [vmem:[#allocation3 + $0x1158] sm:$0xf]  ;;  %v11001_v18 = vor.u32 %v12821_v8, %v11000_v25  ;;  %7613 = vmatpush.bf16.msra.mxu2 %v10745_v11  ;;  %v13393_v10 = vadd.f32 %v7374_v7, %v7362_v6  ;;  %v7337_v11 = vpop.f32.mrf.mxu0 }
 0x5db   :  { %v12621_v14 = vld [vmem:[#allocation3 + $0x1174] sm:$0xf0] }
 0x5dc   :  { %v10456_v24 = vld [vmem:[#allocation3 + $0x1358] sm:$0xf]  ;;  %v10201_v52 = vor.u32 %v12621_v14, %v10200_v49  ;;  %7626 = vmatpush.bf16.msra.mxu3 %v11001_v18 }
 0x5dd   :  { %v12685_v19 = vld [vmem:[#allocation3 + $0x1374] sm:$0xf0] }
 0x5de   :  { %v10712_v27 = vld [vmem:[#allocation3 + $0x1558] sm:$0xf]  ;;  %v10457_v48 = vor.u32 %v12685_v19, %v10456_v24  ;;  %7588 = vmatpush.bf16.msra.mxu0 %v10201_v52 }
 0x5df   :  { %v12749_v45 = vld [vmem:[#allocation3 + $0x1574] sm:$0xf0] }
 0x5e0   :  { %v10968_v40 = vld [vmem:[#allocation3 + $0x1758] sm:$0xf]  ;;  %v10713_v51 = vor.u32 %v12749_v45, %v10712_v27  ;;  %7601 = vmatpush.bf16.msra.mxu1 %v10457_v48  ;;  %v7350_v27 = vpop.f32.mrf.mxu1 }
 0x5e1   :  { %v12813_v46 = vld [vmem:[#allocation3 + $0x1774] sm:$0xf0] }
 0x5e2   :  { %v10168_v41 = vld [vmem:[#allocation3 + $0x1118] sm:$0xf]  ;;  %v10969_v30 = vor.u32 %v12813_v46, %v10968_v40  ;;  %7614 = vmatpush.bf16.msra.mxu2 %v10713_v51 }
 0x5e3   :  { %v12613_v28 = vld [vmem:[#allocation3 + $0x1134] sm:$0xf0] }
 0x5e4   :  { %v10424_v43 = vld [vmem:[#allocation3 + $0x1318] sm:$0xf]  ;;  %v10169_v42 = vor.u32 %v12613_v28, %v10168_v41  ;;  %7627 = vmatpush.bf16.msra.mxu3 %v10969_v30 }
 0x5e5   :  { %v12677_v33 = vld [vmem:[#allocation3 + $0x1334] sm:$0xf0] }
 0x5e6   :  { %v10680_v34 = vld [vmem:[#allocation3 + $0x1518] sm:$0xf]  ;;  %v10425_v50 = vor.u32 %v12677_v33, %v10424_v43  ;;  %7589 = vmatpush.bf16.msra.mxu0 %v10169_v42 }
 0x5e7   :  { %v12741_v15 = vld [vmem:[#allocation3 + $0x1534] sm:$0xf0] }
 0x5e8   :  { %v10936_v36 = vld [vmem:[#allocation3 + $0x1718] sm:$0xf]  ;;  %v10681_v53 = vor.u32 %v12741_v15, %v10680_v34  ;;  %7602 = vmatpush.bf16.msra.mxu1 %v10425_v50 }
 0x5e9   :  { %v12805_v37 = vld [vmem:[#allocation3 + $0x1734] sm:$0xf0] }
 0x5ea   :  { %v10136_v55 = vld [vmem:[#allocation3 + $0x10d8] sm:$0xf]  ;;  %v10937_v60 = vor.u32 %v12805_v37, %v10936_v36  ;;  %7615 = vmatpush.bf16.msra.mxu2 %v10681_v53  ;;  %v7363_v37 = vpop.f32.mrf.mxu2 }
 0x5eb   :  { %v12605_v56 = vld [vmem:[#allocation3 + $0x10f4] sm:$0xf0] }
 0x5ec   :  { %v10392_v58 = vld [vmem:[#allocation3 + $0x12d8] sm:$0xf]  ;;  %v10137_v63 = vor.u32 %v12605_v56, %v10136_v55  ;;  %7628 = vmatpush.bf16.msra.mxu3 %v10937_v60  ;;  %v7376_v55 = vpop.f32.mrf.mxu3 }
 0x5ed   :  { %v12669_v57 = vld [vmem:[#allocation3 + $0x12f4] sm:$0xf0] }
 0x5ee   :  { %v10648_v47 = vld [vmem:[#allocation3 + $0x14d8] sm:$0xf]  ;;  %v10393_v0 = vor.u32 %v12669_v57, %v10392_v58  ;;  %7590 = vmatpush.bf16.msra.mxu0 %v10137_v63 }
 0x5ef   :  { %v12733_v12 = vld [vmem:[#allocation3 + $0x14f4] sm:$0xf0] }
 0x5f0   :  { %v10904_v35 = vld [vmem:[#allocation3 + $0x16d8] sm:$0xf]  ;;  %v10649_v1 = vor.u32 %v12733_v12, %v10648_v47  ;;  %7603 = vmatpush.bf16.msra.mxu1 %v10393_v0 }
 0x5f1   :  { %v12797_v61 = vld [vmem:[#allocation3 + $0x16f4] sm:$0xf0] }
 0x5f2   :  { %v10104_v17 = vld [vmem:[#allocation3 + $0x1098] sm:$0xf]  ;;  %v10905_v13 = vor.u32 %v12797_v61, %v10904_v35  ;;  %7616 = vmatpush.bf16.msra.mxu2 %v10649_v1 }
 0x5f3   :  { %v12597_v2 = vld [vmem:[#allocation3 + $0x10b4] sm:$0xf0] }
 0x5f4   :  { %v10360_v16 = vld [vmem:[#allocation3 + $0x1298] sm:$0xf]  ;;  %v10105_v9 = vor.u32 %v12597_v2, %v10104_v17  ;;  %7629 = vmatpush.bf16.msra.mxu3 %v10905_v13 }
 0x5f5   :  { %v12661_v4 = vld [vmem:[#allocation3 + $0x12b4] sm:$0xf0] }
 0x5f6   :  { %v10616_v3 = vld [vmem:[#allocation3 + $0x1498] sm:$0xf]  ;;  %v10361_v49 = vor.u32 %v12661_v4, %v10360_v16  ;;  %7591 = vmatpush.bf16.msra.mxu0 %v10105_v9 }
 0x5f7   :  { %v12725_v5 = vld [vmem:[#allocation3 + $0x14b4] sm:$0xf0] }
 0x5f8   :  { %v10872_v25 = vld [vmem:[#allocation3 + $0x1698] sm:$0xf]  ;;  %v10617_v14 = vor.u32 %v12725_v5, %v10616_v3  ;;  %7604 = vmatpush.bf16.msra.mxu1 %v10361_v49 }
 0x5f9   :  { %v12789_v8 = vld [vmem:[#allocation3 + $0x16b4] sm:$0xf0] }
 0x5fa   :  { %v10072_v24 = vld [vmem:[#allocation3 + $0x1058] sm:$0xf]  ;;  %v10873_v45 = vor.u32 %v12789_v8, %v10872_v25  ;;  %7617 = vmatpush.bf16.msra.mxu2 %v10617_v14 }
 0x5fb   :  { %v12589_v18 = vld [vmem:[#allocation3 + $0x1074] sm:$0xf0] }
 0x5fc   :  { %v10328_v19 = vld [vmem:[#allocation3 + $0x1258] sm:$0xf]  ;;  %v10073_v41 = vor.u32 %v12589_v18, %v10072_v24  ;;  %7630 = vmatpush.bf16.msra.mxu3 %v10873_v45 }
 0x5fd   :  { %v12653_v40 = vld [vmem:[#allocation3 + $0x1274] sm:$0xf0] }
 0x5fe   :  { %v10584_v46 = vld [vmem:[#allocation3 + $0x1458] sm:$0xf]  ;;  %v10329_v30 = vor.u32 %v12653_v40, %v10328_v19  ;;  %7592 = vmatpush.bf16.msra.mxu0 %v10073_v41  ;;  %v13131_v40 = vld [vmem:[#allocation1 + $0x12] sm:$0xff] }
 0x5ff   :  { %v12717_v52 = vld [vmem:[#allocation3 + $0x1474] sm:$0xf0] }
 0x600   :  { %v10840_v48 = vld [vmem:[#allocation3 + $0x1658] sm:$0xf]  ;;  %v10585_v33 = vor.u32 %v12717_v52, %v10584_v46  ;;  %7605 = vmatpush.bf16.msra.mxu1 %v10329_v30  ;;  %v13132_v46 = vld [vmem:[#allocation1 + $0x9] sm:$0xff] }
 0x601   :  { %v12781_v51 = vld [vmem:[#allocation3 + $0x1674] sm:$0xf0] }
 0x602   :  { %v10040_v28 = vld [vmem:[#allocation3 + $0x1018] sm:$0xf]  ;;  %v10841_v42 = vor.u32 %v12781_v51, %v10840_v48  ;;  %7618 = vmatpush.bf16.msra.mxu2 %v10585_v33 }
 0x603   :  { %v12581_v43 = vld [vmem:[#allocation3 + $0x1034] sm:$0xf0] }
 0x604   :  { %v10296_v34 = vld [vmem:[#allocation3 + $0x1218] sm:$0xf]  ;;  %v10041_v59 = vor.u32 %v12581_v43, %v10040_v28  ;;  %7631 = vmatpush.bf16.msra.mxu3 %v10841_v42 }
 0x605   :  { %v12645_v15 = vld [vmem:[#allocation3 + $0x1234] sm:$0xf0] }
 0x606   :  { %v10552_v36 = vld [vmem:[#allocation3 + $0x1418] sm:$0xf]  ;;  %v10297_v12 = vor.u32 %v12645_v15, %v10296_v34  ;;  %7593 = vmatpush.bf16.msra.mxu0 %v10041_v59 }
 0x607   :  { %v12709_v44 = vld [vmem:[#allocation3 + $0x1434] sm:$0xf0] }
 0x608   :  { %v10808_v50 = vld [vmem:[#allocation3 + $0x1618] sm:$0xf]  ;;  %v10553_v35 = vor.u32 %v12709_v44, %v10552_v36  ;;  %7606 = vmatpush.bf16.msra.mxu1 %v10297_v12  ;;  %v7387_v44 = vpop.f32.mrf.mxu0 }
 0x609   :  { %v12773_v53 = vld [vmem:[#allocation3 + $0x1634] sm:$0xf0]  ;;  %v7388_v55 = vadd.f32 %v7387_v44, %v13393_v10 }
 0x60a   :  { %v11288_v56 = vld [vmem:[#allocation3 + $0x19d8] sm:$0xf]  ;;  %v10809_v63 = vor.u32 %v12773_v53, %v10808_v50  ;;  %7619 = vmatpush.bf16.msra.mxu2 %v10553_v35 }
 0x60b   :  { %v12893_v58 = vld [vmem:[#allocation3 + $0x19f4] sm:$0xf0]  ;;  %7607 = vmatmul.bf16.vlgmr.msra.gmra.mxu1 %v13132_v46 }
 0x60c   :  { %v11544_v54 = vld [vmem:[#allocation3 + $0x1bd8] sm:$0xf]  ;;  %v11289_v0 = vor.u32 %v12893_v58, %v11288_v56  ;;  %7632 = vmatpush.bf16.msra.mxu3 %v10809_v63  ;;  %v7400_v58 = vpop.f32.mrf.mxu1 }
 0x60d   :  { %v12957_v60 = vld [vmem:[#allocation3 + $0x1bf4] sm:$0xf0]  ;;  %7620 = vmatmul.bf16.vlgmr.msra.gmra.mxu2 %v13131_v40  ;;  %v7401_v35 = vadd.f32 %v7400_v58, %v7388_v55 }
 0x60e   :  { %v11800_v57 = vld [vmem:[#allocation3 + $0x1dd8] sm:$0xf]  ;;  %v11545_v1 = vor.u32 %v12957_v60, %v11544_v54  ;;  %7638 = vmatpush.bf16.msrb.mxu0 %v11289_v0 }
 0x60f   :  { %v13021_v47 = vld [vmem:[#allocation3 + $0x1df4] sm:$0xf0] }
 0x610   :  { %v12056_v61 = vld [vmem:[#allocation3 + $0x1fd8] sm:$0xf]  ;;  %v11801_v17 = vor.u32 %v13021_v47, %v11800_v57  ;;  %7651 = vmatpush.bf16.msrb.mxu1 %v11545_v1 }
 0x611   :  { %v13085_v62 = vld [vmem:[#allocation3 + $0x1ff4] sm:$0xf0] }
 0x612   :  { %v11256_v2 = vld [vmem:[#allocation3 + $0x1998] sm:$0xf]  ;;  %v12057_v13 = vor.u32 %v13085_v62, %v12056_v61  ;;  %7664 = vmatpush.bf16.msrb.mxu2 %v11801_v17 }
 0x613   :  { %v12885_v16 = vld [vmem:[#allocation3 + $0x19b4] sm:$0xf0] }
 0x614   :  { %v11512_v23 = vld [vmem:[#allocation3 + $0x1b98] sm:$0xf]  ;;  %v11257_v25 = vor.u32 %v12885_v16, %v11256_v2  ;;  %7677 = vmatpush.bf16.msrb.mxu3 %v12057_v13 }
 0x615   :  { %v12949_v4 = vld [vmem:[#allocation3 + $0x1bb4] sm:$0xf0] }
 0x616   :  { %v11768_v3 = vld [vmem:[#allocation3 + $0x1d98] sm:$0xf]  ;;  %v11513_v8 = vor.u32 %v12949_v4, %v11512_v23  ;;  %7639 = vmatpush.bf16.msrb.mxu0 %v11257_v25 }
 0x617   :  { %v13013_v5 = vld [vmem:[#allocation3 + $0x1db4] sm:$0xf0] }
 0x618   :  { %v12024_v6 = vld [vmem:[#allocation3 + $0x1f98] sm:$0xf]  ;;  %v11769_v9 = vor.u32 %v13013_v5, %v11768_v3  ;;  %7652 = vmatpush.bf16.msrb.mxu1 %v11513_v8  ;;  %v7413_v3 = vpop.f32.mrf.mxu2  ;;  %v7426_v8 = vpop.f32.mrf.mxu3 }
 0x619   :  { %v13077_v7 = vld [vmem:[#allocation3 + $0x1fb4] sm:$0xf0]  ;;  %v7414_v25 = vadd.f32 %v7413_v3, %v7401_v35  ;;  %v12249_v35 = vld [vmem:[#allocation3 + $0x5dc] sm:$0xf] }
 0x61a   :  { %v11224_v11 = vld [vmem:[#allocation3 + $0x1958] sm:$0xf]  ;;  %v12025_v18 = vor.u32 %v13077_v7, %v12024_v6  ;;  %7665 = vmatpush.bf16.msrb.mxu2 %v11769_v9 }
 0x61b   :  { %v12877_v49 = vld [vmem:[#allocation3 + $0x1974] sm:$0xf0] }
 0x61c   :  { %v11480_v14 = vld [vmem:[#allocation3 + $0x1b58] sm:$0xf]  ;;  %v11225_v41 = vor.u32 %v12877_v49, %v11224_v11  ;;  %7678 = vmatpush.bf16.msrb.mxu3 %v12025_v18  ;;  %v7389_v49 = vpop.f32.mrf.mxu0  ;;  %v13396_v18 = vadd.f32 %v7426_v8, %v7414_v25  ;;  %v12305_v25 = vld [vmem:[#allocation3 + $0x79c] sm:$0xf] }
 0x61d   :  { %v13130_v24 = vld [vmem:[#allocation1] sm:$0xff] }
 0x61e   :  { %7594 = vmatmul.bf16.vlgmr.msra.gmra.mxu0 %v13130_v24  ;;  %v12941_v19 = vld [vmem:[#allocation3 + $0x1b74] sm:$0xf0]  ;;  %v7402_v24 = vpop.f32.mrf.mxu1  ;;  %v8954_v8 = vld [vmem:[#allocation3 + $0x7b8] sm:$0xf0] }
 0x61f   :  { %v11736_v27 = vld [vmem:[#allocation3 + $0x1d58] sm:$0xf]  ;;  %v11481_v28 = vor.u32 %v12941_v19, %v11480_v14  ;;  %7640 = vmatpush.bf16.msrb.mxu0 %v11225_v41  ;;  %v8154_v24 = vld [vmem:[#allocation3 + $0x178] sm:$0xf0] }
 0x620   :  { %v13005_v45 = vld [vmem:[#allocation3 + $0x1d74] sm:$0xf0]  ;;  %v7415_v58 = vpop.f32.mrf.mxu2 }
 0x621   :  { %v11992_v52 = vld [vmem:[#allocation3 + $0x1f58] sm:$0xf]  ;;  %v11737_v43 = vor.u32 %v13005_v45, %v11736_v27  ;;  %7653 = vmatpush.bf16.msrb.mxu1 %v11481_v28  ;;  %v8890_v58 = vld [vmem:[#allocation3 + $0x738] sm:$0xf0] }
 0x622   :  { %v13069_v48 = vld [vmem:[#allocation3 + $0x1f74] sm:$0xf0] }
 0x623   :  { %v13133_v51 = vld [vmem:[#allocation1 + $0x1b] sm:$0xff]  ;;  %v11993_v15 = vor.u32 %v13069_v48, %v11992_v52  ;;  %7666 = vmatpush.bf16.msrb.mxu2 %v11737_v43 }
 0x624   :  { %7633 = vmatmul.bf16.vlgmr.msra.gmra.mxu3 %v13133_v51  ;;  %v11192_v30 = vld [vmem:[#allocation3 + $0x1918] sm:$0xf] }
 0x625   :  { %v12869_v33 = vld [vmem:[#allocation3 + $0x1934] sm:$0xf0]  ;;  %7679 = vmatpush.bf16.msrb.mxu3 %v11993_v15 }
 0x626   :  { %v11448_v34 = vld [vmem:[#allocation3 + $0x1b18] sm:$0xf]  ;;  %v11193_v56 = vor.u32 %v12869_v33, %v11192_v30 }
 0x627   :  { %v12933_v36 = vld [vmem:[#allocation3 + $0x1b34] sm:$0xf0] }
 0x628   :  { %v11704_v37 = vld [vmem:[#allocation3 + $0x1d18] sm:$0xf]  ;;  %v11449_v54 = vor.u32 %v12933_v36, %v11448_v34  ;;  %7641 = vmatpush.bf16.msrb.mxu0 %v11193_v56 }
 0x629   :  { %v12997_v42 = vld [vmem:[#allocation3 + $0x1d34] sm:$0xf0] }
 0x62a   :  { %v11960_v50 = vld [vmem:[#allocation3 + $0x1f18] sm:$0xf]  ;;  %v11705_v59 = vor.u32 %v12997_v42, %v11704_v37  ;;  %7654 = vmatpush.bf16.msrb.mxu1 %v11449_v54  ;;  %v12121_v54 = vld [vmem:[#allocation3 + $0x1dc] sm:$0xf] }
 0x62b   :  { %v13061_v53 = vld [vmem:[#allocation3 + $0x1f34] sm:$0xf0] }
 0x62c   :  { %v11160_v60 = vld [vmem:[#allocation3 + $0x18d8] sm:$0xf]  ;;  %v11961_v12 = vor.u32 %v13061_v53, %v11960_v50  ;;  %7667 = vmatpush.bf16.msrb.mxu2 %v11705_v59  ;;  %v8218_v59 = vld [vmem:[#allocation3 + $0x1f8] sm:$0xf0] }
 0x62d   :  { %v12861_v57 = vld [vmem:[#allocation3 + $0x18f4] sm:$0xf0] }
 0x62e   :  { %v11416_v47 = vld [vmem:[#allocation3 + $0x1ad8] sm:$0xf]  ;;  %v11161_v17 = vor.u32 %v12861_v57, %v11160_v60  ;;  %7680 = vmatpush.bf16.msrb.mxu3 %v11961_v12  ;;  %v12185_v60 = vld [vmem:[#allocation3 + $0x3dc] sm:$0xf]  ;;  %v7428_v57 = vpop.f32.mrf.mxu3 }
 0x62f   :  { %v12925_v61 = vld [vmem:[#allocation3 + $0x1af4] sm:$0xf0]  ;;  %v8474_v12 = vld [vmem:[#allocation3 + $0x3f8] sm:$0xf0] }
 0x630   :  { %v11672_v62 = vld [vmem:[#allocation3 + $0x1cd8] sm:$0xf]  ;;  %v11417_v10 = vor.u32 %v12925_v61, %v11416_v47  ;;  %7642 = vmatpush.bf16.msrb.mxu0 %v11161_v17  ;;  %v8730_v61 = vld [vmem:[#allocation3 + $0x5f8] sm:$0xf0] }
 0x631   :  { %v12989_v63 = vld [vmem:[#allocation3 + $0x1cf4] sm:$0xf0] }
 0x632   :  { %v11928_v0 = vld [vmem:[#allocation3 + $0x1ed8] sm:$0xf]  ;;  %v11673_v2 = vor.u32 %v12989_v63, %v11672_v62  ;;  %7655 = vmatpush.bf16.msrb.mxu1 %v11417_v10  ;;  %v8221_v10 = vor.u32 %v12121_v54, %v8218_v59 }
 0x633   :  { %v13053_v1 = vld [vmem:[#allocation3 + $0x1ef4] sm:$0xf0] }
 0x634   :  { %v11128_v16 = vld [vmem:[#allocation3 + $0x1898] sm:$0xf]  ;;  %v11929_v4 = vor.u32 %v13053_v1, %v11928_v0  ;;  %7668 = vmatpush.bf16.msrb.mxu2 %v11673_v2  ;;  %v12313_v0 = vld [vmem:[#allocation3 + $0x7dc] sm:$0xf]  ;;  %v8477_v2 = vor.u32 %v12185_v60, %v8474_v12  ;;  %v7452_v60 = vpop.f32.mrf.mxu1 }
 0x635   :  { %v12853_v23 = vld [vmem:[#allocation3 + $0x18b4] sm:$0xf0]  ;;  %v8986_v1 = vld [vmem:[#allocation3 + $0x7f8] sm:$0xf0] }
 0x636   :  { %v11384_v13 = vld [vmem:[#allocation3 + $0x1a98] sm:$0xf]  ;;  %v11129_v14 = vor.u32 %v12853_v23, %v11128_v16  ;;  %7681 = vmatpush.bf16.msrb.mxu3 %v11929_v4  ;;  %v8733_v16 = vor.u32 %v12249_v35, %v8730_v61  ;;  %v12113_v23 = vld [vmem:[#allocation3 + $0x19c] sm:$0xf]  ;;  %v8989_v3 = vor.u32 %v12313_v0, %v8986_v1 }
 0x637   :  { %v12917_v5 = vld [vmem:[#allocation3 + $0x1ab4] sm:$0xf0]  ;;  %v12177_v4 = vld [vmem:[#allocation3 + $0x39c] sm:$0xf] }
 0x638   :  { %v11640_v6 = vld [vmem:[#allocation3 + $0x1c98] sm:$0xf]  ;;  %v11385_v19 = vor.u32 %v12917_v5, %v11384_v13  ;;  %7643 = vmatpush.bf16.msrb.mxu0 %v11129_v14  ;;  %v8186_v13 = vld [vmem:[#allocation3 + $0x1b8] sm:$0xf0] }
 0x639   :  { %v12981_v7 = vld [vmem:[#allocation3 + $0x1cb4] sm:$0xf0]  ;;  %v8442_v5 = vld [vmem:[#allocation3 + $0x3b8] sm:$0xf0] }
 0x63a   :  { %v11896_v9 = vld [vmem:[#allocation3 + $0x1e98] sm:$0xf]  ;;  %v11641_v27 = vor.u32 %v12981_v7, %v11640_v6  ;;  %7656 = vmatpush.bf16.msrb.mxu1 %v11385_v19  ;;  %v12241_v6 = vld [vmem:[#allocation3 + $0x59c] sm:$0xf] }
 0x63b   :  { %v13045_v11 = vld [vmem:[#allocation3 + $0x1eb4] sm:$0xf0]  ;;  %v8698_v7 = vld [vmem:[#allocation3 + $0x5b8] sm:$0xf0] }
 0x63c   :  { %v11096_v45 = vld [vmem:[#allocation3 + $0x1858] sm:$0xf]  ;;  %v11897_v52 = vor.u32 %v13045_v11, %v11896_v9  ;;  %7669 = vmatpush.bf16.msrb.mxu2 %v11641_v27  ;;  %v8189_v9 = vor.u32 %v12113_v23, %v8186_v13  ;;  %v8445_v11 = vor.u32 %v12177_v4, %v8442_v5  ;;  %v8701_v49 = vor.u32 %v12241_v6, %v8698_v7  ;;  %v12105_v14 = vld [vmem:[#allocation3 + $0x15c] sm:$0xf]  ;;  %v7465_v6 = vpop.f32.mrf.mxu2 }
 0x63d   :  { %v12845_v40 = vld [vmem:[#allocation3 + $0x1874] sm:$0xf0]  ;;  %v12169_v19 = vld [vmem:[#allocation3 + $0x35c] sm:$0xf] }
 0x63e   :  { %v11352_v46 = vld [vmem:[#allocation3 + $0x1a58] sm:$0xf]  ;;  %v11097_v30 = vor.u32 %v12845_v40, %v11096_v45  ;;  %7682 = vmatpush.bf16.msrb.mxu3 %v11897_v52  ;;  %v13134_v27 = vld [vmem:[#allocation1 + $0x24] sm:$0xff]  ;;  %v8957_v45 = vor.u32 %v12305_v25, %v8954_v8 }
 0x63f   :  { %v12909_v48 = vld [vmem:[#allocation3 + $0x1a74] sm:$0xf0]  ;;  %v8410_v40 = vld [vmem:[#allocation3 + $0x378] sm:$0xf0] }
 0x640   :  { %v11608_v51 = vld [vmem:[#allocation3 + $0x1c58] sm:$0xf]  ;;  %v11353_v15 = vor.u32 %v12909_v48, %v11352_v46  ;;  %7644 = vmatpush.bf16.msrb.mxu0 %v11097_v30  ;;  %v12233_v46 = vld [vmem:[#allocation3 + $0x55c] sm:$0xf]  ;;  %v13135_v48 = vld [vmem:[#allocation1 + $0x36] sm:$0xff]  ;;  %v8157_v30 = vor.u32 %v12105_v14, %v8154_v24 }
 0x641   :  { %v12973_v41 = vld [vmem:[#allocation3 + $0x1c74] sm:$0xf0]  ;;  %v8666_v52 = vld [vmem:[#allocation3 + $0x578] sm:$0xf0] }
 0x642   :  { %v11864_v28 = vld [vmem:[#allocation3 + $0x1e58] sm:$0xf]  ;;  %v11609_v36 = vor.u32 %v12973_v41, %v11608_v51  ;;  %7657 = vmatpush.bf16.msrb.mxu1 %v11353_v15  ;;  %v13136_v51 = vld [vmem:[#allocation1 + $0x2d] sm:$0xff]  ;;  %v12297_v41 = vld [vmem:[#allocation3 + $0x75c] sm:$0xf] }
 0x643   :  { %v13037_v43 = vld [vmem:[#allocation3 + $0x1e74] sm:$0xf0]  ;;  %v12097_v15 = vld [vmem:[#allocation3 + $0x11c] sm:$0xf] }
 0x644   :  { %v11064_v33 = vld [vmem:[#allocation3 + $0x1818] sm:$0xf]  ;;  %v11865_v50 = vor.u32 %v13037_v43, %v11864_v28  ;;  %7670 = vmatpush.bf16.msrb.mxu2 %v11609_v36  ;;  %v8922_v28 = vld [vmem:[#allocation3 + $0x778] sm:$0xf0] }
 0x645   :  { %v12837_v34 = vld [vmem:[#allocation3 + $0x1834] sm:$0xf0]  ;;  %v8122_v36 = vld [vmem:[#allocation3 + $0x138] sm:$0xf0] }
 0x646   :  { %v11320_v37 = vld [vmem:[#allocation3 + $0x1a18] sm:$0xf]  ;;  %v11065_v47 = vor.u32 %v12837_v34, %v11064_v33  ;;  %7683 = vmatpush.bf16.msrb.mxu3 %v11865_v50  ;;  %v8413_v33 = vor.u32 %v12169_v19, %v8410_v40  ;;  %v8669_v34 = vor.u32 %v12233_v46, %v8666_v52  ;;  %v12225_v50 = vld [vmem:[#allocation3 + $0x51c] sm:$0xf]  ;;  %v8125_v59 = vor.u32 %v12097_v15, %v8122_v36 }
 0x647   :  { %v12901_v42 = vld [vmem:[#allocation3 + $0x1a34] sm:$0xf0]  ;;  %v12089_v12 = vld [vmem:[#allocation3 + $0xdc] sm:$0xf] }
 0x648   :  { %v11576_v44 = vld [vmem:[#allocation3 + $0x1c18] sm:$0xf]  ;;  %v11321_v62 = vor.u32 %v12901_v42, %v11320_v37  ;;  %7645 = vmatpush.bf16.msrb.mxu0 %v11065_v47  ;;  %v12161_v37 = vld [vmem:[#allocation3 + $0x31c] sm:$0xf]  ;;  %v8925_v42 = vor.u32 %v12297_v41, %v8922_v28 }
 0x649   :  { %v12965_v53 = vld [vmem:[#allocation3 + $0x1c34] sm:$0xf0]  ;;  %v8090_v35 = vld [vmem:[#allocation3 + $0xf8] sm:$0xf0] }
 0x64a   :  { %v11832_v55 = vld [vmem:[#allocation3 + $0x1e18] sm:$0xf]  ;;  %v11577_v63 = vor.u32 %v12965_v53, %v11576_v44  ;;  %7658 = vmatpush.bf16.msrb.mxu1 %v11321_v62  ;;  %v8378_v44 = vld [vmem:[#allocation3 + $0x338] sm:$0xf0] }
 0x64b   :  { %v13029_v56 = vld [vmem:[#allocation3 + $0x1e34] sm:$0xf0]  ;;  %7646 = vmatmul.bf16.vlgmr.msrb.gmra.mxu0 %v13134_v27  ;;  %v8634_v53 = vld [vmem:[#allocation3 + $0x538] sm:$0xf0]  ;;  %v8381_v57 = vor.u32 %v12161_v37, %v8378_v44  ;;  %v7454_v27 = vpop.f32.mrf.mxu1 }
 0x64c   :  { %v11833_v17 = vor.u32 %v13029_v56, %v11832_v55  ;;  %7671 = vmatpush.bf16.msrb.mxu2 %v11577_v63  ;;  %7690 = vmatpush.bf16.msra.mxu0 %v8221_v10  ;;  %v13137_v43 = vld [vmem:[#allocation1 + $0x3f] sm:$0xff]  ;;  %v7439_v55 = vpop.f32.mrf.mxu0  ;;  %v8637_v47 = vor.u32 %v12225_v50, %v8634_v53 }
 0x64d   :  { %7659 = vmatmul.bf16.vlgmr.msrb.gmra.mxu1 %v13136_v51  ;;  %v12289_v56 = vld [vmem:[#allocation3 + $0x71c] sm:$0xf]  ;;  %v7440_v54 = vadd.f32 %v7439_v55, %v13396_v18 }
 0x64e   :  { %7684 = vmatpush.bf16.msrb.mxu3 %v11833_v17  ;;  %7703 = vmatpush.bf16.msra.mxu1 %v8477_v2  ;;  %v12153_v61 = vld [vmem:[#allocation3 + $0x2dc] sm:$0xf]  ;;  %v8893_v62 = vor.u32 %v12289_v56, %v8890_v58 }
 0x64f   :  { %7672 = vmatmul.bf16.vlgmr.msrb.gmra.mxu2 %v13135_v48  ;;  %v7453_v63 = vadd.f32 %v7452_v60, %v7440_v54  ;;  %v8346_v0 = vld [vmem:[#allocation3 + $0x2f8] sm:$0xf0] }
 0x650   :  { %7716 = vmatpush.bf16.msra.mxu2 %v8733_v16  ;;  %7691 = vmatpush.bf16.msra.mxu0 %v8189_v9  ;;  %v12217_v1 = vld [vmem:[#allocation3 + $0x4dc] sm:$0xf]  ;;  %v8093_v16 = vor.u32 %v12089_v12, %v8090_v35  ;;  %v8349_v18 = vor.u32 %v12153_v61, %v8346_v0 }
 0x651   :  { %7685 = vmatmul.bf16.vlgmr.msrb.gmra.mxu3 %v13137_v43  ;;  %v8602_v17 = vld [vmem:[#allocation3 + $0x4f8] sm:$0xf0]  ;;  %v7466_v9 = vadd.f32 %v7465_v6, %v7453_v63 }
 0x652   :  { %7729 = vmatpush.bf16.msra.mxu3 %v8989_v3  ;;  %7704 = vmatpush.bf16.msra.mxu1 %v8445_v11  ;;  %v12281_v10 = vld [vmem:[#allocation3 + $0x6dc] sm:$0xf]  ;;  %v8605_v23 = vor.u32 %v12217_v1, %v8602_v17  ;;  %v7478_v11 = vpop.f32.mrf.mxu3 }
 0x653   :  { %v8858_v2 = vld [vmem:[#allocation3 + $0x6f8] sm:$0xf0] }
 0x654   :  { %7717 = vmatpush.bf16.msra.mxu2 %v8701_v49  ;;  %7692 = vmatpush.bf16.msra.mxu0 %v8157_v30  ;;  %v12081_v13 = vld [vmem:[#allocation3 + $0x9c] sm:$0xf]  ;;  %v8861_v5 = vor.u32 %v12281_v10, %v8858_v2  ;;  %v7441_v24 = vpop.f32.mrf.mxu0 }
 0x655   :  { %v8058_v4 = vld [vmem:[#allocation3 + $0xb8] sm:$0xf0] }
 0x656   :  { %7730 = vmatpush.bf16.msra.mxu3 %v8957_v45  ;;  %7705 = vmatpush.bf16.msra.mxu1 %v8413_v33  ;;  %v12145_v3 = vld [vmem:[#allocation3 + $0x29c] sm:$0xf]  ;;  %v8061_v19 = vor.u32 %v12081_v13, %v8058_v4  ;;  %v7479_v45 = vadd.f32 %v7478_v11, %v7466_v9 }
 0x657   :  { %v8314_v7 = vld [vmem:[#allocation3 + $0x2b8] sm:$0xf0] }
 0x658   :  { %7718 = vmatpush.bf16.msra.mxu2 %v8669_v34  ;;  %7693 = vmatpush.bf16.msra.mxu0 %v8125_v59  ;;  %v12209_v25 = vld [vmem:[#allocation3 + $0x49c] sm:$0xf]  ;;  %v8317_v40 = vor.u32 %v12145_v3, %v8314_v7  ;;  %v7909_v33 = vrot.slane %v7479_v45, 6 }
 0x659   :  { %v8570_v8 = vld [vmem:[#allocation3 + $0x4b8] sm:$0xf0] }
 0x65a   :  { %7731 = vmatpush.bf16.msra.mxu3 %v8925_v42  ;;  %7706 = vmatpush.bf16.msra.mxu1 %v8381_v57  ;;  %v12273_v49 = vld [vmem:[#allocation3 + $0x69c] sm:$0xf]  ;;  %v8573_v46 = vor.u32 %v12209_v25, %v8570_v8  ;;  %v13401_v44 = vsel %vm7912_vm0, %v13380_v39, %v7909_v33 }
 0x65b   :  { %v8826_v14 = vld [vmem:[#allocation3 + $0x6b8] sm:$0xf0] }
 0x65c   :  { %7719 = vmatpush.bf16.msra.mxu2 %v8637_v47  ;;  %7694 = vmatpush.bf16.msra.mxu0 %v8093_v16  ;;  %v12073_v52 = vld [vmem:[#allocation3 + $0x5c] sm:$0xf]  ;;  %v8829_v41 = vor.u32 %v12273_v49, %v8826_v14  ;;  %v7467_v47 = vpop.f32.mrf.mxu2 }
 0x65d   :  { %v8026_v48 = vld [vmem:[#allocation3 + $0x78] sm:$0xf0] }
 0x65e   :  { %7732 = vmatpush.bf16.msra.mxu3 %v8893_v62  ;;  %7707 = vmatpush.bf16.msra.mxu1 %v8349_v18  ;;  %v12137_v51 = vld [vmem:[#allocation3 + $0x25c] sm:$0xf]  ;;  %v8029_v36 = vor.u32 %v12073_v52, %v8026_v48  ;;  %v7480_v62 = vpop.f32.mrf.mxu3 }
 0x65f   :  { %v8282_v28 = vld [vmem:[#allocation3 + $0x278] sm:$0xf0] }
 0x660   :  { %7720 = vmatpush.bf16.msra.mxu2 %v8605_v23  ;;  %v12201_v43 = vld [vmem:[#allocation3 + $0x45c] sm:$0xf]  ;;  %7695 = vmatpush.bf16.msra.mxu0 %v8061_v19  ;;  %v8285_v50 = vor.u32 %v12137_v51, %v8282_v28 }
 0x661   :  { %v8538_v30 = vld [vmem:[#allocation3 + $0x478] sm:$0xf0] }
 0x662   :  { %7733 = vmatpush.bf16.msra.mxu3 %v8861_v5  ;;  %v12265_v34 = vld [vmem:[#allocation3 + $0x65c] sm:$0xf]  ;;  %7708 = vmatpush.bf16.msra.mxu1 %v8317_v40  ;;  %v8541_v53 = vor.u32 %v12201_v43, %v8538_v30 }
 0x663   :  { %v8794_v15 = vld [vmem:[#allocation3 + $0x678] sm:$0xf0] }
 0x664   :  { %v12065_v37 = vld [vmem:[#allocation3 + $0x1c] sm:$0xf]  ;;  %7721 = vmatpush.bf16.msra.mxu2 %v8573_v46  ;;  %v8797_v54 = vor.u32 %v12265_v34, %v8794_v15  ;;  %7696 = vmatpush.bf16.msra.mxu0 %v8029_v36 }
 0x665   :  { %v7994_v42 = vld [vmem:[#allocation3 + $0x38] sm:$0xf0] }
 0x666   :  { %v12129_v55 = vld [vmem:[#allocation3 + $0x21c] sm:$0xf]  ;;  %7734 = vmatpush.bf16.msra.mxu3 %v8829_v41  ;;  %v7997_v39 = vor.u32 %v12065_v37, %v7994_v42  ;;  %7709 = vmatpush.bf16.msra.mxu1 %v8285_v50 }
 0x667   :  { %v8250_v56 = vld [vmem:[#allocation3 + $0x238] sm:$0xf0] }
 0x668   :  { %v12193_v58 = vld [vmem:[#allocation3 + $0x41c] sm:$0xf]  ;;  %7722 = vmatpush.bf16.msra.mxu2 %v8541_v53  ;;  %v8253_v17 = vor.u32 %v12129_v55, %v8250_v56  ;;  %7697 = vmatpush.bf16.msra.mxu0 %v7997_v39  ;;  %v7491_v55 = vpop.f32.mrf.mxu0 }
 0x669   :  { %v8506_v59 = vld [vmem:[#allocation3 + $0x438] sm:$0xf0] }
 0x66a   :  { %v12257_v60 = vld [vmem:[#allocation3 + $0x61c] sm:$0xf]  ;;  %v8509_v10 = vor.u32 %v12193_v58, %v8506_v59  ;;  %7735 = vmatpush.bf16.msra.mxu3 %v8797_v54  ;;  %7710 = vmatpush.bf16.msra.mxu1 %v8253_v17 }
 0x66b   :  { %v8762_v57 = vld [vmem:[#allocation3 + $0x638] sm:$0xf0]  ;;  %7698 = vmatmul.bf16.vlgmr.msra.gmra.mxu0 %v13234_v21 }
 0x66c   :  { %v12377_v12 = vld [vmem:[#allocation3 + $0x9dc] sm:$0xf]  ;;  %v8765_v18 = vor.u32 %v12257_v60, %v8762_v57  ;;  %7723 = vmatpush.bf16.msra.mxu2 %v8509_v10  ;;  %v7504_v60 = vpop.f32.mrf.mxu1 }
 0x66d   :  { %v9242_v35 = vld [vmem:[#allocation3 + $0x9f8] sm:$0xf0]  ;;  %7711 = vmatmul.bf16.vlgmr.msra.gmra.mxu1 %v13239_v26 }
 0x66e   :  { %v12441_v61 = vld [vmem:[#allocation3 + $0xbdc] sm:$0xf]  ;;  %v9245_v23 = vor.u32 %v12377_v12, %v9242_v35  ;;  %7736 = vmatpush.bf16.msra.mxu3 %v8765_v18 }
 0x66f   :  { %v9498_v63 = vld [vmem:[#allocation3 + $0xbf8] sm:$0xf0]  ;;  %7724 = vmatmul.bf16.vlgmr.msra.gmra.mxu2 %v13232_v20 }
 0x670   :  { %v12505_v0 = vld [vmem:[#allocation3 + $0xddc] sm:$0xf]  ;;  %v9501_v13 = vor.u32 %v12441_v61, %v9498_v63  ;;  %7742 = vmatpush.bf16.msrb.mxu0 %v9245_v23  ;;  %v7505_v61 = vadd.f32 %v7504_v60, %v7491_v55 }
 0x671   :  { %v9754_v1 = vld [vmem:[#allocation3 + $0xdf8] sm:$0xf0]  ;;  %7737 = vmatmul.bf16.vlgmr.msra.gmra.mxu3 %v13236_v22 }
 0x672   :  { %v12569_v2 = vld [vmem:[#allocation3 + $0xfdc] sm:$0xf]  ;;  %v9757_v4 = vor.u32 %v12505_v0, %v9754_v1  ;;  %7755 = vmatpush.bf16.msrb.mxu1 %v9501_v13 }
 0x673   :  { %v10010_v16 = vld [vmem:[#allocation3 + $0xff8] sm:$0xf0] }
 0x674   :  { %v12369_v3 = vld [vmem:[#allocation3 + $0x99c] sm:$0xf]  ;;  %v10013_v7 = vor.u32 %v12569_v2, %v10010_v16  ;;  %7768 = vmatpush.bf16.msrb.mxu2 %v9757_v4  ;;  %v7517_v16 = vpop.f32.mrf.mxu2 }
 0x675   :  { %v9210_v5 = vld [vmem:[#allocation3 + $0x9b8] sm:$0xf0] }
 0x676   :  { %v12433_v6 = vld [vmem:[#allocation3 + $0xb9c] sm:$0xf]  ;;  %v9213_v14 = vor.u32 %v12369_v3, %v9210_v5  ;;  %7781 = vmatpush.bf16.msrb.mxu3 %v10013_v7  ;;  %v7518_v3 = vadd.f32 %v7517_v16, %v7505_v61  ;;  %v7530_v5 = vpop.f32.mrf.mxu3 }
 0x677   :  { %v9466_v25 = vld [vmem:[#allocation3 + $0xbb8] sm:$0xf0] }
 0x678   :  { %v12497_v8 = vld [vmem:[#allocation3 + $0xd9c] sm:$0xf]  ;;  %v9469_v24 = vor.u32 %v12433_v6, %v9466_v25  ;;  %7743 = vmatpush.bf16.msrb.mxu0 %v9213_v14 }
 0x679   :  { %v9722_v9 = vld [vmem:[#allocation3 + $0xdb8] sm:$0xf0] }
 0x67a   :  { %v12561_v11 = vld [vmem:[#allocation3 + $0xf9c] sm:$0xf]  ;;  %v9725_v19 = vor.u32 %v12497_v8, %v9722_v9  ;;  %7756 = vmatpush.bf16.msrb.mxu1 %v9469_v24  ;;  %v13407_v8 = vadd.f32 %v7530_v5, %v7518_v3  ;;  %v7493_v9 = vpop.f32.mrf.mxu0 }
 0x67b   :  { %v9978_v49 = vld [vmem:[#allocation3 + $0xfb8] sm:$0xf0] }
 0x67c   :  { %v12361_v27 = vld [vmem:[#allocation3 + $0x95c] sm:$0xf]  ;;  %v9981_v46 = vor.u32 %v12561_v11, %v9978_v49  ;;  %7769 = vmatpush.bf16.msrb.mxu2 %v9725_v19 }
 0x67d   :  { %v9178_v45 = vld [vmem:[#allocation3 + $0x978] sm:$0xf0] }
 0x67e   :  { %v12425_v40 = vld [vmem:[#allocation3 + $0xb5c] sm:$0xf]  ;;  %v9181_v43 = vor.u32 %v12361_v27, %v9178_v45  ;;  %7782 = vmatpush.bf16.msrb.mxu3 %v9981_v46  ;;  %v7506_v27 = vpop.f32.mrf.mxu1 }
 0x67f   :  { %v9434_v52 = vld [vmem:[#allocation3 + $0xb78] sm:$0xf0] }
 0x680   :  { %v12489_v48 = vld [vmem:[#allocation3 + $0xd5c] sm:$0xf]  ;;  %v9437_v30 = vor.u32 %v12425_v40, %v9434_v52  ;;  %7744 = vmatpush.bf16.msrb.mxu0 %v9181_v43 }
 0x681   :  { %v9690_v51 = vld [vmem:[#allocation3 + $0xd78] sm:$0xf0] }
 0x682   :  { %v12553_v41 = vld [vmem:[#allocation3 + $0xf5c] sm:$0xf]  ;;  %v9693_v33 = vor.u32 %v12489_v48, %v9690_v51  ;;  %7757 = vmatpush.bf16.msrb.mxu1 %v9437_v30 }
 0x683   :  { %v9946_v28 = vld [vmem:[#allocation3 + $0xf78] sm:$0xf0] }
 0x684   :  { %v12353_v34 = vld [vmem:[#allocation3 + $0x91c] sm:$0xf]  ;;  %v9949_v37 = vor.u32 %v12553_v41, %v9946_v28  ;;  %7770 = vmatpush.bf16.msrb.mxu2 %v9693_v33 }
 0x685   :  { %v9146_v15 = vld [vmem:[#allocation3 + $0x938] sm:$0xf0] }
 0x686   :  { %v12417_v36 = vld [vmem:[#allocation3 + $0xb1c] sm:$0xf]  ;;  %v9149_v22 = vor.u32 %v12353_v34, %v9146_v15  ;;  %7783 = vmatpush.bf16.msrb.mxu3 %v9949_v37  ;;  %v7519_v37 = vpop.f32.mrf.mxu2 }
 0x687   :  { %v9402_v20 = vld [vmem:[#allocation3 + $0xb38] sm:$0xf0]  ;;  %v7556_v37 = vpop.f32.mrf.mxu1 }
 0x688   :  { %v12481_v42 = vld [vmem:[#allocation3 + $0xd1c] sm:$0xf]  ;;  %v9405_v26 = vor.u32 %v12417_v36, %v9402_v20  ;;  %7745 = vmatpush.bf16.msrb.mxu0 %v9149_v22 }
 0x689   :  { %v9658_v50 = vld [vmem:[#allocation3 + $0xd38] sm:$0xf0] }
 0x68a   :  { %v12545_v53 = vld [vmem:[#allocation3 + $0xf1c] sm:$0xf]  ;;  %v9661_v56 = vor.u32 %v12481_v42, %v9658_v50  ;;  %7758 = vmatpush.bf16.msrb.mxu1 %v9405_v26 }
 0x68b   :  { %v9914_v21 = vld [vmem:[#allocation3 + $0xf38] sm:$0xf0] }
 0x68c   :  { %v12345_v58 = vld [vmem:[#allocation3 + $0x8dc] sm:$0xf]  ;;  %v9917_v57 = vor.u32 %v12545_v53, %v9914_v21  ;;  %7771 = vmatpush.bf16.msrb.mxu2 %v9661_v56  ;;  %v7532_v21 = vpop.f32.mrf.mxu3 }
 0x68d   :  { %v9114_v54 = vld [vmem:[#allocation3 + $0x8f8] sm:$0xf0] }
 0x68e   :  { %v12409_v59 = vld [vmem:[#allocation3 + $0xadc] sm:$0xf]  ;;  %v9117_v63 = vor.u32 %v12345_v58, %v9114_v54  ;;  %7784 = vmatpush.bf16.msrb.mxu3 %v9917_v57 }
 0x68f   :  { %v9370_v47 = vld [vmem:[#allocation3 + $0xaf8] sm:$0xf0] }
 0x690   :  { %v12473_v12 = vld [vmem:[#allocation3 + $0xcdc] sm:$0xf]  ;;  %v9373_v0 = vor.u32 %v12409_v59, %v9370_v47  ;;  %7746 = vmatpush.bf16.msrb.mxu0 %v9117_v63 }
 0x691   :  { %v9626_v35 = vld [vmem:[#allocation3 + $0xcf8] sm:$0xf0] }
 0x692   :  { %v12537_v62 = vld [vmem:[#allocation3 + $0xedc] sm:$0xf]  ;;  %v9629_v1 = vor.u32 %v12473_v12, %v9626_v35  ;;  %7759 = vmatpush.bf16.msrb.mxu1 %v9373_v0 }
 0x693   :  { %v9882_v39 = vld [vmem:[#allocation3 + $0xef8] sm:$0xf0] }
 0x694   :  { %v12337_v17 = vld [vmem:[#allocation3 + $0x89c] sm:$0xf]  ;;  %v9885_v18 = vor.u32 %v12537_v62, %v9882_v39  ;;  %7772 = vmatpush.bf16.msrb.mxu2 %v9629_v1 }
 0x695   :  { %v9082_v10 = vld [vmem:[#allocation3 + $0x8b8] sm:$0xf0] }
 0x696   :  { %v12401_v2 = vld [vmem:[#allocation3 + $0xa9c] sm:$0xf]  ;;  %v9085_v25 = vor.u32 %v12337_v17, %v9082_v10  ;;  %7785 = vmatpush.bf16.msrb.mxu3 %v9885_v18 }
 0x697   :  { %v9338_v23 = vld [vmem:[#allocation3 + $0xab8] sm:$0xf0] }
 0x698   :  { %v12465_v13 = vld [vmem:[#allocation3 + $0xc9c] sm:$0xf]  ;;  %v9341_v11 = vor.u32 %v12401_v2, %v9338_v23  ;;  %7747 = vmatpush.bf16.msrb.mxu0 %v9085_v25 }
 0x699   :  { %v9594_v4 = vld [vmem:[#allocation3 + $0xcb8] sm:$0xf0] }
 0x69a   :  { %v12529_v6 = vld [vmem:[#allocation3 + $0xe9c] sm:$0xf]  ;;  %v9597_v49 = vor.u32 %v12465_v13, %v9594_v4  ;;  %7760 = vmatpush.bf16.msrb.mxu1 %v9341_v11 }
 0x69b   :  { %v9850_v7 = vld [vmem:[#allocation3 + $0xeb8] sm:$0xf0] }
 0x69c   :  { %v12329_v14 = vld [vmem:[#allocation3 + $0x85c] sm:$0xf]  ;;  %v9853_v45 = vor.u32 %v12529_v6, %v9850_v7  ;;  %7773 = vmatpush.bf16.msrb.mxu2 %v9597_v49 }
 0x69d   :  { %v9050_v24 = vld [vmem:[#allocation3 + $0x878] sm:$0xf0] }
 0x69e   :  { %v12393_v19 = vld [vmem:[#allocation3 + $0xa5c] sm:$0xf]  ;;  %v9053_v41 = vor.u32 %v12329_v14, %v9050_v24  ;;  %7786 = vmatpush.bf16.msrb.mxu3 %v9853_v45 }
 0x69f   :  { %v9306_v40 = vld [vmem:[#allocation3 + $0xa78] sm:$0xf0] }
 0x6a0   :  { %v12457_v46 = vld [vmem:[#allocation3 + $0xc5c] sm:$0xf]  ;;  %v9309_v30 = vor.u32 %v12393_v19, %v9306_v40  ;;  %7748 = vmatpush.bf16.msrb.mxu0 %v9053_v41 }
 0x6a1   :  { %v9562_v52 = vld [vmem:[#allocation3 + $0xc78] sm:$0xf0] }
 0x6a2   :  { %v12521_v48 = vld [vmem:[#allocation3 + $0xe5c] sm:$0xf]  ;;  %v9565_v33 = vor.u32 %v12457_v46, %v9562_v52  ;;  %7761 = vmatpush.bf16.msrb.mxu1 %v9309_v30 }
 0x6a3   :  { %v9818_v51 = vld [vmem:[#allocation3 + $0xe78] sm:$0xf0] }
 0x6a4   :  { %v12321_v28 = vld [vmem:[#allocation3 + $0x81c] sm:$0xf]  ;;  %v9821_v20 = vor.u32 %v12521_v48, %v9818_v51  ;;  %7774 = vmatpush.bf16.msrb.mxu2 %v9565_v33 }
 0x6a5   :  { %v9018_v43 = vld [vmem:[#allocation3 + $0x838] sm:$0xf0] }
 0x6a6   :  { %v12385_v34 = vld [vmem:[#allocation3 + $0xa1c] sm:$0xf]  ;;  %v9021_v56 = vor.u32 %v12321_v28, %v9018_v43  ;;  %7787 = vmatpush.bf16.msrb.mxu3 %v9821_v20  ;;  %v7543_v43 = vpop.f32.mrf.mxu0 }
 0x6a7   :  { %v9274_v15 = vld [vmem:[#allocation3 + $0xa38] sm:$0xf0] }
 0x6a8   :  { %v12449_v36 = vld [vmem:[#allocation3 + $0xc1c] sm:$0xf]  ;;  %v9277_v60 = vor.u32 %v12385_v34, %v9274_v15  ;;  %7749 = vmatpush.bf16.msrb.mxu0 %v9021_v56 }
 0x6a9   :  { %v9530_v42 = vld [vmem:[#allocation3 + $0xc38] sm:$0xf0] }
 0x6aa   :  { %v12513_v50 = vld [vmem:[#allocation3 + $0xe1c] sm:$0xf]  ;;  %v9533_v57 = vor.u32 %v12449_v36, %v9530_v42  ;;  %7762 = vmatpush.bf16.msrb.mxu1 %v9277_v60  ;;  %v7544_v36 = vadd.f32 %v7543_v43, %v13407_v8 }
 0x6ab   :  { %v9786_v53 = vld [vmem:[#allocation3 + $0xe38] sm:$0xf0]  ;;  %7750 = vmatmul.bf16.vlgmr.msrb.gmra.mxu0 %v13246_v31 }
 0x6ac   :  { %v12633_v22 = vld [vmem:[#allocation3 + $0x11dc] sm:$0xf]  ;;  %v9789_v35 = vor.u32 %v12513_v50, %v9786_v53  ;;  %7775 = vmatpush.bf16.msrb.mxu2 %v9533_v57  ;;  %v7569_v57 = vpop.f32.mrf.mxu2 }
 0x6ad   :  { %v10266_v55 = vld [vmem:[#allocation3 + $0x11f8] sm:$0xf0]  ;;  %7763 = vmatmul.bf16.vlgmr.msrb.gmra.mxu1 %v13250_v38 }
 0x6ae   :  { %v12697_v26 = vld [vmem:[#allocation3 + $0x13dc] sm:$0xf]  ;;  %v10269_v61 = vor.u32 %v12633_v22, %v10266_v55  ;;  %7788 = vmatpush.bf16.msrb.mxu3 %v9789_v35  ;;  %v7557_v55 = vadd.f32 %v7556_v37, %v7544_v36 }
 0x6af   :  { %v10522_v58 = vld [vmem:[#allocation3 + $0x13f8] sm:$0xf0]  ;;  %7776 = vmatmul.bf16.vlgmr.msrb.gmra.mxu2 %v13244_v29 }
 0x6b0   :  { %v12761_v54 = vld [vmem:[#allocation3 + $0x15dc] sm:$0xf]  ;;  %v10525_v62 = vor.u32 %v12697_v26, %v10522_v58  ;;  %7794 = vmatpush.bf16.msra.mxu0 %v10269_v61  ;;  %v7570_v61 = vadd.f32 %v7569_v57, %v7557_v55 }
 0x6b1   :  { %v10778_v59 = vld [vmem:[#allocation3 + $0x15f8] sm:$0xf0]  ;;  %7789 = vmatmul.bf16.vlgmr.msrb.gmra.mxu3 %v13248_v32 }
 0x6b2   :  { %v12825_v47 = vld [vmem:[#allocation3 + $0x17dc] sm:$0xf]  ;;  %v10781_v39 = vor.u32 %v12761_v54, %v10778_v59  ;;  %7807 = vmatpush.bf16.msra.mxu1 %v10525_v62  ;;  %v7582_v62 = vpop.f32.mrf.mxu3 }
 0x6b3   :  { %v11034_v12 = vld [vmem:[#allocation3 + $0x17f8] sm:$0xf0] }
 0x6b4   :  { %v12625_v63 = vld [vmem:[#allocation3 + $0x119c] sm:$0xf]  ;;  %v11037_v17 = vor.u32 %v12825_v47, %v11034_v12  ;;  %7820 = vmatpush.bf16.msra.mxu2 %v10781_v39 }
 0x6b5   :  { %v10234_v0 = vld [vmem:[#allocation3 + $0x11b8] sm:$0xf0] }
 0x6b6   :  { %v12689_v1 = vld [vmem:[#allocation3 + $0x139c] sm:$0xf]  ;;  %v10237_v13 = vor.u32 %v12625_v63, %v10234_v0  ;;  %7833 = vmatpush.bf16.msra.mxu3 %v11037_v17  ;;  %v7545_v17 = vpop.f32.mrf.mxu0 }
 0x6b7   :  { %v10490_v10 = vld [vmem:[#allocation3 + $0x13b8] sm:$0xf0]  ;;  %v13139_v17 = vld [vmem:[#allocation1 + $0x12] sm:$0xff] }
 0x6b8   :  { %v12753_v2 = vld [vmem:[#allocation3 + $0x159c] sm:$0xf]  ;;  %v10493_v4 = vor.u32 %v12689_v1, %v10490_v10  ;;  %7795 = vmatpush.bf16.msra.mxu0 %v10237_v13  ;;  %v13414_v1 = vadd.f32 %v7582_v62, %v7570_v61  ;;  %v7558_v13 = vpop.f32.mrf.mxu1 }
 0x6b9   :  { %v10746_v16 = vld [vmem:[#allocation3 + $0x15b8] sm:$0xf0] }
 0x6ba   :  { %v12817_v18 = vld [vmem:[#allocation3 + $0x179c] sm:$0xf]  ;;  %v10749_v3 = vor.u32 %v12753_v2, %v10746_v16  ;;  %7808 = vmatpush.bf16.msra.mxu1 %v10493_v4 }
 0x6bb   :  { %v11002_v23 = vld [vmem:[#allocation3 + $0x17b8] sm:$0xf0] }
 0x6bc   :  { %v12617_v5 = vld [vmem:[#allocation3 + $0x115c] sm:$0xf]  ;;  %v11005_v25 = vor.u32 %v12817_v18, %v11002_v23  ;;  %7821 = vmatpush.bf16.msra.mxu2 %v10749_v3 }
 0x6bd   :  { %v10202_v6 = vld [vmem:[#allocation3 + $0x1178] sm:$0xf0] }
 0x6be   :  { %v12681_v7 = vld [vmem:[#allocation3 + $0x135c] sm:$0xf]  ;;  %v10205_v19 = vor.u32 %v12617_v5, %v10202_v6  ;;  %7834 = vmatpush.bf16.msra.mxu3 %v11005_v25 }
 0x6bf   :  { %v10458_v9 = vld [vmem:[#allocation3 + $0x1378] sm:$0xf0] }
 0x6c0   :  { %v12745_v11 = vld [vmem:[#allocation3 + $0x155c] sm:$0xf]  ;;  %v10461_v27 = vor.u32 %v12681_v7, %v10458_v9  ;;  %7796 = vmatpush.bf16.msra.mxu0 %v10205_v19 }
 0x6c1   :  { %v10714_v49 = vld [vmem:[#allocation3 + $0x1578] sm:$0xf0] }
 0x6c2   :  { %v12809_v14 = vld [vmem:[#allocation3 + $0x175c] sm:$0xf]  ;;  %v10717_v45 = vor.u32 %v12745_v11, %v10714_v49  ;;  %7809 = vmatpush.bf16.msra.mxu1 %v10461_v27 }
 0x6c3   :  { %v10970_v24 = vld [vmem:[#allocation3 + $0x1778] sm:$0xf0] }
 0x6c4   :  { %v12609_v40 = vld [vmem:[#allocation3 + $0x111c] sm:$0xf]  ;;  %v10973_v52 = vor.u32 %v12809_v14, %v10970_v24  ;;  %7822 = vmatpush.bf16.msra.mxu2 %v10717_v45 }
 0x6c5   :  { %v10170_v46 = vld [vmem:[#allocation3 + $0x1138] sm:$0xf0] }
 0x6c6   :  { %v12673_v29 = vld [vmem:[#allocation3 + $0x131c] sm:$0xf]  ;;  %v10173_v28 = vor.u32 %v12609_v40, %v10170_v46  ;;  %7835 = vmatpush.bf16.msra.mxu3 %v10973_v52  ;;  %v7571_v40 = vpop.f32.mrf.mxu2 }
 0x6c7   :  { %v10426_v48 = vld [vmem:[#allocation3 + $0x1338] sm:$0xf0] }
 0x6c8   :  { %v12737_v51 = vld [vmem:[#allocation3 + $0x151c] sm:$0xf]  ;;  %v10429_v38 = vor.u32 %v12673_v29, %v10426_v48  ;;  %7797 = vmatpush.bf16.msra.mxu0 %v10173_v28 }
 0x6c9   :  { %v10682_v31 = vld [vmem:[#allocation3 + $0x1538] sm:$0xf0] }
 0x6ca   :  { %v12801_v41 = vld [vmem:[#allocation3 + $0x171c] sm:$0xf]  ;;  %v10685_v30 = vor.u32 %v12737_v51, %v10682_v31  ;;  %7810 = vmatpush.bf16.msra.mxu1 %v10429_v38  ;;  %v7584_v51 = vpop.f32.mrf.mxu3 }
 0x6cb   :  { %v10938_v32 = vld [vmem:[#allocation3 + $0x1738] sm:$0xf0] }
 0x6cc   :  { %v12601_v33 = vld [vmem:[#allocation3 + $0x10dc] sm:$0xf]  ;;  %v10941_v20 = vor.u32 %v12801_v41, %v10938_v32  ;;  %7823 = vmatpush.bf16.msra.mxu2 %v10685_v30 }
 0x6cd   :  { %v10138_v34 = vld [vmem:[#allocation3 + $0x10f8] sm:$0xf0] }
 0x6ce   :  { %v12665_v15 = vld [vmem:[#allocation3 + $0x12dc] sm:$0xf]  ;;  %v10141_v26 = vor.u32 %v12601_v33, %v10138_v34  ;;  %7836 = vmatpush.bf16.msra.mxu3 %v10941_v20 }
 0x6cf   :  { %v10394_v42 = vld [vmem:[#allocation3 + $0x12f8] sm:$0xf0] }
 0x6d0   :  { %v12729_v50 = vld [vmem:[#allocation3 + $0x14dc] sm:$0xf]  ;;  %v10397_v56 = vor.u32 %v12665_v15, %v10394_v42  ;;  %7798 = vmatpush.bf16.msra.mxu0 %v10141_v26 }
 0x6d1   :  { %v10650_v53 = vld [vmem:[#allocation3 + $0x14f8] sm:$0xf0] }
 0x6d2   :  { %v12793_v21 = vld [vmem:[#allocation3 + $0x16dc] sm:$0xf]  ;;  %v10653_v58 = vor.u32 %v12729_v50, %v10650_v53  ;;  %7811 = vmatpush.bf16.msra.mxu1 %v10397_v56 }
 0x6d3   :  { %v10906_v22 = vld [vmem:[#allocation3 + $0x16f8] sm:$0xf0] }
 0x6d4   :  { %v12593_v54 = vld [vmem:[#allocation3 + $0x109c] sm:$0xf]  ;;  %v10909_v8 = vor.u32 %v12793_v21, %v10906_v22  ;;  %7824 = vmatpush.bf16.msra.mxu2 %v10653_v58 }
 0x6d5   :  { %v10106_v59 = vld [vmem:[#allocation3 + $0x10b8] sm:$0xf0] }
 0x6d6   :  { %v12657_v60 = vld [vmem:[#allocation3 + $0x129c] sm:$0xf]  ;;  %v10109_v0 = vor.u32 %v12593_v54, %v10106_v59  ;;  %7837 = vmatpush.bf16.msra.mxu3 %v10909_v8 }
 0x6d7   :  { %v10362_v47 = vld [vmem:[#allocation3 + $0x12b8] sm:$0xf0] }
 0x6d8   :  { %v12721_v12 = vld [vmem:[#allocation3 + $0x149c] sm:$0xf]  ;;  %v10365_v10 = vor.u32 %v12657_v60, %v10362_v47  ;;  %7799 = vmatpush.bf16.msra.mxu0 %v10109_v0 }
 0x6d9   :  { %v10618_v35 = vld [vmem:[#allocation3 + $0x14b8] sm:$0xf0] }
 0x6da   :  { %v12785_v39 = vld [vmem:[#allocation3 + $0x169c] sm:$0xf]  ;;  %v10621_v2 = vor.u32 %v12721_v12, %v10618_v35  ;;  %7812 = vmatpush.bf16.msra.mxu1 %v10365_v10  ;;  %v13140_v10 = vld [vmem:[#allocation1 + $0x9] sm:$0xff] }
 0x6db   :  { %v10874_v63 = vld [vmem:[#allocation3 + $0x16b8] sm:$0xf0] }
 0x6dc   :  { %v12585_v16 = vld [vmem:[#allocation3 + $0x105c] sm:$0xf]  ;;  %v10877_v4 = vor.u32 %v12785_v39, %v10874_v63  ;;  %7825 = vmatpush.bf16.msra.mxu2 %v10621_v2 }
 0x6dd   :  { %v10074_v18 = vld [vmem:[#allocation3 + $0x1078] sm:$0xf0] }
 0x6de   :  { %v12649_v23 = vld [vmem:[#allocation3 + $0x125c] sm:$0xf]  ;;  %v10077_v9 = vor.u32 %v12585_v16, %v10074_v18  ;;  %7838 = vmatpush.bf16.msra.mxu3 %v10877_v4  ;;  %v13141_v18 = vld [vmem:[#allocation1 + $0x1b] sm:$0xff] }
 0x6df   :  { %v10330_v3 = vld [vmem:[#allocation3 + $0x1278] sm:$0xf0] }
 0x6e0   :  { %v12713_v5 = vld [vmem:[#allocation3 + $0x145c] sm:$0xf]  ;;  %v10333_v14 = vor.u32 %v12649_v23, %v10330_v3  ;;  %7800 = vmatpush.bf16.msra.mxu0 %v10077_v9 }
 0x6e1   :  { %v10586_v6 = vld [vmem:[#allocation3 + $0x1478] sm:$0xf0] }
 0x6e2   :  { %v12777_v7 = vld [vmem:[#allocation3 + $0x165c] sm:$0xf]  ;;  %v10589_v24 = vor.u32 %v12713_v5, %v10586_v6  ;;  %7813 = vmatpush.bf16.msra.mxu1 %v10333_v14 }
 0x6e3   :  { %v10842_v25 = vld [vmem:[#allocation3 + $0x1678] sm:$0xf0] }
 0x6e4   :  { %v12577_v11 = vld [vmem:[#allocation3 + $0x101c] sm:$0xf]  ;;  %v10845_v46 = vor.u32 %v12777_v7, %v10842_v25  ;;  %7826 = vmatpush.bf16.msra.mxu2 %v10589_v24 }
 0x6e5   :  { %v10042_v49 = vld [vmem:[#allocation3 + $0x1038] sm:$0xf0] }
 0x6e6   :  { %v12641_v19 = vld [vmem:[#allocation3 + $0x121c] sm:$0xf]  ;;  %v10045_v28 = vor.u32 %v12577_v11, %v10042_v49  ;;  %7839 = vmatpush.bf16.msra.mxu3 %v10845_v46  ;;  %v7595_v49 = vpop.f32.mrf.mxu0 }
 0x6e7   :  { %v10298_v27 = vld [vmem:[#allocation3 + $0x1238] sm:$0xf0] }
 0x6e8   :  { %v12705_v45 = vld [vmem:[#allocation3 + $0x141c] sm:$0xf]  ;;  %v10301_v33 = vor.u32 %v12641_v19, %v10298_v27  ;;  %7801 = vmatpush.bf16.msra.mxu0 %v10045_v28  ;;  %v7596_v19 = vadd.f32 %v7595_v49, %v13414_v1 }
 0x6e9   :  { %v10554_v29 = vld [vmem:[#allocation3 + $0x1438] sm:$0xf0] }
 0x6ea   :  { %v12769_v52 = vld [vmem:[#allocation3 + $0x161c] sm:$0xf]  ;;  %v10557_v34 = vor.u32 %v12705_v45, %v10554_v29  ;;  %7814 = vmatpush.bf16.msra.mxu1 %v10301_v33  ;;  %v7608_v45 = vpop.f32.mrf.mxu1 }
 0x6eb   :  { %v10810_v48 = vld [vmem:[#allocation3 + $0x1638] sm:$0xf0] }
 0x6ec   :  { %v12889_v31 = vld [vmem:[#allocation3 + $0x19dc] sm:$0xf]  ;;  %v10813_v37 = vor.u32 %v12769_v52, %v10810_v48  ;;  %7827 = vmatpush.bf16.msra.mxu2 %v10557_v34 }
 0x6ed   :  { %v11290_v41 = vld [vmem:[#allocation3 + $0x19f8] sm:$0xf0]  ;;  %7815 = vmatmul.bf16.vlgmr.msra.gmra.mxu1 %v13140_v10 }
 0x6ee   :  { %v12953_v32 = vld [vmem:[#allocation3 + $0x1bdc] sm:$0xf]  ;;  %v11293_v20 = vor.u32 %v12889_v31, %v11290_v41  ;;  %7840 = vmatpush.bf16.msra.mxu3 %v10813_v37  ;;  %v7609_v31 = vadd.f32 %v7608_v45, %v7596_v19  ;;  %v13144_v45 = vld [vmem:[#allocation1 + $0x36] sm:$0xff] }
 0x6ef   :  { %v11546_v43 = vld [vmem:[#allocation3 + $0x1bf8] sm:$0xf0]  ;;  %7828 = vmatmul.bf16.vlgmr.msra.gmra.mxu2 %v13139_v17 }
 0x6f0   :  { %v13017_v38 = vld [vmem:[#allocation3 + $0x1ddc] sm:$0xf]  ;;  %v11549_v42 = vor.u32 %v12953_v32, %v11546_v43  ;;  %7846 = vmatpush.bf16.msrb.mxu0 %v11293_v20  ;;  %v7621_v20 = vpop.f32.mrf.mxu2 }
 0x6f1   :  { %v11802_v30 = vld [vmem:[#allocation3 + $0x1df8] sm:$0xf0]  ;;  %7841 = vmatmul.bf16.vlgmr.msra.gmra.mxu3 %v13141_v18 }
 0x6f2   :  { %v13081_v15 = vld [vmem:[#allocation3 + $0x1fdc] sm:$0xf]  ;;  %v11805_v50 = vor.u32 %v13017_v38, %v11802_v30  ;;  %7859 = vmatpush.bf16.msrb.mxu1 %v11549_v42 }
 0x6f3   :  { %v12058_v36 = vld [vmem:[#allocation3 + $0x1ff8] sm:$0xf0] }
 0x6f4   :  { %v12881_v53 = vld [vmem:[#allocation3 + $0x199c] sm:$0xf]  ;;  %v12061_v55 = vor.u32 %v13081_v15, %v12058_v36  ;;  %7872 = vmatpush.bf16.msrb.mxu2 %v11805_v50 }
 0x6f5   :  { %v11258_v21 = vld [vmem:[#allocation3 + $0x19b8] sm:$0xf0] }
 0x6f6   :  { %v12945_v22 = vld [vmem:[#allocation3 + $0x1b9c] sm:$0xf]  ;;  %v11261_v60 = vor.u32 %v12881_v53, %v11258_v21  ;;  %7885 = vmatpush.bf16.msrb.mxu3 %v12061_v55  ;;  %v7622_v21 = vadd.f32 %v7621_v20, %v7609_v31 }
 0x6f7   :  { %v11514_v26 = vld [vmem:[#allocation3 + $0x1bb8] sm:$0xf0] }
 0x6f8   :  { %v13009_v56 = vld [vmem:[#allocation3 + $0x1d9c] sm:$0xf]  ;;  %v11517_v57 = vor.u32 %v12945_v22, %v11514_v26  ;;  %7847 = vmatpush.bf16.msrb.mxu0 %v11261_v60  ;;  %v7634_v22 = vpop.f32.mrf.mxu3 }
 0x6f9   :  { %v11770_v58 = vld [vmem:[#allocation3 + $0x1db8] sm:$0xf0] }
 0x6fa   :  { %v13073_v54 = vld [vmem:[#allocation3 + $0x1f9c] sm:$0xf]  ;;  %v11773_v8 = vor.u32 %v13009_v56, %v11770_v58  ;;  %7860 = vmatpush.bf16.msrb.mxu1 %v11517_v57  ;;  %v7597_v56 = vpop.f32.mrf.mxu0 }
 0x6fb   :  { %v12026_v59 = vld [vmem:[#allocation3 + $0x1fb8] sm:$0xf0] }
 0x6fc   :  { %v12873_v47 = vld [vmem:[#allocation3 + $0x195c] sm:$0xf]  ;;  %v12029_v62 = vor.u32 %v13073_v54, %v12026_v59  ;;  %7873 = vmatpush.bf16.msrb.mxu2 %v11773_v8  ;;  %v7610_v54 = vpop.f32.mrf.mxu1  ;;  %v7635_v59 = vadd.f32 %v7634_v22, %v7622_v21 }
 0x6fd   :  { %v11226_v12 = vld [vmem:[#allocation3 + $0x1978] sm:$0xf0] }
 0x6fe   :  { %v12937_v35 = vld [vmem:[#allocation3 + $0x1b5c] sm:$0xf]  ;;  %v11229_v23 = vor.u32 %v12873_v47, %v11226_v12  ;;  %7886 = vmatpush.bf16.msrb.mxu3 %v12029_v62 }
 0x6ff   :  { %v13138_v61 = vld [vmem:[#allocation1] sm:$0xff] }
 0x700   :  { %7802 = vmatmul.bf16.vlgmr.msra.gmra.mxu0 %v13138_v61  ;;  %v11482_v39 = vld [vmem:[#allocation3 + $0x1b78] sm:$0xf0] }
 0x701   :  { %v13001_v63 = vld [vmem:[#allocation3 + $0x1d5c] sm:$0xf]  ;;  %v11485_v13 = vor.u32 %v12937_v35, %v11482_v39  ;;  %7848 = vmatpush.bf16.msrb.mxu0 %v11229_v23 }
 0x702   :  { %v11738_v0 = vld [vmem:[#allocation3 + $0x1d78] sm:$0xf0] }
 0x703   :  { %v13065_v2 = vld [vmem:[#allocation3 + $0x1f5c] sm:$0xf]  ;;  %v11741_v4 = vor.u32 %v13001_v63, %v11738_v0  ;;  %7861 = vmatpush.bf16.msrb.mxu1 %v11485_v13 }
 0x704   :  { %v11994_v16 = vld [vmem:[#allocation3 + $0x1f78] sm:$0xf0] }
 0x705   :  { %v12865_v3 = vld [vmem:[#allocation3 + $0x191c] sm:$0xf]  ;;  %v11997_v7 = vor.u32 %v13065_v2, %v11994_v16  ;;  %7874 = vmatpush.bf16.msrb.mxu2 %v11741_v4 }
 0x706   :  { %v11194_v5 = vld [vmem:[#allocation3 + $0x1938] sm:$0xf0] }
 0x707   :  { %v12929_v6 = vld [vmem:[#allocation3 + $0x1b1c] sm:$0xf]  ;;  %v11197_v27 = vor.u32 %v12865_v3, %v11194_v5  ;;  %7887 = vmatpush.bf16.msrb.mxu3 %v11997_v7 }
 0x708   :  { %v11450_v25 = vld [vmem:[#allocation3 + $0x1b38] sm:$0xf0] }
 0x709   :  { %v12993_v9 = vld [vmem:[#allocation3 + $0x1d1c] sm:$0xf]  ;;  %v11453_v40 = vor.u32 %v12929_v6, %v11450_v25  ;;  %7849 = vmatpush.bf16.msrb.mxu0 %v11197_v27  ;;  %v7623_v6 = vpop.f32.mrf.mxu2  ;;  %v13143_v27 = vld [vmem:[#allocation1 + $0x2d] sm:$0xff] }
 0x70a   :  { %v11706_v11 = vld [vmem:[#allocation3 + $0x1d38] sm:$0xf0] }
 0x70b   :  { %v13057_v14 = vld [vmem:[#allocation3 + $0x1f1c] sm:$0xf]  ;;  %v11709_v46 = vor.u32 %v12993_v9, %v11706_v11  ;;  %7862 = vmatpush.bf16.msrb.mxu1 %v11453_v40  ;;  %v7636_v9 = vpop.f32.mrf.mxu3 }
 0x70c   :  { %v11962_v24 = vld [vmem:[#allocation3 + $0x1f38] sm:$0xf0] }
 0x70d   :  { %v12857_v29 = vld [vmem:[#allocation3 + $0x18dc] sm:$0xf]  ;;  %v11965_v51 = vor.u32 %v13057_v14, %v11962_v24  ;;  %7875 = vmatpush.bf16.msrb.mxu2 %v11709_v46  ;;  %v7647_v46 = vpop.f32.mrf.mxu0 }
 0x70e   :  { %v11162_v52 = vld [vmem:[#allocation3 + $0x18f8] sm:$0xf0] }
 0x70f   :  { %v12921_v48 = vld [vmem:[#allocation3 + $0x1adc] sm:$0xf]  ;;  %v11165_v30 = vor.u32 %v12857_v29, %v11162_v52  ;;  %7888 = vmatpush.bf16.msrb.mxu3 %v11965_v51  ;;  %v7648_v29 = vadd.f32 %v7647_v46, %v7635_v59  ;;  %v7660_v52 = vpop.f32.mrf.mxu1 }
 0x710   :  { %v11418_v41 = vld [vmem:[#allocation3 + $0x1af8] sm:$0xf0] }
 0x711   :  { %v12985_v32 = vld [vmem:[#allocation3 + $0x1cdc] sm:$0xf]  ;;  %v11421_v1 = vor.u32 %v12921_v48, %v11418_v41  ;;  %7850 = vmatpush.bf16.msrb.mxu0 %v11165_v30  ;;  %v7661_v48 = vadd.f32 %v7660_v52, %v7648_v29  ;;  %v7673_v51 = vpop.f32.mrf.mxu2 }
 0x712   :  { %v11674_v28 = vld [vmem:[#allocation3 + $0x1cf8] sm:$0xf0] }
 0x713   :  { %v13049_v43 = vld [vmem:[#allocation3 + $0x1edc] sm:$0xf]  ;;  %v11677_v33 = vor.u32 %v12985_v32, %v11674_v28  ;;  %7863 = vmatpush.bf16.msrb.mxu1 %v11421_v1  ;;  %v7674_v31 = vadd.f32 %v7673_v51, %v7661_v48  ;;  %v7686_v41 = vpop.f32.mrf.mxu3 }
 0x714   :  { %v11930_v38 = vld [vmem:[#allocation3 + $0x1ef8] sm:$0xf0] }
 0x715   :  { %v12849_v34 = vld [vmem:[#allocation3 + $0x189c] sm:$0xf]  ;;  %v11933_v37 = vor.u32 %v13049_v43, %v11930_v38  ;;  %7876 = vmatpush.bf16.msrb.mxu2 %v11677_v33  ;;  %v7649_v32 = vpop.f32.mrf.mxu0  ;;  %v13417_v43 = vadd.f32 %v7686_v41, %v7674_v31 }
 0x716   :  { %v11130_v15 = vld [vmem:[#allocation3 + $0x18b8] sm:$0xf0] }
 0x717   :  { %v12913_v36 = vld [vmem:[#allocation3 + $0x1a9c] sm:$0xf]  ;;  %v11133_v58 = vor.u32 %v12849_v34, %v11130_v15  ;;  %7889 = vmatpush.bf16.msrb.mxu3 %v11933_v37  ;;  %v7662_v28 = vpop.f32.mrf.mxu1  ;;  %v7910_v51 = vrot.slane %v13417_v43, 4 }
 0x718   :  { %v11386_v42 = vld [vmem:[#allocation3 + $0x1ab8] sm:$0xf0] }
 0x719   :  { %v12977_v50 = vld [vmem:[#allocation3 + $0x1c9c] sm:$0xf]  ;;  %v11389_v60 = vor.u32 %v12913_v36, %v11386_v42  ;;  %7851 = vmatpush.bf16.msrb.mxu0 %v11133_v58  ;;  %v7675_v38 = vpop.f32.mrf.mxu2 }
 0x71a   :  { %v11642_v53 = vld [vmem:[#allocation3 + $0x1cb8] sm:$0xf0] }
 0x71b   :  { %v13041_v55 = vld [vmem:[#allocation3 + $0x1e9c] sm:$0xf]  ;;  %v11645_v57 = vor.u32 %v12977_v50, %v11642_v53  ;;  %7864 = vmatpush.bf16.msrb.mxu1 %v11389_v60  ;;  %v7688_v30 = vpop.f32.mrf.mxu3 }
 0x71c   :  { %v11898_v26 = vld [vmem:[#allocation3 + $0x1eb8] sm:$0xf0] }
 0x71d   :  { %v12841_v8 = vld [vmem:[#allocation3 + $0x185c] sm:$0xf]  ;;  %v11901_v35 = vor.u32 %v13041_v55, %v11898_v26  ;;  %7877 = vmatpush.bf16.msrb.mxu2 %v11645_v57  ;;  %v7699_v1 = vpop.f32.mrf.mxu0 }
 0x71e   :  { %v11098_v47 = vld [vmem:[#allocation3 + $0x1878] sm:$0xf0] }
 0x71f   :  { %v12905_v12 = vld [vmem:[#allocation3 + $0x1a5c] sm:$0xf]  ;;  %v11101_v17 = vor.u32 %v12841_v8, %v11098_v47  ;;  %7890 = vmatpush.bf16.msrb.mxu3 %v11901_v35  ;;  %v7712_v33 = vpop.f32.mrf.mxu1 }
 0x720   :  { %v11354_v61 = vld [vmem:[#allocation3 + $0x1a78] sm:$0xf0]  ;;  %v7713_v34 = vadd.f32 %v7712_v33, %v7699_v1 }
 0x721   :  { %v12969_v62 = vld [vmem:[#allocation3 + $0x1c5c] sm:$0xf]  ;;  %v11357_v10 = vor.u32 %v12905_v12, %v11354_v61  ;;  %7852 = vmatpush.bf16.msrb.mxu0 %v11101_v17  ;;  %v7725_v15 = vpop.f32.mrf.mxu2 }
 0x722   :  { %v11610_v39 = vld [vmem:[#allocation3 + $0x1c78] sm:$0xf0]  ;;  %v7726_v36 = vadd.f32 %v7725_v15, %v7713_v34 }
 0x723   :  { %v13033_v63 = vld [vmem:[#allocation3 + $0x1e5c] sm:$0xf]  ;;  %v11613_v2 = vor.u32 %v12969_v62, %v11610_v39  ;;  %7865 = vmatpush.bf16.msrb.mxu1 %v11357_v10  ;;  %v7738_v37 = vpop.f32.mrf.mxu3 }
 0x724   :  { %v11866_v0 = vld [vmem:[#allocation3 + $0x1e78] sm:$0xf0]  ;;  %v7739_v20 = vadd.f32 %v7738_v37, %v7726_v36 }
 0x725   :  { %v12833_v16 = vld [vmem:[#allocation3 + $0x181c] sm:$0xf]  ;;  %v11869_v13 = vor.u32 %v13033_v63, %v11866_v0  ;;  %7878 = vmatpush.bf16.msrb.mxu2 %v11613_v2  ;;  %v7701_v42 = vpop.f32.mrf.mxu0 }
 0x726   :  { %v11066_v18 = vld [vmem:[#allocation3 + $0x1838] sm:$0xf0] }
 0x727   :  { %v12897_v23 = vld [vmem:[#allocation3 + $0x1a1c] sm:$0xf]  ;;  %v11069_v11 = vor.u32 %v12833_v16, %v11066_v18  ;;  %7891 = vmatpush.bf16.msrb.mxu3 %v11869_v13  ;;  %v7714_v50 = vpop.f32.mrf.mxu1 }
 0x728   :  { %v11322_v4 = vld [vmem:[#allocation3 + $0x1a38] sm:$0xf0] }
 0x729   :  { %v12961_v3 = vld [vmem:[#allocation3 + $0x1c1c] sm:$0xf]  ;;  %v11325_v49 = vor.u32 %v12897_v23, %v11322_v4  ;;  %7853 = vmatpush.bf16.msrb.mxu0 %v11069_v11  ;;  %v7727_v53 = vpop.f32.mrf.mxu2 }
 0x72a   :  { %v11578_v5 = vld [vmem:[#allocation3 + $0x1c38] sm:$0xf0] }
 0x72b   :  { %v13025_v7 = vld [vmem:[#allocation3 + $0x1e1c] sm:$0xf]  ;;  %v11581_v14 = vor.u32 %v12961_v3, %v11578_v5  ;;  %7866 = vmatpush.bf16.msrb.mxu1 %v11325_v49  ;;  %v7740_v21 = vpop.f32.mrf.mxu3  ;;  %v13146_v5 = vld [vmem:[#allocation5] sm:$0xff] }
 0x72c   :  { %v11834_v25 = vld [vmem:[#allocation3 + $0x1e38] sm:$0xf0]  ;;  %v7939_v6 = vperm.slane %v13146_v5, 5  ;;  %v7938_v9 = vperm.slane %v13146_v5, 4 }
 0x72d   :  { %v11837_v24 = vor.u32 %v13025_v7, %v11834_v25  ;;  %7879 = vmatpush.bf16.msrb.mxu2 %v11581_v14  ;;  %v13142_v19 = vld [vmem:[#allocation1 + $0x24] sm:$0xff]  ;;  %v7751_v22 = vpop.f32.mrf.mxu0  ;;  %v7940_v7 = vperm.slane %v13146_v5, 6  ;;  %v7941_v25 = vperm.slane %v13146_v5, 7 }
 0x72e   :  { %7854 = vmatmul.bf16.vlgmr.msrb.gmra.mxu0 %v13142_v19  ;;  %7867 = vmatmul.bf16.vlgmr.msrb.gmra.mxu1 %v13143_v27  ;;  %v13145_v40 = vld [vmem:[#allocation1 + $0x3f] sm:$0xff]  ;;  %v7752_v47 = vadd.f32 %v7751_v22, %v7739_v20  ;;  %v7945_v49 = vrot.slane %v7939_v6, 6 }
 0x72f   :  { %7892 = vmatpush.bf16.msrb.mxu3 %v11837_v24  ;;  %v7764_v55 = vpop.f32.mrf.mxu1  ;;  %v7946_v14 = vrot.slane %v7940_v7, 4  ;;  %v7947_v24 = vrot.slane %v7941_v25, 2 }
 0x730   :  { %7880 = vmatmul.bf16.vlgmr.msrb.gmra.mxu2 %v13144_v45  ;;  %v7765_v62 = vadd.f32 %v7764_v55, %v7752_v47  ;;  %v7951_v52 = vsel %vm7912_vm0, %v7938_v9, %v7945_v49 }
 0x731   :  { %v7952_v48 = vsel %vm7914_vm1, %v7946_v14, %v7947_v24 }
 0x732   :  { %7893 = vmatmul.bf16.vlgmr.msrb.gmra.mxu3 %v13145_v40  ;;  %v7777_v26 = vpop.f32.mrf.mxu2  ;;  %v7953_v41 = vsel %vm7916_vm2, %v7951_v52, %v7952_v48 }
 0x733   :  { %v7778_v63 = vadd.f32 %v7777_v26, %v7765_v62 }
 0x734   :  { %v7790_v56 = vpop.f32.mrf.mxu3 }
 0x735   :  { %v7753_v58 = vpop.f32.mrf.mxu0  ;;  %v7791_v10 = vadd.f32 %v7790_v56, %v7778_v63 }
 0x737   :  { %v7766_v54 = vpop.f32.mrf.mxu1 }
 0x73a   :  { %v7779_v59 = vpop.f32.mrf.mxu2 }
 0x73c   :  { %v7792_v60 = vpop.f32.mrf.mxu3 }
 0x76a   :  { %v7816_v8 = vpop.f32.mrf.mxu1 }
 0x772   :  { %v7829_v12 = vpop.f32.mrf.mxu2  ;;  %v7818_v39 = vpop.f32.mrf.mxu1 }
 0x774   :  { %v7842_v35 = vpop.f32.mrf.mxu3 }
 0x77a   :  { %v7831_v0 = vpop.f32.mrf.mxu2 }
 0x77c   :  { %v7844_v17 = vpop.f32.mrf.mxu3 }
 0x77d   :  { %v7803_v57 = vpop.f32.mrf.mxu0 }
 0x77e   :  { %v7804_v2 = vadd.f32 %v7803_v57, %v7791_v10 }
 0x780   :  { %v7817_v16 = vadd.f32 %v7816_v8, %v7804_v2 }
 0x782   :  { %v7830_v18 = vadd.f32 %v7829_v12, %v7817_v16 }
 0x784   :  { %v7843_v23 = vadd.f32 %v7842_v35, %v7830_v18 }
 0x785   :  { %v7805_v61 = vpop.f32.mrf.mxu0 }
 0x7ab   :  { %v7855_v13 = vpop.f32.mrf.mxu0  ;;  %v7868_v4 = vpop.f32.mrf.mxu1 }
 0x7ac   :  { %v7856_v3 = vadd.f32 %v7855_v13, %v7843_v23 }
 0x7ae   :  { %v7869_v11 = vadd.f32 %v7868_v4, %v7856_v3 }
 0x7b3   :  { %v7881_v19 = vpop.f32.mrf.mxu2  ;;  %v7857_v40 = vpop.f32.mrf.mxu0 }
 0x7b4   :  { %v7882_v27 = vadd.f32 %v7881_v19, %v7869_v11  ;;  %v7870_v46 = vpop.f32.mrf.mxu1 }
 0x7b5   :  { %v7894_v45 = vpop.f32.mrf.mxu3 }
 0x7b6   :  { %v7895_v29 = vadd.f32 %v7894_v45, %v7882_v27 }
 0x7b8   :  { %v7911_v31 = vrot.slane %v7895_v29, 2 }
 0x7ba   :  { %v7919_v32 = vsel %vm7914_vm1, %v7910_v51, %v7911_v31 }
 0x7bb   :  { %v7920_v28 = vsel %vm7916_vm2, %v13401_v44, %v7919_v32  ;;  %v7883_v38 = vpop.f32.mrf.mxu2 }
 0x7bc   :  { %v7957_v30 = vadd.f32 %v7953_v41, %v7920_v28 }
 0x7bd   :  { %v7896_v1 = vpop.f32.mrf.mxu3 }
 0x7be   :  { %7959 = vst [vmem:[%s13432_s3 + $0x8] sm:$0xff] %v7957_v30 }
 0x7bf   :  { %7964 = vsyncpa [#allocation4], 1 }
 0x7c0   :  { %7965 = vsyncpa [#allocation6], 1 }

</bundles_post_ra>
